<compile_context>
chip_gen: v6e
topology: v6e:2x2x1
jax: 0.10.0
libtpu: 0.0.40
codegen_flags: <defaults>
</compile_context>

<pallas_src>
import functools

import jax
import jax.numpy as jnp
from jax import lax
from jax.experimental import pallas as pl
from jax.experimental.pallas import tpu as pltpu

_EPS = 1e-5
_LANE = 128
_VMEM_LIMIT = 48 * 1024 * 1024   # <= v7x physical 64 MiB, > v5e's 16 MiB default


# --------------------------------------------------------------------------
# Kernels
# --------------------------------------------------------------------------
def _conv3x3_stats_kernel(x_ref, scale_ref, shift_ref, w_ref,
                          y_ref, stats_ref, slab_ref,
                          *, apply_bn_relu, group_layout):
    """One (batch, row-tile) step: 3x3 'same' grouped conv + BN statistics.

    x_ref     : (1, H, W, C) bf16   full conv input image (resident per batch)
    scale_ref : (1, C) f32          fused BN scale for the input (pass B only)
    shift_ref : (1, C) f32          fused BN shift for the input (pass B only)
    w_ref     : (9, C, C) bf16 dense block-diagonal taps, or
                (9, G, Cg_in, Cg_out) bf16 per-group taps
    y_ref     : (1, Hb, W, C) bf16  conv output row tile (pre-BN)
    stats_ref : (1, 1, 2, C) f32    per-tile [sum, sum_of_squares]
    slab_ref  : (1, Hb+2, W, C) f32 scratch: row tile + 1-row halo (H-padded only,
                width stays W so every slab access is (8,128)-aligned)
    """
    W, C = x_ref.shape[2], x_ref.shape[3]
    Hb = y_ref.shape[1]
    rows = Hb * W
    r = pl.program_id(1)
    nr = pl.num_programs(1)
    row0 = r * Hb

    # ---- fused input transform (identity for pass A, BN1+ReLU for pass B) ----
    def transform(v):
        v = v.astype(jnp.float32)
        if apply_bn_relu:
            s = scale_ref[...].reshape(1, 1, 1, C)
            t = shift_ref[...].reshape(1, 1, 1, C)
            v = jnp.maximum(v * s + t, 0.0)
        return v

    # ---- build the H-padded slab (aligned writes only) ------------------------
    zrow = jnp.zeros((1, 1, W, C), slab_ref.dtype)
    slab_ref[:, 0:1, :, :] = zrow
    slab_ref[:, Hb + 1:Hb + 2, :, :] = zrow
    slab_ref[:, 1:Hb + 1, :, :] = transform(x_ref[:, pl.ds(row0, Hb), :, :])

    @pl.when(r > 0)
    def _():
        slab_ref[:, 0:1, :, :] = transform(x_ref[:, pl.ds(row0 - 1, 1), :, :])

    @pl.when(r < nr - 1)
    def _():
        slab_ref[:, Hb + 1:Hb + 2, :, :] = transform(
            x_ref[:, pl.ds(row0 + Hb, 1), :, :])

    # ---- aligned im2col: +/-1 column shift via sublane roll + border mask -----
    col = lax.broadcasted_iota(jnp.int32, (rows, 1), 0) % W
    not_first_col = col > 0            # kx == 0 reads column w-1 (zero at w == 0)
    not_last_col = col < (W - 1)       # kx == 2 reads column w+1 (zero at w == W-1)

    def tap_patch(band, kx):
        if kx == 1:
            p = band
        else:
            p = pltpu.roll(band, (1 - kx) % rows, 0)     # XLU sublane rotate
            p = jnp.where(not_first_col if kx == 0 else not_last_col, p, 0.0)
        return p.astype(jnp.bfloat16)

    # ---- BN statistics from the exact f32 accumulator, in row chunks ----------
    def write_stats(acc, c0, nc):
        chunk = min(rows, 512)
        s1 = jnp.zeros((1, nc), jnp.float32)
        s2 = jnp.zeros((1, nc), jnp.float32)
        for i in range(0, rows, chunk):
            n = min(chunk, rows - i)
            blk = acc[i:i + n]
            ones = jnp.ones((1, n), jnp.float32)
            s1 = s1 + jnp.dot(ones, blk, preferred_element_type=jnp.float32)
            s2 = s2 + jnp.dot(ones, blk * blk, preferred_element_type=jnp.float32)
        stats_ref[:, :, 0:1, c0:c0 + nc] = s1.reshape(1, 1, 1, nc)
        stats_ref[:, :, 1:2, c0:c0 + nc] = s2.reshape(1, 1, 1, nc)

    # ---- grouped 3x3 conv as bf16 MXU matmuls with f32 accumulation -----------
    if group_layout is None:
        acc = jnp.zeros((rows, C), jnp.float32)
        for ky in range(3):
            band = slab_ref[:, ky:ky + Hb, :, :].reshape(rows, C)
            for kx in range(3):
                acc = acc + jnp.dot(tap_patch(band, kx), w_ref[ky * 3 + kx],
                                    preferred_element_type=jnp.float32)
        y_ref[...] = acc.reshape(1, Hb, W, C).astype(y_ref.dtype)
        write_stats(acc, 0, C)
    else:
        # Per-group path (contraction >= 256 so the MXU stays full); each group
        # streams straight into a lane-aligned slice of y_ref (one live acc).
        # TODO(synk): fuse pairs of 128-wide groups into 256-wide block-diagonal
        # matmuls instead of falling back to the dense path for cg_in == 128.
        G, cg_in, cg_out = group_layout
        for g in range(G):
            acc = jnp.zeros((rows, cg_out), jnp.float32)
            for ky in range(3):
                band = slab_ref[:, ky:ky + Hb, :,
                                g * cg_in:(g + 1) * cg_in].reshape(rows, cg_in)
                for kx in range(3):
                    acc = acc + jnp.dot(tap_patch(band, kx),
                                        w_ref[ky * 3 + kx, g],
                                        preferred_element_type=jnp.float32)
            y_ref[:, :, :, g * cg_out:(g + 1) * cg_out] = (
                acc.reshape(1, Hb, W, cg_out).astype(y_ref.dtype))
            write_stats(acc, g * cg_out, cg_out)


def _bn_add_relu_kernel(y_ref, res_ref, scale_ref, shift_ref, o_ref):
    """out = relu(bn2(conv2_out) + residual) on flattened (rows, C) blocks."""
    s = scale_ref[...]
    t = shift_ref[...]
    y = y_ref[...].astype(jnp.float32)
    res = res_ref[...].astype(jnp.float32)
    o_ref[...] = jnp.maximum(y * s + t + res, 0.0)


# --------------------------------------------------------------------------
# Wrappers
# --------------------------------------------------------------------------
def _round_up(x, m):
    return ((x + m - 1) // m) * m


def _pick_row_block(H, W, C):
    """Largest divisor of H whose per-step VMEM footprint fits the budget."""
    resident = 2 * H * W * C * 2                  # double-buffered bf16 input image
    budget = 40 * 1024 * 1024                     # headroom under v7x's 64 MiB
    last = H
    for hb in range(H, 0, -1):
        if H % hb:
            continue
        last = hb
        tile = ((hb + 2) * W * C * 4              # f32 slab scratch
                + 3 * hb * W * C * 4              # f32 acc + patch temporaries
                + 2 * hb * W * C * 2)             # double-buffered bf16 output block
        if resident + tile <= budget:
            return hb
    return last


def _pick_flat_rows(total, cap=8192):
    """Largest divisor of `total` that is <= cap and a multiple of 8."""
    for rb in range(min(total, cap), 7, -1):
        if total % rb == 0 and rb % 8 == 0:
            return rb
    return total


def _prepare_conv_weight(w, groups, cpad):
    """PyTorch grouped conv weight (Cout, Cin//groups, 3, 3) -> MXU-friendly form.

    Returns (weights_bf16, group_layout):
      group_layout is None              -> dense block-diagonal (9, cpad, cpad)
      group_layout = (G, cg_in, cg_out) -> per-group (9, G, cg_in, cg_out)
                                           (only when the contraction is >= 256)
    """
    cout, cg_in, kh, kw = w.shape
    cg_out = cout // groups
    cin = cg_in * groups
    if (cg_in % 256 == 0 and cg_out % _LANE == 0
            and cin == cpad and cout == cpad):
        wg = w.reshape(groups, cg_out, cg_in, kh, kw)
        wk = jnp.transpose(wg, (3, 4, 0, 2, 1)).reshape(kh * kw, groups, cg_in, cg_out)
        return wk.astype(jnp.bfloat16), (groups, cg_in, cg_out)
    dense = jnp.zeros((kh * kw, cpad, cpad), jnp.float32)
    for g in range(groups):
        blk = w[g * cg_out:(g + 1) * cg_out]                 # (cg_out, cg_in, 3, 3)
        blk = jnp.transpose(blk, (2, 3, 1, 0)).reshape(kh * kw, cg_in, cg_out)
        dense = dense.at[:, g * cg_in:(g + 1) * cg_in,
                         g * cg_out:(g + 1) * cg_out].set(blk)
    return dense.astype(jnp.bfloat16), None


def _conv3x3_pass(x, scale, shift, w, *, apply_bn_relu, group_layout, block_h):
    N, H, W, C = x.shape
    R = H // block_h
    kernel = functools.partial(_conv3x3_stats_kernel,
                               apply_bn_relu=apply_bn_relu,
                               group_layout=group_layout)
    if w.ndim == 3:
        w_spec = pl.BlockSpec(tuple(w.shape), lambda b, r: (0, 0, 0))
    else:
        w_spec = pl.BlockSpec(tuple(w.shape), lambda b, r: (0, 0, 0, 0))
    # NOTE: the weight block index is grid-invariant, so it is fetched once;
    # the second pipeline buffer it reserves is small for these weight sizes.
    return pl.pallas_call(
        kernel,
        out_shape=(jax.ShapeDtypeStruct((N, H, W, C), jnp.bfloat16),
                   jax.ShapeDtypeStruct((N, R, 2, C), jnp.float32)),
        grid=(N, R),
        in_specs=[
            pl.BlockSpec((1, H, W, C), lambda b, r: (b, 0, 0, 0)),  # resident per image
            pl.BlockSpec((1, C), lambda b, r: (0, 0)),
            pl.BlockSpec((1, C), lambda b, r: (0, 0)),
            w_spec,
        ],
        out_specs=(pl.BlockSpec((1, block_h, W, C), lambda b, r: (b, r, 0, 0)),
                   pl.BlockSpec((1, 1, 2, C), lambda b, r: (b, r, 0, 0))),
        scratch_shapes=[pltpu.VMEM((1, block_h + 2, W, C), jnp.float32)],
        compiler_params=pltpu.CompilerParams(
            dimension_semantics=("parallel", "parallel"),
            vmem_limit_bytes=_VMEM_LIMIT),
    )(x, scale, shift, w)


def _bn_add_relu_pass(y_flat, res_flat, scale, shift, block_rows):
    T, C = y_flat.shape
    return pl.pallas_call(
        _bn_add_relu_kernel,
        out_shape=jax.ShapeDtypeStruct((T, C), jnp.float32),
        grid=(T // block_rows,),
        in_specs=[
            pl.BlockSpec((block_rows, C), lambda i: (i, 0)),
            pl.BlockSpec((block_rows, C), lambda i: (i, 0)),
            pl.BlockSpec((1, C), lambda i: (0, 0)),
            pl.BlockSpec((1, C), lambda i: (0, 0)),
        ],
        out_specs=pl.BlockSpec((block_rows, C), lambda i: (i, 0)),
        compiler_params=pltpu.CompilerParams(
            dimension_semantics=("parallel",),
            vmem_limit_bytes=_VMEM_LIMIT),
    )(y_flat, res_flat, scale, shift)


def _bn_affine(stats, count, gamma, beta, eps=_EPS):
    """Finalize global (training-mode) BN from per-tile [sum, sumsq] stats."""
    s = jnp.sum(stats, axis=(0, 1))                        # (2, C)
    mean = s[0] / count
    var = jnp.maximum(s[1] / count - mean * mean, 0.0)     # clamp fp cancellation
    scale = gamma * lax.rsqrt(var + eps)
    shift = beta - mean * scale
    return scale.reshape(1, -1), shift.reshape(1, -1)


@functools.partial(jax.jit, static_argnames=("num_group",))
def basic_block_pallas(x_nchw, w1, g1, b1, w2, g2, b2, *, num_group):
    """BasicBlock forward (stride=1, downsample=None). x_nchw: (N, Cin, H, W)."""
    N, Cin, H, W = x_nchw.shape
    Cmid = w1.shape[0]                                     # planes * 2
    assert Cmid == Cin, "residual path requires inplanes == planes * 2"
    assert W % 8 == 0, "W must be a multiple of 8"  # TODO(synk): general W support
    # TODO(synk): stride != 1 / downsample path not implemented (module defaults).
    # TODO(synk): for Cin < 128 a spatial-into-lane packing would avoid the
    # 128-lane channel-pad waste; not implemented.

    Cp = max(_LANE, _round_up(Cin, _LANE))                 # lane-dense channel dim

    # NCHW -> NHWC, channel pad, bf16 once at the boundary (XLA glue).
    x_nhwc = jnp.transpose(x_nchw, (0, 2, 3, 1))
    x_bf16 = jnp.pad(x_nhwc, ((0, 0), (0, 0), (0, 0),
                              (0, Cp - Cin))).astype(jnp.bfloat16)

    w1k, lay1 = _prepare_conv_weight(w1, num_group, Cp)
    w2k, lay2 = _prepare_conv_weight(w2, num_group, Cp)
    pad_c = (0, Cp - Cmid)
    g1p, b1p = jnp.pad(g1, pad_c), jnp.pad(b1, pad_c)
    g2p, b2p = jnp.pad(g2, pad_c), jnp.pad(b2, pad_c)

    zeros_c = jnp.zeros((1, Cp), jnp.float32)
    count = N * H * W
    hb = _pick_row_block(H, W, Cp)

    # pass A: conv1 + per-tile BN1 statistics
    y1, st1 = _conv3x3_pass(x_bf16, zeros_c, zeros_c, w1k,
                            apply_bn_relu=False, group_layout=lay1, block_h=hb)
    scale1, shift1 = _bn_affine(st1, count, g1p, b1p)

    # pass B: fused BN1+ReLU -> conv2 + per-tile BN2 statistics
    y2, st2 = _conv3x3_pass(y1, scale1, shift1, w2k,
                            apply_bn_relu=True, group_layout=lay2, block_h=hb)
    scale2, shift2 = _bn_affine(st2, count, g2p, b2p)

    # pass C: BN2 + residual add + ReLU on flattened lane-dense rows
    T = N * H * W
    rb = _pick_flat_rows(T)
    out_flat = _bn_add_relu_pass(y2.reshape(T, Cp), x_bf16.reshape(T, Cp),
                                 scale2, shift2, rb)

    out = out_flat.reshape(N, H, W, Cp)[..., :Cmid]
    return jnp.transpose(out, (0, 3, 1, 2))                # back to NCHW


# --------------------------------------------------------------------------
# Pure-JAX reference (PyTorch training-mode semantics; conv operands cast to
# bf16 with f32 accumulation to match the kernel's MXU dtype).
# --------------------------------------------------------------------------
def _reference_forward(x_nchw, w1, g1, b1, w2, g2, b2, groups):
    def conv(x, w):
        return lax.conv_general_dilated(
            x.astype(jnp.bfloat16), w.astype(jnp.bfloat16),
            window_strides=(1, 1), padding=((1, 1), (1, 1)),
            dimension_numbers=("NCHW", "OIHW", "NCHW"),
            feature_group_count=groups,
            preferred_element_type=jnp.float32)

    def bn(x, g, b):
        mu = x.mean(axis=(0, 2, 3), keepdims=True)
        var = ((x - mu) ** 2).mean(axis=(0, 2, 3), keepdims=True)
        return ((x - mu) * lax.rsqrt(var + _EPS)
                * g.reshape(1, -1, 1, 1) + b.reshape(1, -1, 1, 1))

    out = jax.nn.relu(bn(conv(x_nchw, w1), g1, b1))
    out = bn(conv(out, w2), g2, b2)
    return jax.nn.relu(out + x_nchw)


if __name__ == "__main__":
    # Small config: inplanes=8, planes=4 (planes*2 == inplanes), num_group=4,
    # stride=1, downsample=None (the configuration the reference forward defines).
    N, H, W = 2, 16, 16
    inplanes, planes, num_group = 8, 4, 4
    Cmid = planes * 2

    key = jax.random.PRNGKey(0)
    k1, k2, k3, k4, k5, k6, kx = jax.random.split(key, 7)

    w1 = 0.1 * jax.random.normal(k1, (Cmid, inplanes // num_group, 3, 3), jnp.float32)
    w2 = 0.1 * jax.random.normal(k2, (Cmid, Cmid // num_group, 3, 3), jnp.float32)
    g1 = 1.0 + 0.1 * jax.random.normal(k3, (Cmid,), jnp.float32)
    b1 = 0.1 * jax.random.normal(k4, (Cmid,), jnp.float32)
    g2 = 1.0 + 0.1 * jax.random.normal(k5, (Cmid,), jnp.float32)
    b2 = 0.1 * jax.random.normal(k6, (Cmid,), jnp.float32)
    x = jax.random.normal(kx, (N, inplanes, H, W), jnp.float32)

    out = basic_block_pallas(x, w1, g1, b1, w2, g2, b2, num_group=num_group)
    out = jax.block_until_ready(out)

    ref = _reference_forward(x, w1, g1, b1, w2, g2, b2, num_group)
    assert out.shape == ref.shape, (out.shape, ref.shape)
    # Tolerance reflects the intentional bf16 storage of y1/y2 and of the
    # residual (HBM-traffic optimization); the math itself is f32-accumulated.
    max_err = float(jnp.max(jnp.abs(out - ref)))
    assert jnp.allclose(out, ref, rtol=3e-2, atol=3e-2), max_err

    print("KERNEL_OK")
</pallas_src>

<mosaic_0001>
module attributes {stable_mosaic.version = 11 : i64} {
  func.func @_conv3x3_stats_kernel(%arg0: i32, %arg1: i32, %arg2: memref<1x16x16x128xbf16, #tpu.memory_space<vmem>>, %arg3: memref<1x128xf32, #tpu.memory_space<vmem>>, %arg4: memref<1x128xf32, #tpu.memory_space<vmem>>, %arg5: memref<9x128x128xbf16, #tpu.memory_space<vmem>>, %arg6: memref<1x16x16x128xbf16, #tpu.memory_space<vmem>>, %arg7: memref<1x1x2x128xf32, #tpu.memory_space<vmem>>, %arg8: memref<1x18x16x128xf32, #tpu.memory_space<vmem>>) attributes {dimension_semantics = [#tpu.dimension_semantics<parallel>, #tpu.dimension_semantics<parallel>], iteration_bounds = array<i64: 2, 1>, scalar_prefetch = 0 : i64, scratch_operands = 1 : i64, tpu.core_type = #tpu.core_type<tc>, window_params = [{transform_indices = @transform_0, window_bounds = array<i64: 1, 16, 16, 128>}, {pipeline_mode = #tpu.pipeline_mode<synchronous>, transform_indices = @transform_1, window_bounds = array<i64: 1, 128>}, {pipeline_mode = #tpu.pipeline_mode<synchronous>, transform_indices = @transform_2, window_bounds = array<i64: 1, 128>}, {pipeline_mode = #tpu.pipeline_mode<synchronous>, transform_indices = @transform_3, window_bounds = array<i64: 9, 128, 128>}, {transform_indices = @transform_4, window_bounds = array<i64: 1, 16, 16, 128>}, {transform_indices = @transform_5, window_bounds = array<i64: 1, 1, 2, 128>}]} {
    %c16_i32 = arith.constant 16 : i32
    %0 = arith.muli %arg1, %c16_i32 : i32
    %cst = arith.constant 0.000000e+00 : f32
    %1 = vector.broadcast %cst : f32 to vector<1x1x16x128xf32>
    %c0 = arith.constant 0 : index
    %c0_0 = arith.constant 0 : index
    %c0_1 = arith.constant 0 : index
    %c0_2 = arith.constant 0 : index
    %2 = vector.load %arg8[%c0, %c0_0, %c0_1, %c0_2] : memref<1x18x16x128xf32, #tpu.memory_space<vmem>>, vector<1x1x16x128xf32>
    tpu.vector_store %arg8[%c0, %c0_0, %c0_1, %c0_2], %1 {strides = array<i32>} : memref<1x18x16x128xf32, #tpu.memory_space<vmem>>, vector<1x1x16x128xf32>,
    %c0_3 = arith.constant 0 : index
    %c17 = arith.constant 17 : index
    %c0_4 = arith.constant 0 : index
    %c0_5 = arith.constant 0 : index
    %3 = vector.load %arg8[%c0_3, %c17, %c0_4, %c0_5] : memref<1x18x16x128xf32, #tpu.memory_space<vmem>>, vector<1x1x16x128xf32>
    tpu.vector_store %arg8[%c0_3, %c17, %c0_4, %c0_5], %1 {strides = array<i32>} : memref<1x18x16x128xf32, #tpu.memory_space<vmem>>, vector<1x1x16x128xf32>,
    %c0_6 = arith.constant 0 : index
    %4 = arith.index_cast %0 : i32 to index
    %c0_7 = arith.constant 0 : index
    %c0_8 = arith.constant 0 : index
    %5 = vector.load %arg2[%c0_6, %4, %c0_7, %c0_8] : memref<1x16x16x128xbf16, #tpu.memory_space<vmem>>, vector<1x16x16x128xbf16>
    %6 = arith.extf %5 : vector<1x16x16x128xbf16> to vector<1x16x16x128xf32>
    %c0_9 = arith.constant 0 : index
    %c1 = arith.constant 1 : index
    %c0_10 = arith.constant 0 : index
    %c0_11 = arith.constant 0 : index
    %7 = vector.load %arg8[%c0_9, %c1, %c0_10, %c0_11] : memref<1x18x16x128xf32, #tpu.memory_space<vmem>>, vector<1x16x16x128xf32>
    tpu.vector_store %arg8[%c0_9, %c1, %c0_10, %c0_11], %6 {strides = array<i32>} : memref<1x18x16x128xf32, #tpu.memory_space<vmem>>, vector<1x16x16x128xf32>,
    %c0_i32 = arith.constant 0 : i32
    %8 = arith.cmpi sgt, %arg1, %c0_i32 : i32
    %9 = arith.extui %8 : i1 to i32
    %c0_i32_12 = arith.constant 0 : i32
    %10 = arith.cmpi ne, %9, %c0_i32_12 : i32
    scf.if %10 {
      %c1_i32_91 = arith.constant 1 : i32
      %132 = arith.subi %0, %c1_i32_91 : i32
      %c0_92 = arith.constant 0 : index
      %133 = arith.index_cast %132 : i32 to index
      %c0_93 = arith.constant 0 : index
      %c0_94 = arith.constant 0 : index
      %134 = vector.load %arg2[%c0_92, %133, %c0_93, %c0_94] : memref<1x16x16x128xbf16, #tpu.memory_space<vmem>>, vector<1x1x16x128xbf16>
      %135 = arith.extf %134 : vector<1x1x16x128xbf16> to vector<1x1x16x128xf32>
      %c0_95 = arith.constant 0 : index
      %c0_96 = arith.constant 0 : index
      %c0_97 = arith.constant 0 : index
      %c0_98 = arith.constant 0 : index
      %136 = vector.load %arg8[%c0_95, %c0_96, %c0_97, %c0_98] : memref<1x18x16x128xf32, #tpu.memory_space<vmem>>, vector<1x1x16x128xf32>
      tpu.vector_store %arg8[%c0_95, %c0_96, %c0_97, %c0_98], %135 {strides = array<i32>} : memref<1x18x16x128xf32, #tpu.memory_space<vmem>>, vector<1x1x16x128xf32>,
    } else {
    }
    %c0_i32_13 = arith.constant 0 : i32
    %11 = arith.cmpi slt, %arg1, %c0_i32_13 : i32
    %12 = arith.extui %11 : i1 to i32
    %c0_i32_14 = arith.constant 0 : i32
    %13 = arith.cmpi ne, %12, %c0_i32_14 : i32
    scf.if %13 {
      %c16_i32_91 = arith.constant 16 : i32
      %132 = arith.addi %0, %c16_i32_91 : i32
      %c0_92 = arith.constant 0 : index
      %133 = arith.index_cast %132 : i32 to index
      %c0_93 = arith.constant 0 : index
      %c0_94 = arith.constant 0 : index
      %134 = vector.load %arg2[%c0_92, %133, %c0_93, %c0_94] : memref<1x16x16x128xbf16, #tpu.memory_space<vmem>>, vector<1x1x16x128xbf16>
      %135 = arith.extf %134 : vector<1x1x16x128xbf16> to vector<1x1x16x128xf32>
      %c0_95 = arith.constant 0 : index
      %c17_96 = arith.constant 17 : index
      %c0_97 = arith.constant 0 : index
      %c0_98 = arith.constant 0 : index
      %136 = vector.load %arg8[%c0_95, %c17_96, %c0_97, %c0_98] : memref<1x18x16x128xf32, #tpu.memory_space<vmem>>, vector<1x1x16x128xf32>
      tpu.vector_store %arg8[%c0_95, %c17_96, %c0_97, %c0_98], %135 {strides = array<i32>} : memref<1x18x16x128xf32, #tpu.memory_space<vmem>>, vector<1x1x16x128xf32>,
    } else {
    }
    %14 = tpu.iota {dimensions = array<i32: 0>} : vector<256x1xi32>
    %c16_i32_15 = arith.constant 16 : i32
    %c0_i32_16 = arith.constant 0 : i32
    %15 = arith.cmpi eq, %c16_i32_15, %c0_i32_16 : i32
    %c1_i32 = arith.constant 1 : i32
    %16 = arith.select %15, %c1_i32, %c16_i32_15 : i32
    %17 = vector.broadcast %16 : i32 to vector<256x1xi32>
    %18 = arith.remsi %14, %17 : vector<256x1xi32>
    %c0_i32_17 = arith.constant 0 : i32
    %19 = vector.broadcast %c0_i32_17 : i32 to vector<256x1xi32>
    %20 = arith.cmpi ne, %18, %19 : vector<256x1xi32>
    %c0_i32_18 = arith.constant 0 : i32
    %21 = vector.broadcast %c0_i32_18 : i32 to vector<256x1xi32>
    %22 = arith.cmpi slt, %18, %21 : vector<256x1xi32>
    %c0_i32_19 = arith.constant 0 : i32
    %23 = arith.cmpi slt, %16, %c0_i32_19 : i32
    %24 = vector.broadcast %23 : i1 to vector<256x1xi1>
    %25 = vector.broadcast %24 : vector<256x1xi1> to vector<256x1xi1>
    %26 = arith.xori %22, %25 : vector<256x1xi1>
    %27 = arith.andi %26, %20 : vector<256x1xi1>
    %28 = vector.broadcast %16 : i32 to vector<256x1xi32>
    %29 = arith.addi %18, %28 : vector<256x1xi32>
    %30 = arith.select %27, %29, %18 : vector<256x1xi1>, vector<256x1xi32>
    %c0_i32_20 = arith.constant 0 : i32
    %31 = vector.broadcast %c0_i32_20 : i32 to vector<256x1xi32>
    %32 = arith.cmpi sgt, %30, %31 : vector<256x1xi32>
    %c15_i32 = arith.constant 15 : i32
    %33 = vector.broadcast %c15_i32 : i32 to vector<256x1xi32>
    %34 = arith.cmpi slt, %30, %33 : vector<256x1xi32>
    %cst_21 = arith.constant 0.000000e+00 : f32
    %35 = vector.broadcast %cst_21 : f32 to vector<256x128xf32>
    %c0_22 = arith.constant 0 : index
    %c0_23 = arith.constant 0 : index
    %c0_24 = arith.constant 0 : index
    %c0_25 = arith.constant 0 : index
    %36 = vector.load %arg8[%c0_22, %c0_23, %c0_24, %c0_25] : memref<1x18x16x128xf32, #tpu.memory_space<vmem>>, vector<1x16x16x128xf32>
    %37 = vector.shape_cast %36 : vector<1x16x16x128xf32> to vector<256x128xf32>
    %c1_i32_26 = arith.constant 1 : i32
    %38 = tpu.dynamic_rotate %37 by %c1_i32_26 dim 0 : vector<256x128xf32>, i32 -> vector<256x128xf32>
    %cst_27 = arith.constant 0.000000e+00 : f32
    %39 = vector.shape_cast %32 : vector<256x1xi1> to vector<256x1xi1>
    %40 = vector.broadcast %39 : vector<256x1xi1> to vector<256x128xi1>
    %41 = vector.broadcast %cst_27 : f32 to vector<256x128xf32>
    %42 = arith.select %40, %38, %41 : vector<256x128xi1>, vector<256x128xf32>
    %43 = arith.truncf %42 : vector<256x128xf32> to vector<256x128xbf16>
    %c0_28 = arith.constant 0 : index
    %c0_29 = arith.constant 0 : index
    %c0_30 = arith.constant 0 : index
    %44 = vector.load %arg5[%c0_28, %c0_29, %c0_30] : memref<9x128x128xbf16, #tpu.memory_space<vmem>>, vector<1x128x128xbf16>
    %45 = vector.shape_cast %44 : vector<1x128x128xbf16> to vector<128x128xbf16>
    %cst_31 = arith.constant dense<0.000000e+00> : vector<256x128xf32>
    %46 = tpu.matmul %43, %45, %cst_31 {dimension_numbers = #tpu.dot_dimension_numbers<[1], [0], [0], [1], [0, 0, 1, 1], [], []>} : vector<256x128xbf16>, vector<128x128xbf16>, vector<256x128xf32> -> vector<256x128xf32>
    %47 = arith.addf %35, %46 : vector<256x128xf32>
    %48 = arith.truncf %37 : vector<256x128xf32> to vector<256x128xbf16>
    %c1_32 = arith.constant 1 : index
    %c0_33 = arith.constant 0 : index
    %c0_34 = arith.constant 0 : index
    %49 = vector.load %arg5[%c1_32, %c0_33, %c0_34] : memref<9x128x128xbf16, #tpu.memory_space<vmem>>, vector<1x128x128xbf16>
    %50 = vector.shape_cast %49 : vector<1x128x128xbf16> to vector<128x128xbf16>
    %cst_35 = arith.constant dense<0.000000e+00> : vector<256x128xf32>
    %51 = tpu.matmul %48, %50, %cst_35 {dimension_numbers = #tpu.dot_dimension_numbers<[1], [0], [0], [1], [0, 0, 1, 1], [], []>} : vector<256x128xbf16>, vector<128x128xbf16>, vector<256x128xf32> -> vector<256x128xf32>
    %52 = arith.addf %47, %51 : vector<256x128xf32>
    %c255_i32 = arith.constant 255 : i32
    %53 = tpu.dynamic_rotate %37 by %c255_i32 dim 0 : vector<256x128xf32>, i32 -> vector<256x128xf32>
    %cst_36 = arith.constant 0.000000e+00 : f32
    %54 = vector.shape_cast %34 : vector<256x1xi1> to vector<256x1xi1>
    %55 = vector.broadcast %54 : vector<256x1xi1> to vector<256x128xi1>
    %56 = vector.broadcast %cst_36 : f32 to vector<256x128xf32>
    %57 = arith.select %55, %53, %56 : vector<256x128xi1>, vector<256x128xf32>
    %58 = arith.truncf %57 : vector<256x128xf32> to vector<256x128xbf16>
    %c2 = arith.constant 2 : index
    %c0_37 = arith.constant 0 : index
    %c0_38 = arith.constant 0 : index
    %59 = vector.load %arg5[%c2, %c0_37, %c0_38] : memref<9x128x128xbf16, #tpu.memory_space<vmem>>, vector<1x128x128xbf16>
    %60 = vector.shape_cast %59 : vector<1x128x128xbf16> to vector<128x128xbf16>
    %cst_39 = arith.constant dense<0.000000e+00> : vector<256x128xf32>
    %61 = tpu.matmul %58, %60, %cst_39 {dimension_numbers = #tpu.dot_dimension_numbers<[1], [0], [0], [1], [0, 0, 1, 1], [], []>} : vector<256x128xbf16>, vector<128x128xbf16>, vector<256x128xf32> -> vector<256x128xf32>
    %62 = arith.addf %52, %61 : vector<256x128xf32>
    %c0_40 = arith.constant 0 : index
    %c1_41 = arith.constant 1 : index
    %c0_42 = arith.constant 0 : index
    %c0_43 = arith.constant 0 : index
    %63 = vector.load %arg8[%c0_40, %c1_41, %c0_42, %c0_43] : memref<1x18x16x128xf32, #tpu.memory_space<vmem>>, vector<1x16x16x128xf32>
    %64 = vector.shape_cast %63 : vector<1x16x16x128xf32> to vector<256x128xf32>
    %c1_i32_44 = arith.constant 1 : i32
    %65 = tpu.dynamic_rotate %64 by %c1_i32_44 dim 0 : vector<256x128xf32>, i32 -> vector<256x128xf32>
    %cst_45 = arith.constant 0.000000e+00 : f32
    %66 = vector.shape_cast %32 : vector<256x1xi1> to vector<256x1xi1>
    %67 = vector.broadcast %66 : vector<256x1xi1> to vector<256x128xi1>
    %68 = vector.broadcast %cst_45 : f32 to vector<256x128xf32>
    %69 = arith.select %67, %65, %68 : vector<256x128xi1>, vector<256x128xf32>
    %70 = arith.truncf %69 : vector<256x128xf32> to vector<256x128xbf16>
    %c3 = arith.constant 3 : index
    %c0_46 = arith.constant 0 : index
    %c0_47 = arith.constant 0 : index
    %71 = vector.load %arg5[%c3, %c0_46, %c0_47] : memref<9x128x128xbf16, #tpu.memory_space<vmem>>, vector<1x128x128xbf16>
    %72 = vector.shape_cast %71 : vector<1x128x128xbf16> to vector<128x128xbf16>
    %cst_48 = arith.constant dense<0.000000e+00> : vector<256x128xf32>
    %73 = tpu.matmul %70, %72, %cst_48 {dimension_numbers = #tpu.dot_dimension_numbers<[1], [0], [0], [1], [0, 0, 1, 1], [], []>} : vector<256x128xbf16>, vector<128x128xbf16>, vector<256x128xf32> -> vector<256x128xf32>
    %74 = arith.addf %62, %73 : vector<256x128xf32>
    %75 = arith.truncf %64 : vector<256x128xf32> to vector<256x128xbf16>
    %c4 = arith.constant 4 : index
    %c0_49 = arith.constant 0 : index
    %c0_50 = arith.constant 0 : index
    %76 = vector.load %arg5[%c4, %c0_49, %c0_50] : memref<9x128x128xbf16, #tpu.memory_space<vmem>>, vector<1x128x128xbf16>
    %77 = vector.shape_cast %76 : vector<1x128x128xbf16> to vector<128x128xbf16>
    %cst_51 = arith.constant dense<0.000000e+00> : vector<256x128xf32>
    %78 = tpu.matmul %75, %77, %cst_51 {dimension_numbers = #tpu.dot_dimension_numbers<[1], [0], [0], [1], [0, 0, 1, 1], [], []>} : vector<256x128xbf16>, vector<128x128xbf16>, vector<256x128xf32> -> vector<256x128xf32>
    %79 = arith.addf %74, %78 : vector<256x128xf32>
    %c255_i32_52 = arith.constant 255 : i32
    %80 = tpu.dynamic_rotate %64 by %c255_i32_52 dim 0 : vector<256x128xf32>, i32 -> vector<256x128xf32>
    %cst_53 = arith.constant 0.000000e+00 : f32
    %81 = vector.shape_cast %34 : vector<256x1xi1> to vector<256x1xi1>
    %82 = vector.broadcast %81 : vector<256x1xi1> to vector<256x128xi1>
    %83 = vector.broadcast %cst_53 : f32 to vector<256x128xf32>
    %84 = arith.select %82, %80, %83 : vector<256x128xi1>, vector<256x128xf32>
    %85 = arith.truncf %84 : vector<256x128xf32> to vector<256x128xbf16>
    %c5 = arith.constant 5 : index
    %c0_54 = arith.constant 0 : index
    %c0_55 = arith.constant 0 : index
    %86 = vector.load %arg5[%c5, %c0_54, %c0_55] : memref<9x128x128xbf16, #tpu.memory_space<vmem>>, vector<1x128x128xbf16>
    %87 = vector.shape_cast %86 : vector<1x128x128xbf16> to vector<128x128xbf16>
    %cst_56 = arith.constant dense<0.000000e+00> : vector<256x128xf32>
    %88 = tpu.matmul %85, %87, %cst_56 {dimension_numbers = #tpu.dot_dimension_numbers<[1], [0], [0], [1], [0, 0, 1, 1], [], []>} : vector<256x128xbf16>, vector<128x128xbf16>, vector<256x128xf32> -> vector<256x128xf32>
    %89 = arith.addf %79, %88 : vector<256x128xf32>
    %c0_57 = arith.constant 0 : index
    %c2_58 = arith.constant 2 : index
    %c0_59 = arith.constant 0 : index
    %c0_60 = arith.constant 0 : index
    %90 = vector.load %arg8[%c0_57, %c2_58, %c0_59, %c0_60] : memref<1x18x16x128xf32, #tpu.memory_space<vmem>>, vector<1x16x16x128xf32>
    %91 = vector.shape_cast %90 : vector<1x16x16x128xf32> to vector<256x128xf32>
    %c1_i32_61 = arith.constant 1 : i32
    %92 = tpu.dynamic_rotate %91 by %c1_i32_61 dim 0 : vector<256x128xf32>, i32 -> vector<256x128xf32>
    %cst_62 = arith.constant 0.000000e+00 : f32
    %93 = vector.shape_cast %32 : vector<256x1xi1> to vector<256x1xi1>
    %94 = vector.broadcast %93 : vector<256x1xi1> to vector<256x128xi1>
    %95 = vector.broadcast %cst_62 : f32 to vector<256x128xf32>
    %96 = arith.select %94, %92, %95 : vector<256x128xi1>, vector<256x128xf32>
    %97 = arith.truncf %96 : vector<256x128xf32> to vector<256x128xbf16>
    %c6 = arith.constant 6 : index
    %c0_63 = arith.constant 0 : index
    %c0_64 = arith.constant 0 : index
    %98 = vector.load %arg5[%c6, %c0_63, %c0_64] : memref<9x128x128xbf16, #tpu.memory_space<vmem>>, vector<1x128x128xbf16>
    %99 = vector.shape_cast %98 : vector<1x128x128xbf16> to vector<128x128xbf16>
    %cst_65 = arith.constant dense<0.000000e+00> : vector<256x128xf32>
    %100 = tpu.matmul %97, %99, %cst_65 {dimension_numbers = #tpu.dot_dimension_numbers<[1], [0], [0], [1], [0, 0, 1, 1], [], []>} : vector<256x128xbf16>, vector<128x128xbf16>, vector<256x128xf32> -> vector<256x128xf32>
    %101 = arith.addf %89, %100 : vector<256x128xf32>
    %102 = arith.truncf %91 : vector<256x128xf32> to vector<256x128xbf16>
    %c7 = arith.constant 7 : index
    %c0_66 = arith.constant 0 : index
    %c0_67 = arith.constant 0 : index
    %103 = vector.load %arg5[%c7, %c0_66, %c0_67] : memref<9x128x128xbf16, #tpu.memory_space<vmem>>, vector<1x128x128xbf16>
    %104 = vector.shape_cast %103 : vector<1x128x128xbf16> to vector<128x128xbf16>
    %cst_68 = arith.constant dense<0.000000e+00> : vector<256x128xf32>
    %105 = tpu.matmul %102, %104, %cst_68 {dimension_numbers = #tpu.dot_dimension_numbers<[1], [0], [0], [1], [0, 0, 1, 1], [], []>} : vector<256x128xbf16>, vector<128x128xbf16>, vector<256x128xf32> -> vector<256x128xf32>
    %106 = arith.addf %101, %105 : vector<256x128xf32>
    %c255_i32_69 = arith.constant 255 : i32
    %107 = tpu.dynamic_rotate %91 by %c255_i32_69 dim 0 : vector<256x128xf32>, i32 -> vector<256x128xf32>
    %cst_70 = arith.constant 0.000000e+00 : f32
    %108 = vector.shape_cast %34 : vector<256x1xi1> to vector<256x1xi1>
    %109 = vector.broadcast %108 : vector<256x1xi1> to vector<256x128xi1>
    %110 = vector.broadcast %cst_70 : f32 to vector<256x128xf32>
    %111 = arith.select %109, %107, %110 : vector<256x128xi1>, vector<256x128xf32>
    %112 = arith.truncf %111 : vector<256x128xf32> to vector<256x128xbf16>
    %c8 = arith.constant 8 : index
    %c0_71 = arith.constant 0 : index
    %c0_72 = arith.constant 0 : index
    %113 = vector.load %arg5[%c8, %c0_71, %c0_72] : memref<9x128x128xbf16, #tpu.memory_space<vmem>>, vector<1x128x128xbf16>
    %114 = vector.shape_cast %113 : vector<1x128x128xbf16> to vector<128x128xbf16>
    %cst_73 = arith.constant dense<0.000000e+00> : vector<256x128xf32>
    %115 = tpu.matmul %112, %114, %cst_73 {dimension_numbers = #tpu.dot_dimension_numbers<[1], [0], [0], [1], [0, 0, 1, 1], [], []>} : vector<256x128xbf16>, vector<128x128xbf16>, vector<256x128xf32> -> vector<256x128xf32>
    %116 = arith.addf %106, %115 : vector<256x128xf32>
    %117 = vector.shape_cast %116 : vector<256x128xf32> to vector<1x16x16x128xf32>
    %118 = arith.truncf %117 : vector<1x16x16x128xf32> to vector<1x16x16x128xbf16>
    %c0_74 = arith.constant 0 : index
    %c0_75 = arith.constant 0 : index
    %c0_76 = arith.constant 0 : index
    %c0_77 = arith.constant 0 : index
    %119 = vector.load %arg6[%c0_74, %c0_75, %c0_76, %c0_77] : memref<1x16x16x128xbf16, #tpu.memory_space<vmem>>, vector<1x16x16x128xbf16>
    tpu.vector_store %arg6[%c0_74, %c0_75, %c0_76, %c0_77], %118 {strides = array<i32>} : memref<1x16x16x128xbf16, #tpu.memory_space<vmem>>, vector<1x16x16x128xbf16>,
    %cst_78 = arith.constant 0.000000e+00 : f32
    %120 = vector.broadcast %cst_78 : f32 to vector<1x128xf32>
    %cst_79 = arith.constant 0.000000e+00 : f32
    %121 = vector.broadcast %cst_79 : f32 to vector<1x128xf32>
    %cst_80 = arith.constant 1.000000e+00 : f32
    %122 = vector.broadcast %cst_80 : f32 to vector<1x256xf32>
    %cst_81 = arith.constant dense<0.000000e+00> : vector<1x128xf32>
    %123 = tpu.matmul %122, %116, %cst_81 {dimension_numbers = #tpu.dot_dimension_numbers<[1], [0], [0], [1], [0, 0, 1, 1], [], []>} : vector<1x256xf32>, vector<256x128xf32>, vector<1x128xf32> -> vector<1x128xf32>
    %124 = arith.addf %120, %123 : vector<1x128xf32>
    %125 = arith.mulf %116, %116 : vector<256x128xf32>
    %cst_82 = arith.constant dense<0.000000e+00> : vector<1x128xf32>
    %126 = tpu.matmul %122, %125, %cst_82 {dimension_numbers = #tpu.dot_dimension_numbers<[1], [0], [0], [1], [0, 0, 1, 1], [], []>} : vector<1x256xf32>, vector<256x128xf32>, vector<1x128xf32> -> vector<1x128xf32>
    %127 = arith.addf %121, %126 : vector<1x128xf32>
    %128 = vector.shape_cast %124 : vector<1x128xf32> to vector<1x1x1x128xf32>
    %c0_83 = arith.constant 0 : index
    %c0_84 = arith.constant 0 : index
    %c0_85 = arith.constant 0 : index
    %c0_86 = arith.constant 0 : index
    %129 = vector.load %arg7[%c0_83, %c0_84, %c0_85, %c0_86] : memref<1x1x2x128xf32, #tpu.memory_space<vmem>>, vector<1x1x1x128xf32>
    tpu.vector_store %arg7[%c0_83, %c0_84, %c0_85, %c0_86], %128 {strides = array<i32>} : memref<1x1x2x128xf32, #tpu.memory_space<vmem>>, vector<1x1x1x128xf32>,
    %130 = vector.shape_cast %127 : vector<1x128xf32> to vector<1x1x1x128xf32>
    %c0_87 = arith.constant 0 : index
    %c0_88 = arith.constant 0 : index
    %c1_89 = arith.constant 1 : index
    %c0_90 = arith.constant 0 : index
    %131 = vector.load %arg7[%c0_87, %c0_88, %c1_89, %c0_90] : memref<1x1x2x128xf32, #tpu.memory_space<vmem>>, vector<1x1x1x128xf32>
    tpu.vector_store %arg7[%c0_87, %c0_88, %c1_89, %c0_90], %130 {strides = array<i32>} : memref<1x1x2x128xf32, #tpu.memory_space<vmem>>, vector<1x1x1x128xf32>,
    return
  }
  func.func @transform_0(%arg0: i32, %arg1: i32) -> (i32, i32, i32, i32) {
    %c0_i32 = arith.constant 0 : i32
    %c0_i32_0 = arith.constant 0 : i32
    %c0_i32_1 = arith.constant 0 : i32
    %c0_i32_2 = arith.constant 0 : i32
    return %arg0, %c0_i32, %c0_i32_0, %c0_i32_1 : i32, i32, i32, i32
  }
  func.func @transform_1(%arg0: i32, %arg1: i32) -> (i32, i32) {
    %c0_i32 = arith.constant 0 : i32
    %c0_i32_0 = arith.constant 0 : i32
    %c0_i32_1 = arith.constant 0 : i32
    return %c0_i32, %c0_i32_0 : i32, i32
  }
  func.func @transform_2(%arg0: i32, %arg1: i32) -> (i32, i32) {
    %c0_i32 = arith.constant 0 : i32
    %c0_i32_0 = arith.constant 0 : i32
    %c0_i32_1 = arith.constant 0 : i32
    return %c0_i32, %c0_i32_0 : i32, i32
  }
  func.func @transform_3(%arg0: i32, %arg1: i32) -> (i32, i32, i32) {
    %c0_i32 = arith.constant 0 : i32
    %c0_i32_0 = arith.constant 0 : i32
    %c0_i32_1 = arith.constant 0 : i32
    %c0_i32_2 = arith.constant 0 : i32
    return %c0_i32, %c0_i32_0, %c0_i32_1 : i32, i32, i32
  }
  func.func @transform_4(%arg0: i32, %arg1: i32) -> (i32, i32, i32, i32) {
    %c0_i32 = arith.constant 0 : i32
    %c0_i32_0 = arith.constant 0 : i32
    %c0_i32_1 = arith.constant 0 : i32
    return %arg0, %arg1, %c0_i32, %c0_i32_0 : i32, i32, i32, i32
  }
  func.func @transform_5(%arg0: i32, %arg1: i32) -> (i32, i32, i32, i32) {
    %c0_i32 = arith.constant 0 : i32
    %c0_i32_0 = arith.constant 0 : i32
    %c0_i32_1 = arith.constant 0 : i32
    return %arg0, %arg1, %c0_i32, %c0_i32_0 : i32, i32, i32, i32
  }
}

module attributes {stable_mosaic.version = 11 : i64} {
  func.func @_conv3x3_stats_kernel(%arg0: i32, %arg1: i32, %arg2: memref<1x16x16x128xbf16, #tpu.memory_space<vmem>>, %arg3: memref<1x128xf32, #tpu.memory_space<vmem>>, %arg4: memref<1x128xf32, #tpu.memory_space<vmem>>, %arg5: memref<9x128x128xbf16, #tpu.memory_space<vmem>>, %arg6: memref<1x16x16x128xbf16, #tpu.memory_space<vmem>>, %arg7: memref<1x1x2x128xf32, #tpu.memory_space<vmem>>, %arg8: memref<1x18x16x128xf32, #tpu.memory_space<vmem>>) attributes {dimension_semantics = [#tpu.dimension_semantics<parallel>, #tpu.dimension_semantics<parallel>], iteration_bounds = array<i64: 2, 1>, scalar_prefetch = 0 : i64, scratch_operands = 1 : i64, tpu.core_type = #tpu.core_type<tc>, window_params = [{transform_indices = @transform_0, window_bounds = array<i64: 1, 16, 16, 128>}, {pipeline_mode = #tpu.pipeline_mode<synchronous>, transform_indices = @transform_1, window_bounds = array<i64: 1, 128>}, {pipeline_mode = #tpu.pipeline_mode<synchronous>, transform_indices = @transform_2, window_bounds = array<i64: 1, 128>}, {pipeline_mode = #tpu.pipeline_mode<synchronous>, transform_indices = @transform_3, window_bounds = array<i64: 9, 128, 128>}, {transform_indices = @transform_4, window_bounds = array<i64: 1, 16, 16, 128>}, {transform_indices = @transform_5, window_bounds = array<i64: 1, 1, 2, 128>}]} {
    %c16_i32 = arith.constant 16 : i32
    %0 = arith.muli %arg1, %c16_i32 : i32
    %cst = arith.constant 0.000000e+00 : f32
    %1 = vector.broadcast %cst : f32 to vector<1x1x16x128xf32>
    %c0 = arith.constant 0 : index
    %c0_0 = arith.constant 0 : index
    %c0_1 = arith.constant 0 : index
    %c0_2 = arith.constant 0 : index
    %2 = vector.load %arg8[%c0, %c0_0, %c0_1, %c0_2] : memref<1x18x16x128xf32, #tpu.memory_space<vmem>>, vector<1x1x16x128xf32>
    tpu.vector_store %arg8[%c0, %c0_0, %c0_1, %c0_2], %1 {strides = array<i32>} : memref<1x18x16x128xf32, #tpu.memory_space<vmem>>, vector<1x1x16x128xf32>,
    %c0_3 = arith.constant 0 : index
    %c17 = arith.constant 17 : index
    %c0_4 = arith.constant 0 : index
    %c0_5 = arith.constant 0 : index
    %3 = vector.load %arg8[%c0_3, %c17, %c0_4, %c0_5] : memref<1x18x16x128xf32, #tpu.memory_space<vmem>>, vector<1x1x16x128xf32>
    tpu.vector_store %arg8[%c0_3, %c17, %c0_4, %c0_5], %1 {strides = array<i32>} : memref<1x18x16x128xf32, #tpu.memory_space<vmem>>, vector<1x1x16x128xf32>,
    %c0_6 = arith.constant 0 : index
    %4 = arith.index_cast %0 : i32 to index
    %c0_7 = arith.constant 0 : index
    %c0_8 = arith.constant 0 : index
    %5 = vector.load %arg2[%c0_6, %4, %c0_7, %c0_8] : memref<1x16x16x128xbf16, #tpu.memory_space<vmem>>, vector<1x16x16x128xbf16>
    %6 = arith.extf %5 : vector<1x16x16x128xbf16> to vector<1x16x16x128xf32>
    %c0_9 = arith.constant 0 : index
    %c0_10 = arith.constant 0 : index
    %7 = vector.load %arg3[%c0_9, %c0_10] : memref<1x128xf32, #tpu.memory_space<vmem>>, vector<1x128xf32>
    %8 = vector.shape_cast %7 : vector<1x128xf32> to vector<1x1x1x128xf32>
    %c0_11 = arith.constant 0 : index
    %c0_12 = arith.constant 0 : index
    %9 = vector.load %arg4[%c0_11, %c0_12] : memref<1x128xf32, #tpu.memory_space<vmem>>, vector<1x128xf32>
    %10 = vector.shape_cast %9 : vector<1x128xf32> to vector<1x1x1x128xf32>
    %11 = vector.broadcast %8 : vector<1x1x1x128xf32> to vector<1x16x16x128xf32>
    %12 = arith.mulf %6, %11 : vector<1x16x16x128xf32>
    %13 = vector.broadcast %10 : vector<1x1x1x128xf32> to vector<1x16x16x128xf32>
    %14 = arith.addf %12, %13 : vector<1x16x16x128xf32>
    %cst_13 = arith.constant 0.000000e+00 : f32
    %15 = vector.broadcast %cst_13 : f32 to vector<1x16x16x128xf32>
    %16 = arith.maximumf %14, %15 : vector<1x16x16x128xf32>
    %c0_14 = arith.constant 0 : index
    %c1 = arith.constant 1 : index
    %c0_15 = arith.constant 0 : index
    %c0_16 = arith.constant 0 : index
    %17 = vector.load %arg8[%c0_14, %c1, %c0_15, %c0_16] : memref<1x18x16x128xf32, #tpu.memory_space<vmem>>, vector<1x16x16x128xf32>
    tpu.vector_store %arg8[%c0_14, %c1, %c0_15, %c0_16], %16 {strides = array<i32>} : memref<1x18x16x128xf32, #tpu.memory_space<vmem>>, vector<1x16x16x128xf32>,
    %c0_i32 = arith.constant 0 : i32
    %18 = arith.cmpi sgt, %arg1, %c0_i32 : i32
    %19 = arith.extui %18 : i1 to i32
    %c0_i32_17 = arith.constant 0 : i32
    %20 = arith.cmpi ne, %19, %c0_i32_17 : i32
    scf.if %20 {
      %c1_i32_96 = arith.constant 1 : i32
      %142 = arith.subi %0, %c1_i32_96 : i32
      %c0_97 = arith.constant 0 : index
      %143 = arith.index_cast %142 : i32 to index
      %c0_98 = arith.constant 0 : index
      %c0_99 = arith.constant 0 : index
      %144 = vector.load %arg2[%c0_97, %143, %c0_98, %c0_99] : memref<1x16x16x128xbf16, #tpu.memory_space<vmem>>, vector<1x1x16x128xbf16>
      %145 = arith.extf %144 : vector<1x1x16x128xbf16> to vector<1x1x16x128xf32>
      %c0_100 = arith.constant 0 : index
      %c0_101 = arith.constant 0 : index
      %146 = vector.load %arg3[%c0_100, %c0_101] : memref<1x128xf32, #tpu.memory_space<vmem>>, vector<1x128xf32>
      %147 = vector.shape_cast %146 : vector<1x128xf32> to vector<1x1x1x128xf32>
      %c0_102 = arith.constant 0 : index
      %c0_103 = arith.constant 0 : index
      %148 = vector.load %arg4[%c0_102, %c0_103] : memref<1x128xf32, #tpu.memory_space<vmem>>, vector<1x128xf32>
      %149 = vector.shape_cast %148 : vector<1x128xf32> to vector<1x1x1x128xf32>
      %150 = vector.broadcast %147 : vector<1x1x1x128xf32> to vector<1x1x16x128xf32>
      %151 = arith.mulf %145, %150 : vector<1x1x16x128xf32>
      %152 = vector.broadcast %149 : vector<1x1x1x128xf32> to vector<1x1x16x128xf32>
      %153 = arith.addf %151, %152 : vector<1x1x16x128xf32>
      %cst_104 = arith.constant 0.000000e+00 : f32
      %154 = vector.broadcast %cst_104 : f32 to vector<1x1x16x128xf32>
      %155 = arith.maximumf %153, %154 : vector<1x1x16x128xf32>
      %c0_105 = arith.constant 0 : index
      %c0_106 = arith.constant 0 : index
      %c0_107 = arith.constant 0 : index
      %c0_108 = arith.constant 0 : index
      %156 = vector.load %arg8[%c0_105, %c0_106, %c0_107, %c0_108] : memref<1x18x16x128xf32, #tpu.memory_space<vmem>>, vector<1x1x16x128xf32>
      tpu.vector_store %arg8[%c0_105, %c0_106, %c0_107, %c0_108], %155 {strides = array<i32>} : memref<1x18x16x128xf32, #tpu.memory_space<vmem>>, vector<1x1x16x128xf32>,
    } else {
    }
    %c0_i32_18 = arith.constant 0 : i32
    %21 = arith.cmpi slt, %arg1, %c0_i32_18 : i32
    %22 = arith.extui %21 : i1 to i32
    %c0_i32_19 = arith.constant 0 : i32
    %23 = arith.cmpi ne, %22, %c0_i32_19 : i32
    scf.if %23 {
      %c16_i32_96 = arith.constant 16 : i32
      %142 = arith.addi %0, %c16_i32_96 : i32
      %c0_97 = arith.constant 0 : index
      %143 = arith.index_cast %142 : i32 to index
      %c0_98 = arith.constant 0 : index
      %c0_99 = arith.constant 0 : index
      %144 = vector.load %arg2[%c0_97, %143, %c0_98, %c0_99] : memref<1x16x16x128xbf16, #tpu.memory_space<vmem>>, vector<1x1x16x128xbf16>
      %145 = arith.extf %144 : vector<1x1x16x128xbf16> to vector<1x1x16x128xf32>
      %c0_100 = arith.constant 0 : index
      %c0_101 = arith.constant 0 : index
      %146 = vector.load %arg3[%c0_100, %c0_101] : memref<1x128xf32, #tpu.memory_space<vmem>>, vector<1x128xf32>
      %147 = vector.shape_cast %146 : vector<1x128xf32> to vector<1x1x1x128xf32>
      %c0_102 = arith.constant 0 : index
      %c0_103 = arith.constant 0 : index
      %148 = vector.load %arg4[%c0_102, %c0_103] : memref<1x128xf32, #tpu.memory_space<vmem>>, vector<1x128xf32>
      %149 = vector.shape_cast %148 : vector<1x128xf32> to vector<1x1x1x128xf32>
      %150 = vector.broadcast %147 : vector<1x1x1x128xf32> to vector<1x1x16x128xf32>
      %151 = arith.mulf %145, %150 : vector<1x1x16x128xf32>
      %152 = vector.broadcast %149 : vector<1x1x1x128xf32> to vector<1x1x16x128xf32>
      %153 = arith.addf %151, %152 : vector<1x1x16x128xf32>
      %cst_104 = arith.constant 0.000000e+00 : f32
      %154 = vector.broadcast %cst_104 : f32 to vector<1x1x16x128xf32>
      %155 = arith.maximumf %153, %154 : vector<1x1x16x128xf32>
      %c0_105 = arith.constant 0 : index
      %c17_106 = arith.constant 17 : index
      %c0_107 = arith.constant 0 : index
      %c0_108 = arith.constant 0 : index
      %156 = vector.load %arg8[%c0_105, %c17_106, %c0_107, %c0_108] : memref<1x18x16x128xf32, #tpu.memory_space<vmem>>, vector<1x1x16x128xf32>
      tpu.vector_store %arg8[%c0_105, %c17_106, %c0_107, %c0_108], %155 {strides = array<i32>} : memref<1x18x16x128xf32, #tpu.memory_space<vmem>>, vector<1x1x16x128xf32>,
    } else {
    }
    %24 = tpu.iota {dimensions = array<i32: 0>} : vector<256x1xi32>
    %c16_i32_20 = arith.constant 16 : i32
    %c0_i32_21 = arith.constant 0 : i32
    %25 = arith.cmpi eq, %c16_i32_20, %c0_i32_21 : i32
    %c1_i32 = arith.constant 1 : i32
    %26 = arith.select %25, %c1_i32, %c16_i32_20 : i32
    %27 = vector.broadcast %26 : i32 to vector<256x1xi32>
    %28 = arith.remsi %24, %27 : vector<256x1xi32>
    %c0_i32_22 = arith.constant 0 : i32
    %29 = vector.broadcast %c0_i32_22 : i32 to vector<256x1xi32>
    %30 = arith.cmpi ne, %28, %29 : vector<256x1xi32>
    %c0_i32_23 = arith.constant 0 : i32
    %31 = vector.broadcast %c0_i32_23 : i32 to vector<256x1xi32>
    %32 = arith.cmpi slt, %28, %31 : vector<256x1xi32>
    %c0_i32_24 = arith.constant 0 : i32
    %33 = arith.cmpi slt, %26, %c0_i32_24 : i32
    %34 = vector.broadcast %33 : i1 to vector<256x1xi1>
    %35 = vector.broadcast %34 : vector<256x1xi1> to vector<256x1xi1>
    %36 = arith.xori %32, %35 : vector<256x1xi1>
    %37 = arith.andi %36, %30 : vector<256x1xi1>
    %38 = vector.broadcast %26 : i32 to vector<256x1xi32>
    %39 = arith.addi %28, %38 : vector<256x1xi32>
    %40 = arith.select %37, %39, %28 : vector<256x1xi1>, vector<256x1xi32>
    %c0_i32_25 = arith.constant 0 : i32
    %41 = vector.broadcast %c0_i32_25 : i32 to vector<256x1xi32>
    %42 = arith.cmpi sgt, %40, %41 : vector<256x1xi32>
    %c15_i32 = arith.constant 15 : i32
    %43 = vector.broadcast %c15_i32 : i32 to vector<256x1xi32>
    %44 = arith.cmpi slt, %40, %43 : vector<256x1xi32>
    %cst_26 = arith.constant 0.000000e+00 : f32
    %45 = vector.broadcast %cst_26 : f32 to vector<256x128xf32>
    %c0_27 = arith.constant 0 : index
    %c0_28 = arith.constant 0 : index
    %c0_29 = arith.constant 0 : index
    %c0_30 = arith.constant 0 : index
    %46 = vector.load %arg8[%c0_27, %c0_28, %c0_29, %c0_30] : memref<1x18x16x128xf32, #tpu.memory_space<vmem>>, vector<1x16x16x128xf32>
    %47 = vector.shape_cast %46 : vector<1x16x16x128xf32> to vector<256x128xf32>
    %c1_i32_31 = arith.constant 1 : i32
    %48 = tpu.dynamic_rotate %47 by %c1_i32_31 dim 0 : vector<256x128xf32>, i32 -> vector<256x128xf32>
    %cst_32 = arith.constant 0.000000e+00 : f32
    %49 = vector.shape_cast %42 : vector<256x1xi1> to vector<256x1xi1>
    %50 = vector.broadcast %49 : vector<256x1xi1> to vector<256x128xi1>
    %51 = vector.broadcast %cst_32 : f32 to vector<256x128xf32>
    %52 = arith.select %50, %48, %51 : vector<256x128xi1>, vector<256x128xf32>
    %53 = arith.truncf %52 : vector<256x128xf32> to vector<256x128xbf16>
    %c0_33 = arith.constant 0 : index
    %c0_34 = arith.constant 0 : index
    %c0_35 = arith.constant 0 : index
    %54 = vector.load %arg5[%c0_33, %c0_34, %c0_35] : memref<9x128x128xbf16, #tpu.memory_space<vmem>>, vector<1x128x128xbf16>
    %55 = vector.shape_cast %54 : vector<1x128x128xbf16> to vector<128x128xbf16>
    %cst_36 = arith.constant dense<0.000000e+00> : vector<256x128xf32>
    %56 = tpu.matmul %53, %55, %cst_36 {dimension_numbers = #tpu.dot_dimension_numbers<[1], [0], [0], [1], [0, 0, 1, 1], [], []>} : vector<256x128xbf16>, vector<128x128xbf16>, vector<256x128xf32> -> vector<256x128xf32>
    %57 = arith.addf %45, %56 : vector<256x128xf32>
    %58 = arith.truncf %47 : vector<256x128xf32> to vector<256x128xbf16>
    %c1_37 = arith.constant 1 : index
    %c0_38 = arith.constant 0 : index
    %c0_39 = arith.constant 0 : index
    %59 = vector.load %arg5[%c1_37, %c0_38, %c0_39] : memref<9x128x128xbf16, #tpu.memory_space<vmem>>, vector<1x128x128xbf16>
    %60 = vector.shape_cast %59 : vector<1x128x128xbf16> to vector<128x128xbf16>
    %cst_40 = arith.constant dense<0.000000e+00> : vector<256x128xf32>
    %61 = tpu.matmul %58, %60, %cst_40 {dimension_numbers = #tpu.dot_dimension_numbers<[1], [0], [0], [1], [0, 0, 1, 1], [], []>} : vector<256x128xbf16>, vector<128x128xbf16>, vector<256x128xf32> -> vector<256x128xf32>
    %62 = arith.addf %57, %61 : vector<256x128xf32>
    %c255_i32 = arith.constant 255 : i32
    %63 = tpu.dynamic_rotate %47 by %c255_i32 dim 0 : vector<256x128xf32>, i32 -> vector<256x128xf32>
    %cst_41 = arith.constant 0.000000e+00 : f32
    %64 = vector.shape_cast %44 : vector<256x1xi1> to vector<256x1xi1>
    %65 = vector.broadcast %64 : vector<256x1xi1> to vector<256x128xi1>
    %66 = vector.broadcast %cst_41 : f32 to vector<256x128xf32>
    %67 = arith.select %65, %63, %66 : vector<256x128xi1>, vector<256x128xf32>
    %68 = arith.truncf %67 : vector<256x128xf32> to vector<256x128xbf16>
    %c2 = arith.constant 2 : index
    %c0_42 = arith.constant 0 : index
    %c0_43 = arith.constant 0 : index
    %69 = vector.load %arg5[%c2, %c0_42, %c0_43] : memref<9x128x128xbf16, #tpu.memory_space<vmem>>, vector<1x128x128xbf16>
    %70 = vector.shape_cast %69 : vector<1x128x128xbf16> to vector<128x128xbf16>
    %cst_44 = arith.constant dense<0.000000e+00> : vector<256x128xf32>
    %71 = tpu.matmul %68, %70, %cst_44 {dimension_numbers = #tpu.dot_dimension_numbers<[1], [0], [0], [1], [0, 0, 1, 1], [], []>} : vector<256x128xbf16>, vector<128x128xbf16>, vector<256x128xf32> -> vector<256x128xf32>
    %72 = arith.addf %62, %71 : vector<256x128xf32>
    %c0_45 = arith.constant 0 : index
    %c1_46 = arith.constant 1 : index
    %c0_47 = arith.constant 0 : index
    %c0_48 = arith.constant 0 : index
    %73 = vector.load %arg8[%c0_45, %c1_46, %c0_47, %c0_48] : memref<1x18x16x128xf32, #tpu.memory_space<vmem>>, vector<1x16x16x128xf32>
    %74 = vector.shape_cast %73 : vector<1x16x16x128xf32> to vector<256x128xf32>
    %c1_i32_49 = arith.constant 1 : i32
    %75 = tpu.dynamic_rotate %74 by %c1_i32_49 dim 0 : vector<256x128xf32>, i32 -> vector<256x128xf32>
    %cst_50 = arith.constant 0.000000e+00 : f32
    %76 = vector.shape_cast %42 : vector<256x1xi1> to vector<256x1xi1>
    %77 = vector.broadcast %76 : vector<256x1xi1> to vector<256x128xi1>
    %78 = vector.broadcast %cst_50 : f32 to vector<256x128xf32>
    %79 = arith.select %77, %75, %78 : vector<256x128xi1>, vector<256x128xf32>
    %80 = arith.truncf %79 : vector<256x128xf32> to vector<256x128xbf16>
    %c3 = arith.constant 3 : index
    %c0_51 = arith.constant 0 : index
    %c0_52 = arith.constant 0 : index
    %81 = vector.load %arg5[%c3, %c0_51, %c0_52] : memref<9x128x128xbf16, #tpu.memory_space<vmem>>, vector<1x128x128xbf16>
    %82 = vector.shape_cast %81 : vector<1x128x128xbf16> to vector<128x128xbf16>
    %cst_53 = arith.constant dense<0.000000e+00> : vector<256x128xf32>
    %83 = tpu.matmul %80, %82, %cst_53 {dimension_numbers = #tpu.dot_dimension_numbers<[1], [0], [0], [1], [0, 0, 1, 1], [], []>} : vector<256x128xbf16>, vector<128x128xbf16>, vector<256x128xf32> -> vector<256x128xf32>
    %84 = arith.addf %72, %83 : vector<256x128xf32>
    %85 = arith.truncf %74 : vector<256x128xf32> to vector<256x128xbf16>
    %c4 = arith.constant 4 : index
    %c0_54 = arith.constant 0 : index
    %c0_55 = arith.constant 0 : index
    %86 = vector.load %arg5[%c4, %c0_54, %c0_55] : memref<9x128x128xbf16, #tpu.memory_space<vmem>>, vector<1x128x128xbf16>
    %87 = vector.shape_cast %86 : vector<1x128x128xbf16> to vector<128x128xbf16>
    %cst_56 = arith.constant dense<0.000000e+00> : vector<256x128xf32>
    %88 = tpu.matmul %85, %87, %cst_56 {dimension_numbers = #tpu.dot_dimension_numbers<[1], [0], [0], [1], [0, 0, 1, 1], [], []>} : vector<256x128xbf16>, vector<128x128xbf16>, vector<256x128xf32> -> vector<256x128xf32>
    %89 = arith.addf %84, %88 : vector<256x128xf32>
    %c255_i32_57 = arith.constant 255 : i32
    %90 = tpu.dynamic_rotate %74 by %c255_i32_57 dim 0 : vector<256x128xf32>, i32 -> vector<256x128xf32>
    %cst_58 = arith.constant 0.000000e+00 : f32
    %91 = vector.shape_cast %44 : vector<256x1xi1> to vector<256x1xi1>
    %92 = vector.broadcast %91 : vector<256x1xi1> to vector<256x128xi1>
    %93 = vector.broadcast %cst_58 : f32 to vector<256x128xf32>
    %94 = arith.select %92, %90, %93 : vector<256x128xi1>, vector<256x128xf32>
    %95 = arith.truncf %94 : vector<256x128xf32> to vector<256x128xbf16>
    %c5 = arith.constant 5 : index
    %c0_59 = arith.constant 0 : index
    %c0_60 = arith.constant 0 : index
    %96 = vector.load %arg5[%c5, %c0_59, %c0_60] : memref<9x128x128xbf16, #tpu.memory_space<vmem>>, vector<1x128x128xbf16>
    %97 = vector.shape_cast %96 : vector<1x128x128xbf16> to vector<128x128xbf16>
    %cst_61 = arith.constant dense<0.000000e+00> : vector<256x128xf32>
    %98 = tpu.matmul %95, %97, %cst_61 {dimension_numbers = #tpu.dot_dimension_numbers<[1], [0], [0], [1], [0, 0, 1, 1], [], []>} : vector<256x128xbf16>, vector<128x128xbf16>, vector<256x128xf32> -> vector<256x128xf32>
    %99 = arith.addf %89, %98 : vector<256x128xf32>
    %c0_62 = arith.constant 0 : index
    %c2_63 = arith.constant 2 : index
    %c0_64 = arith.constant 0 : index
    %c0_65 = arith.constant 0 : index
    %100 = vector.load %arg8[%c0_62, %c2_63, %c0_64, %c0_65] : memref<1x18x16x128xf32, #tpu.memory_space<vmem>>, vector<1x16x16x128xf32>
    %101 = vector.shape_cast %100 : vector<1x16x16x128xf32> to vector<256x128xf32>
    %c1_i32_66 = arith.constant 1 : i32
    %102 = tpu.dynamic_rotate %101 by %c1_i32_66 dim 0 : vector<256x128xf32>, i32 -> vector<256x128xf32>
    %cst_67 = arith.constant 0.000000e+00 : f32
    %103 = vector.shape_cast %42 : vector<256x1xi1> to vector<256x1xi1>
    %104 = vector.broadcast %103 : vector<256x1xi1> to vector<256x128xi1>
    %105 = vector.broadcast %cst_67 : f32 to vector<256x128xf32>
    %106 = arith.select %104, %102, %105 : vector<256x128xi1>, vector<256x128xf32>
    %107 = arith.truncf %106 : vector<256x128xf32> to vector<256x128xbf16>
    %c6 = arith.constant 6 : index
    %c0_68 = arith.constant 0 : index
    %c0_69 = arith.constant 0 : index
    %108 = vector.load %arg5[%c6, %c0_68, %c0_69] : memref<9x128x128xbf16, #tpu.memory_space<vmem>>, vector<1x128x128xbf16>
    %109 = vector.shape_cast %108 : vector<1x128x128xbf16> to vector<128x128xbf16>
    %cst_70 = arith.constant dense<0.000000e+00> : vector<256x128xf32>
    %110 = tpu.matmul %107, %109, %cst_70 {dimension_numbers = #tpu.dot_dimension_numbers<[1], [0], [0], [1], [0, 0, 1, 1], [], []>} : vector<256x128xbf16>, vector<128x128xbf16>, vector<256x128xf32> -> vector<256x128xf32>
    %111 = arith.addf %99, %110 : vector<256x128xf32>
    %112 = arith.truncf %101 : vector<256x128xf32> to vector<256x128xbf16>
    %c7 = arith.constant 7 : index
    %c0_71 = arith.constant 0 : index
    %c0_72 = arith.constant 0 : index
    %113 = vector.load %arg5[%c7, %c0_71, %c0_72] : memref<9x128x128xbf16, #tpu.memory_space<vmem>>, vector<1x128x128xbf16>
    %114 = vector.shape_cast %113 : vector<1x128x128xbf16> to vector<128x128xbf16>
    %cst_73 = arith.constant dense<0.000000e+00> : vector<256x128xf32>
    %115 = tpu.matmul %112, %114, %cst_73 {dimension_numbers = #tpu.dot_dimension_numbers<[1], [0], [0], [1], [0, 0, 1, 1], [], []>} : vector<256x128xbf16>, vector<128x128xbf16>, vector<256x128xf32> -> vector<256x128xf32>
    %116 = arith.addf %111, %115 : vector<256x128xf32>
    %c255_i32_74 = arith.constant 255 : i32
    %117 = tpu.dynamic_rotate %101 by %c255_i32_74 dim 0 : vector<256x128xf32>, i32 -> vector<256x128xf32>
    %cst_75 = arith.constant 0.000000e+00 : f32
    %118 = vector.shape_cast %44 : vector<256x1xi1> to vector<256x1xi1>
    %119 = vector.broadcast %118 : vector<256x1xi1> to vector<256x128xi1>
    %120 = vector.broadcast %cst_75 : f32 to vector<256x128xf32>
    %121 = arith.select %119, %117, %120 : vector<256x128xi1>, vector<256x128xf32>
    %122 = arith.truncf %121 : vector<256x128xf32> to vector<256x128xbf16>
    %c8 = arith.constant 8 : index
    %c0_76 = arith.constant 0 : index
    %c0_77 = arith.constant 0 : index
    %123 = vector.load %arg5[%c8, %c0_76, %c0_77] : memref<9x128x128xbf16, #tpu.memory_space<vmem>>, vector<1x128x128xbf16>
    %124 = vector.shape_cast %123 : vector<1x128x128xbf16> to vector<128x128xbf16>
    %cst_78 = arith.constant dense<0.000000e+00> : vector<256x128xf32>
    %125 = tpu.matmul %122, %124, %cst_78 {dimension_numbers = #tpu.dot_dimension_numbers<[1], [0], [0], [1], [0, 0, 1, 1], [], []>} : vector<256x128xbf16>, vector<128x128xbf16>, vector<256x128xf32> -> vector<256x128xf32>
    %126 = arith.addf %116, %125 : vector<256x128xf32>
    %127 = vector.shape_cast %126 : vector<256x128xf32> to vector<1x16x16x128xf32>
    %128 = arith.truncf %127 : vector<1x16x16x128xf32> to vector<1x16x16x128xbf16>
    %c0_79 = arith.constant 0 : index
    %c0_80 = arith.constant 0 : index
    %c0_81 = arith.constant 0 : index
    %c0_82 = arith.constant 0 : index
    %129 = vector.load %arg6[%c0_79, %c0_80, %c0_81, %c0_82] : memref<1x16x16x128xbf16, #tpu.memory_space<vmem>>, vector<1x16x16x128xbf16>
    tpu.vector_store %arg6[%c0_79, %c0_80, %c0_81, %c0_82], %128 {strides = array<i32>} : memref<1x16x16x128xbf16, #tpu.memory_space<vmem>>, vector<1x16x16x128xbf16>,
    %cst_83 = arith.constant 0.000000e+00 : f32
    %130 = vector.broadcast %cst_83 : f32 to vector<1x128xf32>
    %cst_84 = arith.constant 0.000000e+00 : f32
    %131 = vector.broadcast %cst_84 : f32 to vector<1x128xf32>
    %cst_85 = arith.constant 1.000000e+00 : f32
    %132 = vector.broadcast %cst_85 : f32 to vector<1x256xf32>
    %cst_86 = arith.constant dense<0.000000e+00> : vector<1x128xf32>
    %133 = tpu.matmul %132, %126, %cst_86 {dimension_numbers = #tpu.dot_dimension_numbers<[1], [0], [0], [1], [0, 0, 1, 1], [], []>} : vector<1x256xf32>, vector<256x128xf32>, vector<1x128xf32> -> vector<1x128xf32>
    %134 = arith.addf %130, %133 : vector<1x128xf32>
    %135 = arith.mulf %126, %126 : vector<256x128xf32>
    %cst_87 = arith.constant dense<0.000000e+00> : vector<1x128xf32>
    %136 = tpu.matmul %132, %135, %cst_87 {dimension_numbers = #tpu.dot_dimension_numbers<[1], [0], [0], [1], [0, 0, 1, 1], [], []>} : vector<1x256xf32>, vector<256x128xf32>, vector<1x128xf32> -> vector<1x128xf32>
    %137 = arith.addf %131, %136 : vector<1x128xf32>
    %138 = vector.shape_cast %134 : vector<1x128xf32> to vector<1x1x1x128xf32>
    %c0_88 = arith.constant 0 : index
    %c0_89 = arith.constant 0 : index
    %c0_90 = arith.constant 0 : index
    %c0_91 = arith.constant 0 : index
    %139 = vector.load %arg7[%c0_88, %c0_89, %c0_90, %c0_91] : memref<1x1x2x128xf32, #tpu.memory_space<vmem>>, vector<1x1x1x128xf32>
    tpu.vector_store %arg7[%c0_88, %c0_89, %c0_90, %c0_91], %138 {strides = array<i32>} : memref<1x1x2x128xf32, #tpu.memory_space<vmem>>, vector<1x1x1x128xf32>,
    %140 = vector.shape_cast %137 : vector<1x128xf32> to vector<1x1x1x128xf32>
    %c0_92 = arith.constant 0 : index
    %c0_93 = arith.constant 0 : index
    %c1_94 = arith.constant 1 : index
    %c0_95 = arith.constant 0 : index
    %141 = vector.load %arg7[%c0_92, %c0_93, %c1_94, %c0_95] : memref<1x1x2x128xf32, #tpu.memory_space<vmem>>, vector<1x1x1x128xf32>
    tpu.vector_store %arg7[%c0_92, %c0_93, %c1_94, %c0_95], %140 {strides = array<i32>} : memref<1x1x2x128xf32, #tpu.memory_space<vmem>>, vector<1x1x1x128xf32>,
    return
  }
  func.func @transform_0(%arg0: i32, %arg1: i32) -> (i32, i32, i32, i32) {
    %c0_i32 = arith.constant 0 : i32
    %c0_i32_0 = arith.constant 0 : i32
    %c0_i32_1 = arith.constant 0 : i32
    %c0_i32_2 = arith.constant 0 : i32
    return %arg0, %c0_i32, %c0_i32_0, %c0_i32_1 : i32, i32, i32, i32
  }
  func.func @transform_1(%arg0: i32, %arg1: i32) -> (i32, i32) {
    %c0_i32 = arith.constant 0 : i32
    %c0_i32_0 = arith.constant 0 : i32
    %c0_i32_1 = arith.constant 0 : i32
    return %c0_i32, %c0_i32_0 : i32, i32
  }
  func.func @transform_2(%arg0: i32, %arg1: i32) -> (i32, i32) {
    %c0_i32 = arith.constant 0 : i32
    %c0_i32_0 = arith.constant 0 : i32
    %c0_i32_1 = arith.constant 0 : i32
    return %c0_i32, %c0_i32_0 : i32, i32
  }
  func.func @transform_3(%arg0: i32, %arg1: i32) -> (i32, i32, i32) {
    %c0_i32 = arith.constant 0 : i32
    %c0_i32_0 = arith.constant 0 : i32
    %c0_i32_1 = arith.constant 0 : i32
    %c0_i32_2 = arith.constant 0 : i32
    return %c0_i32, %c0_i32_0, %c0_i32_1 : i32, i32, i32
  }
  func.func @transform_4(%arg0: i32, %arg1: i32) -> (i32, i32, i32, i32) {
    %c0_i32 = arith.constant 0 : i32
    %c0_i32_0 = arith.constant 0 : i32
    %c0_i32_1 = arith.constant 0 : i32
    return %arg0, %arg1, %c0_i32, %c0_i32_0 : i32, i32, i32, i32
  }
  func.func @transform_5(%arg0: i32, %arg1: i32) -> (i32, i32, i32, i32) {
    %c0_i32 = arith.constant 0 : i32
    %c0_i32_0 = arith.constant 0 : i32
    %c0_i32_1 = arith.constant 0 : i32
    return %arg0, %arg1, %c0_i32, %c0_i32_0 : i32, i32, i32, i32
  }
}

module attributes {stable_mosaic.version = 11 : i64} {
  func.func @_bn_add_relu_kernel(%arg0: i32, %arg1: memref<512x128xbf16, #tpu.memory_space<vmem>>, %arg2: memref<512x128xbf16, #tpu.memory_space<vmem>>, %arg3: memref<1x128xf32, #tpu.memory_space<vmem>>, %arg4: memref<1x128xf32, #tpu.memory_space<vmem>>, %arg5: memref<512x128xf32, #tpu.memory_space<vmem>>) attributes {dimension_semantics = [#tpu.dimension_semantics<parallel>], iteration_bounds = array<i64: 1>, scalar_prefetch = 0 : i64, scratch_operands = 0 : i64, tpu.core_type = #tpu.core_type<tc>, window_params = [{transform_indices = @transform_0, window_bounds = array<i64: 512, 128>}, {transform_indices = @transform_1, window_bounds = array<i64: 512, 128>}, {pipeline_mode = #tpu.pipeline_mode<synchronous>, transform_indices = @transform_2, window_bounds = array<i64: 1, 128>}, {pipeline_mode = #tpu.pipeline_mode<synchronous>, transform_indices = @transform_3, window_bounds = array<i64: 1, 128>}, {transform_indices = @transform_4, window_bounds = array<i64: 512, 128>}]} {
    %c0 = arith.constant 0 : index
    %c0_0 = arith.constant 0 : index
    %0 = vector.load %arg3[%c0, %c0_0] : memref<1x128xf32, #tpu.memory_space<vmem>>, vector<1x128xf32>
    %c0_1 = arith.constant 0 : index
    %c0_2 = arith.constant 0 : index
    %1 = vector.load %arg4[%c0_1, %c0_2] : memref<1x128xf32, #tpu.memory_space<vmem>>, vector<1x128xf32>
    %c0_3 = arith.constant 0 : index
    %c0_4 = arith.constant 0 : index
    %2 = vector.load %arg1[%c0_3, %c0_4] : memref<512x128xbf16, #tpu.memory_space<vmem>>, vector<512x128xbf16>
    %3 = arith.extf %2 : vector<512x128xbf16> to vector<512x128xf32>
    %c0_5 = arith.constant 0 : index
    %c0_6 = arith.constant 0 : index
    %4 = vector.load %arg2[%c0_5, %c0_6] : memref<512x128xbf16, #tpu.memory_space<vmem>>, vector<512x128xbf16>
    %5 = arith.extf %4 : vector<512x128xbf16> to vector<512x128xf32>
    %6 = vector.broadcast %0 : vector<1x128xf32> to vector<512x128xf32>
    %7 = arith.mulf %3, %6 : vector<512x128xf32>
    %8 = vector.broadcast %1 : vector<1x128xf32> to vector<512x128xf32>
    %9 = arith.addf %7, %8 : vector<512x128xf32>
    %10 = arith.addf %9, %5 : vector<512x128xf32>
    %cst = arith.constant 0.000000e+00 : f32
    %11 = vector.broadcast %cst : f32 to vector<512x128xf32>
    %12 = arith.maximumf %10, %11 : vector<512x128xf32>
    %c0_7 = arith.constant 0 : index
    %c0_8 = arith.constant 0 : index
    %13 = vector.load %arg5[%c0_7, %c0_8] : memref<512x128xf32, #tpu.memory_space<vmem>>, vector<512x128xf32>
    tpu.vector_store %arg5[%c0_7, %c0_8], %12 {strides = array<i32>} : memref<512x128xf32, #tpu.memory_space<vmem>>, vector<512x128xf32>,
    return
  }
  func.func @transform_0(%arg0: i32) -> (i32, i32) {
    %c0_i32 = arith.constant 0 : i32
    %c0_i32_0 = arith.constant 0 : i32
    return %arg0, %c0_i32 : i32, i32
  }
  func.func @transform_1(%arg0: i32) -> (i32, i32) {
    %c0_i32 = arith.constant 0 : i32
    %c0_i32_0 = arith.constant 0 : i32
    return %arg0, %c0_i32 : i32, i32
  }
  func.func @transform_2(%arg0: i32) -> (i32, i32) {
    %c0_i32 = arith.constant 0 : i32
    %c0_i32_0 = arith.constant 0 : i32
    %c0_i32_1 = arith.constant 0 : i32
    return %c0_i32, %c0_i32_0 : i32, i32
  }
  func.func @transform_3(%arg0: i32) -> (i32, i32) {
    %c0_i32 = arith.constant 0 : i32
    %c0_i32_0 = arith.constant 0 : i32
    %c0_i32_1 = arith.constant 0 : i32
    return %c0_i32, %c0_i32_0 : i32, i32
  }
  func.func @transform_4(%arg0: i32) -> (i32, i32) {
    %c0_i32 = arith.constant 0 : i32
    %c0_i32_0 = arith.constant 0 : i32
    return %arg0, %c0_i32 : i32, i32
  }
}

</mosaic_0001>

<bundles_post_ra>
// kernel: basic_block_pallas.5
= control target key start
LH: loop header
LB: loop body
LE: loop exit
PB: predicated region body
PF: predicated region fallthrough
CT: control target
= control target key end

     0   :  { %s1478_s0 = inlined_call_operand.vmem [shape: bf16[512,128], index: 0, kind: input, shape index: {}]   ;;  %s1479_s1 = inlined_call_operand.vmem [shape: bf16[512,128], index: 1, kind: input, shape index: {}]   ;;  %s1480_s2 = inlined_call_operand.vmem [shape: f32[1,128], index: 2, kind: input, shape index: {}]   ;;  %s1481_s3 = inlined_call_operand.vmem [shape: f32[1,128], index: 3, kind: input, shape index: {}]   ;;  %s1482_s4 = inlined_call_operand.vmem [shape: f32[512,128], index: 4, kind: output, shape index: {}]  }
   0x1   :  { %v959_v0 = vld [vmem:[%s1480_s2] ss:$0 sm:$0xff]  ;;  %v869_v5 = vld [vmem:[%s1478_s0 + $0x8] sm:$0xff]   ;;  %v870_v12 = vld [vmem:[%s1478_s0 + $0x10] sm:$0xff]  }
   0x2   :  { %v614_v1 = vld [vmem:[%s1478_s0] sm:$0xff]   ;;  %v900_v6 = vld [vmem:[%s1479_s1 + $0x8] sm:$0xff]   ;;  %v619_v10 = vunpack.c.l.bf16 %v869_v5  ;;  %v901_v13 = vld [vmem:[%s1479_s1 + $0x10] sm:$0xff]   ;;  %v620_v16 = vunpack.c.h.bf16 %v869_v5  ;;  %v623_v20 = vunpack.c.l.bf16 %v870_v12  ;;  %v624_v22 = vunpack.c.h.bf16 %v870_v12 }
   0x3   :  { %v615_v2 = vunpack.c.l.bf16 %v614_v1  ;;  %v742_v3 = vld [vmem:[%s1479_s1] sm:$0xff]   ;;  %v616_v4 = vunpack.c.h.bf16 %v614_v1  ;;  %v747_v11 = vunpack.c.l.bf16 %v900_v6  ;;  %v748_v17 = vunpack.c.h.bf16 %v900_v6  ;;  %v871_v18 = vld [vmem:[%s1478_s0 + $0x18] sm:$0xff]   ;;  %v873_v54 = vld [vmem:[%s1478_s0 + $0x28] sm:$0xff]  }
   0x4   :  { %v976_v7 = vld [vmem:[%s1481_s3] ss:$0 sm:$0xff]  ;;  %v743_v8 = vunpack.c.l.bf16 %v742_v3  ;;  %v744_v9 = vunpack.c.h.bf16 %v742_v3  ;;  %v283_v19 = vmul.f32 %v619_v10, %v959_v0  ;;  %v751_v21 = vunpack.c.l.bf16 %v901_v13  ;;  %v902_v23 = vld [vmem:[%s1479_s1 + $0x18] sm:$0xff]   ;;  %v904_v55 = vld [vmem:[%s1479_s1 + $0x28] sm:$0xff]  }
   0x5   :  { %v281_v14 = vmul.f32 %v615_v2, %v959_v0  ;;  %v282_v15 = vmul.f32 %v616_v4, %v959_v0  ;;  %v284_v26 = vmul.f32 %v620_v16, %v959_v0  ;;  %v752_v27 = vunpack.c.h.bf16 %v901_v13  ;;  %v872_v40 = vld [vmem:[%s1478_s0 + $0x20] sm:$0xff]   ;;  %v874_v1 = vld [vmem:[%s1478_s0 + $0x30] sm:$0xff]   ;;  %v875_v16 = vld [vmem:[%s1478_s0 + $0x38] sm:$0xff]  }
   0x6   :  { %v353_v28 = vadd.f32 %v976_v7, %v283_v19  ;;  %v285_v29 = vmul.f32 %v623_v20, %v959_v0  ;;  %v286_v30 = vmul.f32 %v624_v22, %v959_v0  ;;  %v627_v31 = vunpack.c.l.bf16 %v871_v18  ;;  %v903_v45 = vld [vmem:[%s1479_s1 + $0x20] sm:$0xff]   ;;  %v905_v2 = vld [vmem:[%s1479_s1 + $0x30] sm:$0xff]  }
   0x7   :  { %v351_v24 = vadd.f32 %v976_v7, %v281_v14  ;;  %v352_v25 = vadd.f32 %v976_v7, %v282_v15  ;;  %v354_v34 = vadd.f32 %v976_v7, %v284_v26  ;;  %v755_v35 = vunpack.c.l.bf16 %v902_v23 }
   0x8   :  { %v417_v36 = vadd.f32 %v747_v11, %v353_v28  ;;  %v355_v37 = vadd.f32 %v976_v7, %v285_v29  ;;  %v356_v38 = vadd.f32 %v976_v7, %v286_v30  ;;  %v287_v39 = vmul.f32 %v627_v31, %v959_v0 }
   0x9   :  { %v415_v32 = vadd.f32 %v743_v8, %v351_v24  ;;  %v416_v33 = vadd.f32 %v744_v9, %v352_v25  ;;  %v418_v43 = vadd.f32 %v748_v17, %v354_v34  ;;  %v628_v44 = vunpack.c.h.bf16 %v871_v18  ;;  %v876_v34 = vld [vmem:[%s1478_s0 + $0x40] sm:$0xff]  }
   0xa   :  { %v481_v46 = vmax.f32 %v417_v36, 0.0  ;;  %v419_v47 = vadd.f32 %v751_v21, %v355_v37  ;;  %v420_v48 = vadd.f32 %v752_v27, %v356_v38  ;;  %v357_v49 = vadd.f32 %v976_v7, %v287_v39  ;;  %v906_v21 = vld [vmem:[%s1479_s1 + $0x38] sm:$0xff]   ;;  %v907_v39 = vld [vmem:[%s1479_s1 + $0x40] sm:$0xff]  }
   0xb   :  { %v479_v41 = vmax.f32 %v415_v32, 0.0  ;;  %v480_v42 = vmax.f32 %v416_v33, 0.0  ;;  %v482_v50 = vmax.f32 %v418_v43, 0.0  ;;  %v756_v51 = vunpack.c.h.bf16 %v902_v23 }
   0xc   :  { %v288_v52 = vmul.f32 %v628_v44, %v959_v0  ;;  %v631_v53 = vunpack.c.l.bf16 %v872_v40  ;;  %545 = vst [vmem:[%s1482_s4 + $0x10] sm:$0xff] %v481_v46  ;;  %v483_v56 = vmax.f32 %v419_v47, 0.0  ;;  %v484_v57 = vmax.f32 %v420_v48, 0.0  ;;  %v877_v48 = vld [vmem:[%s1478_s0 + $0x48] sm:$0xff]  }
   0xd   :  { %543 = vst [vmem:[%s1482_s4] sm:$0xff] %v479_v41  ;;  %544 = vst [vmem:[%s1482_s4 + $0x8] sm:$0xff] %v480_v42  ;;  %v421_v58 = vadd.f32 %v755_v35, %v357_v49  ;;  %v759_v59 = vunpack.c.l.bf16 %v903_v45  ;;  %v632_v62 = vunpack.c.h.bf16 %v872_v40  ;;  %v760_v63 = vunpack.c.h.bf16 %v903_v45  ;;  %v908_v49 = vld [vmem:[%s1479_s1 + $0x48] sm:$0xff]  }
   0xe   :  { %546 = vst [vmem:[%s1482_s4 + $0x18] sm:$0xff] %v482_v50  ;;  %v358_v60 = vadd.f32 %v976_v7, %v288_v52  ;;  %v289_v61 = vmul.f32 %v631_v53, %v959_v0  ;;  %547 = vst [vmem:[%s1482_s4 + $0x20] sm:$0xff] %v483_v56  ;;  %v635_v4 = vunpack.c.l.bf16 %v873_v54  ;;  %v763_v5 = vunpack.c.l.bf16 %v904_v55 }
   0xf   :  { %548 = vst [vmem:[%s1482_s4 + $0x28] sm:$0xff] %v484_v57  ;;  %v485_v3 = vmax.f32 %v421_v58, 0.0  ;;  %v636_v6 = vunpack.c.h.bf16 %v873_v54  ;;  %v290_v10 = vmul.f32 %v632_v62, %v959_v0  ;;  %v764_v11 = vunpack.c.h.bf16 %v904_v55  ;;  %v878_v58 = vld [vmem:[%s1478_s0 + $0x50] sm:$0xff]  }
  0x10   :  { %v422_v8 = vadd.f32 %v756_v51, %v358_v60  ;;  %v359_v9 = vadd.f32 %v976_v7, %v289_v61  ;;  %v291_v12 = vmul.f32 %v635_v4, %v959_v0  ;;  %v639_v14 = vunpack.c.l.bf16 %v874_v1 }
  0x11   :  { %549 = vst [vmem:[%s1482_s4 + $0x30] sm:$0xff] %v485_v3  ;;  %v292_v13 = vmul.f32 %v636_v6, %v959_v0  ;;  %v767_v15 = vunpack.c.l.bf16 %v905_v2  ;;  %v360_v19 = vadd.f32 %v976_v7, %v290_v10  ;;  %v640_v20 = vunpack.c.h.bf16 %v874_v1  ;;  %v879_v10 = vld [vmem:[%s1478_s0 + $0x58] sm:$0xff]  }
  0x12   :  { %v486_v17 = vmax.f32 %v422_v8, 0.0  ;;  %v423_v18 = vadd.f32 %v759_v59, %v359_v9  ;;  %v361_v22 = vadd.f32 %v976_v7, %v291_v12  ;;  %v293_v24 = vmul.f32 %v639_v14, %v959_v0 }
  0x13   :  { %v362_v23 = vadd.f32 %v976_v7, %v292_v13  ;;  %v768_v25 = vunpack.c.h.bf16 %v905_v2  ;;  %v424_v27 = vadd.f32 %v760_v63, %v360_v19  ;;  %v294_v28 = vmul.f32 %v640_v20, %v959_v0  ;;  %v909_v63 = vld [vmem:[%s1479_s1 + $0x50] sm:$0xff]   ;;  %v910_v19 = vld [vmem:[%s1479_s1 + $0x58] sm:$0xff]  }
  0x14   :  { %550 = vst [vmem:[%s1482_s4 + $0x38] sm:$0xff] %v486_v17  ;;  %v487_v26 = vmax.f32 %v423_v18, 0.0  ;;  %v643_v29 = vunpack.c.l.bf16 %v875_v16  ;;  %v425_v30 = vadd.f32 %v763_v5, %v361_v22  ;;  %v363_v32 = vadd.f32 %v976_v7, %v293_v24 }
  0x15   :  { %v426_v31 = vadd.f32 %v764_v11, %v362_v23  ;;  %v771_v33 = vunpack.c.l.bf16 %v906_v21  ;;  %v488_v35 = vmax.f32 %v424_v27, 0.0  ;;  %v364_v36 = vadd.f32 %v976_v7, %v294_v28  ;;  %v880_v28 = vld [vmem:[%s1478_s0 + $0x60] sm:$0xff]  }
  0x16   :  { %551 = vst [vmem:[%s1482_s4 + $0x40] sm:$0xff] %v487_v26  ;;  %v295_v37 = vmul.f32 %v643_v29, %v959_v0  ;;  %v644_v38 = vunpack.c.h.bf16 %v875_v16  ;;  %v489_v40 = vmax.f32 %v425_v30, 0.0  ;;  %v427_v42 = vadd.f32 %v767_v15, %v363_v32 }
  0x17   :  { %v490_v41 = vmax.f32 %v426_v31, 0.0  ;;  %v772_v43 = vunpack.c.h.bf16 %v906_v21  ;;  %552 = vst [vmem:[%s1482_s4 + $0x48] sm:$0xff] %v488_v35  ;;  %v428_v44 = vadd.f32 %v768_v25, %v364_v36  ;;  %v647_v47 = vunpack.c.l.bf16 %v876_v34 }
  0x18   :  { %v365_v45 = vadd.f32 %v976_v7, %v295_v37  ;;  %v296_v46 = vmul.f32 %v644_v38, %v959_v0  ;;  %553 = vst [vmem:[%s1482_s4 + $0x50] sm:$0xff] %v489_v40  ;;  %v491_v50 = vmax.f32 %v427_v42, 0.0  ;;  %v775_v51 = vunpack.c.l.bf16 %v907_v39  ;;  %v881_v42 = vld [vmem:[%s1478_s0 + $0x68] sm:$0xff]  }
  0x19   :  { %554 = vst [vmem:[%s1482_s4 + $0x58] sm:$0xff] %v490_v41  ;;  %v648_v52 = vunpack.c.h.bf16 %v876_v34  ;;  %v776_v53 = vunpack.c.h.bf16 %v907_v39  ;;  %v492_v54 = vmax.f32 %v428_v44, 0.0  ;;  %v297_v57 = vmul.f32 %v647_v47, %v959_v0 }
  0x1a   :  { %v429_v55 = vadd.f32 %v771_v33, %v365_v45  ;;  %v366_v56 = vadd.f32 %v976_v7, %v296_v46  ;;  %555 = vst [vmem:[%s1482_s4 + $0x60] sm:$0xff] %v491_v50  ;;  %v651_v60 = vunpack.c.l.bf16 %v877_v48  ;;  %v779_v61 = vunpack.c.l.bf16 %v908_v49  ;;  %v911_v33 = vld [vmem:[%s1479_s1 + $0x60] sm:$0xff]  }
  0x1b   :  { %v298_v59 = vmul.f32 %v648_v52, %v959_v0  ;;  %v652_v62 = vunpack.c.h.bf16 %v877_v48  ;;  %556 = vst [vmem:[%s1482_s4 + $0x68] sm:$0xff] %v492_v54  ;;  %v367_v3 = vadd.f32 %v976_v7, %v297_v57  ;;  %v780_v4 = vunpack.c.h.bf16 %v908_v49  ;;  %v882_v52 = vld [vmem:[%s1478_s0 + $0x70] sm:$0xff]  }
  0x1c   :  { %v493_v1 = vmax.f32 %v429_v55, 0.0  ;;  %v430_v2 = vadd.f32 %v772_v43, %v366_v56  ;;  %v299_v6 = vmul.f32 %v651_v60, %v959_v0  ;;  %v655_v9 = vunpack.c.l.bf16 %v878_v58  ;;  %v912_v43 = vld [vmem:[%s1479_s1 + $0x68] sm:$0xff]   ;;  %v913_v57 = vld [vmem:[%s1479_s1 + $0x70] sm:$0xff]  }
  0x1d   :  { %v368_v5 = vadd.f32 %v976_v7, %v298_v59  ;;  %v300_v8 = vmul.f32 %v652_v62, %v959_v0  ;;  %v431_v12 = vadd.f32 %v775_v51, %v367_v3  ;;  %v783_v13 = vunpack.c.l.bf16 %v909_v63  ;;  %v883_v3 = vld [vmem:[%s1478_s0 + $0x78] sm:$0xff]  }
  0x1e   :  { %557 = vst [vmem:[%s1482_s4 + $0x70] sm:$0xff] %v493_v1  ;;  %v494_v11 = vmax.f32 %v430_v2, 0.0  ;;  %v656_v14 = vunpack.c.h.bf16 %v878_v58  ;;  %v369_v16 = vadd.f32 %v976_v7, %v299_v6  ;;  %v301_v18 = vmul.f32 %v655_v9, %v959_v0 }
  0x1f   :  { %v432_v15 = vadd.f32 %v776_v53, %v368_v5  ;;  %v370_v17 = vadd.f32 %v976_v7, %v300_v8  ;;  %v495_v20 = vmax.f32 %v431_v12, 0.0  ;;  %v784_v21 = vunpack.c.h.bf16 %v909_v63 }
  0x20   :  { %558 = vst [vmem:[%s1482_s4 + $0x78] sm:$0xff] %v494_v11  ;;  %v302_v22 = vmul.f32 %v656_v14, %v959_v0  ;;  %v659_v23 = vunpack.c.l.bf16 %v879_v10  ;;  %v433_v25 = vadd.f32 %v779_v61, %v369_v16  ;;  %v371_v27 = vadd.f32 %v976_v7, %v301_v18 }
  0x21   :  { %v496_v24 = vmax.f32 %v432_v15, 0.0  ;;  %v434_v26 = vadd.f32 %v780_v4, %v370_v17  ;;  %559 = vst [vmem:[%s1482_s4 + $0x80] sm:$0xff] %v495_v20  ;;  %v787_v30 = vunpack.c.l.bf16 %v910_v19  ;;  %v660_v32 = vunpack.c.h.bf16 %v879_v10 }
  0x22   :  { %v372_v29 = vadd.f32 %v976_v7, %v302_v22  ;;  %v303_v31 = vmul.f32 %v659_v23, %v959_v0  ;;  %v497_v34 = vmax.f32 %v433_v25, 0.0  ;;  %v435_v36 = vadd.f32 %v783_v13, %v371_v27  ;;  %v914_v13 = vld [vmem:[%s1479_s1 + $0x78] sm:$0xff]   ;;  %v884_v22 = vld [vmem:[%s1478_s0 + $0x80] sm:$0xff]  }
  0x23   :  { %560 = vst [vmem:[%s1482_s4 + $0x88] sm:$0xff] %v496_v24  ;;  %v498_v35 = vmax.f32 %v434_v26, 0.0  ;;  %v788_v37 = vunpack.c.h.bf16 %v910_v19  ;;  %v304_v40 = vmul.f32 %v660_v32, %v959_v0  ;;  %v663_v41 = vunpack.c.l.bf16 %v880_v28  ;;  %v915_v27 = vld [vmem:[%s1479_s1 + $0x80] sm:$0xff]  }
  0x24   :  { %v436_v38 = vadd.f32 %v784_v21, %v372_v29  ;;  %v373_v39 = vadd.f32 %v976_v7, %v303_v31  ;;  %561 = vst [vmem:[%s1482_s4 + $0x90] sm:$0xff] %v497_v34  ;;  %v499_v44 = vmax.f32 %v435_v36, 0.0  ;;  %v791_v45 = vunpack.c.l.bf16 %v911_v33  ;;  %v885_v36 = vld [vmem:[%s1478_s0 + $0x88] sm:$0xff]  }
  0x25   :  { %562 = vst [vmem:[%s1482_s4 + $0x98] sm:$0xff] %v498_v35  ;;  %v664_v46 = vunpack.c.h.bf16 %v880_v28  ;;  %v792_v47 = vunpack.c.h.bf16 %v911_v33  ;;  %v374_v50 = vadd.f32 %v976_v7, %v304_v40  ;;  %v305_v51 = vmul.f32 %v663_v41, %v959_v0 }
  0x26   :  { %v500_v48 = vmax.f32 %v436_v38, 0.0  ;;  %v437_v49 = vadd.f32 %v787_v30, %v373_v39  ;;  %563 = vst [vmem:[%s1482_s4 + $0xa0] sm:$0xff] %v499_v44  ;;  %v667_v54 = vunpack.c.l.bf16 %v881_v42  ;;  %v795_v55 = vunpack.c.l.bf16 %v912_v43 }
  0x27   :  { %v306_v53 = vmul.f32 %v664_v46, %v959_v0  ;;  %v668_v56 = vunpack.c.h.bf16 %v881_v42  ;;  %v438_v59 = vadd.f32 %v788_v37, %v374_v50  ;;  %v375_v60 = vadd.f32 %v976_v7, %v305_v51  ;;  %v916_v37 = vld [vmem:[%s1479_s1 + $0x88] sm:$0xff]   ;;  %v886_v46 = vld [vmem:[%s1478_s0 + $0x90] sm:$0xff]  }
  0x28   :  { %564 = vst [vmem:[%s1482_s4 + $0xa8] sm:$0xff] %v500_v48  ;;  %v501_v58 = vmax.f32 %v437_v49, 0.0  ;;  %v796_v61 = vunpack.c.h.bf16 %v912_v43  ;;  %v307_v63 = vmul.f32 %v667_v54, %v959_v0  ;;  %v671_v2 = vunpack.c.l.bf16 %v882_v52  ;;  %v917_v51 = vld [vmem:[%s1479_s1 + $0x90] sm:$0xff]  }
  0x29   :  { %v376_v62 = vadd.f32 %v976_v7, %v306_v53  ;;  %v308_v1 = vmul.f32 %v668_v56, %v959_v0  ;;  %v502_v4 = vmax.f32 %v438_v59, 0.0  ;;  %v439_v5 = vadd.f32 %v791_v45, %v375_v60  ;;  %v887_v60 = vld [vmem:[%s1478_s0 + $0x98] sm:$0xff]  }
  0x2a   :  { %565 = vst [vmem:[%s1482_s4 + $0xb0] sm:$0xff] %v501_v58  ;;  %v799_v6 = vunpack.c.l.bf16 %v913_v57  ;;  %v672_v8 = vunpack.c.h.bf16 %v882_v52  ;;  %v377_v10 = vadd.f32 %v976_v7, %v307_v63  ;;  %v309_v12 = vmul.f32 %v671_v2, %v959_v0 }
  0x2b   :  { %v440_v9 = vadd.f32 %v792_v47, %v376_v62  ;;  %v378_v11 = vadd.f32 %v976_v7, %v308_v1  ;;  %566 = vst [vmem:[%s1482_s4 + $0xb8] sm:$0xff] %v502_v4  ;;  %v503_v14 = vmax.f32 %v439_v5, 0.0  ;;  %v800_v15 = vunpack.c.h.bf16 %v913_v57 }
  0x2c   :  { %v310_v16 = vmul.f32 %v672_v8, %v959_v0  ;;  %v675_v17 = vunpack.c.l.bf16 %v883_v3  ;;  %v441_v19 = vadd.f32 %v795_v55, %v377_v10  ;;  %v379_v21 = vadd.f32 %v976_v7, %v309_v12 }
  0x2d   :  { %v504_v18 = vmax.f32 %v440_v9, 0.0  ;;  %v442_v20 = vadd.f32 %v796_v61, %v378_v11  ;;  %567 = vst [vmem:[%s1482_s4 + $0xc0] sm:$0xff] %v503_v14  ;;  %v803_v24 = vunpack.c.l.bf16 %v914_v13  ;;  %v676_v26 = vunpack.c.h.bf16 %v883_v3 }
  0x2e   :  { %v380_v23 = vadd.f32 %v976_v7, %v310_v16  ;;  %v311_v25 = vmul.f32 %v675_v17, %v959_v0  ;;  %v505_v28 = vmax.f32 %v441_v19, 0.0  ;;  %v443_v30 = vadd.f32 %v799_v6, %v379_v21  ;;  %v918_v6 = vld [vmem:[%s1479_s1 + $0x98] sm:$0xff]   ;;  %v888_v16 = vld [vmem:[%s1478_s0 + $0xa0] sm:$0xff]  }
  0x2f   :  { %568 = vst [vmem:[%s1482_s4 + $0xc8] sm:$0xff] %v504_v18  ;;  %v506_v29 = vmax.f32 %v442_v20, 0.0  ;;  %v804_v31 = vunpack.c.h.bf16 %v914_v13  ;;  %v312_v34 = vmul.f32 %v676_v26, %v959_v0  ;;  %v679_v35 = vunpack.c.l.bf16 %v884_v22  ;;  %v919_v21 = vld [vmem:[%s1479_s1 + $0xa0] sm:$0xff]  }
  0x30   :  { %v444_v32 = vadd.f32 %v800_v15, %v380_v23  ;;  %v381_v33 = vadd.f32 %v976_v7, %v311_v25  ;;  %569 = vst [vmem:[%s1482_s4 + $0xd0] sm:$0xff] %v505_v28  ;;  %v507_v38 = vmax.f32 %v443_v30, 0.0  ;;  %v807_v39 = vunpack.c.l.bf16 %v915_v27  ;;  %v889_v30 = vld [vmem:[%s1478_s0 + $0xa8] sm:$0xff]  }
  0x31   :  { %570 = vst [vmem:[%s1482_s4 + $0xd8] sm:$0xff] %v506_v29  ;;  %v680_v40 = vunpack.c.h.bf16 %v884_v22  ;;  %v808_v41 = vunpack.c.h.bf16 %v915_v27  ;;  %v382_v44 = vadd.f32 %v976_v7, %v312_v34  ;;  %v313_v45 = vmul.f32 %v679_v35, %v959_v0 }
  0x32   :  { %v508_v42 = vmax.f32 %v444_v32, 0.0  ;;  %v445_v43 = vadd.f32 %v803_v24, %v381_v33  ;;  %571 = vst [vmem:[%s1482_s4 + $0xe0] sm:$0xff] %v507_v38  ;;  %v683_v48 = vunpack.c.l.bf16 %v885_v36  ;;  %v811_v49 = vunpack.c.l.bf16 %v916_v37 }
  0x33   :  { %v314_v47 = vmul.f32 %v680_v40, %v959_v0  ;;  %v684_v50 = vunpack.c.h.bf16 %v885_v36  ;;  %v446_v53 = vadd.f32 %v804_v31, %v382_v44  ;;  %v383_v54 = vadd.f32 %v976_v7, %v313_v45  ;;  %v920_v31 = vld [vmem:[%s1479_s1 + $0xa8] sm:$0xff]   ;;  %v890_v40 = vld [vmem:[%s1478_s0 + $0xb0] sm:$0xff]  }
  0x34   :  { %572 = vst [vmem:[%s1482_s4 + $0xe8] sm:$0xff] %v508_v42  ;;  %v509_v52 = vmax.f32 %v445_v43, 0.0  ;;  %v812_v55 = vunpack.c.h.bf16 %v916_v37  ;;  %v315_v57 = vmul.f32 %v683_v48, %v959_v0  ;;  %v687_v59 = vunpack.c.l.bf16 %v886_v46  ;;  %v921_v45 = vld [vmem:[%s1479_s1 + $0xb0] sm:$0xff]  }
  0x35   :  { %v384_v56 = vadd.f32 %v976_v7, %v314_v47  ;;  %v316_v58 = vmul.f32 %v684_v50, %v959_v0  ;;  %v510_v61 = vmax.f32 %v446_v53, 0.0  ;;  %v447_v62 = vadd.f32 %v807_v39, %v383_v54  ;;  %v891_v54 = vld [vmem:[%s1478_s0 + $0xb8] sm:$0xff]  }
  0x36   :  { %573 = vst [vmem:[%s1482_s4 + $0xf0] sm:$0xff] %v509_v52  ;;  %v815_v63 = vunpack.c.l.bf16 %v917_v51  ;;  %v688_v1 = vunpack.c.h.bf16 %v886_v46  ;;  %v385_v3 = vadd.f32 %v976_v7, %v315_v57  ;;  %v317_v5 = vmul.f32 %v687_v59, %v959_v0 }
  0x37   :  { %v448_v2 = vadd.f32 %v808_v41, %v384_v56  ;;  %v386_v4 = vadd.f32 %v976_v7, %v316_v58  ;;  %574 = vst [vmem:[%s1482_s4 + $0xf8] sm:$0xff] %v510_v61  ;;  %v511_v8 = vmax.f32 %v447_v62, 0.0  ;;  %v816_v9 = vunpack.c.h.bf16 %v917_v51 }
  0x38   :  { %v318_v10 = vmul.f32 %v688_v1, %v959_v0  ;;  %v691_v11 = vunpack.c.l.bf16 %v887_v60  ;;  %v449_v13 = vadd.f32 %v811_v49, %v385_v3  ;;  %v387_v15 = vadd.f32 %v976_v7, %v317_v5 }
  0x39   :  { %v512_v12 = vmax.f32 %v448_v2, 0.0  ;;  %v450_v14 = vadd.f32 %v812_v55, %v386_v4  ;;  %575 = vst [vmem:[%s1482_s4 + $0x100] sm:$0xff] %v511_v8  ;;  %v819_v18 = vunpack.c.l.bf16 %v918_v6  ;;  %v692_v20 = vunpack.c.h.bf16 %v887_v60 }
  0x3a   :  { %v388_v17 = vadd.f32 %v976_v7, %v318_v10  ;;  %v319_v19 = vmul.f32 %v691_v11, %v959_v0  ;;  %v513_v22 = vmax.f32 %v449_v13, 0.0  ;;  %v451_v24 = vadd.f32 %v815_v63, %v387_v15  ;;  %v922_v63 = vld [vmem:[%s1479_s1 + $0xb8] sm:$0xff]   ;;  %v892_v10 = vld [vmem:[%s1478_s0 + $0xc0] sm:$0xff]  }
  0x3b   :  { %576 = vst [vmem:[%s1482_s4 + $0x108] sm:$0xff] %v512_v12  ;;  %v514_v23 = vmax.f32 %v450_v14, 0.0  ;;  %v820_v25 = vunpack.c.h.bf16 %v918_v6  ;;  %v320_v28 = vmul.f32 %v692_v20, %v959_v0  ;;  %v695_v29 = vunpack.c.l.bf16 %v888_v16  ;;  %v923_v15 = vld [vmem:[%s1479_s1 + $0xc0] sm:$0xff]  }
  0x3c   :  { %v452_v26 = vadd.f32 %v816_v9, %v388_v17  ;;  %v389_v27 = vadd.f32 %v976_v7, %v319_v19  ;;  %577 = vst [vmem:[%s1482_s4 + $0x110] sm:$0xff] %v513_v22  ;;  %v515_v32 = vmax.f32 %v451_v24, 0.0  ;;  %v823_v33 = vunpack.c.l.bf16 %v919_v21  ;;  %v893_v24 = vld [vmem:[%s1478_s0 + $0xc8] sm:$0xff]  }
  0x3d   :  { %578 = vst [vmem:[%s1482_s4 + $0x118] sm:$0xff] %v514_v23  ;;  %v696_v34 = vunpack.c.h.bf16 %v888_v16  ;;  %v824_v35 = vunpack.c.h.bf16 %v919_v21  ;;  %v390_v38 = vadd.f32 %v976_v7, %v320_v28  ;;  %v321_v39 = vmul.f32 %v695_v29, %v959_v0 }
  0x3e   :  { %v516_v36 = vmax.f32 %v452_v26, 0.0  ;;  %v453_v37 = vadd.f32 %v819_v18, %v389_v27  ;;  %579 = vst [vmem:[%s1482_s4 + $0x120] sm:$0xff] %v515_v32  ;;  %v699_v42 = vunpack.c.l.bf16 %v889_v30  ;;  %v827_v43 = vunpack.c.l.bf16 %v920_v31 }
  0x3f   :  { %v322_v41 = vmul.f32 %v696_v34, %v959_v0  ;;  %v700_v44 = vunpack.c.h.bf16 %v889_v30  ;;  %v454_v47 = vadd.f32 %v820_v25, %v390_v38  ;;  %v391_v48 = vadd.f32 %v976_v7, %v321_v39  ;;  %v924_v25 = vld [vmem:[%s1479_s1 + $0xc8] sm:$0xff]   ;;  %v894_v34 = vld [vmem:[%s1478_s0 + $0xd0] sm:$0xff]  }
  0x40   :  { %580 = vst [vmem:[%s1482_s4 + $0x128] sm:$0xff] %v516_v36  ;;  %v517_v46 = vmax.f32 %v453_v37, 0.0  ;;  %v828_v49 = vunpack.c.h.bf16 %v920_v31  ;;  %v323_v51 = vmul.f32 %v699_v42, %v959_v0  ;;  %v703_v53 = vunpack.c.l.bf16 %v890_v40  ;;  %v925_v39 = vld [vmem:[%s1479_s1 + $0xd0] sm:$0xff]  }
  0x41   :  { %v392_v50 = vadd.f32 %v976_v7, %v322_v41  ;;  %v324_v52 = vmul.f32 %v700_v44, %v959_v0  ;;  %v518_v55 = vmax.f32 %v454_v47, 0.0  ;;  %v455_v56 = vadd.f32 %v823_v33, %v391_v48  ;;  %v895_v48 = vld [vmem:[%s1478_s0 + $0xd8] sm:$0xff]  }
  0x42   :  { %581 = vst [vmem:[%s1482_s4 + $0x130] sm:$0xff] %v517_v46  ;;  %v831_v57 = vunpack.c.l.bf16 %v921_v45  ;;  %v704_v58 = vunpack.c.h.bf16 %v890_v40  ;;  %v393_v60 = vadd.f32 %v976_v7, %v323_v51  ;;  %v325_v62 = vmul.f32 %v703_v53, %v959_v0 }
  0x43   :  { %v456_v59 = vadd.f32 %v824_v35, %v392_v50  ;;  %v394_v61 = vadd.f32 %v976_v7, %v324_v52  ;;  %582 = vst [vmem:[%s1482_s4 + $0x138] sm:$0xff] %v518_v55  ;;  %v519_v1 = vmax.f32 %v455_v56, 0.0  ;;  %v832_v2 = vunpack.c.h.bf16 %v921_v45 }
  0x44   :  { %v326_v3 = vmul.f32 %v704_v58, %v959_v0  ;;  %v707_v4 = vunpack.c.l.bf16 %v891_v54  ;;  %v457_v6 = vadd.f32 %v827_v43, %v393_v60  ;;  %v395_v9 = vadd.f32 %v976_v7, %v325_v62 }
  0x45   :  { %v520_v5 = vmax.f32 %v456_v59, 0.0  ;;  %v458_v8 = vadd.f32 %v828_v49, %v394_v61  ;;  %583 = vst [vmem:[%s1482_s4 + $0x140] sm:$0xff] %v519_v1  ;;  %v835_v12 = vunpack.c.l.bf16 %v922_v63  ;;  %v708_v14 = vunpack.c.h.bf16 %v891_v54 }
  0x46   :  { %v396_v11 = vadd.f32 %v976_v7, %v326_v3  ;;  %v327_v13 = vmul.f32 %v707_v4, %v959_v0  ;;  %v521_v16 = vmax.f32 %v457_v6, 0.0  ;;  %v459_v18 = vadd.f32 %v831_v57, %v395_v9  ;;  %v926_v57 = vld [vmem:[%s1479_s1 + $0xd8] sm:$0xff]   ;;  %v896_v3 = vld [vmem:[%s1478_s0 + $0xe0] sm:$0xff]  }
  0x47   :  { %584 = vst [vmem:[%s1482_s4 + $0x148] sm:$0xff] %v520_v5  ;;  %v522_v17 = vmax.f32 %v458_v8, 0.0  ;;  %v836_v19 = vunpack.c.h.bf16 %v922_v63  ;;  %v328_v22 = vmul.f32 %v708_v14, %v959_v0  ;;  %v711_v23 = vunpack.c.l.bf16 %v892_v10  ;;  %v927_v9 = vld [vmem:[%s1479_s1 + $0xe0] sm:$0xff]  }
  0x48   :  { %v460_v20 = vadd.f32 %v832_v2, %v396_v11  ;;  %v397_v21 = vadd.f32 %v976_v7, %v327_v13  ;;  %585 = vst [vmem:[%s1482_s4 + $0x150] sm:$0xff] %v521_v16  ;;  %v523_v26 = vmax.f32 %v459_v18, 0.0  ;;  %v839_v27 = vunpack.c.l.bf16 %v923_v15  ;;  %v897_v18 = vld [vmem:[%s1478_s0 + $0xe8] sm:$0xff]  }
  0x49   :  { %586 = vst [vmem:[%s1482_s4 + $0x158] sm:$0xff] %v522_v17  ;;  %v712_v28 = vunpack.c.h.bf16 %v892_v10  ;;  %v840_v29 = vunpack.c.h.bf16 %v923_v15  ;;  %v398_v32 = vadd.f32 %v976_v7, %v328_v22  ;;  %v329_v33 = vmul.f32 %v711_v23, %v959_v0 }
  0x4a   :  { %v524_v30 = vmax.f32 %v460_v20, 0.0  ;;  %v461_v31 = vadd.f32 %v835_v12, %v397_v21  ;;  %587 = vst [vmem:[%s1482_s4 + $0x160] sm:$0xff] %v523_v26  ;;  %v715_v36 = vunpack.c.l.bf16 %v893_v24  ;;  %v843_v37 = vunpack.c.l.bf16 %v924_v25 }
  0x4b   :  { %v330_v35 = vmul.f32 %v712_v28, %v959_v0  ;;  %v716_v38 = vunpack.c.h.bf16 %v893_v24  ;;  %v462_v41 = vadd.f32 %v836_v19, %v398_v32  ;;  %v399_v42 = vadd.f32 %v976_v7, %v329_v33  ;;  %v928_v19 = vld [vmem:[%s1479_s1 + $0xe8] sm:$0xff]   ;;  %v898_v28 = vld [vmem:[%s1478_s0 + $0xf0] sm:$0xff]  }
  0x4c   :  { %588 = vst [vmem:[%s1482_s4 + $0x168] sm:$0xff] %v524_v30  ;;  %v525_v40 = vmax.f32 %v461_v31, 0.0  ;;  %v844_v43 = vunpack.c.h.bf16 %v924_v25  ;;  %v331_v45 = vmul.f32 %v715_v36, %v959_v0  ;;  %v719_v47 = vunpack.c.l.bf16 %v894_v34  ;;  %v929_v33 = vld [vmem:[%s1479_s1 + $0xf0] sm:$0xff]  }
  0x4d   :  { %v400_v44 = vadd.f32 %v976_v7, %v330_v35  ;;  %v332_v46 = vmul.f32 %v716_v38, %v959_v0  ;;  %v526_v49 = vmax.f32 %v462_v41, 0.0  ;;  %v463_v50 = vadd.f32 %v839_v27, %v399_v42  ;;  %v899_v42 = vld [vmem:[%s1478_s0 + $0xf8] sm:$0xff]  }
  0x4e   :  { %589 = vst [vmem:[%s1482_s4 + $0x170] sm:$0xff] %v525_v40  ;;  %v847_v51 = vunpack.c.l.bf16 %v925_v39  ;;  %v720_v52 = vunpack.c.h.bf16 %v894_v34  ;;  %v401_v54 = vadd.f32 %v976_v7, %v331_v45  ;;  %v333_v56 = vmul.f32 %v719_v47, %v959_v0 }
  0x4f   :  { %v464_v53 = vadd.f32 %v840_v29, %v400_v44  ;;  %v402_v55 = vadd.f32 %v976_v7, %v332_v46  ;;  %590 = vst [vmem:[%s1482_s4 + $0x178] sm:$0xff] %v526_v49  ;;  %v527_v58 = vmax.f32 %v463_v50, 0.0  ;;  %v848_v59 = vunpack.c.h.bf16 %v925_v39 }
  0x50   :  { %v334_v60 = vmul.f32 %v720_v52, %v959_v0  ;;  %v723_v61 = vunpack.c.l.bf16 %v895_v48  ;;  %v465_v63 = vadd.f32 %v843_v37, %v401_v54  ;;  %v403_v2 = vadd.f32 %v976_v7, %v333_v56 }
  0x51   :  { %v528_v62 = vmax.f32 %v464_v53, 0.0  ;;  %v466_v1 = vadd.f32 %v844_v43, %v402_v55  ;;  %591 = vst [vmem:[%s1482_s4 + $0x180] sm:$0xff] %v527_v58  ;;  %v851_v5 = vunpack.c.l.bf16 %v926_v57  ;;  %v724_v8 = vunpack.c.h.bf16 %v895_v48 }
  0x52   :  { %v404_v4 = vadd.f32 %v976_v7, %v334_v60  ;;  %v335_v6 = vmul.f32 %v723_v61, %v959_v0  ;;  %v529_v10 = vmax.f32 %v465_v63, 0.0  ;;  %v467_v12 = vadd.f32 %v847_v51, %v403_v2  ;;  %v930_v51 = vld [vmem:[%s1479_s1 + $0xf8] sm:$0xff]  }
  0x53   :  { %592 = vst [vmem:[%s1482_s4 + $0x188] sm:$0xff] %v528_v62  ;;  %v530_v11 = vmax.f32 %v466_v1, 0.0  ;;  %v852_v13 = vunpack.c.h.bf16 %v926_v57  ;;  %v336_v16 = vmul.f32 %v724_v8, %v959_v0  ;;  %v727_v17 = vunpack.c.l.bf16 %v896_v3 }
  0x54   :  { %v468_v14 = vadd.f32 %v848_v59, %v404_v4  ;;  %v405_v15 = vadd.f32 %v976_v7, %v335_v6  ;;  %593 = vst [vmem:[%s1482_s4 + $0x190] sm:$0xff] %v529_v10  ;;  %v531_v20 = vmax.f32 %v467_v12, 0.0  ;;  %v855_v21 = vunpack.c.l.bf16 %v927_v9 }
  0x55   :  { %594 = vst [vmem:[%s1482_s4 + $0x198] sm:$0xff] %v530_v11  ;;  %v728_v22 = vunpack.c.h.bf16 %v896_v3  ;;  %v856_v23 = vunpack.c.h.bf16 %v927_v9  ;;  %v406_v26 = vadd.f32 %v976_v7, %v336_v16  ;;  %v337_v27 = vmul.f32 %v727_v17, %v959_v0 }
  0x56   :  { %v532_v24 = vmax.f32 %v468_v14, 0.0  ;;  %v469_v25 = vadd.f32 %v851_v5, %v405_v15  ;;  %595 = vst [vmem:[%s1482_s4 + $0x1a0] sm:$0xff] %v531_v20  ;;  %v731_v30 = vunpack.c.l.bf16 %v897_v18  ;;  %v859_v31 = vunpack.c.l.bf16 %v928_v19 }
  0x57   :  { %v338_v29 = vmul.f32 %v728_v22, %v959_v0  ;;  %v732_v32 = vunpack.c.h.bf16 %v897_v18  ;;  %v470_v35 = vadd.f32 %v852_v13, %v406_v26  ;;  %v407_v36 = vadd.f32 %v976_v7, %v337_v27 }
  0x58   :  { %596 = vst [vmem:[%s1482_s4 + $0x1a8] sm:$0xff] %v532_v24  ;;  %v533_v34 = vmax.f32 %v469_v25, 0.0  ;;  %v860_v37 = vunpack.c.h.bf16 %v928_v19  ;;  %v339_v39 = vmul.f32 %v731_v30, %v959_v0  ;;  %v735_v41 = vunpack.c.l.bf16 %v898_v28 }
  0x59   :  { %v408_v38 = vadd.f32 %v976_v7, %v338_v29  ;;  %v340_v40 = vmul.f32 %v732_v32, %v959_v0  ;;  %v534_v43 = vmax.f32 %v470_v35, 0.0  ;;  %v471_v44 = vadd.f32 %v855_v21, %v407_v36 }
  0x5a   :  { %597 = vst [vmem:[%s1482_s4 + $0x1b0] sm:$0xff] %v533_v34  ;;  %v863_v45 = vunpack.c.l.bf16 %v929_v33  ;;  %v736_v46 = vunpack.c.h.bf16 %v898_v28  ;;  %v409_v48 = vadd.f32 %v976_v7, %v339_v39  ;;  %v341_v50 = vmul.f32 %v735_v41, %v959_v0 }
  0x5b   :  { %v472_v47 = vadd.f32 %v856_v23, %v408_v38  ;;  %v410_v49 = vadd.f32 %v976_v7, %v340_v40  ;;  %598 = vst [vmem:[%s1482_s4 + $0x1b8] sm:$0xff] %v534_v43  ;;  %v535_v52 = vmax.f32 %v471_v44, 0.0  ;;  %v864_v53 = vunpack.c.h.bf16 %v929_v33 }
  0x5c   :  { %v342_v54 = vmul.f32 %v736_v46, %v959_v0  ;;  %v739_v55 = vunpack.c.l.bf16 %v899_v42  ;;  %v473_v57 = vadd.f32 %v859_v31, %v409_v48  ;;  %v411_v59 = vadd.f32 %v976_v7, %v341_v50 }
  0x5d   :  { %v536_v56 = vmax.f32 %v472_v47, 0.0  ;;  %v474_v58 = vadd.f32 %v860_v37, %v410_v49  ;;  %599 = vst [vmem:[%s1482_s4 + $0x1c0] sm:$0xff] %v535_v52  ;;  %v867_v61 = vunpack.c.l.bf16 %v930_v51  ;;  %v740_v63 = vunpack.c.h.bf16 %v899_v42 }
  0x5e   :  { %v412_v60 = vadd.f32 %v976_v7, %v342_v54  ;;  %v343_v62 = vmul.f32 %v739_v55, %v959_v0  ;;  %v537_v1 = vmax.f32 %v473_v57, 0.0  ;;  %v475_v3 = vadd.f32 %v863_v45, %v411_v59 }
  0x5f   :  { %600 = vst [vmem:[%s1482_s4 + $0x1c8] sm:$0xff] %v536_v56  ;;  %v538_v2 = vmax.f32 %v474_v58, 0.0  ;;  %v868_v6 = vunpack.c.h.bf16 %v930_v51  ;;  %v344_v8 = vmul.f32 %v740_v63, %v959_v0 }
  0x60   :  { %v476_v4 = vadd.f32 %v864_v53, %v412_v60  ;;  %v413_v5 = vadd.f32 %v976_v7, %v343_v62  ;;  %601 = vst [vmem:[%s1482_s4 + $0x1d0] sm:$0xff] %v537_v1  ;;  %v539_v9 = vmax.f32 %v475_v3, 0.0 }
  0x61   :  { %602 = vst [vmem:[%s1482_s4 + $0x1d8] sm:$0xff] %v538_v2  ;;  %v414_v12 = vadd.f32 %v976_v7, %v344_v8 }
  0x62   :  { %v540_v10 = vmax.f32 %v476_v4, 0.0  ;;  %v477_v11 = vadd.f32 %v867_v61, %v413_v5  ;;  %603 = vst [vmem:[%s1482_s4 + $0x1e0] sm:$0xff] %v539_v9 }
  0x63   :  { %v478_v13 = vadd.f32 %v868_v6, %v414_v12 }
  0x64   :  { %604 = vst [vmem:[%s1482_s4 + $0x1e8] sm:$0xff] %v540_v10  ;;  %v541_v0 = vmax.f32 %v477_v11, 0.0 }
  0x65   :  { %v542_v14 = vmax.f32 %v478_v13, 0.0 }
  0x66   :  { %605 = vst [vmem:[%s1482_s4 + $0x1f0] sm:$0xff] %v541_v0 }
  0x67   :  { %606 = vst [vmem:[%s1482_s4 + $0x1f8] sm:$0xff] %v542_v14 }

// kernel: basic_block_pallas.3
= control target key start
LH: loop header
LB: loop body
LE: loop exit
PB: predicated region body
PF: predicated region fallthrough
CT: control target
= control target key end

     0   :  { %s6195_s18 = smov 0   ;;  %s6197_s19 = smov 0   ;;  %s8235_s0 = inlined_call_operand.vmem [shape: bf16[2,16,16,128], index: 0, kind: input, shape index: {}]   ;;  %s8236_s1 = inlined_call_operand.vmem [shape: f32[1,128], index: 1, kind: input, shape index: {}, may-alias: {1,2}]   ;;  %s8237_s2 = inlined_call_operand.vmem [shape: f32[1,128], index: 2, kind: input, shape index: {}, may-alias: {1,2}]   ;;  %s8238_s3 = inlined_call_operand.vmem [shape: bf16[9,128,128], index: 3, kind: input, shape index: {}]   ;;  %s8239_s4 = inlined_call_operand.vmem [shape: bf16[2,16,16,128], index: 4, kind: output, shape index: {0}]   ;;  %s8240_s5 = inlined_call_operand.vmem [shape: f32[2,1,2,128], index: 5, kind: output, shape index: {1}]  }
   0x1   :  { %s6199_s20 = smov 0  }
   0x2 LB: > { %s28_s1 = sadd.s32 1, %s6155_s19  ;;  %p4563_p0 = scmp.ge.s32.totalorder %s6159_s20, 1  ;;  %s6159_s20 = sphi %s6199_s20, %s16_s20   ;;  %s6155_s19 = sphi %s6197_s19, %s8683_s19   ;;  %s6151_s18 = sphi %s6195_s18, %s8682_s18  }
   0x3   : > { %p30_p1 = scmp.ge.s32.totalorder %s28_s1, 2  ;;  %p206_p2 = scmp.lt.s32.totalorder %s6159_s20, 3 }
   0x5   : > { %s8685_s1 = smov (%p30_p1, %s28_s1), 0  ;;  %p207_p3 = pnand %p4563_p0, %p206_p2 }
   0x7   : > { %210 = sbr.rel (%p207_p3) target bundleno = 818 (0x332), region = 36 }
   0xc   : > { %v6049_v0 = vld [vmem:[%s8238_s3 + $0x78] sm:$0xff]   ;;  %v8241_v2 = vmov 0.0|0.0   ;;  %v6051_v3 = vld [vmem:[%s8238_s3 + $0x70] sm:$0xff]   ;;  %p246_p4 = scmp.lt.s32.totalorder %s6151_s18, 1  ;;  %v6053_v5 = vld [vmem:[%s8238_s3 + $0x68] sm:$0xff]   ;;  %v404_v7 = vlaneseq  ;;  %v6162_v18 = vmov 0.0  }
   0xd   : > { %v6050_v1 = vld [vmem:[%s8238_s3 + $0x38] sm:$0xff]   ;;  %5605 = vmatprep.mubr.bf16.mxu0 %v8241_v2  ;;  %5589 = vmatprep.subr.bf16.mxu0 %v6049_v0  ;;  %v6052_v4 = vld [vmem:[%s8238_s3 + $0x30] sm:$0xff]   ;;  %v6054_v6 = vld [vmem:[%s8238_s3 + $0x28] sm:$0xff]   ;;  %v6268_v19 = vrot.slane %v6162_v18, 7  ;;  %vm8267_vm2 = vmmov 1   ;;  %v8362_v31 = vmov 0 }
   0xe   : > { %5637 = vmatprep.subr.bf16.mxu1 %v6050_v1  ;;  %5590 = vmatpush3.bf16.msra.mxu0 %v6049_v0  ;;  %s8687_s18 = smov (!%p246_p4, %s6151_s18), 1  ;;  %v6055_v8 = vld [vmem:[%s8238_s3 + $0x60] sm:$0xff]   ;;  %v6241_v10 = vshrl.u32 %v404_v7, 7  ;;  %v6057_v11 = vld [vmem:[%s8238_s3 + $0x58] sm:$0xff]   ;;  %v6059_v14 = vld [vmem:[%s8238_s3 + $0x50] sm:$0xff]   ;;  %v8368_v57 = vmov 0 }
   0xf   : > { %5638 = vmatpush3.bf16.msra.mxu1 %v6050_v1  ;;  %5591 = vmatprep.subr.bf16.mxu0 %v6051_v3  ;;  %v6056_v9 = vld [vmem:[%s8238_s3 + $0x20] sm:$0xff]   ;;  %s5095_s11 = sshll.u32 %s8687_s18, 7  ;;  %v6058_v12 = vld [vmem:[%s8238_s3 + $0x18] sm:$0xff]   ;;  %v6060_v16 = vld [vmem:[%s8238_s3 + $0x10] sm:$0xff]   ;;  %8360 = vst [vmem:[#allocation3_spill] sm:$0xff] %v6268_v19 }
  0x10   : > { %5639 = vmatprep.subr.bf16.mxu1 %v6052_v4  ;;  %s6254_s2 = scalar_lea.vmem %s8235_s0, %s5095_s11  ;;  %v441_v13 = vand.u32 15, %v6241_v10  ;;  %vm8266_vm0 = vcmp.lt.s32.totalorder %v6241_v10, 1  ;;  %v407_v23 = vadd.s32 16, %v6241_v10  ;;  %v6061_v24 = vld [vmem:[%s8238_s3 + $0x48] sm:$0xff]   ;;  %v409_v33 = vadd.s32 32, %v6241_v10  ;;  %v6063_v34 = vld [vmem:[%s8238_s3 + $0x40] sm:$0xff]   ;;  %s7961_s17 = scalar_lea.vmem %s8239_s4, %s5095_s11 }
  0x11   : > { %v6261_v15 = vld [vmem:[%s6254_s2 + $0x70] sm:$0xff]   ;;  %v6271_v20 = vld [vmem:[%s6254_s2] sm:$0xff]   ;;  %v6275_v21 = vld [vmem:[%s6254_s2 + $0x8] sm:$0xff]   ;;  %v411_v45 = vadd.s32 48, %v6241_v10  ;;  %v413_v56 = vadd.s32 64, %v6241_v10  ;;  %s4568_s11 = sshll.u32 %s8687_s18, 1 }
  0x12   : > { %5592 = vmatpush3.bf16.msra.mxu0 %v6051_v3  ;;  %v8242_v17 = vunpack.c.h.bf16 %v6261_v15  ;;  %vm821_vm1 = vcmp.gt.s32.totalorder %v441_v13, 0  ;;  %v8277_v25 = vunpack.c.l.bf16 %v6271_v20  ;;  %v8265_v26 = vunpack.c.h.bf16 %v6271_v20  ;;  %v6062_v27 = vld [vmem:[%s8238_s3 + $0x8] sm:$0xff]   ;;  %v6064_v38 = vld [vmem:[%s8238_s3] sm:$0xff]   ;;  %v6324_v41 = vld [vmem:[%s6254_s2 + $0x10] sm:$0xff]   ;;  %s268_s23 = scalar_lea.vmem %s8240_s5, %s4568_s11 }
  0x13   : > { %5640 = vmatpush3.bf16.msra.mxu1 %v6052_v4  ;;  %5593 = vmatprep.subr.bf16.mxu0 %v6053_v5  ;;  %v8264_v29 = vunpack.c.l.bf16 %v6275_v21  ;;  %v8263_v30 = vunpack.c.h.bf16 %v6275_v21  ;;  %vm6297_vm3 = vmpackc.low %vm8267_vm2, %vm821_vm1  ;;  %v455_v35 = vand.u32 15, %v407_v23  ;;  %v469_v42 = vand.u32 15, %v409_v33  ;;  %v6327_v43 = vld [vmem:[%s6254_s2 + $0x18] sm:$0xff]   ;;  %v6371_v60 = vld [vmem:[%s6254_s2 + $0x20] sm:$0xff]  }
  0x14   : > { %5641 = vmatprep.subr.bf16.mxu1 %v6054_v6  ;;  %v6279_v22 = vrot.slane %v8242_v17, 7  ;;  %v8363_v31 = vsel %vm6297_vm3, 4294967295, %v8362_v31  ;;  %v6308_v36 = vrot.slane %v8277_v25, 7  ;;  %v920_v37 = vrot.slane %v8265_v26, 7  ;;  %v6065_v50 = vld [vmem:[%s8238_s3 + $0xb8] sm:$0xff]   ;;  %v6381_v0 = vld [vmem:[%s6254_s2 + $0x28] sm:$0xff]  }
  0x15   : > { %v6319_v39 = vrot.slane %v8264_v29, 7  ;;  %v922_v40 = vrot.slane %v8263_v30, 7  ;;  %vm6329_vm4 = vcmp.gt.s32.totalorder %v455_v35, 0  ;;  %v8258_v48 = vunpack.c.l.bf16 %v6324_v41  ;;  %v6066_v55 = vld [vmem:[%s8238_s3 + $0xf8] sm:$0xff]   ;;  %v6067_v1 = vld [vmem:[%s8238_s3 + $0xb0] sm:$0xff]   ;;  %v6070_v33 = vld [vmem:[%s8238_s3 + $0xe8] sm:$0xff]  }
  0x16   : > { %5594 = vmatpush3.bf16.msra.mxu0 %v6053_v5  ;;  %8361 = vst [vmem:[#allocation4_spill] sm:$0xff] %v6279_v22  ;;  %v981_v28 = vsel %vm8266_vm0, %v6279_v22, %v6268_v19  ;;  %v6337_v46 = vsel %vm8266_vm0, %v6308_v36, %v920_v37  ;;  %v979_v47 = vsel %vm8266_vm0, %v6268_v19, %v6308_v36  ;;  %v8257_v49 = vunpack.c.h.bf16 %v6324_v41  ;;  %vm6365_vm6 = vmpackc.low %vm8267_vm2, %vm6329_vm4  ;;  %v6068_v7 = vld [vmem:[%s8238_s3 + $0xf0] sm:$0xff]  }
  0x17   : > { %5642 = vmatpush3.bf16.msra.mxu1 %v6054_v6  ;;  %5595 = vmatprep.subr.bf16.mxu0 %v6055_v8  ;;  %v4606_v32 = vpack.c.bf16 %v6268_v19, %v981_v28  ;;  %8364 = vst [vmem:[#allocation5_spill] sm:$0xff] %v6319_v39  ;;  %v6351_v51 = vsel %vm8266_vm0, %v6319_v39, %v922_v40  ;;  %v8256_v53 = vunpack.c.l.bf16 %v6327_v43  ;;  %v8255_v54 = vunpack.c.h.bf16 %v6327_v43  ;;  %v6069_v28 = vld [vmem:[%s8238_s3 + $0xa8] sm:$0xff]   ;;  %v6432_v35 = vld [vmem:[%s6254_s2 + $0x30] sm:$0xff]  }
  0x18   : > { %5643 = vmatprep.subr.bf16.mxu1 %v6056_v9  ;;  %8367 = vst [vmem:[#allocation6_spill] sm:$0xff] %v6351_v51  ;;  %v977_v52 = vsel %vm8266_vm0, %v920_v37, %v6319_v39  ;;  %vm825_vm5 = vcmp.gt.s32.totalorder %v469_v42, 0  ;;  %v8369_v57 = vsel %vm6365_vm6, 4294967295, %v8368_v57  ;;  %v4609_v58 = vpack.c.bf16 %v6337_v46, %v979_v47  ;;  %v6435_v37 = vld [vmem:[%s6254_s2 + $0x38] sm:$0xff]  }
  0x19   : > { %5653 = vmatprep.mubr.msk.bf16.mxu1 %vm6297_vm3, %v4606_v32  ;;  %8370 = vst [vmem:[#allocation7_spill] sm:$0xff] %v8369_v57  ;;  %v483_v59 = vand.u32 15, %v411_v45  ;;  %v6374_v61 = vpack.c.bf16 %v6351_v51, %v977_v52  ;;  %v923_v62 = vrot.slane %v8258_v48, 7  ;;  %v924_v63 = vrot.slane %v8257_v49, 7  ;;  %vm6387_vm7 = vmpackc.low %vm8267_vm2, %vm825_vm5  ;;  %v6659_v48 = vld [vmem:[%s6254_s2 + $0x60] sm:$0xff]  }
  0x1a   : > { %5596 = vmatpush3.bf16.msra.mxu0 %v6055_v8  ;;  %v8371_v3 = vmov 0  ;;  %v925_v4 = vrot.slane %v8256_v53, 7  ;;  %v926_v5 = vrot.slane %v8255_v54, 7  ;;  %v497_v6 = vand.u32 15, %v413_v56  ;;  %v6075_v8 = vld [vmem:[%s8238_s3 + $0x90] sm:$0xff]  }
  0x1b   : > { %5644 = vmatpush3.bf16.msra.mxu1 %v6056_v9  ;;  %5597 = vmatprep.subr.bf16.mxu0 %v6057_v11  ;;  %v8372_v3 = vsel %vm6387_vm7, 4294967295, %v8371_v3  ;;  %vm6402_vm8 = vcmp.gt.s32.totalorder %v483_v59, 0  ;;  %v415_v9 = vadd.s32 80, %v6241_v10  ;;  %v8254_v13 = vunpack.c.l.bf16 %v6371_v60  ;;  %v6072_v59 = vld [vmem:[%s8238_s3 + $0xe0] sm:$0xff]  }
  0x1c   : > { %5645 = vmatprep.subr.bf16.mxu1 %v6058_v12  ;;  %8373 = vst [vmem:[#allocation8_spill] sm:$0xff] %v8372_v3  ;;  %v973_v23 = vsel %vm8266_vm0, %v924_v63, %v925_v4  ;;  %vm829_vm9 = vcmp.gt.s32.totalorder %v497_v6, 0  ;;  %v417_v32 = vadd.s32 96, %v6241_v10  ;;  %vm6440_vm10 = vmpackc.low %vm8267_vm2, %vm6402_vm8  ;;  %v8380_v45 = vmov 0 }
  0x1d   : > { %v927_v42 = vrot.slane %v8254_v13, 7  ;;  %vm6451_vm11 = vmpackc.low %vm8267_vm2, %vm829_vm9  ;;  %v511_v47 = vand.u32 15, %v415_v9  ;;  %v8244_v6 = vunpack.c.l.bf16 %v6435_v37  ;;  %v423_v17 = vadd.s32 144, %v6241_v10 }
  0x1e   : > { %5598 = vmatpush3.bf16.msra.mxu0 %v6057_v11  ;;  %v974_v11 = vsel %vm8266_vm0, %v923_v62, %v924_v63  ;;  %v8381_v45 = vsel %vm6451_vm11, 4294967295, %v8380_v45  ;;  %v525_v56 = vand.u32 15, %v417_v32  ;;  %v419_v63 = vadd.s32 112, %v6241_v10 }
  0x1f   : > { %5646 = vmatpush3.bf16.msra.mxu1 %v6058_v12  ;;  %5599 = vmatprep.subr.bf16.mxu0 %v6059_v14  ;;  %v975_v12 = vsel %vm8266_vm0, %v922_v40, %v923_v62  ;;  %8382 = vst [vmem:[#allocation11_spill] sm:$0xff] %v8381_v45  ;;  %v8245_v62 = vunpack.c.h.bf16 %v6432_v35  ;;  %vm6482_vm12 = vcmp.gt.s32.totalorder %v511_v47, 0  ;;  %v6743_v51 = vrot.slane %v6162_v18, 1 }
  0x20   : > { %5647 = vmatprep.subr.bf16.mxu1 %v6060_v16  ;;  %vm833_vm13 = vcmp.gt.s32.totalorder %v525_v56, 0  ;;  %v539_v32 = vand.u32 15, %v419_v63  ;;  %vm6509_vm14 = vmpackc.low %vm8267_vm2, %vm6482_vm12  ;;  %v6520_v63 = vld [vmem:[%s6254_s2 + $0x48] sm:$0xff]   ;;  %v8429_v25 = vunpack.c.l.bf16 %v6261_v15  ;;  %v8430_v18 = vmov 0 }
  0x21   : > { %vm6523_vm15 = vmpackc.low %vm8267_vm2, %vm833_vm13  ;;  %8422 = vst [vmem:[#allocation23_spill] sm:$0xff] %v6743_v51  ;;  %v8471_v57 = vunpack.c.l.bf16 %v6432_v35 }
  0x22   : > { %5600 = vmatpush3.bf16.msra.mxu0 %v6059_v14  ;;  %v8249_v14 = vunpack.c.h.bf16 %v6371_v60  ;;  %vm6538_vm1 = vcmp.gt.s32.totalorder %v539_v32, 0 }
  0x23   : > { %5648 = vmatpush3.bf16.msra.mxu1 %v6060_v16  ;;  %5601 = vmatprep.subr.bf16.mxu0 %v6061_v24  ;;  %v972_v16 = vsel %vm8266_vm0, %v925_v4, %v926_v5  ;;  %v971_v4 = vsel %vm8266_vm0, %v926_v5, %v927_v42  ;;  %v6073_v5 = vld [vmem:[%s8238_s3 + $0x98] sm:$0xff]   ;;  %vm6574_vm5 = vmpackc.low %vm8267_vm2, %vm6538_vm1 }
  0x24   : > { %5649 = vmatprep.subr.bf16.mxu1 %v6062_v27  ;;  %v6444_v40 = vpack.c.bf16 %v972_v16, %v973_v23  ;;  %v928_v44 = vrot.slane %v8249_v14, 7  ;;  %v6074_v23 = vld [vmem:[%s8238_s3 + $0xd8] sm:$0xff]   ;;  %v6585_v14 = vld [vmem:[%s6254_s2 + $0x50] sm:$0xff]  }
  0x26   : > { %5602 = vmatpush3.bf16.msra.mxu0 %v6061_v24  ;;  %v8248_v24 = vunpack.c.l.bf16 %v6381_v0 }
  0x27   : > { %5650 = vmatpush3.bf16.msra.mxu1 %v6062_v27  ;;  %5603 = vmatprep.subr.bf16.mxu0 %v6063_v34  ;;  %v8247_v27 = vunpack.c.h.bf16 %v6381_v0 }
  0x28   : > { %5651 = vmatprep.subr.bf16.mxu1 %v6064_v38 }
  0x29   : > { %v930_v52 = vrot.slane %v8247_v27, 7 }
  0x2a   : > { %5604 = vmatpush3.bf16.msra.mxu0 %v6063_v34  ;;  %v6429_v34 = vpack.c.bf16 %v974_v11, %v975_v12  ;;  %v421_v12 = vadd.s32 128, %v6241_v10 }
  0x2b   : > { %5652 = vmatpush3.bf16.msra.mxu1 %v6064_v38  ;;  %5685 = vmatprep.subr.bf16.mxu0 %v6065_v50  ;;  %v8377_v38 = vmov 0 }
  0x2c   : > { %5733 = vmatprep.subr.bf16.mxu1 %v6066_v55  ;;  %8376 = vst [vmem:[#allocation9_spill] sm:$0xff] %v6429_v34  ;;  %v8378_v38 = vsel %vm6440_vm10, 4294967295, %v8377_v38 }
  0x2d   : > { %5606 = vmatmul.mubr.bf16.vlgmr.msra.gmra.mxu0 %v6271_v20  ;;  %8379 = vst [vmem:[#allocation10_spill] sm:$0xff] %v8378_v38 }
  0x2e   : > { %5654 = vmatmul.mubr.msk.bf16.vlgmr.msra.gmra.mxu1 %vm6365_vm6, %v4609_v58  ;;  %5609 = vmatprep.mubr.bf16.mxu0 %v6275_v21  ;;  %v8246_v58 = vunpack.c.l.bf16 %v6432_v35 }
  0x2f   : > { %5657 = vmatprep.mubr.msk.bf16.mxu1 %vm6387_vm7, %v6374_v61  ;;  %5686 = vmatpush3.bf16.msra.mxu0 %v6065_v50  ;;  %v929_v50 = vrot.slane %v8248_v24, 7 }
  0x30   : > { %5734 = vmatpush3.bf16.msra.mxu1 %v6066_v55  ;;  %5687 = vmatprep.subr.bf16.mxu0 %v6067_v1  ;;  %v6071_v55 = vld [vmem:[%s8238_s3 + $0xa0] sm:$0xff]   ;;  %v931_v16 = vrot.slane %v8246_v58, 7 }
  0x31   : > { %5735 = vmatprep.subr.bf16.mxu1 %v6068_v7  ;;  %v968_v9 = vsel %vm8266_vm0, %v929_v50, %v930_v52  ;;  %v969_v11 = vsel %vm8266_vm0, %v928_v44, %v929_v50  ;;  %v933_v50 = vrot.slane %v8244_v6, 7  ;;  %v8250_v6 = vunpack.c.h.bf16 %v6520_v63 }
  0x32   : > { %v6513_v47 = vpack.c.bf16 %v968_v9, %v969_v11  ;;  %v6076_v9 = vld [vmem:[%s8238_s3 + $0xd0] sm:$0xff]   ;;  %v967_v11 = vsel %vm8266_vm0, %v930_v52, %v931_v16 }
  0x33   : > { %5688 = vmatpush3.bf16.msra.mxu0 %v6067_v1  ;;  %v970_v1 = vsel %vm8266_vm0, %v927_v42, %v928_v44  ;;  %v6504_v42 = vld [vmem:[%s6254_s2 + $0x40] sm:$0xff]   ;;  %v8385_v44 = vmov 0 }
  0x34   : > { %5736 = vmatpush3.bf16.msra.mxu1 %v6068_v7  ;;  %5689 = vmatprep.subr.bf16.mxu0 %v6069_v28  ;;  %v8243_v7 = vunpack.c.h.bf16 %v6435_v37  ;;  %v8386_v44 = vsel %vm6509_vm14, 4294967295, %v8385_v44  ;;  %v8253_v2 = vunpack.c.l.bf16 %v6504_v42  ;;  %v8252_v32 = vunpack.c.h.bf16 %v6504_v42 }
  0x35   : > { %5610 = vmatmul.mubr.bf16.gmra.mxu0 %v6324_v41  ;;  %5737 = vmatprep.subr.bf16.mxu1 %v6070_v33  ;;  %8387 = vst [vmem:[#allocation12_spill] sm:$0xff] %v8386_v44  ;;  %v8485_v45 = vunpack.c.l.bf16 %v6504_v42 }
  0x36   : > { %5658 = vmatmul.mubr.msk.bf16.gmra.mxu1 %vm6440_vm10, %v6429_v34  ;;  %5613 = vmatprep.mubr.bf16.mxu0 %v6327_v43  ;;  %v934_v56 = vrot.slane %v8243_v7, 7  ;;  %v935_v27 = vrot.slane %v8253_v2, 7  ;;  %v936_v24 = vrot.slane %v8252_v32, 7  ;;  %v427_v32 = vadd.s32 176, %v6241_v10 }
  0x37   : > { %5661 = vmatprep.mubr.msk.bf16.mxu1 %vm6451_vm11, %v6444_v40  ;;  %5690 = vmatpush3.bf16.msra.mxu0 %v6069_v28  ;;  %v6499_v28 = vpack.c.bf16 %v970_v1, %v971_v4  ;;  %v8388_v1 = vmov 0  ;;  %v553_v4 = vand.u32 15, %v421_v12  ;;  %v1579_v38 = vrot.slane %v8485_v45, 1 }
  0x38   : > { %5738 = vmatpush3.bf16.msra.mxu1 %v6070_v33  ;;  %5691 = vmatprep.subr.bf16.mxu0 %v6071_v55  ;;  %v932_v33 = vrot.slane %v8245_v62, 7  ;;  %v8389_v1 = vsel %vm6523_vm15, 4294967295, %v8388_v1  ;;  %v964_v12 = vsel %vm8266_vm0, %v933_v50, %v934_v56  ;;  %v6077_v62 = vld [vmem:[%s8238_s3 + $0x88] sm:$0xff]   ;;  %v595_v49 = vand.u32 15, %v427_v32 }
  0x39   : > { %5739 = vmatprep.subr.bf16.mxu1 %v6072_v59  ;;  %8390 = vst [vmem:[#allocation13_spill] sm:$0xff] %v8389_v1  ;;  %vm6554_vm4 = vcmp.gt.s32.totalorder %v553_v4, 0  ;;  %v6078_v4 = vld [vmem:[%s8238_s3 + $0xc8] sm:$0xff]   ;;  %v8497_v1 = vunpack.c.l.bf16 %v6585_v14 }
  0x3a   : > { %v965_v52 = vsel %vm8266_vm0, %v932_v33, %v933_v50  ;;  %v567_v50 = vand.u32 15, %v423_v17  ;;  %vm6590_vm8 = vmpackc.low %vm8267_vm2, %vm6554_vm4  ;;  %v938_v17 = vrot.slane %v8250_v6, 7  ;;  %v962_v6 = vsel %vm8266_vm0, %v935_v27, %v936_v24 }
  0x3b   : > { %5692 = vmatpush3.bf16.msra.mxu0 %v6071_v55  ;;  %v8399_v55 = vmov 0  ;;  %vm843_vm4 = vcmp.gt.s32.totalorder %v595_v49, 0  ;;  %v433_v49 = vadd.s32 224, %v6241_v10  ;;  %v1583_v44 = vrot.slane %v8497_v1, 1 }
  0x3c   : > { %5740 = vmatpush3.bf16.msra.mxu1 %v6072_v59  ;;  %5693 = vmatprep.subr.bf16.mxu0 %v6073_v5  ;;  %v966_v59 = vsel %vm8266_vm0, %v931_v16, %v932_v33  ;;  %v8251_v16 = vunpack.c.l.bf16 %v6520_v63  ;;  %v6578_v33 = vpack.c.bf16 %v964_v12, %v965_v52  ;;  %v8400_v55 = vsel %vm6590_vm8, 4294967295, %v8399_v55  ;;  %v6080_v12 = vld [vmem:[%s8238_s3 + $0xc0] sm:$0xff]  }
  0x3d   : > { %5614 = vmatmul.mubr.bf16.gmra.mxu0 %v6371_v60  ;;  %5741 = vmatprep.subr.bf16.mxu1 %v6074_v23  ;;  %v6569_v58 = vpack.c.bf16 %v966_v59, %v967_v11  ;;  %8401 = vst [vmem:[#allocation16_spill] sm:$0xff] %v8400_v55  ;;  %v6079_v11 = vld [vmem:[%s8238_s3 + $0x80] sm:$0xff]   ;;  %v8261_v52 = vunpack.c.h.bf16 %v6585_v14  ;;  %vm6617_vm9 = vcmp.gt.s32.totalorder %v567_v50, 0 }
  0x3e   : > { %5662 = vmatmul.mubr.msk.bf16.gmra.mxu1 %vm6509_vm14, %v6499_v28  ;;  %5617 = vmatprep.mubr.bf16.mxu0 %v6381_v0  ;;  %8398 = vst [vmem:[#allocation15_spill] sm:$0xff] %v6578_v33  ;;  %v937_v59 = vrot.slane %v8251_v16, 7  ;;  %v963_v16 = vsel %vm8266_vm0, %v934_v56, %v935_v27  ;;  %v6635_v27 = vld [vmem:[%s8238_s3 + $0x138] sm:$0xff]   ;;  %vm6652_vm13 = vmpackc.low %vm8267_vm2, %vm6617_vm9 }
  0x3f   : > { %5665 = vmatprep.mubr.msk.bf16.mxu1 %vm6523_vm15, %v6513_v47  ;;  %5694 = vmatpush3.bf16.msra.mxu0 %v6073_v5  ;;  %v425_v5 = vadd.s32 160, %v6241_v10  ;;  %v6643_v56 = vpack.c.bf16 %v962_v6, %v963_v16  ;;  %v8408_v6 = vmov 0 }
  0x40   : > { %5742 = vmatpush3.bf16.msra.mxu1 %v6074_v23  ;;  %5695 = vmatprep.subr.bf16.mxu0 %v6075_v8  ;;  %v8395_v23 = vmov 0  ;;  %v960_v2 = vsel %vm8266_vm0, %v937_v59, %v938_v17  ;;  %v961_v13 = vsel %vm8266_vm0, %v936_v24, %v937_v59  ;;  %v6641_v24 = vld [vmem:[%s8238_s3 + $0x178] sm:$0xff]   ;;  %v940_v59 = vrot.slane %v8261_v52, 7 }
  0x41   : > { %5743 = vmatprep.subr.bf16.mxu1 %v6076_v9  ;;  %v8396_v23 = vsel %vm6574_vm5, 4294967295, %v8395_v23  ;;  %v581_v7 = vand.u32 15, %v425_v5  ;;  %8404 = vst [vmem:[#allocation17_spill] sm:$0xff] %v6643_v56  ;;  %v6656_v53 = vpack.c.bf16 %v960_v2, %v961_v13  ;;  %v6673_v13 = vld [vmem:[%s6254_s2 + $0x68] sm:$0xff]  }
  0x42   : > { %8397 = vst [vmem:[#allocation14_spill] sm:$0xff] %v8396_v23  ;;  %v8269_v30 = vunpack.c.h.bf16 %v6673_v13 }
  0x43   : > { %5696 = vmatpush3.bf16.msra.mxu0 %v6075_v8  ;;  %v6603_v8 = vld [vmem:[%s6254_s2 + $0x58] sm:$0xff]   ;;  %vm841_vm12 = vcmp.gt.s32.totalorder %v581_v7, 0  ;;  %v8405_v7 = vmov 0 }
  0x44   : > { %5744 = vmatpush3.bf16.msra.mxu1 %v6076_v9  ;;  %5697 = vmatprep.subr.bf16.mxu0 %v6077_v62  ;;  %v8262_v9 = vunpack.c.l.bf16 %v6585_v14  ;;  %v8260_v50 = vunpack.c.l.bf16 %v6603_v8  ;;  %v8259_v54 = vunpack.c.h.bf16 %v6603_v8  ;;  %v8406_v7 = vsel %vm6652_vm13, 4294967295, %v8405_v7  ;;  %vm6662_vm1 = vmpackc.low %vm8267_vm2, %vm841_vm12 }
  0x45   : > { %5618 = vmatmul.mubr.bf16.gmra.mxu0 %v6432_v35  ;;  %5745 = vmatprep.subr.bf16.mxu1 %v6078_v4  ;;  %8407 = vst [vmem:[#allocation18_spill] sm:$0xff] %v8406_v7  ;;  %v8409_v6 = vsel %vm6662_vm1, 4294967295, %v8408_v6  ;;  %vm6700_vm12 = vmpackc.low %vm8267_vm2, %vm843_vm4  ;;  %v8508_v55 = vunpack.c.h.bf16 %v6603_v8 }
  0x46   : > { %5666 = vmatmul.mubr.msk.bf16.gmra.mxu1 %vm6574_vm5, %v6569_v58  ;;  %5621 = vmatprep.mubr.bf16.mxu0 %v6435_v37  ;;  %8410 = vst [vmem:[#allocation19_spill] sm:$0xff] %v8409_v6  ;;  %v941_v16 = vrot.slane %v8260_v50, 7  ;;  %v942_v5 = vrot.slane %v8259_v54, 7  ;;  %v8273_v54 = vunpack.c.h.bf16 %v6659_v48 }
  0x47   : > { %5669 = vmatprep.mubr.msk.bf16.mxu1 %vm6590_vm8, %v6578_v33  ;;  %5698 = vmatpush3.bf16.msra.mxu0 %v6077_v62  ;;  %v429_v62 = vadd.s32 192, %v6241_v10  ;;  %v1586_v23 = vrot.slane %v8508_v55, 1 }
  0x48   : > { %5746 = vmatpush3.bf16.msra.mxu1 %v6078_v4  ;;  %5699 = vmatprep.subr.bf16.mxu0 %v6079_v11  ;;  %v939_v4 = vrot.slane %v8262_v9, 7  ;;  %v956_v50 = vsel %vm8266_vm0, %v941_v16, %v942_v5  ;;  %v957_v52 = vsel %vm8266_vm0, %v940_v59, %v941_v16  ;;  %v8270_v9 = vunpack.c.l.bf16 %v6673_v13 }
  0x49   : > { %5747 = vmatprep.subr.bf16.mxu1 %v6080_v12  ;;  %v609_v2 = vand.u32 15, %v429_v62  ;;  %v8276_v62 = vunpack.c.l.bf16 %v6659_v48  ;;  %v6704_v26 = vpack.c.bf16 %v956_v50, %v957_v52  ;;  %v944_v16 = vrot.slane %v8273_v54, 7  ;;  %v6721_v50 = vld [vmem:[%s6254_s2 + $0x78] sm:$0xff]  }
  0x4a   : > { %v958_v32 = vsel %vm8266_vm0, %v939_v4, %v940_v59  ;;  %v637_v52 = vand.u32 15, %v433_v49  ;;  %8417 = vst [vmem:[#allocation22_spill] sm:$0xff] %v6721_v50  ;;  %v8425_v49 = vmov 0 }
  0x4b   : > { %5700 = vmatpush3.bf16.msra.mxu0 %v6079_v11  ;;  %v431_v11 = vadd.s32 208, %v6241_v10  ;;  %vm845_vm9 = vcmp.gt.s32.totalorder %v609_v2, 0  ;;  %v943_v59 = vrot.slane %v8276_v62, 7  ;;  %v8414_v2 = vmov 0 }
  0x4c   : > { %5748 = vmatpush3.bf16.msra.mxu1 %v6080_v12  ;;  %5781 = vmatprep.subr.bf16.mxu0 %v6635_v27  ;;  %v959_v12 = vsel %vm8266_vm0, %v938_v17, %v939_v4  ;;  %v8411_v4 = vmov 0  ;;  %vm6711_vm0 = vmpackc.low %vm8267_vm2, %vm845_vm9  ;;  %vm8418_vm9 = vcmp.lt.s32.totalorder %v6241_v10, 1  ;;  %v406_v62 = vadd.s32 8, %v6241_v10 }
  0x4d   : > { %5622 = vmatmul.mubr.bf16.gmra.mxu0 %v6504_v42  ;;  %5829 = vmatprep.subr.bf16.mxu1 %v6641_v24  ;;  %v6697_v29 = vpack.c.bf16 %v958_v32, %v959_v12  ;;  %v623_v17 = vand.u32 15, %v431_v11  ;;  %v8412_v4 = vsel %vm6700_vm12, 4294967295, %v8411_v4  ;;  %v8415_v2 = vsel %vm6711_vm0, 4294967295, %v8414_v2  ;;  %vm8419_vm2 = vmmov %vm8418_vm9 }
  0x4e   : > { %5670 = vmatmul.mubr.msk.bf16.gmra.mxu1 %vm6652_vm13, %v6643_v56  ;;  %5625 = vmatprep.mubr.bf16.mxu0 %v6520_v63  ;;  %8413 = vst [vmem:[#allocation20_spill] sm:$0xff] %v8412_v4  ;;  %8416 = vst [vmem:[#allocation21_spill] sm:$0xff] %v8415_v2  ;;  %v945_v32 = vrot.slane %v8270_v9, 7  ;;  %v946_v11 = vrot.slane %v8269_v30, 7  ;;  %v954_v12 = vsel %vm8418_vm9, %v943_v59, %v944_v16  ;;  %v435_v9 = vadd.s32 240, %v6241_v10 }
  0x4f   : > { %5673 = vmatprep.mubr.msk.bf16.mxu1 %vm6662_vm1, %v6656_v53  ;;  %vm847_vm4 = vcmp.gt.s32.totalorder %v623_v17, 0  ;;  %v955_v30 = vsel %vm8419_vm2, %v942_v5, %v943_v59  ;;  %vm8420_vm1 = vmmov %vm8419_vm2  ;;  %v8423_v5 = vunpack.c.l.bf16 %v6271_v20  ;;  %vm8424_vm2 = vmmov 1  }
  0x50   : > { %v952_v54 = vsel %vm8420_vm1, %v945_v32, %v946_v11  ;;  %v6745_v19 = vpack.c.bf16 %v954_v12, %v955_v30  ;;  %vm6752_vm9 = vmpackc.low %vm8424_vm2, %vm847_vm4  ;;  %v448_v30 = vand.u32 15, %v406_v62  ;;  %v8433_v12 = vunpack.c.h.bf16 %v6721_v50 }
  0x51   : > { %v6749_v59 = vrot.slane %v8423_v5, 1  ;;  %v8426_v49 = vsel %vm6752_vm9, 4294967295, %v8425_v49  ;;  %vm8436_vm4 = vmmov %vm8420_vm1 }
  0x52   : > { %8427 = vst [vmem:[#allocation24_spill] sm:$0xff] %v8426_v49  ;;  %v6768_v5 = vrot.slane %v8433_v12, 7  ;;  %vm854_vm13 = vcmp.lt.s32.totalorder %v448_v30, 15 }
  0x54   : > { %8434 = vst [vmem:[#allocation27_spill] sm:$0xff] %v6768_v5 }
  0x55   : > { %5626 = vmatmul.mubr.bf16.gmra.mxu0 %v6585_v14 }
  0x56   : > { %5674 = vmatmul.mubr.msk.bf16.gmra.mxu1 %vm6700_vm12, %v6697_v29  ;;  %5629 = vmatprep.mubr.bf16.mxu0 %v6603_v8  ;;  %vm8421_vm12 = vmmov %vm8420_vm1 }
  0x57   : > { %5677 = vmatprep.mubr.msk.bf16.mxu1 %vm6711_vm0, %v6704_v26  ;;  %v953_v17 = vsel %vm8421_vm12, %v944_v16, %v945_v32  ;;  %vm849_vm0 = vcmp.gt.s32.totalorder %v637_v52, 0  ;;  %v651_v32 = vand.u32 15, %v435_v9  ;;  %v947_v52 = vrot.slane %v8429_v25, 7 }
  0x58   : > { %v6756_v16 = vpack.c.bf16 %v952_v54, %v953_v17  ;;  %vm6762_vm12 = vmpackc.low %vm8424_vm2, %vm849_vm0  ;;  %v8435_v54 = vunpack.c.h.bf16 %v6271_v20  ;;  %v408_v25 = vadd.s32 24, %v6241_v10  ;;  %v410_v17 = vadd.s32 40, %v6241_v10 }
  0x59   : > { %v8431_v18 = vsel %vm6762_vm12, 4294967295, %v8430_v18  ;;  %vm851_vm0 = vcmp.gt.s32.totalorder %v651_v32, 0  ;;  %v950_v20 = vsel %vm8436_vm4, %v947_v52, %v6279_v22  ;;  %v951_v62 = vsel %vm8420_vm1, %v946_v11, %v947_v52 }
  0x5a   : > { %8428 = vst [vmem:[#allocation25_spill] sm:$0xff] %v6756_v16  ;;  %8432 = vst [vmem:[#allocation26_spill] sm:$0xff] %v8431_v18  ;;  %v1564_v9 = vrot.slane %v8435_v54, 1  ;;  %v8438_v54 = vunpack.c.l.bf16 %v6275_v21  ;;  %v6804_v11 = vpack.c.bf16 %v950_v20, %v951_v62  ;;  %v462_v18 = vand.u32 15, %v408_v25 }
  0x5b   : > { %vm6800_vm4 = vmpackc.low %vm8424_vm2, %vm851_vm0  ;;  %v476_v49 = vand.u32 15, %v410_v17  ;;  %v8452_v62 = vunpack.c.h.bf16 %v6324_v41 }
  0x5c   : > { %v6793_v39 = vrot.slane %v8438_v54, 1  ;;  %v8443_v54 = vmov 0 }
  0x5d   : > { %5630 = vmatmul.mubr.bf16.gmra.mxu0 %v6659_v48  ;;  %vm858_vm0 = vcmp.lt.s32.totalorder %v476_v49, 15 }
  0x5e   : > { %5678 = vmatmul.mubr.msk.bf16.gmra.mxu1 %vm6752_vm9, %v6745_v19  ;;  %5633 = vmatprep.mubr.bf16.mxu0 %v6673_v13  ;;  %vm8437_vm9 = vcmp.lt.s32.totalorder %v6241_v10, 7  ;;  %8439 = vst [vmem:[#allocation28_spill] sm:$0xff] %v6793_v39 }
  0x5f   : > { %5681 = vmatprep.mubr.msk.bf16.mxu1 %vm6762_vm12, %v6756_v16  ;;  %v1623_v12 = vsel %vm8437_vm9, %v6743_v51, %v6749_v59  ;;  %vm8440_vm12 = vmmov %vm8420_vm1  ;;  %v8446_v16 = vunpack.c.l.bf16 %v6324_v41  ;;  %vm8447_vm1 = vcmp.lt.s32.totalorder %v6241_v10, 7  ;;  %v6083_v41 = vld [vmem:[%s8238_s3 + $0x130] sm:$0xff]  }
  0x60   : > { %v2091_v32 = vsel %vm8440_vm12, %v6768_v5, %v6308_v36  ;;  %v4678_v52 = vpack.c.bf16 %v1623_v12, %v6743_v51  ;;  %vm6808_vm9 = vmpackc.low %vm854_vm13, %vm8424_vm2  ;;  %v8445_v36 = vunpack.c.h.bf16 %v6275_v21  ;;  %v1622_v20 = vsel %vm8447_vm1, %v6749_v59, %v1564_v9 }
  0x61   : > { %v8444_v54 = vsel %vm6808_vm9, 4294967295, %v8443_v54  ;;  %v4750_v30 = vpack.c.bf16 %v6337_v46, %v2091_v32  ;;  %v1567_v50 = vrot.slane %v8446_v16, 1  ;;  %vm8448_vm13 = vmmov %vm8447_vm1  ;;  %vm856_vm12 = vcmp.lt.s32.totalorder %v462_v18, 15 }
  0x62   : > { %v1566_v5 = vrot.slane %v8445_v36, 1  ;;  %v1621_v25 = vsel %vm8448_vm13, %v1564_v9, %v6793_v39  ;;  %v412_v21 = vadd.s32 56, %v6241_v10  ;;  %v414_v46 = vadd.s32 72, %v6241_v10  ;;  %vm8449_vm13 = vmmov %vm8447_vm1 }
  0x63   : > { %v6838_v17 = vpack.c.bf16 %v1621_v25, %v1622_v20  ;;  %v1568_v12 = vrot.slane %v8452_v62, 1  ;;  %v8453_v32 = vunpack.c.l.bf16 %v6327_v43  ;;  %v8456_v36 = vunpack.c.h.bf16 %v6327_v43 }
  0x64   : > { %v1619_v16 = vsel %vm8447_vm1, %v1566_v5, %v1567_v50  ;;  %v1620_v9 = vsel %vm8449_vm13, %v6793_v39, %v1566_v5  ;;  %vm6852_vm1 = vmpackc.low %vm858_vm0, %vm8424_vm2  ;;  %v490_v5 = vand.u32 15, %v412_v21  ;;  %v8457_v25 = vunpack.c.l.bf16 %v6371_v60 }
  0x65   : > { %5634 = vmatmul.mubr.bf16.gmra.mxu0 %v6261_v15  ;;  %v6845_v49 = vpack.c.bf16 %v1619_v16, %v1620_v9  ;;  %v1570_v20 = vrot.slane %v8456_v36, 1  ;;  %v504_v16 = vand.u32 15, %v414_v46  ;;  %v6084_v9 = vld [vmem:[%s8238_s3 + $0x170] sm:$0xff]   ;;  %v416_v62 = vadd.s32 88, %v6241_v10 }
  0x66   : > { %5682 = vmatmul.mubr.msk.bf16.gmra.mxu1 %vm6800_vm4, %v6804_v11  ;;  %5701 = vmatprep.mubr.msk.bf16.mxu0 %vm6808_vm9, %v4678_v52  ;;  %vm6841_vm9 = vmpackc.low %vm856_vm12, %vm8424_vm2  ;;  %v1569_v52 = vrot.slane %v8453_v32, 1  ;;  %v1571_v39 = vrot.slane %v8457_v25, 1  ;;  %v418_v32 = vadd.s32 104, %v6241_v10 }
  0x67   : > { %5749 = vmatprep.mubr.msk.bf16.mxu1 %vm6297_vm3, %v4750_v30  ;;  %v8454_v30 = vmov 0  ;;  %vm8458_vm12 = vmmov %vm8449_vm13  ;;  %vm860_vm13 = vcmp.lt.s32.totalorder %v490_v5, 15 }
  0x68   : > { %v8455_v30 = vsel %vm6852_vm1, 4294967295, %v8454_v30  ;;  %v1617_v43 = vsel %vm8458_vm12, %v1568_v12, %v1569_v52  ;;  %vm8459_vm0 = vmmov %vm8458_vm12 }
  0x69   : > { %v1618_v21 = vsel %vm8459_vm0, %v1567_v50, %v1568_v12  ;;  %vm8460_vm3 = vmmov %vm8459_vm0  ;;  %v6085_v50 = vld [vmem:[%s8238_s3 + $0x128] sm:$0xff]  }
  0x6a   : > { %v1615_v46 = vsel %vm8460_vm3, %v1570_v20, %v1571_v39  ;;  %v6893_v12 = vpack.c.bf16 %v1617_v43, %v1618_v21  ;;  %vm6899_vm3 = vmpackc.low %vm860_vm13, %vm8424_vm2  ;;  %v518_v43 = vand.u32 15, %v416_v62  ;;  %v8470_v21 = vunpack.c.h.bf16 %v6381_v0 }
  0x6b   : > { %vm8473_vm12 = vmmov %vm8459_vm0  ;;  %v420_v62 = vadd.s32 120, %v6241_v10 }
  0x6c   : > { %v1574_v3 = vrot.slane %v8470_v21, 1  ;;  %v8481_v21 = vmov 0 }
  0x6d   : > { %5702 = vmatmul.mubr.msk.bf16.vlgmr.msra.gmra.mxu0 %vm6841_vm9, %v6838_v17 }
  0x6e   : > { %5750 = vmatmul.mubr.msk.bf16.vlgmr.msra.gmra.mxu1 %vm6365_vm6, %v6374_v61  ;;  %5705 = vmatprep.mubr.msk.bf16.mxu0 %vm6852_vm1, %v6845_v49  ;;  %vm8461_vm6 = vmmov %vm8459_vm0  ;;  %vm862_vm1 = vcmp.lt.s32.totalorder %v504_v16, 15  ;;  %v8467_v16 = vmov 0 }
  0x6f   : > { %5753 = vmatprep.mubr.msk.bf16.mxu1 %vm6387_vm7, %v6429_v34  ;;  %v1616_v61 = vsel %vm8461_vm6, %v1569_v52, %v1570_v20  ;;  %5782 = vmatpush3.bf16.msra.mxu0 %v6635_v27  ;;  %v6086_v52 = vld [vmem:[%s8238_s3 + $0x168] sm:$0xff]   ;;  %v8462_v27 = vmov 0  ;;  %v8466_v20 = vunpack.c.l.bf16 %v6381_v0  ;;  %vm6910_vm6 = vmpackc.low %vm862_vm1, %vm8424_vm2  ;;  %v1575_v34 = vrot.slane %v8471_v57, 1  ;;  %v6088_v0 = vld [vmem:[%s8238_s3 + $0x160] sm:$0xff]  }
  0x70   : > { %5830 = vmatpush3.bf16.msra.mxu1 %v6641_v24  ;;  %5783 = vmatprep.subr.bf16.mxu0 %v6083_v41  ;;  %v8463_v27 = vsel %vm6899_vm3, 4294967295, %v8462_v27  ;;  %v6903_v5 = vpack.c.bf16 %v1615_v46, %v1616_v61  ;;  %v8465_v24 = vunpack.c.h.bf16 %v6371_v60  ;;  %v8468_v16 = vsel %vm6910_vm6, 4294967295, %v8467_v16  ;;  %v6087_v60 = vld [vmem:[%s8238_s3 + $0x120] sm:$0xff]   ;;  %vm8472_vm1 = vmmov %vm8459_vm0 }
  0x71   : > { %5831 = vmatprep.subr.bf16.mxu1 %v6084_v9  ;;  %8464 = vst [vmem:[#allocation29_spill] sm:$0xff] %v8463_v27  ;;  %v1573_v25 = vrot.slane %v8466_v20, 1  ;;  %8469 = vst [vmem:[#allocation30_spill] sm:$0xff] %v8468_v16  ;;  %v532_v46 = vand.u32 15, %v418_v32  ;;  %vm864_vm0 = vcmp.lt.s32.totalorder %v518_v43, 15  ;;  %v422_v32 = vadd.s32 136, %v6241_v10 }
  0x72   : > { %v1572_v36 = vrot.slane %v8465_v24, 1  ;;  %vm8474_vm13 = vmmov %vm8472_vm1  ;;  %v6107_v16 = vld [vmem:[%s8238_s3 + $0x190] sm:$0xff]   ;;  %v7280_v27 = vld [vmem:[%s6254_s2 + $0x28] sm:$0xff]  }
  0x73   : > { %5784 = vmatpush3.bf16.msra.mxu0 %v6083_v41  ;;  %vm866_vm7 = vcmp.lt.s32.totalorder %v532_v46, 15  ;;  %v546_v46 = vand.u32 15, %v420_v62  ;;  %v424_v62 = vadd.s32 152, %v6241_v10 }
  0x74   : > { %5832 = vmatpush3.bf16.msra.mxu1 %v6084_v9  ;;  %5785 = vmatprep.subr.bf16.mxu0 %v6085_v50  ;;  %v1613_v57 = vsel %vm8472_vm1, %v1572_v36, %v1573_v25  ;;  %v1614_v41 = vsel %vm8473_vm12, %v1571_v39, %v1572_v36  ;;  %v1611_v9 = vsel %vm8474_vm13, %v1574_v3, %v1575_v34  ;;  %v6089_v39 = vld [vmem:[%s8238_s3 + $0x118] sm:$0xff]  }
  0x75   : > { %5706 = vmatmul.mubr.msk.bf16.gmra.mxu0 %vm6899_vm3, %v6893_v12  ;;  %5833 = vmatprep.subr.bf16.mxu1 %v6086_v52  ;;  %v6949_v24 = vpack.c.bf16 %v1613_v57, %v1614_v41  ;;  %v6090_v36 = vld [vmem:[%s8238_s3 + $0x158] sm:$0xff]   ;;  %v8484_v57 = vunpack.c.h.bf16 %v6435_v37 }
  0x76   : > { %5754 = vmatmul.mubr.msk.bf16.gmra.mxu1 %vm6440_vm10, %v6444_v40  ;;  %5709 = vmatprep.mubr.msk.bf16.mxu0 %vm6910_vm6, %v6903_v5  ;;  %vm8475_vm10 = vmmov %vm8472_vm1 }
  0x77   : > { %5757 = vmatprep.mubr.msk.bf16.mxu1 %vm6451_vm11, %v6499_v28  ;;  %v1612_v61 = vsel %vm8475_vm10, %v1573_v25, %v1574_v3  ;;  %5786 = vmatpush3.bf16.msra.mxu0 %v6085_v50  ;;  %vm6955_vm10 = vmpackc.low %vm864_vm0, %vm8424_vm2  ;;  %v8476_v3 = vmov 0  ;;  %v8480_v25 = vunpack.c.l.bf16 %v6435_v37  ;;  %v1578_v41 = vrot.slane %v8484_v57, 1  ;;  %v6092_v37 = vld [vmem:[%s8238_s3 + $0x150] sm:$0xff]  }
  0x78   : > { %5834 = vmatpush3.bf16.msra.mxu1 %v6086_v52  ;;  %5787 = vmatprep.subr.bf16.mxu0 %v6087_v60  ;;  %v8477_v3 = vsel %vm6955_vm10, 4294967295, %v8476_v3  ;;  %v6959_v50 = vpack.c.bf16 %v1611_v9, %v1612_v61  ;;  %v8479_v52 = vunpack.c.h.bf16 %v6432_v35  ;;  %vm6966_vm1 = vmpackc.low %vm866_vm7, %vm8424_vm2  ;;  %v560_v9 = vand.u32 15, %v422_v32  ;;  %v6091_v35 = vld [vmem:[%s8238_s3 + $0x110] sm:$0xff]  }
  0x79   : > { %5835 = vmatprep.subr.bf16.mxu1 %v6088_v0  ;;  %8478 = vst [vmem:[#allocation31_spill] sm:$0xff] %v8477_v3  ;;  %v1577_v43 = vrot.slane %v8480_v25, 1  ;;  %v8482_v21 = vsel %vm6966_vm1, 4294967295, %v8481_v21  ;;  %vm8486_vm7 = vmmov %vm8473_vm12  ;;  %vm868_vm0 = vcmp.lt.s32.totalorder %v546_v46, 15  ;;  %v426_v32 = vadd.s32 168, %v6241_v10  ;;  %v7306_v3 = vld [vmem:[%s6254_s2 + $0x38] sm:$0xff]  }
  0x7a   : > { %v1576_v20 = vrot.slane %v8479_v52, 1  ;;  %8483 = vst [vmem:[#allocation32_spill] sm:$0xff] %v8482_v21  ;;  %vm8487_vm12 = vmmov %vm8486_vm7  ;;  %vm870_vm11 = vcmp.lt.s32.totalorder %v560_v9, 15  ;;  %v8493_v46 = vunpack.c.l.bf16 %v6520_v63  ;;  %v574_v9 = vand.u32 15, %v424_v62  ;;  %v6096_v62 = vld [vmem:[%s8238_s3 + $0x140] sm:$0xff]  }
  0x7b   : > { %5788 = vmatpush3.bf16.msra.mxu0 %v6087_v60  ;;  %vm8488_vm13 = vmmov %vm8486_vm7  ;;  %v6111_v21 = vld [vmem:[%s8238_s3 + $0x180] sm:$0xff]  }
  0x7c   : > { %5836 = vmatpush3.bf16.msra.mxu1 %v6088_v0  ;;  %5789 = vmatprep.subr.bf16.mxu0 %v6089_v39  ;;  %v1609_v45 = vsel %vm8486_vm7, %v1576_v20, %v1577_v43  ;;  %v1610_v60 = vsel %vm8487_vm12, %v1575_v34, %v1576_v20  ;;  %v1607_v0 = vsel %vm8488_vm13, %v1578_v41, %v1579_v38  ;;  %v6093_v34 = vld [vmem:[%s8238_s3 + $0x108] sm:$0xff]   ;;  %v1581_v57 = vrot.slane %v8493_v46, 1 }
  0x7d   : > { %5710 = vmatmul.mubr.msk.bf16.gmra.mxu0 %vm6955_vm10, %v6949_v24  ;;  %5837 = vmatprep.subr.bf16.mxu1 %v6090_v36  ;;  %v7005_v52 = vpack.c.bf16 %v1609_v45, %v1610_v60  ;;  %v6094_v20 = vld [vmem:[%s8238_s3 + $0x148] sm:$0xff]   ;;  %v8496_v45 = vunpack.c.h.bf16 %v6520_v63  ;;  %v430_v46 = vadd.s32 200, %v6241_v10 }
  0x7e   : > { %5758 = vmatmul.mubr.msk.bf16.gmra.mxu1 %vm6509_vm14, %v6513_v47  ;;  %5713 = vmatprep.mubr.msk.bf16.mxu0 %vm6966_vm1, %v6959_v50  ;;  %vm8489_vm14 = vmmov %vm8486_vm7 }
  0x7f   : > { %5761 = vmatprep.mubr.msk.bf16.mxu1 %vm6523_vm15, %v6569_v58  ;;  %v1608_v61 = vsel %vm8489_vm14, %v1577_v43, %v1578_v41  ;;  %5790 = vmatpush3.bf16.msra.mxu0 %v6089_v39  ;;  %vm7011_vm14 = vmpackc.low %vm868_vm0, %vm8424_vm2  ;;  %v8494_v41 = vmov 0  ;;  %v1582_v60 = vrot.slane %v8496_v45, 1  ;;  %vm872_vm0 = vcmp.lt.s32.totalorder %v574_v9, 15 }
  0x80   : > { %5838 = vmatpush3.bf16.msra.mxu1 %v6090_v36  ;;  %5791 = vmatprep.subr.bf16.mxu0 %v6091_v35  ;;  %v7015_v39 = vpack.c.bf16 %v1607_v0, %v1608_v61  ;;  %v8492_v36 = vunpack.c.h.bf16 %v6504_v42  ;;  %vm7022_vm7 = vmpackc.low %vm870_vm11, %vm8424_vm2  ;;  %v588_v0 = vand.u32 15, %v426_v32  ;;  %v6095_v61 = vld [vmem:[%s8238_s3 + $0x100] sm:$0xff]   ;;  %v8504_v9 = vunpack.c.h.bf16 %v6585_v14 }
  0x81   : > { %5839 = vmatprep.subr.bf16.mxu1 %v6092_v37  ;;  %v8495_v41 = vsel %vm7022_vm7, 4294967295, %v8494_v41  ;;  %vm8498_vm11 = vmmov %vm8487_vm12 }
  0x82   : > { %v1580_v43 = vrot.slane %v8492_v36, 1  ;;  %vm8499_vm12 = vmmov %vm8498_vm11  ;;  %v428_v36 = vadd.s32 184, %v6241_v10  ;;  %vm874_vm15 = vcmp.lt.s32.totalorder %v588_v0, 15  ;;  %v1584_v45 = vrot.slane %v8504_v9, 1 }
  0x83   : > { %5792 = vmatpush3.bf16.msra.mxu0 %v6091_v35  ;;  %vm8500_vm13 = vmmov %vm8498_vm11 }
  0x84   : > { %5840 = vmatpush3.bf16.msra.mxu1 %v6092_v37  ;;  %5793 = vmatprep.subr.bf16.mxu0 %v6093_v34  ;;  %v1605_v1 = vsel %vm8498_vm11, %v1580_v43, %v1581_v57  ;;  %v1606_v35 = vsel %vm8499_vm12, %v1579_v38, %v1580_v43  ;;  %v1603_v37 = vsel %vm8500_vm13, %v1582_v60, %v1583_v44  ;;  %v7061_v38 = vld [vmem:[%s8238_s3 + $0x1b8] sm:$0xff]  }
  0x85   : > { %5714 = vmatmul.mubr.msk.bf16.gmra.mxu0 %vm7011_vm14, %v7005_v52  ;;  %5841 = vmatprep.subr.bf16.mxu1 %v6094_v20  ;;  %v7063_v43 = vpack.c.bf16 %v1605_v1, %v1606_v35  ;;  %v8506_v1 = vmov 0  ;;  %v602_v35 = vand.u32 15, %v428_v36  ;;  %v434_v36 = vadd.s32 232, %v6241_v10 }
  0x86   : > { %5762 = vmatmul.mubr.msk.bf16.gmra.mxu1 %vm6574_vm5, %v6578_v33  ;;  %5717 = vmatprep.mubr.msk.bf16.mxu0 %vm7022_vm7, %v7015_v39  ;;  %vm8501_vm5 = vmmov %vm8498_vm11 }
  0x87   : > { %5765 = vmatprep.mubr.msk.bf16.mxu1 %vm6590_vm8, %v6643_v56  ;;  %v1604_v32 = vsel %vm8501_vm5, %v1581_v57, %v1582_v60  ;;  %5794 = vmatpush3.bf16.msra.mxu0 %v6093_v34  ;;  %v7068_v57 = vld [vmem:[%s8238_s3 + $0x1f8] sm:$0xff]   ;;  %vm7071_vm5 = vmpackc.low %vm872_vm0, %vm8424_vm2  ;;  %v8502_v34 = vmov 0  ;;  %v8505_v60 = vunpack.c.l.bf16 %v6603_v8  ;;  %v8509_v56 = vunpack.c.l.bf16 %v6659_v48 }
  0x88   : > { %5842 = vmatpush3.bf16.msra.mxu1 %v6094_v20  ;;  %5795 = vmatprep.subr.bf16.mxu0 %v6095_v61  ;;  %v8503_v34 = vsel %vm7071_vm5, 4294967295, %v8502_v34  ;;  %v7075_v20 = vpack.c.bf16 %v1603_v37, %v1604_v32  ;;  %vm7082_vm11 = vmpackc.low %vm874_vm15, %vm8424_vm2  ;;  %v616_v37 = vand.u32 15, %v430_v46  ;;  %vm8510_vm15 = vnez %v8406_v7 }
  0x89   : > { %5843 = vmatprep.subr.bf16.mxu1 %v6096_v62  ;;  %v1585_v0 = vrot.slane %v8505_v60, 1  ;;  %v8507_v1 = vsel %vm7082_vm11, 4294967295, %v8506_v1  ;;  %v1587_v33 = vrot.slane %v8509_v56, 1  ;;  %vm8511_vm0 = vmmov %vm8499_vm12  ;;  %vm876_vm13 = vcmp.lt.s32.totalorder %v602_v35, 15 }
  0x8a   : > { %v1602_v56 = vsel %vm8511_vm0, %v1583_v44, %v1584_v45  ;;  %vm8512_vm8 = vnez %v8409_v6  ;;  %v432_v32 = vadd.s32 216, %v6241_v10  ;;  %v8515_v44 = vmov 0 }
  0x8b   : > { %5796 = vmatpush3.bf16.msra.mxu0 %v6095_v61  ;;  %v1601_v55 = vsel %vm8499_vm12, %v1584_v45, %v1585_v0  ;;  %vm7117_vm12 = vmpackc.low %vm876_vm13, %vm8424_vm2  ;;  %v8518_v45 = vunpack.c.h.bf16 %v6659_v48  ;;  %v8519_v35 = vunpack.c.l.bf16 %v6673_v13  ;;  %v8524_v6 = vunpack.c.l.bf16 %v6261_v15 }
  0x8c   : > { %5844 = vmatpush3.bf16.msra.mxu1 %v6096_v62  ;;  %5877 = vmatprep.subr.bf16.mxu0 %v7061_v38  ;;  %v7114_v46 = vpack.c.bf16 %v1601_v55, %v1602_v56  ;;  %v8516_v44 = vsel %vm7117_vm12, 4294967295, %v8515_v44  ;;  %v8521_v55 = vmov 0  ;;  %v630_v56 = vand.u32 15, %v432_v32  ;;  %vm8527_vm13 = vmmov %vm8511_vm0 }
  0x8d   : > { %5718 = vmatmul.mubr.msk.bf16.gmra.mxu0 %vm7071_vm5, %v7063_v43  ;;  %5925 = vmatprep.subr.bf16.mxu1 %v7068_v57  ;;  %vm8513_vm5 = vmmov %vm8511_vm0  ;;  %8517 = vst [vmem:[#allocation33_spill] sm:$0xff] %v8516_v44  ;;  %v1588_v60 = vrot.slane %v8518_v45, 1  ;;  %v1591_v7 = vrot.slane %v8524_v6, 1  ;;  %v436_v45 = vadd.s32 248, %v6241_v10 }
  0x8e   : > { %5766 = vmatmul.mubr.msk.bf16.gmra.mxu1 %vm8510_vm15, %v6656_v53  ;;  %5721 = vmatprep.mubr.msk.bf16.mxu0 %vm7082_vm11, %v7075_v20  ;;  %v1599_v61 = vsel %vm8513_vm5, %v1586_v23, %v1587_v33  ;;  %vm8514_vm15 = vmmov %vm8511_vm0  ;;  %vm878_vm11 = vcmp.lt.s32.totalorder %v616_v37, 15 }
  0x8f   : > { %5769 = vmatprep.mubr.msk.bf16.mxu1 %vm8512_vm8, %v6697_v29  ;;  %v1600_v62 = vsel %vm8514_vm15, %v1585_v0, %v1586_v23  ;;  %v1589_v23 = vrot.slane %v8519_v35, 1  ;;  %v8520_v0 = vunpack.c.h.bf16 %v6673_v13  ;;  %vm7130_vm5 = vmpackc.low %vm878_vm11, %vm8424_vm2  ;;  %vm8525_vm15 = vnez %v8412_v4  ;;  %v8530_v35 = vld [vmem:[#allocation22_spill] sm:$0xff] }
  0x90   : > { %v7121_v9 = vpack.c.bf16 %v1599_v61, %v1600_v62  ;;  %v8522_v55 = vsel %vm7130_vm5, 4294967295, %v8521_v55  ;;  %v644_v61 = vand.u32 15, %v434_v36  ;;  %vm8526_vm11 = vmmov %vm8511_vm0  ;;  %v1598_v32 = vsel %vm8511_vm0, %v1587_v33, %v1588_v60 }
  0x91   : > { %v1590_v37 = vrot.slane %v8520_v0, 1  ;;  %8523 = vst [vmem:[#allocation34_spill] sm:$0xff] %v8522_v55  ;;  %v1597_v62 = vsel %vm8526_vm11, %v1588_v60, %v1589_v23  ;;  %vm880_vm8 = vcmp.lt.s32.totalorder %v630_v56, 15  ;;  %v8532_v33 = vunpack.c.h.bf16 %v6261_v15  ;;  %v8541_v15 = vld [vmem:[#allocation25_spill] sm:$0xff] }
  0x92   : > { %v7158_v4 = vpack.c.bf16 %v1597_v62, %v1598_v32  ;;  %vm7165_vm11 = vmpackc.low %vm880_vm8, %vm8424_vm2  ;;  %v658_v0 = vand.u32 15, %v436_v45  ;;  %v8542_v32 = vld [vmem:[#allocation24_spill] sm:$0xff]  ;;  %v8545_v45 = vld [vmem:[#allocation26_spill] sm:$0xff] }
  0x93   : > { %v1596_v6 = vsel %vm8527_vm13, %v1589_v23, %v1590_v37  ;;  %v7162_v60 = vrot.slane %v8532_v33, 1  ;;  %v8533_v23 = vmov 0  ;;  %vm8543_vm8 = vnez %v8542_v32  ;;  %v8547_v33 = vld [vmem:[#allocation27_spill] sm:$0xff]  ;;  %v8549_v32 = vld [vmem:[#allocation4_spill] sm:$0xff] }
  0x94   : > { %8531 = vst [vmem:[#allocation22_spill] sm:$0xff] %v7158_v4  ;;  %v8534_v23 = vsel %vm7165_vm11, 4294967295, %v8533_v23  ;;  %vm884_vm13 = vcmp.lt.s32.totalorder %v658_v0, 15 }
  0x95   : > { %5722 = vmatmul.mubr.msk.bf16.gmra.mxu0 %vm7117_vm12, %v7114_v46  ;;  %vm8528_vm12 = vnez %v8415_v2  ;;  %8535 = vst [vmem:[#allocation35_spill] sm:$0xff] %v8534_v23 }
  0x96   : > { %5770 = vmatmul.mubr.msk.bf16.gmra.mxu1 %vm8525_vm15, %v6704_v26  ;;  %5725 = vmatprep.mubr.msk.bf16.mxu0 %vm7130_vm5, %v7121_v9  ;;  %vm8529_vm15 = vmmov %vm8511_vm0  ;;  %vm882_vm5 = vcmp.lt.s32.totalorder %v644_v61, 15  ;;  %v8540_v61 = vunpack.c.l.bf16 %v8530_v35 }
  0x97   : > { %5773 = vmatprep.mubr.msk.bf16.mxu1 %vm8528_vm12, %v6745_v19  ;;  %v1595_v36 = vsel %vm8529_vm15, %v1590_v37, %v1591_v7  ;;  %vm7172_vm15 = vmpackc.low %vm882_vm5, %vm8424_vm2  ;;  %v8537_v37 = vmov 0  ;;  %vm8546_vm12 = vnez %v8545_v45 }
  0x98   : > { %v7169_v56 = vpack.c.bf16 %v1595_v36, %v1596_v6  ;;  %v8538_v37 = vsel %vm7172_vm15, 4294967295, %v8537_v37  ;;  %v2058_v62 = vrot.slane %v8540_v61, 7  ;;  %vm8544_vm5 = vmmov %vm8511_vm0  ;;  %v1625_v36 = vsel %vm8511_vm0, %v7162_v60, %v6743_v51  ;;  %v6121_v51 = vld [vmem:[%s6254_s2] sm:$0xff]  }
  0x99   : > { %8539 = vst [vmem:[#allocation37_spill] sm:$0xff] %v8538_v37  ;;  %v7190_v6 = vsel %vm8544_vm5, %v1591_v7, %v7162_v60  ;;  %vm7207_vm5 = vmpackc.low %vm884_vm13, %vm8424_vm2  ;;  %vm8555_vm2 = vnez %v8455_v30  ;;  %vm8557_vm0 = vnez %v8507_v1  ;;  %vm8559_vm13 = vnez %v8516_v44 }
  0x9a   : > { %8536 = vst [vmem:[#allocation36_spill] sm:$0xff] %v7169_v56  ;;  %v4723_v2 = vpack.c.bf16 %v1625_v36, %v7190_v6  ;;  %v6102_v36 = vld [vmem:[%s8238_s3 + $0x1e8] sm:$0xff]  }
  0x9d   : > { %5726 = vmatmul.mubr.msk.bf16.gmra.mxu0 %vm7165_vm11, %v7158_v4 }
  0x9e   : > { %5774 = vmatmul.mubr.msk.bf16.gmra.mxu1 %vm8543_vm8, %v8541_v15  ;;  %5729 = vmatprep.mubr.msk.bf16.mxu0 %vm7172_vm15, %v7169_v56  ;;  %vm8548_vm8 = vcmp.lt.s32.totalorder %v6241_v10, 1  ;;  %v8551_v15 = vmov 0 }
  0x9f   : > { %5777 = vmatprep.mubr.msk.bf16.mxu1 %vm8546_vm12, %v6804_v11  ;;  %v2060_v61 = vsel %vm8548_vm8, %v2058_v62, %v8547_v33  ;;  %vm8550_vm15 = vmmov %vm8548_vm8  ;;  %v8552_v15 = vsel %vm7207_vm5, 4294967295, %v8551_v15  ;;  %vm8556_vm8 = vnez %v8503_v34 }
  0xa0   : > { %v2061_v7 = vsel %vm8550_vm15, %v8549_v32, %v2058_v62  ;;  %8553 = vst [vmem:[#allocation26_spill] sm:$0xff] %v8552_v15  ;;  %vm8554_vm15 = vnez %v8444_v54  ;;  %v6099_v62 = vld [vmem:[%s8238_s3 + $0x1b0] sm:$0xff]   ;;  %v7226_v32 = vld [vmem:[%s6254_s2 + $0x8] sm:$0xff]  }
  0xa1   : > { %v7211_v0 = vpack.c.bf16 %v2060_v61, %v2061_v7  ;;  %v6103_v61 = vld [vmem:[%s8238_s3 + $0x1a0] sm:$0xff]   ;;  %v6131_v15 = vld [vmem:[%s6254_s2 + $0x48] sm:$0xff]  }
  0xa2   : > { %v7264_v7 = vld [vmem:[%s6254_s2 + $0x20] sm:$0xff]  }
  0xa5   : > { %5730 = vmatmul.mubr.msk.bf16.gmra.mxu0 %vm7207_vm5, %v4723_v2  ;;  %v6100_v2 = vld [vmem:[%s8238_s3 + $0x1f0] sm:$0xff]  }
  0xa6   : > { %5778 = vmatmul.mubr.msk.bf16.gmra.mxu1 %vm6800_vm4, %v7211_v0  ;;  %5797 = vmatprep.mubr.bf16.mxu0 %v6121_v51  ;;  %v7236_v51 = vld [vmem:[%s6254_s2 + $0x10] sm:$0xff]  }
  0xa7   : > { %5845 = vmatprep.mubr.msk.bf16.mxu1 %vm8554_vm15, %v6838_v17  ;;  %v6101_v17 = vld [vmem:[%s8238_s3 + $0x1a8] sm:$0xff]  }
  0xad   : > { %5798 = vmatmul.mubr.bf16.vlgmr.msra.gmra.mxu0 %v7226_v32 }
  0xae   : > { %5846 = vmatmul.mubr.msk.bf16.vlgmr.msra.gmra.mxu1 %vm6841_vm9, %v6845_v49  ;;  %5801 = vmatprep.mubr.bf16.mxu0 %v7236_v51 }
  0xaf   : > { %5849 = vmatprep.mubr.msk.bf16.mxu1 %vm8555_vm2, %v6893_v12  ;;  %5878 = vmatpush3.bf16.msra.mxu0 %v7061_v38  ;;  %v7254_v38 = vld [vmem:[%s6254_s2 + $0x18] sm:$0xff]  }
  0xb0   : > { %5926 = vmatpush3.bf16.msra.mxu1 %v7068_v57  ;;  %5879 = vmatprep.subr.bf16.mxu0 %v6099_v62  ;;  %v6104_v57 = vld [vmem:[%s8238_s3 + $0x1e0] sm:$0xff]  }
  0xb1   : > { %5927 = vmatprep.subr.bf16.mxu1 %v6100_v2 }
  0xb3   : > { %5880 = vmatpush3.bf16.msra.mxu0 %v6099_v62  ;;  %v6105_v62 = vld [vmem:[%s8238_s3 + $0x198] sm:$0xff]  }
  0xb4   : > { %5928 = vmatpush3.bf16.msra.mxu1 %v6100_v2  ;;  %5881 = vmatprep.subr.bf16.mxu0 %v6101_v17  ;;  %v6106_v2 = vld [vmem:[%s8238_s3 + $0x1d8] sm:$0xff]  }
  0xb5   : > { %5802 = vmatmul.mubr.bf16.gmra.mxu0 %v7254_v38  ;;  %5929 = vmatprep.subr.bf16.mxu1 %v6102_v36 }
  0xb6   : > { %5850 = vmatmul.mubr.msk.bf16.gmra.mxu1 %vm6899_vm3, %v6903_v5  ;;  %5805 = vmatprep.mubr.bf16.mxu0 %v7264_v7 }
  0xb7   : > { %5853 = vmatprep.mubr.msk.bf16.mxu1 %vm6910_vm6, %v6949_v24  ;;  %5882 = vmatpush3.bf16.msra.mxu0 %v6101_v17  ;;  %v6108_v17 = vld [vmem:[%s8238_s3 + $0x1d0] sm:$0xff]  }
  0xb8   : > { %5930 = vmatpush3.bf16.msra.mxu1 %v6102_v36  ;;  %5883 = vmatprep.subr.bf16.mxu0 %v6103_v61  ;;  %v7290_v36 = vld [vmem:[%s6254_s2 + $0x30] sm:$0xff]  }
  0xb9   : > { %5931 = vmatprep.subr.bf16.mxu1 %v6104_v57 }
  0xbb   : > { %5884 = vmatpush3.bf16.msra.mxu0 %v6103_v61  ;;  %v6109_v61 = vld [vmem:[%s8238_s3 + $0x188] sm:$0xff]  }
  0xbc   : > { %5932 = vmatpush3.bf16.msra.mxu1 %v6104_v57  ;;  %5885 = vmatprep.subr.bf16.mxu0 %v6105_v62  ;;  %v6110_v57 = vld [vmem:[%s8238_s3 + $0x1c8] sm:$0xff]  }
  0xbd   : > { %5806 = vmatmul.mubr.bf16.gmra.mxu0 %v7280_v27  ;;  %5933 = vmatprep.subr.bf16.mxu1 %v6106_v2 }
  0xbe   : > { %5854 = vmatmul.mubr.msk.bf16.gmra.mxu1 %vm6955_vm10, %v6959_v50  ;;  %5809 = vmatprep.mubr.bf16.mxu0 %v7290_v36 }
  0xbf   : > { %5857 = vmatprep.mubr.msk.bf16.mxu1 %vm6966_vm1, %v7005_v52  ;;  %5886 = vmatpush3.bf16.msra.mxu0 %v6105_v62  ;;  %v6112_v62 = vld [vmem:[%s8238_s3 + $0x1c0] sm:$0xff]  }
  0xc0   : > { %5934 = vmatpush3.bf16.msra.mxu1 %v6106_v2  ;;  %5887 = vmatprep.subr.bf16.mxu0 %v6107_v16 }
  0xc1   : > { %5935 = vmatprep.subr.bf16.mxu1 %v6108_v17 }
  0xc3   : > { %5888 = vmatpush3.bf16.msra.mxu0 %v6107_v16  ;;  %v6113_v16 = vld [vmem:[%s8238_s3 + $0x238] sm:$0xff]  }
  0xc4   : > { %5936 = vmatpush3.bf16.msra.mxu1 %v6108_v17  ;;  %5889 = vmatprep.subr.bf16.mxu0 %v6109_v61  ;;  %v8570_v17 = vld [vmem:[#allocation3_spill] sm:$0xff] }
  0xc5   : > { %5810 = vmatmul.mubr.bf16.gmra.mxu0 %v7306_v3  ;;  %5937 = vmatprep.subr.bf16.mxu1 %v6110_v57 }
  0xc6   : > { %5858 = vmatmul.mubr.msk.bf16.gmra.mxu1 %vm7011_vm14, %v7015_v39  ;;  %5813 = vmatprep.mubr.bf16.mxu0 %v6504_v42  ;;  %v8558_v42 = vunpack.c.l.bf16 %v8530_v35 }
  0xc7   : > { %5861 = vmatprep.mubr.msk.bf16.mxu1 %vm7022_vm7, %v7063_v43  ;;  %5890 = vmatpush3.bf16.msra.mxu0 %v6109_v61  ;;  %vm8561_vm7 = vcmp.lt.s32.totalorder %v6241_v10, 7 }
  0xc8   : > { %5938 = vmatpush3.bf16.msra.mxu1 %v6110_v57  ;;  %5891 = vmatprep.subr.bf16.mxu0 %v6111_v21  ;;  %v2702_v2 = vrot.slane %v8558_v42, 1 }
  0xc9   : > { %5939 = vmatprep.subr.bf16.mxu1 %v6112_v62 }
  0xcb   : > { %5892 = vmatpush3.bf16.msra.mxu0 %v6111_v21  ;;  %v8563_v21 = vunpack.c.h.bf16 %v8530_v35 }
  0xcc   : > { %5940 = vmatpush3.bf16.msra.mxu1 %v6112_v62  ;;  %5973 = vmatprep.subr.bf16.mxu0 %v6113_v16  ;;  %v8572_v62 = vld [vmem:[#allocation6_spill] sm:$0xff] }
  0xcd   : > { %5814 = vmatmul.mubr.bf16.gmra.mxu0 %v6520_v63 }
  0xce   : > { %5862 = vmatmul.mubr.msk.bf16.gmra.mxu1 %vm8556_vm8, %v7075_v20  ;;  %5817 = vmatprep.mubr.bf16.mxu0 %v6585_v14  ;;  %vm8560_vm8 = vnez %v8522_v55  ;;  %v2705_v14 = vsel %vm8561_vm7, %v7162_v60, %v2702_v2  ;;  %vm8565_vm7 = vnez %v8538_v37 }
  0xcf   : > { %5865 = vmatprep.mubr.msk.bf16.mxu1 %vm8557_vm0, %v7114_v46  ;;  %v7344_v63 = vpack.c.bf16 %v2705_v14, %v7190_v6  ;;  %v8569_v6 = vld [vmem:[#allocation5_spill] sm:$0xff] }
  0xd0   : > { %v8574_v14 = vld [vmem:[#allocation9_spill] sm:$0xff] }
  0xd1   : > { %8562 = vst [vmem:[#allocation27_spill] sm:$0xff] %v7344_v63 }
  0xd5   : > { %5818 = vmatmul.mubr.bf16.gmra.mxu0 %v6603_v8  ;;  %v7348_v8 = vrot.slane %v8563_v21, 1  ;;  %v8575_v21 = vld [vmem:[#allocation7_spill] sm:$0xff] }
  0xd6   : > { %5866 = vmatmul.mubr.msk.bf16.gmra.mxu1 %vm8559_vm13, %v7121_v9  ;;  %5821 = vmatprep.mubr.bf16.mxu0 %v6659_v48  ;;  %v7355_v48 = vld [vmem:[%s6254_s2 + $0x70] sm:$0xff]  }
  0xd7   : > { %5869 = vmatprep.mubr.msk.bf16.mxu1 %vm8560_vm8, %v7158_v4  ;;  %8564 = vst [vmem:[#allocation4_spill] sm:$0xff] %v7348_v8  ;;  %vm8566_vm8 = vcmp.lt.s32.totalorder %v6241_v10, 7 }
  0xd8   : > { %v7364_v60 = vsel %vm8566_vm8, %v2702_v2, %v7348_v8  ;;  %vm8568_vm13 = vmmov %vm8566_vm8  ;;  %vm8573_vm8 = vnez %v8363_v31 }
  0xd9   : > { %8567 = vst [vmem:[#allocation38_spill] sm:$0xff] %v7364_v60 }
  0xdd   : > { %5822 = vmatmul.mubr.bf16.gmra.mxu0 %v6673_v13  ;;  %v2735_v13 = vsel %vm8568_vm13, %v7348_v8, %v6749_v59  ;;  %v6114_v59 = vld [vmem:[%s8238_s3 + $0x230] sm:$0xff]  }
  0xde   : > { %5870 = vmatmul.mubr.msk.bf16.gmra.mxu1 %vm7165_vm11, %v7169_v56  ;;  %5825 = vmatprep.mubr.bf16.mxu0 %v7355_v48  ;;  %vm8571_vm11 = vcmp.lt.s32.totalorder %v6241_v10, 1  ;;  %v4891_v57 = vpack.c.bf16 %v2735_v13, %v7364_v60 }
  0xdf   : > { %5873 = vmatprep.mubr.msk.bf16.mxu1 %vm8565_vm7, %v7344_v63  ;;  %v3138_v61 = vsel %vm8571_vm11, %v8570_v17, %v8569_v6  ;;  %vm8576_vm11 = vnez %v8575_v21  ;;  %v8579_v21 = vld [vmem:[#allocation10_spill] sm:$0xff] }
  0xe0   : > { %v4918_v42 = vpack.c.bf16 %v8572_v62, %v3138_v61  ;;  %v6115_v61 = vld [vmem:[%s8238_s3 + $0x228] sm:$0xff]  }
  0xe5   : > { %5826 = vmatmul.mubr.bf16.gmra.mxu0 %v8530_v35  ;;  %v8577_v35 = vld [vmem:[#allocation8_spill] sm:$0xff] }
  0xe6   : > { %5874 = vmatmul.mubr.msk.bf16.gmra.mxu1 %vm7207_vm5, %v4891_v57  ;;  %5893 = vmatprep.mubr.msk.bf16.mxu0 %vm8573_vm8, %v4918_v42  ;;  %vm8578_vm13 = vnez %v8577_v35  ;;  %vm8580_vm8 = vnez %v8579_v21  ;;  %v8581_v35 = vld [vmem:[#allocation11_spill] sm:$0xff]  ;;  %v8583_v21 = vld [vmem:[#allocation12_spill] sm:$0xff] }
  0xe7   : > { %5941 = vmatprep.mubr.bf16.mxu1 %v7226_v32 }
  0xed   : > { %v5607_v2 = vpop.f32.mrf.mxu0  ;;  %5894 = vmatmul.mubr.msk.bf16.vlgmr.msra.gmra.mxu0 %vm8576_vm11, %v8574_v14  ;;  %vm8582_vm11 = vnez %v8581_v35  ;;  %v8585_v35 = vld [vmem:[#allocation15_spill] sm:$0xff] }
  0xee   : > { %v5655_v13 = vpop.f32.mrf.mxu1  ;;  %5942 = vmatmul.mubr.bf16.vlgmr.msra.gmra.mxu1 %v7236_v51  ;;  %5897 = vmatprep.mubr.msk.bf16.mxu0 %vm8578_vm13, %v6444_v40  ;;  %vm8584_vm13 = vnez %v8583_v21 }
  0xef   : > { %v7392_v31 = vadd.f32 %v5655_v13, %v5607_v2  ;;  %v1225_v6 = vpop.f32.mrf.mxu0  ;;  %5945 = vmatprep.mubr.bf16.mxu1 %v7254_v38  ;;  %5974 = vmatpush3.bf16.msra.mxu0 %v6113_v16  ;;  %v6116_v38 = vld [vmem:[%s8238_s3 + $0x220] sm:$0xff]  }
  0xf0   : > { %v1434_v32 = vpop.f32.mrf.mxu1  ;;  %5975 = vmatprep.subr.bf16.mxu0 %v6114_v59 }
  0xf1   : > { %v7398_v57 = vadd.f32 %v1434_v32, %v1225_v6  ;;  %v5608_v62 = vpop.f32.mrf.mxu0 }
  0xf2   : > { %v5656_v51 = vpop.f32.mrf.mxu1 }
  0xf3   : > { %v7400_v42 = vadd.f32 %v5656_v51, %v5608_v62  ;;  %v1228_v14 = vpop.f32.mrf.mxu0  ;;  %5976 = vmatpush3.bf16.msra.mxu0 %v6114_v59  ;;  %v6117_v62 = vld [vmem:[%s8238_s3 + $0x218] sm:$0xff]  }
  0xf4   : > { %v1437_v40 = vpop.f32.mrf.mxu1  ;;  %5977 = vmatprep.subr.bf16.mxu0 %v6115_v61 }
  0xf5   : > { %v7405_v16 = vadd.f32 %v1437_v40, %v1228_v14  ;;  %v5611_v2 = vpop.f32.mrf.mxu0  ;;  %5898 = vmatmul.mubr.msk.bf16.gmra.mxu0 %vm8580_vm8, %v6499_v28 }
  0xf6   : > { %v5659_v13 = vpop.f32.mrf.mxu1  ;;  %5946 = vmatmul.mubr.bf16.gmra.mxu1 %v7264_v7  ;;  %5901 = vmatprep.mubr.msk.bf16.mxu0 %vm8582_vm11, %v6513_v47 }
  0xf7   : > { %v7414_v59 = vadd.f32 %v5659_v13, %v5611_v2  ;;  %v1241_v6 = vpop.f32.mrf.mxu0  ;;  %5949 = vmatprep.mubr.bf16.mxu1 %v7280_v27  ;;  %5978 = vmatpush3.bf16.msra.mxu0 %v6115_v61  ;;  %v6118_v27 = vld [vmem:[%s8238_s3 + $0x210] sm:$0xff]  }
  0xf8   : > { %v1450_v32 = vpop.f32.mrf.mxu1  ;;  %5979 = vmatprep.subr.bf16.mxu0 %v6116_v38 }
  0xf9   : > { %v7420_v28 = vadd.f32 %v1450_v32, %v1241_v6  ;;  %v5612_v51 = vpop.f32.mrf.mxu0  ;;  %v8586_v6 = vld [vmem:[#allocation13_spill] sm:$0xff] }
  0xfa   : > { %v5660_v7 = vpop.f32.mrf.mxu1  ;;  %vm8587_vm8 = vnez %v8586_v6  ;;  %v8589_v6 = vld [vmem:[#allocation14_spill] sm:$0xff] }
  0xfb   : > { %v7422_v14 = vadd.f32 %v5660_v7, %v5612_v51  ;;  %v1244_v40 = vpop.f32.mrf.mxu0  ;;  %5980 = vmatpush3.bf16.msra.mxu0 %v6116_v38  ;;  %vm8590_vm11 = vnez %v8589_v6 }
  0xfc   : > { %v1453_v47 = vpop.f32.mrf.mxu1  ;;  %5981 = vmatprep.subr.bf16.mxu0 %v6117_v62 }
  0xfd   : > { %v7427_v61 = vadd.f32 %v1453_v47, %v1244_v40  ;;  %v5615_v2 = vpop.f32.mrf.mxu0  ;;  %5902 = vmatmul.mubr.msk.bf16.gmra.mxu0 %vm8584_vm13, %v6569_v58  ;;  %v6119_v58 = vld [vmem:[%s8238_s3 + $0x208] sm:$0xff]  }
  0xfe   : > { %v5663_v13 = vpop.f32.mrf.mxu1  ;;  %5950 = vmatmul.mubr.bf16.gmra.mxu1 %v7290_v36  ;;  %5905 = vmatprep.mubr.msk.bf16.mxu0 %vm8587_vm8, %v8585_v35  ;;  %v8588_v35 = vld [vmem:[#allocation17_spill] sm:$0xff] }
  0xff   : > { %v7436_v38 = vadd.f32 %v5663_v13, %v5615_v2  ;;  %v1257_v32 = vpop.f32.mrf.mxu0  ;;  %5953 = vmatprep.mubr.bf16.mxu1 %v7306_v3  ;;  %5982 = vmatpush3.bf16.msra.mxu0 %v6117_v62  ;;  %v6120_v3 = vld [vmem:[%s8238_s3 + $0x200] sm:$0xff]  }
 0x100   : > { %v1466_v51 = vpop.f32.mrf.mxu1  ;;  %5983 = vmatprep.subr.bf16.mxu0 %v6118_v27 }
 0x101   : > { %v7442_v7 = vadd.f32 %v1466_v51, %v1257_v32  ;;  %v5616_v36 = vpop.f32.mrf.mxu0  ;;  %v6130_v51 = vld [vmem:[%s6254_s2 + $0x40] sm:$0xff]  }
 0x102   : > { %v5664_v40 = vpop.f32.mrf.mxu1 }
 0x103   : > { %v7444_v47 = vadd.f32 %v5664_v40, %v5616_v36  ;;  %v1260_v2 = vpop.f32.mrf.mxu0  ;;  %5984 = vmatpush3.bf16.msra.mxu0 %v6118_v27  ;;  %v8591_v36 = vld [vmem:[#allocation16_spill] sm:$0xff] }
 0x104   : > { %v1469_v21 = vpop.f32.mrf.mxu1  ;;  %5985 = vmatprep.subr.bf16.mxu0 %v6119_v58  ;;  %vm8592_vm13 = vnez %v8591_v36 }
 0x105   : > { %v7449_v62 = vadd.f32 %v1469_v21, %v1260_v2  ;;  %v5619_v13 = vpop.f32.mrf.mxu0  ;;  %5906 = vmatmul.mubr.msk.bf16.gmra.mxu0 %vm8590_vm11, %v8588_v35 }
 0x106   : > { %v5667_v32 = vpop.f32.mrf.mxu1  ;;  %5954 = vmatmul.mubr.bf16.gmra.mxu1 %v6130_v51  ;;  %5909 = vmatprep.mubr.msk.bf16.mxu0 %vm8592_vm13, %v6656_v53 }
 0x107   : > { %v7458_v27 = vadd.f32 %v5667_v32, %v5619_v13  ;;  %v1273_v40 = vpop.f32.mrf.mxu0  ;;  %5957 = vmatprep.mubr.bf16.mxu1 %v6131_v15  ;;  %5986 = vmatpush3.bf16.msra.mxu0 %v6119_v58  ;;  %v8593_v32 = vld [vmem:[#allocation18_spill] sm:$0xff]  ;;  %v6132_v58 = vld [vmem:[%s6254_s2 + $0x50] sm:$0xff]  }
 0x108   : > { %v1482_v2 = vpop.f32.mrf.mxu1  ;;  %5987 = vmatprep.subr.bf16.mxu0 %v6120_v3  ;;  %vm8594_vm8 = vnez %v8593_v32 }
 0x109   : > { %v7461_v21 = vadd.f32 %v1482_v2, %v1273_v40  ;;  %v5620_v35 = vpop.f32.mrf.mxu0  ;;  %v8595_v40 = vld [vmem:[#allocation19_spill] sm:$0xff] }
 0x10a   : > { %v5668_v6 = vpop.f32.mrf.mxu1  ;;  %vm8596_vm11 = vnez %v8595_v40  ;;  %v8599_v40 = vld [vmem:[#allocation25_spill] sm:$0xff] }
 0x10b   : > { %v7463_v37 = vadd.f32 %v5668_v6, %v5620_v35  ;;  %v1276_v51 = vpop.f32.mrf.mxu0  ;;  %5988 = vmatpush3.bf16.msra.mxu0 %v6120_v3  ;;  %v6133_v3 = vld [vmem:[%s6254_s2 + $0x58] sm:$0xff]  }
 0x10c   : > { %v1485_v36 = vpop.f32.mrf.mxu1 }
 0x10d   : > { %v7465_v53 = vadd.f32 %v1485_v36, %v1276_v51  ;;  %v5623_v13 = vpop.f32.mrf.mxu0  ;;  %5910 = vmatmul.mubr.msk.bf16.gmra.mxu0 %vm8594_vm8, %v6697_v29 }
 0x10e   : > { %v5671_v15 = vpop.f32.mrf.mxu1  ;;  %5958 = vmatmul.mubr.bf16.gmra.mxu1 %v6132_v58  ;;  %5913 = vmatprep.mubr.msk.bf16.mxu0 %vm8596_vm11, %v6704_v26  ;;  %v8597_v26 = vld [vmem:[#allocation20_spill] sm:$0xff] }
 0x10f   : > { %v7474_v2 = vadd.f32 %v5671_v15, %v5623_v13  ;;  %v7476_v35 = vpop.f32.mrf.mxu0  ;;  %5961 = vmatprep.mubr.bf16.mxu1 %v6133_v3  ;;  %vm8598_vm13 = vnez %v8597_v26  ;;  %v6134_v15 = vld [vmem:[%s6254_s2 + $0x60] sm:$0xff]   ;;  %v8600_v3 = vld [vmem:[#allocation21_spill] sm:$0xff] }
 0x110   : > { %v7479_v6 = vpop.f32.mrf.mxu1  ;;  %vm8601_vm8 = vnez %v8600_v3 }
 0x111   : > { %v5624_v51 = vpop.f32.mrf.mxu0 }
 0x112   : > { %v5672_v36 = vpop.f32.mrf.mxu1 }
 0x113   : > { %v7481_v29 = vadd.f32 %v5672_v36, %v5624_v51  ;;  %v7483_v32 = vpop.f32.mrf.mxu0  ;;  %v6135_v36 = vld [vmem:[%s6254_s2 + $0x68] sm:$0xff]  }
 0x114   : > { %v7485_v58 = vpop.f32.mrf.mxu1 }
 0x115   : > { %v5627_v23 = vpop.f32.mrf.mxu0  ;;  %5914 = vmatmul.mubr.msk.bf16.gmra.mxu0 %vm8598_vm13, %v6745_v19  ;;  %vm8604_vm13 = vcmp.lt.s32.totalorder %v6241_v10, 1 }
 0x116   : > { %v5675_v13 = vpop.f32.mrf.mxu1  ;;  %5962 = vmatmul.mubr.bf16.gmra.mxu1 %v6134_v15  ;;  %5917 = vmatprep.mubr.msk.bf16.mxu0 %vm8601_vm8, %v8599_v40  ;;  %v8602_v40 = vld [vmem:[#allocation24_spill] sm:$0xff] }
 0x117   : > { %v7494_v63 = vadd.f32 %v5675_v13, %v5627_v23  ;;  %v1305_v51 = vpop.f32.mrf.mxu0  ;;  %5965 = vmatprep.mubr.bf16.mxu1 %v6135_v36  ;;  %vm8603_vm11 = vnez %v8602_v40 }
 0x118   : > { %v1514_v60 = vpop.f32.mrf.mxu1 }
 0x119   : > { %v7497_v8 = vadd.f32 %v1514_v60, %v1305_v51  ;;  %v5628_v55 = vpop.f32.mrf.mxu0  ;;  %v6136_v60 = vld [vmem:[%s6254_s2 + $0x78] sm:$0xff]  }
 0x11a   : > { %v5676_v56 = vpop.f32.mrf.mxu1 }
 0x11b   : > { %v7499_v26 = vadd.f32 %v5676_v56, %v5628_v55  ;;  %v1308_v19 = vpop.f32.mrf.mxu0  ;;  %v3108_v55 = vsel %vm8604_vm13, %v8547_v33, %v8570_v17  ;;  %v8605_v33 = vmov 0.0|0.0  }
 0x11c   : > { %v1517_v44 = vpop.f32.mrf.mxu1 }
 0x11d   : > { %v7501_v15 = vadd.f32 %v1517_v44, %v1308_v19  ;;  %v5631_v4 = vpop.f32.mrf.mxu0  ;;  %5918 = vmatmul.mubr.msk.bf16.gmra.mxu0 %vm8603_vm11, %v6804_v11 }
 0x11e   : > { %v5679_v23 = vpop.f32.mrf.mxu1  ;;  %5966 = vmatmul.mubr.bf16.gmra.mxu1 %v7355_v48  ;;  %5921 = vmatprep.mubr.msk.bf16.mxu0 %vm8546_vm12, %v7211_v0  ;;  %v4963_v48 = vpack.c.bf16 %v8570_v17, %v3108_v55 }
 0x11f   : > { %v7514_v56 = vadd.f32 %v5679_v23, %v5631_v4  ;;  %v1321_v44 = vpop.f32.mrf.mxu0  ;;  %5969 = vmatprep.mubr.bf16.mxu1 %v6136_v60 }
 0x120   : > { %v1530_v13 = vpop.f32.mrf.mxu1 }
 0x121   : > { %v7517_v3 = vadd.f32 %v1530_v13, %v1321_v44  ;;  %v5632_v11 = vpop.f32.mrf.mxu0 }
 0x122   : > { %v5680_v51 = vpop.f32.mrf.mxu1 }
 0x123   : > { %v7520_v36 = vadd.f32 %v5680_v51, %v5632_v11  ;;  %v1324_v45 = vpop.f32.mrf.mxu0 }
 0x124   : > { %v1533_v0 = vpop.f32.mrf.mxu1 }
 0x125   : > { %v7522_v19 = vadd.f32 %v1533_v0, %v1324_v45  ;;  %v5635_v40 = vpop.f32.mrf.mxu0  ;;  %5922 = vmatmul.mubr.msk.bf16.gmra.mxu0 %vm6800_vm4, %v4963_v48  ;;  %vm8610_vm4 = vnez %v8495_v41 }
 0x126   : > { %v5683_v4 = vpop.f32.mrf.mxu1  ;;  %5970 = vmatmul.mubr.bf16.gmra.mxu1 %v8605_v33  ;;  %5989 = vmatprep.mubr.msk.bf16.mxu0 %vm8554_vm15, %v6845_v49 }
 0x127   : > { %v7530_v23 = vadd.f32 %v5683_v4, %v5635_v40  ;;  %v1337_v17 = vpop.f32.mrf.mxu0 }
 0x128   : > { %v1546_v55 = vpop.f32.mrf.mxu1 }
 0x129   : > { %v7532_v44 = vadd.f32 %v1546_v55, %v1337_v17  ;;  %v5636_v60 = vpop.f32.mrf.mxu0 }
 0x12a   : > { %v5684_v13 = vpop.f32.mrf.mxu1 }
 0x12b   : > { %v7534_v11 = vadd.f32 %v5684_v13, %v5636_v60  ;;  %v1340_v51 = vpop.f32.mrf.mxu0 }
 0x12c   : > { %v1549_v22 = vpop.f32.mrf.mxu1 }
 0x12d   : > { %v7536_v48 = vadd.f32 %v1549_v22, %v1340_v51  ;;  %v5703_v45 = vpop.f32.mrf.mxu0  ;;  %5990 = vmatmul.mubr.msk.bf16.vlgmr.msra.gmra.mxu0 %vm6841_vm9, %v6893_v12  ;;  %vm8611_vm9 = vnez %v8503_v34  ;;  %v1502_v34 = vadd.f32 %v7485_v58, %v7483_v32  ;;  %v8615_v58 = vld [vmem:[#allocation36_spill] sm:$0xff] }
 0x12e   : > { %v1966_v54 = vadd.f32 %v5703_v45, %v7392_v31  ;;  %v5751_v49 = vpop.f32.mrf.mxu1  ;;  %5993 = vmatprep.mubr.msk.bf16.mxu0 %vm8555_vm2, %v6903_v5 }
 0x12f   : > { %v1837_v0 = vpop.f32.mrf.mxu0 }
 0x130   : > { %v1964_v40 = vadd.f32 %v1837_v0, %v7398_v57  ;;  %v7546_v4 = vadd.f32 %v5751_v49, %v1966_v54  ;;  %v2239_v33 = vpop.f32.mrf.mxu1 }
 0x131   : > { %v5704_v17 = vpop.f32.mrf.mxu0 }
 0x132   : > { %v1967_v55 = vadd.f32 %v5704_v17, %v7400_v42  ;;  %v7549_v60 = vadd.f32 %v2239_v33, %v1964_v40  ;;  %v5752_v18 = vpop.f32.mrf.mxu1 }
 0x133   : > { %v1840_v12 = vpop.f32.mrf.mxu0 }
 0x134   : > { %v1965_v31 = vadd.f32 %v1840_v12, %v7405_v16  ;;  %v7552_v13 = vadd.f32 %v5752_v18, %v1967_v55  ;;  %v2242_v51 = vpop.f32.mrf.mxu1 }
 0x135   : > { %v5707_v30 = vpop.f32.mrf.mxu0  ;;  %5994 = vmatmul.mubr.msk.bf16.gmra.mxu0 %vm6899_vm3, %v6949_v24 }
 0x136   : > { %v1970_v57 = vadd.f32 %v5707_v30, %v7414_v59  ;;  %v7558_v22 = vadd.f32 %v2242_v51, %v1965_v31  ;;  %v5755_v45 = vpop.f32.mrf.mxu1  ;;  %5997 = vmatprep.mubr.msk.bf16.mxu0 %vm6910_vm6, %v6959_v50 }
 0x137   : > { %v1853_v54 = vpop.f32.mrf.mxu0 }
 0x138   : > { %v1968_v16 = vadd.f32 %v1853_v54, %v7420_v28  ;;  %v7564_v49 = vadd.f32 %v5755_v45, %v1970_v57  ;;  %v2255_v0 = vpop.f32.mrf.mxu1 }
 0x139   : > { %v5708_v40 = vpop.f32.mrf.mxu0 }
 0x13a   : > { %v1971_v33 = vadd.f32 %v5708_v40, %v7422_v14  ;;  %v7567_v17 = vadd.f32 %v2255_v0, %v1968_v16  ;;  %v5756_v24 = vpop.f32.mrf.mxu1 }
 0x13b   : > { %v1856_v59 = vpop.f32.mrf.mxu0 }
 0x13c   : > { %v1969_v55 = vadd.f32 %v1856_v59, %v7427_v61  ;;  %v7570_v18 = vadd.f32 %v5756_v24, %v1971_v33  ;;  %v2258_v12 = vpop.f32.mrf.mxu1 }
 0x13d   : > { %v5711_v31 = vpop.f32.mrf.mxu0  ;;  %5998 = vmatmul.mubr.msk.bf16.gmra.mxu0 %vm6955_vm10, %v7005_v52  ;;  %vm8620_vm10 = vcmp.lt.s32.totalorder %v6241_v10, 7 }
 0x13e   : > { %v1974_v28 = vadd.f32 %v5711_v31, %v7436_v38  ;;  %v7576_v51 = vadd.f32 %v2258_v12, %v1969_v55  ;;  %v5759_v30 = vpop.f32.mrf.mxu1  ;;  %6001 = vmatprep.mubr.msk.bf16.mxu0 %vm6966_vm1, %v7015_v39 }
 0x13f   : > { %v1869_v5 = vpop.f32.mrf.mxu0 }
 0x140   : > { %v1972_v61 = vadd.f32 %v1869_v5, %v7442_v7  ;;  %v7582_v57 = vadd.f32 %v5759_v30, %v1974_v28  ;;  %v2271_v45 = vpop.f32.mrf.mxu1 }
 0x141   : > { %v5712_v42 = vpop.f32.mrf.mxu0 }
 0x142   : > { %v1975_v54 = vadd.f32 %v5712_v42, %v7444_v47  ;;  %v7585_v16 = vadd.f32 %v2271_v45, %v1972_v61  ;;  %v5760_v52 = vpop.f32.mrf.mxu1 }
 0x143   : > { %v1872_v38 = vpop.f32.mrf.mxu0 }
 0x144   : > { %v1973_v0 = vadd.f32 %v1872_v38, %v7449_v62  ;;  %v7588_v40 = vadd.f32 %v5760_v52, %v1975_v54  ;;  %v2274_v33 = vpop.f32.mrf.mxu1 }
 0x145   : > { %v5715_v24 = vpop.f32.mrf.mxu0  ;;  %6002 = vmatmul.mubr.msk.bf16.gmra.mxu0 %vm7011_vm14, %v7063_v43  ;;  %vm8627_vm14 = vmmov %vm8620_vm10 }
 0x146   : > { %v1978_v39 = vadd.f32 %v5715_v24, %v7458_v27  ;;  %v7594_v7 = vadd.f32 %v2274_v33, %v1973_v0  ;;  %v5763_v59 = vpop.f32.mrf.mxu1  ;;  %6005 = vmatprep.mubr.msk.bf16.mxu0 %vm8610_vm4, %v7075_v20  ;;  %v1499_v20 = vadd.f32 %v7479_v6, %v7476_v35  ;;  %v8612_v0 = vld [vmem:[#allocation22_spill] sm:$0xff]  ;;  %v8613_v33 = vld [vmem:[#allocation33_spill] sm:$0xff] }
 0x147   : > { %v1885_v47 = vpop.f32.mrf.mxu0  ;;  %vm8614_vm3 = vnez %v8613_v33 }
 0x148   : > { %v1976_v62 = vadd.f32 %v1885_v47, %v7461_v21  ;;  %v7600_v55 = vadd.f32 %v5763_v59, %v1978_v39  ;;  %v2287_v12 = vpop.f32.mrf.mxu1  ;;  %v8618_v47 = vld [vmem:[#allocation23_spill] sm:$0xff] }
 0x149   : > { %v5716_v31 = vpop.f32.mrf.mxu0 }
 0x14a   : > { %v1979_v50 = vadd.f32 %v5716_v31, %v7463_v37  ;;  %v7603_v25 = vadd.f32 %v2287_v12, %v1976_v62  ;;  %v5764_v43 = vpop.f32.mrf.mxu1  ;;  %v8619_v62 = vld [vmem:[#allocation4_spill] sm:$0xff] }
 0x14b   : > { %v1888_v27 = vpop.f32.mrf.mxu0  ;;  %v3752_v12 = vsel %vm8620_vm10, %v8619_v62, %v8618_v47 }
 0x14c   : > { %v1977_v28 = vadd.f32 %v1888_v27, %v7465_v53  ;;  %v7606_v30 = vadd.f32 %v5764_v43, %v1979_v50  ;;  %v2290_v14 = vpop.f32.mrf.mxu1 }
 0x14d   : > { %v5719_v41 = vpop.f32.mrf.mxu0  ;;  %6006 = vmatmul.mubr.msk.bf16.gmra.mxu0 %vm8611_vm9, %v7114_v46 }
 0x14e   : > { %v1982_v21 = vadd.f32 %v5719_v41, %v7474_v2  ;;  %v7614_v37 = vadd.f32 %v2290_v14, %v1977_v28  ;;  %v5767_v5 = vpop.f32.mrf.mxu1  ;;  %6009 = vmatprep.mubr.msk.bf16.mxu0 %vm8557_vm0, %v7121_v9  ;;  %v8621_v41 = vld [vmem:[#allocation38_spill] sm:$0xff] }
 0x14f   : > { %v1901_v53 = vpop.f32.mrf.mxu0 }
 0x150   : > { %v1980_v61 = vadd.f32 %v1901_v53, %v1499_v20  ;;  %v7619_v45 = vadd.f32 %v5767_v5, %v1982_v21  ;;  %v2303_v42 = vpop.f32.mrf.mxu1  ;;  %v5056_v20 = vpack.c.bf16 %v3752_v12, %v8621_v41 }
 0x151   : > { %v5720_v54 = vpop.f32.mrf.mxu0 }
 0x152   : > { %v1983_v46 = vadd.f32 %v5720_v54, %v7481_v29  ;;  %v7624_v35 = vadd.f32 %v2303_v42, %v1980_v61  ;;  %v5768_v2 = vpop.f32.mrf.mxu1  ;;  %v8616_v29 = vld [vmem:[#allocation34_spill] sm:$0xff]  ;;  %v8622_v54 = vld [vmem:[#allocation27_spill] sm:$0xff] }
 0x153   : > { %v1904_v6 = vpop.f32.mrf.mxu0  ;;  %vm8617_vm6 = vnez %v8616_v29 }
 0x154   : > { %v1981_v52 = vadd.f32 %v1904_v6, %v1502_v34  ;;  %v7626_v38 = vadd.f32 %v5768_v2, %v1983_v46  ;;  %v2306_v1 = vpop.f32.mrf.mxu1  ;;  %v8626_v6 = vld [vmem:[#allocation28_spill] sm:$0xff] }
 0x155   : > { %v5723_v9 = vpop.f32.mrf.mxu0  ;;  %6010 = vmatmul.mubr.msk.bf16.gmra.mxu0 %vm8614_vm3, %v8612_v0 }
 0x156   : > { %v1986_v24 = vadd.f32 %v5723_v9, %v7494_v63  ;;  %v7632_v39 = vadd.f32 %v2306_v1, %v1981_v52  ;;  %v5771_v32 = vpop.f32.mrf.mxu1  ;;  %6013 = vmatprep.mubr.msk.bf16.mxu0 %vm8617_vm6, %v8615_v58 }
 0x157   : > { %v1917_v59 = vpop.f32.mrf.mxu0 }
 0x158   : > { %v1984_v31 = vadd.f32 %v1917_v59, %v7497_v8  ;;  %v7642_v50 = vadd.f32 %v5771_v32, %v1986_v24  ;;  %v2319_v43 = vpop.f32.mrf.mxu1  ;;  %v8623_v8 = vld [vmem:[#allocation35_spill] sm:$0xff] }
 0x159   : > { %v5724_v27 = vpop.f32.mrf.mxu0  ;;  %vm8624_vm1 = vnez %v8623_v8 }
 0x15a   : > { %v1987_v63 = vadd.f32 %v5724_v27, %v7499_v26  ;;  %v7645_v28 = vadd.f32 %v2319_v43, %v1984_v31  ;;  %v5772_v14 = vpop.f32.mrf.mxu1 }
 0x15b   : > { %v1920_v21 = vpop.f32.mrf.mxu0 }
 0x15c   : > { %v1985_v5 = vadd.f32 %v1920_v21, %v7501_v15  ;;  %v7649_v53 = vadd.f32 %v5772_v14, %v1987_v63  ;;  %v2322_v61 = vpop.f32.mrf.mxu1  ;;  %v3782_v15 = vsel %vm8627_vm14, %v8618_v47, %v8626_v6 }
 0x15d   : > { %v5727_v42 = vpop.f32.mrf.mxu0  ;;  %6014 = vmatmul.mubr.msk.bf16.gmra.mxu0 %vm8624_vm1, %v8622_v54 }
 0x15e   : > { %v1990_v34 = vadd.f32 %v5727_v42, %v7514_v56  ;;  %v7655_v46 = vadd.f32 %v2322_v61, %v1985_v5  ;;  %v5775_v26 = vpop.f32.mrf.mxu1  ;;  %6017 = vmatprep.mubr.msk.bf16.mxu0 %vm8565_vm7, %v5056_v20  ;;  %v5059_v56 = vpack.c.bf16 %v3782_v15, %v8618_v47 }
 0x15f   : > { %v1933_v52 = vpop.f32.mrf.mxu0 }
 0x160   : > { %v1988_v1 = vadd.f32 %v1933_v52, %v7517_v3  ;;  %v7664_v9 = vadd.f32 %v5775_v26, %v1990_v34  ;;  %v2335_v0 = vpop.f32.mrf.mxu1 }
 0x161   : > { %v5728_v33 = vpop.f32.mrf.mxu0 }
 0x162   : > { %v1991_v24 = vadd.f32 %v5728_v33, %v7520_v36  ;;  %v7668_v32 = vadd.f32 %v2335_v0, %v1988_v1  ;;  %v5776_v58 = vpop.f32.mrf.mxu1 }
 0x163   : > { %v1936_v29 = vpop.f32.mrf.mxu0 }
 0x164   : > { %v1989_v59 = vadd.f32 %v1936_v29, %v7522_v19  ;;  %v7671_v62 = vadd.f32 %v5776_v58, %v1991_v24  ;;  %v2338_v10 = vpop.f32.mrf.mxu1 }
 0x165   : > { %v5731_v12 = vpop.f32.mrf.mxu0  ;;  %6018 = vmatmul.mubr.msk.bf16.gmra.mxu0 %vm7207_vm5, %v5059_v56 }
 0x166   : > { %v1994_v3 = vadd.f32 %v5731_v12, %v7530_v23  ;;  %v7676_v43 = vadd.f32 %v2338_v10, %v1989_v59  ;;  %v5779_v47 = vpop.f32.mrf.mxu1 }
 0x167   : > { %v1949_v27 = vpop.f32.mrf.mxu0 }
 0x168   : > { %v1992_v36 = vadd.f32 %v1949_v27, %v7532_v44  ;;  %v7679_v63 = vadd.f32 %v5779_v47, %v1994_v3  ;;  %v2351_v14 = vpop.f32.mrf.mxu1 }
 0x169   : > { %v5732_v41 = vpop.f32.mrf.mxu0 }
 0x16a   : > { %v1995_v19 = vadd.f32 %v5732_v41, %v7534_v11  ;;  %v7682_v20 = vadd.f32 %v2351_v14, %v1992_v36  ;;  %v5780_v21 = vpop.f32.mrf.mxu1 }
 0x16b   : > { %v1952_v5 = vpop.f32.mrf.mxu0 }
 0x16c   : > { %v1993_v61 = vadd.f32 %v1952_v5, %v7536_v48  ;;  %v7685_v42 = vadd.f32 %v5780_v21, %v1995_v19  ;;  %v2354_v23 = vpop.f32.mrf.mxu1 }
 0x16d   : > { %v5799_v54 = vpop.f32.mrf.mxu0 }
 0x16e   : > { %v7687_v8 = vadd.f32 %v2354_v23, %v1993_v61  ;;  %v2642_v44 = vadd.f32 %v5799_v54, %v7546_v4  ;;  %v5847_v34 = vpop.f32.mrf.mxu1 }
 0x16f   : > { %v2513_v26 = vpop.f32.mrf.mxu0 }
 0x170   : > { %v2640_v2 = vadd.f32 %v2513_v26, %v7549_v60  ;;  %v7691_v6 = vadd.f32 %v5847_v34, %v2642_v44  ;;  %v2883_v11 = vpop.f32.mrf.mxu1 }
 0x171   : > { %v5800_v15 = vpop.f32.mrf.mxu0 }
 0x172   : > { %v7694_v52 = vadd.f32 %v5800_v15, %v7552_v13  ;;  %v7696_v48 = vadd.f32 %v2883_v11, %v2640_v2  ;;  %v7698_v1 = vpop.f32.mrf.mxu1 }
 0x173   : > { %v2516_v0 = vpop.f32.mrf.mxu0 }
 0x174   : > { %v7701_v33 = vadd.f32 %v2516_v0, %v7558_v22  ;;  %v7703_v4 = vpop.f32.mrf.mxu1 }
 0x175   : > { %v5803_v56 = vpop.f32.mrf.mxu0 }
 0x176   : > { %v2646_v60 = vadd.f32 %v5803_v56, %v7564_v49  ;;  %v5851_v24 = vpop.f32.mrf.mxu1 }
 0x177   : > { %v2529_v58 = vpop.f32.mrf.mxu0 }
 0x178   : > { %v2644_v29 = vadd.f32 %v2529_v58, %v7567_v17  ;;  %v7707_v59 = vadd.f32 %v5851_v24, %v2646_v60  ;;  %v2899_v13 = vpop.f32.mrf.mxu1 }
 0x179   : > { %v5804_v10 = vpop.f32.mrf.mxu0 }
 0x17a   : > { %v7710_v12 = vadd.f32 %v5804_v10, %v7570_v18  ;;  %v7712_v31 = vadd.f32 %v2899_v13, %v2644_v29  ;;  %v7714_v22 = vpop.f32.mrf.mxu1 }
 0x17b   : > { %v2532_v3 = vpop.f32.mrf.mxu0 }
 0x17c   : > { %v7717_v47 = vadd.f32 %v2532_v3, %v7576_v51  ;;  %v7719_v49 = vpop.f32.mrf.mxu1 }
 0x17d   : > { %v5807_v27 = vpop.f32.mrf.mxu0 }
 0x17e   : > { %v2650_v17 = vadd.f32 %v5807_v27, %v7582_v57  ;;  %v5855_v36 = vpop.f32.mrf.mxu1 }
 0x17f   : > { %v2545_v14 = vpop.f32.mrf.mxu0 }
 0x180   : > { %v2648_v41 = vadd.f32 %v2545_v14, %v7585_v16  ;;  %v7723_v19 = vadd.f32 %v5855_v36, %v2650_v17  ;;  %v2915_v18 = vpop.f32.mrf.mxu1 }
 0x181   : > { %v5808_v21 = vpop.f32.mrf.mxu0 }
 0x182   : > { %v7726_v5 = vadd.f32 %v5808_v21, %v7588_v40  ;;  %v7728_v61 = vadd.f32 %v2915_v18, %v2648_v41  ;;  %v7730_v51 = vpop.f32.mrf.mxu1 }
 0x183   : > { %v2548_v23 = vpop.f32.mrf.mxu0 }
 0x184   : > { %v7733_v54 = vadd.f32 %v2548_v23, %v7594_v7  ;;  %v7735_v57 = vpop.f32.mrf.mxu1 }
 0x185   : > { %v5811_v44 = vpop.f32.mrf.mxu0 }
 0x186   : > { %v2654_v16 = vadd.f32 %v5811_v44, %v7600_v55  ;;  %v5859_v34 = vpop.f32.mrf.mxu1 }
 0x187   : > { %v2561_v26 = vpop.f32.mrf.mxu0 }
 0x188   : > { %v2652_v2 = vadd.f32 %v2561_v26, %v7603_v25  ;;  %v7739_v11 = vadd.f32 %v5859_v34, %v2654_v16  ;;  %v2931_v40 = vpop.f32.mrf.mxu1 }
 0x189   : > { %v5812_v15 = vpop.f32.mrf.mxu0 }
 0x18a   : > { %v7742_v0 = vadd.f32 %v5812_v15, %v7606_v30  ;;  %v7744_v56 = vadd.f32 %v2931_v40, %v2652_v2  ;;  %v7746_v7 = vpop.f32.mrf.mxu1 }
 0x18b   : > { %v2564_v60 = vpop.f32.mrf.mxu0 }
 0x18c   : > { %v7749_v24 = vadd.f32 %v2564_v60, %v7614_v37  ;;  %v7751_v55 = vpop.f32.mrf.mxu1 }
 0x18d   : > { %v5815_v58 = vpop.f32.mrf.mxu0 }
 0x18e   : > { %v2658_v25 = vadd.f32 %v5815_v58, %v7619_v45  ;;  %v5863_v29 = vpop.f32.mrf.mxu1 }
 0x18f   : > { %v2577_v13 = vpop.f32.mrf.mxu0 }
 0x190   : > { %v2656_v10 = vadd.f32 %v2577_v13, %v7624_v35  ;;  %v7755_v3 = vadd.f32 %v5863_v29, %v2658_v25  ;;  %v2947_v30 = vpop.f32.mrf.mxu1 }
 0x191   : > { %v5816_v27 = vpop.f32.mrf.mxu0 }
 0x192   : > { %v7758_v17 = vadd.f32 %v5816_v27, %v7626_v38  ;;  %v7760_v36 = vadd.f32 %v2947_v30, %v2656_v10  ;;  %v7762_v37 = vpop.f32.mrf.mxu1 }
 0x193   : > { %v2580_v14 = vpop.f32.mrf.mxu0 }
 0x194   : > { %v7765_v41 = vadd.f32 %v2580_v14, %v7632_v39  ;;  %v7767_v45 = vpop.f32.mrf.mxu1 }
 0x195   : > { %v5819_v18 = vpop.f32.mrf.mxu0 }
 0x196   : > { %v2662_v35 = vadd.f32 %v5819_v18, %v7642_v50  ;;  %v5867_v21 = vpop.f32.mrf.mxu1 }
 0x197   : > { %v2593_v23 = vpop.f32.mrf.mxu0 }
 0x198   : > { %v2660_v44 = vadd.f32 %v2593_v23, %v7645_v28  ;;  %v7771_v16 = vadd.f32 %v5867_v21, %v2662_v35  ;;  %v2963_v38 = vpop.f32.mrf.mxu1 }
 0x199   : > { %v5820_v34 = vpop.f32.mrf.mxu0 }
 0x19a   : > { %v7774_v26 = vadd.f32 %v5820_v34, %v7649_v53  ;;  %v7776_v2 = vadd.f32 %v2963_v38, %v2660_v44  ;;  %v7778_v39 = vpop.f32.mrf.mxu1 }
 0x19b   : > { %8630 = vst [vmem:[#allocation3_spill] sm:$0xff] %v7778_v39  ;;  %v2596_v40 = vpop.f32.mrf.mxu0 }
 0x19c   : > { %8629 = vst [vmem:[#allocation5_spill] sm:$0xff] %v7774_v26  ;;  %v7781_v15 = vadd.f32 %v2596_v40, %v7655_v46  ;;  %v7783_v50 = vpop.f32.mrf.mxu1 }
 0x19d   : > { %8632 = vst [vmem:[#allocation9_spill] sm:$0xff] %v7783_v50  ;;  %v5823_v60 = vpop.f32.mrf.mxu0 }
 0x19e   : > { %8631 = vst [vmem:[#allocation6_spill] sm:$0xff] %v7781_v15  ;;  %v2666_v28 = vadd.f32 %v5823_v60, %v7664_v9  ;;  %v5871_v58 = vpop.f32.mrf.mxu1 }
 0x19f   : > { %v2609_v25 = vpop.f32.mrf.mxu0 }
 0x1a0   : > { %v2664_v29 = vadd.f32 %v2609_v25, %v7668_v32  ;;  %v7787_v13 = vadd.f32 %v5871_v58, %v2666_v28  ;;  %v2979_v53 = vpop.f32.mrf.mxu1 }
 0x1a1   : > { %v5824_v10 = vpop.f32.mrf.mxu0 }
 0x1a2   : > { %v7790_v30 = vadd.f32 %v5824_v10, %v7671_v62  ;;  %v7792_v27 = vadd.f32 %v2979_v53, %v2664_v29  ;;  %v7794_v46 = vpop.f32.mrf.mxu1 }
 0x1a3   : > { %8634 = vst [vmem:[#allocation8_spill] sm:$0xff] %v7794_v46  ;;  %v2612_v14 = vpop.f32.mrf.mxu0 }
 0x1a4   : > { %8633 = vst [vmem:[#allocation7_spill] sm:$0xff] %v7790_v30  ;;  %v7797_v18 = vadd.f32 %v2612_v14, %v7676_v43  ;;  %v7799_v9 = vpop.f32.mrf.mxu1 }
 0x1a5   : > { %8636 = vst [vmem:[#allocation11_spill] sm:$0xff] %v7799_v9  ;;  %v5827_v35 = vpop.f32.mrf.mxu0 }
 0x1a6   : > { %8635 = vst [vmem:[#allocation10_spill] sm:$0xff] %v7797_v18  ;;  %v2670_v32 = vadd.f32 %v5827_v35, %v7679_v63  ;;  %v5875_v21 = vpop.f32.mrf.mxu1  ;;  %v8358_v18 = vmov 1.0  }
 0x1a7   : > { %v2625_v23 = vpop.f32.mrf.mxu0  ;;  %4313 = vmatprep.mubr.f32.mxu1 %v8358_v18 }
 0x1a8   : > { %v2668_v44 = vadd.f32 %v2625_v23, %v7682_v20  ;;  %v7803_v38 = vadd.f32 %v5875_v21, %v2670_v32  ;;  %v2995_v62 = vpop.f32.mrf.mxu1 }
 0x1a9   : > { %v5828_v34 = vpop.f32.mrf.mxu0 }
 0x1aa   : > { %v7806_v40 = vadd.f32 %v5828_v34, %v7685_v42  ;;  %v7808_v60 = vadd.f32 %v2995_v62, %v2668_v44  ;;  %v7810_v43 = vpop.f32.mrf.mxu1 }
 0x1ab   : > { %8638 = vst [vmem:[#allocation15_spill] sm:$0xff] %v7810_v43  ;;  %v2628_v28 = vpop.f32.mrf.mxu0 }
 0x1ac   : > { %8637 = vst [vmem:[#allocation12_spill] sm:$0xff] %v7806_v40  ;;  %v7813_v58 = vadd.f32 %v2628_v28, %v7687_v8  ;;  %v7815_v63 = vpop.f32.mrf.mxu1 }
 0x1ad   : > { %8640 = vst [vmem:[#allocation17_spill] sm:$0xff] %v7815_v63  ;;  %v5895_v25 = vpop.f32.mrf.mxu0 }
 0x1ae   : > { %8639 = vst [vmem:[#allocation13_spill] sm:$0xff] %v7813_v58  ;;  %v7818_v20 = vadd.f32 %v5895_v25, %v7691_v6  ;;  %v7820_v29 = vpop.f32.mrf.mxu1 }
 0x1af   : > { %v3286_v53 = vpop.f32.mrf.mxu0 }
 0x1b0   : > { %v7823_v42 = vadd.f32 %v3286_v53, %v7696_v48  ;;  %v7825_v10 = vpop.f32.mrf.mxu1 }
 0x1b1   : > { %v7827_v14 = vpop.f32.mrf.mxu0 }
 0x1b2   : > { %v7831_v8 = vpop.f32.mrf.mxu1 }
 0x1b3   : > { %v7829_v35 = vpop.f32.mrf.mxu0 }
 0x1b4   : > { %v7836_v6 = vpop.f32.mrf.mxu1 }
 0x1b5   : > { %v5899_v32 = vpop.f32.mrf.mxu0 }
 0x1b6   : > { %v7834_v21 = vadd.f32 %v5899_v32, %v7707_v59  ;;  %v7843_v62 = vpop.f32.mrf.mxu1 }
 0x1b7   : > { %v3302_v23 = vpop.f32.mrf.mxu0 }
 0x1b8   : > { %v7839_v44 = vadd.f32 %v3302_v23, %v7712_v31  ;;  %v7850_v53 = vpop.f32.mrf.mxu1 }
 0x1b9   : > { %v7841_v48 = vpop.f32.mrf.mxu0 }
 0x1ba   : > { %v7857_v31 = vpop.f32.mrf.mxu1 }
 0x1bb   : > { %v7845_v34 = vpop.f32.mrf.mxu0 }
 0x1bc   : > { %v7864_v40 = vpop.f32.mrf.mxu1 }
 0x1bd   : > { %v5903_v28 = vpop.f32.mrf.mxu0 }
 0x1be   : > { %v7848_v25 = vadd.f32 %v5903_v28, %v7723_v19 }
 0x1bf   : > { %v3318_v59 = vpop.f32.mrf.mxu0 }
 0x1c0   : > { %v7853_v32 = vadd.f32 %v3318_v59, %v7728_v61  ;;  %v7871_v61 = vpop.f32.mrf.mxu1 }
 0x1c1   : > { %v7855_v63 = vpop.f32.mrf.mxu0 }
 0x1c3   : > { %v7859_v23 = vpop.f32.mrf.mxu0 }
 0x1c5   : > { %v5907_v58 = vpop.f32.mrf.mxu0 }
 0x1c6   : > { %v7862_v43 = vadd.f32 %v5907_v58, %v7739_v11  ;;  %v7879_v11 = vpop.f32.mrf.mxu1 }
 0x1c7   : > { %v3334_v19 = vpop.f32.mrf.mxu0 }
 0x1c8   : > { %v7867_v28 = vadd.f32 %v3334_v19, %v7744_v56  ;;  %v7886_v19 = vpop.f32.mrf.mxu1 }
 0x1c9   : > { %v7869_v9 = vpop.f32.mrf.mxu0 }
 0x1ca   : > { %v7893_v18 = vpop.f32.mrf.mxu1 }
 0x1cb   : > { %v7873_v59 = vpop.f32.mrf.mxu0 }
 0x1cd   : > { %v5911_v46 = vpop.f32.mrf.mxu0 }
 0x1ce   : > { %v7877_v30 = vadd.f32 %v5911_v46, %v7755_v3 }
 0x1cf   : > { %v3350_v58 = vpop.f32.mrf.mxu0 }
 0x1d0   : > { %8641 = vst [vmem:[#allocation14_spill] sm:$0xff] %v7877_v30  ;;  %v7882_v50 = vadd.f32 %v3350_v58, %v7760_v36  ;;  %v7900_v36 = vpop.f32.mrf.mxu1 }
 0x1d1   : > { %v7884_v56 = vpop.f32.mrf.mxu0 }
 0x1d2   : > { %8642 = vst [vmem:[#allocation16_spill] sm:$0xff] %v7882_v50  ;;  %8643 = vst [vmem:[#allocation18_spill] sm:$0xff] %v7884_v56 }
 0x1d3   : > { %v7888_v15 = vpop.f32.mrf.mxu0 }
 0x1d4   : > { %8644 = vst [vmem:[#allocation19_spill] sm:$0xff] %v7888_v15  ;;  %v7907_v15 = vpop.f32.mrf.mxu1 }
 0x1d5   : > { %v5915_v39 = vpop.f32.mrf.mxu0 }
 0x1d6   : > { %v7891_v26 = vadd.f32 %v5915_v39, %v7771_v16 }
 0x1d7   : > { %v3366_v3 = vpop.f32.mrf.mxu0 }
 0x1d8   : > { %8645 = vst [vmem:[#allocation20_spill] sm:$0xff] %v7891_v26  ;;  %v7896_v46 = vadd.f32 %v3366_v3, %v7776_v2  ;;  %v7914_v2 = vpop.f32.mrf.mxu1 }
 0x1d9   : > { %v7898_v30 = vpop.f32.mrf.mxu0 }
 0x1da   : > { %8646 = vst [vmem:[#allocation25_spill] sm:$0xff] %v7896_v46  ;;  %8647 = vst [vmem:[#allocation21_spill] sm:$0xff] %v7898_v30 }
 0x1db   : > { %v7902_v58 = vpop.f32.mrf.mxu0 }
 0x1dc   : > { %8648 = vst [vmem:[#allocation24_spill] sm:$0xff] %v7902_v58  ;;  %v7921_v58 = vpop.f32.mrf.mxu1 }
 0x1dd   : > { %v5919_v50 = vpop.f32.mrf.mxu0 }
 0x1de   : > { %v7905_v56 = vadd.f32 %v5919_v50, %v7787_v13 }
 0x1df   : > { %v3382_v16 = vpop.f32.mrf.mxu0 }
 0x1e0   : > { %8649 = vst [vmem:[#allocation29_spill] sm:$0xff] %v7905_v56  ;;  %v7910_v39 = vadd.f32 %v3382_v16, %v7792_v27  ;;  %v3013_v27 = vadd.f32 %v7698_v1, %v7694_v52  ;;  %v7930_v16 = vpop.f32.mrf.mxu1  ;;  %v3017_v1 = vadd.f32 %v7714_v22, %v7710_v12 }
 0x1e1   : > { %v7912_v26 = vpop.f32.mrf.mxu0 }
 0x1e2   : > { %8650 = vst [vmem:[#allocation30_spill] sm:$0xff] %v7910_v39  ;;  %v3420_v22 = vadd.f32 %v7841_v48, %v3017_v1 }
 0x1e3   : > { %v7916_v3 = vpop.f32.mrf.mxu0 }
 0x1e4   : > { %8651 = vst [vmem:[#allocation31_spill] sm:$0xff] %v7916_v3  ;;  %v3011_v3 = vadd.f32 %v7703_v4, %v7701_v33  ;;  %v3687_v33 = vadd.f32 %v7825_v10, %v7823_v42  ;;  %v3694_v48 = vadd.f32 %v7857_v31, %v3420_v22 }
 0x1e5   : > { %v5923_v46 = vpop.f32.mrf.mxu0 }
 0x1e6   : > { %v7919_v30 = vadd.f32 %v5923_v46, %v7803_v38  ;;  %v3416_v38 = vadd.f32 %v7827_v14, %v3013_v27 }
 0x1e7   : > { %v3398_v50 = vpop.f32.mrf.mxu0 }
 0x1e8   : > { %8652 = vst [vmem:[#allocation32_spill] sm:$0xff] %v7919_v30  ;;  %v7924_v13 = vadd.f32 %v3398_v50, %v7808_v60  ;;  %v3414_v30 = vadd.f32 %v7829_v35, %v3011_v3  ;;  %v7938_v60 = vpop.f32.mrf.mxu1  ;;  %v3690_v52 = vadd.f32 %v7831_v8, %v3416_v38  ;;  %v3015_v3 = vadd.f32 %v7719_v49, %v7717_v47 }
 0x1e9   : > { %v7926_v56 = vpop.f32.mrf.mxu0 }
 0x1ea   : > { %8653 = vst [vmem:[#allocation22_spill] sm:$0xff] %v7924_v13  ;;  %v3689_v13 = vadd.f32 %v7820_v29, %v7818_v20  ;;  %v3688_v4 = vadd.f32 %v7836_v6, %v3414_v30  ;;  %v7954_v27 = vpop.f32.mrf.mxu1  ;;  %v3418_v49 = vadd.f32 %v7845_v34, %v3015_v3  ;;  %v3693_v6 = vadd.f32 %v7843_v62, %v7834_v21 }
 0x1eb   : > { %v7932_v39 = vpop.f32.mrf.mxu0  ;;  %v3691_v34 = vadd.f32 %v7850_v53, %v7839_v44  ;;  %v3019_v21 = vadd.f32 %v7735_v57, %v7733_v54 }
 0x1ec   : > { %8654 = vst [vmem:[#allocation33_spill] sm:$0xff] %v7932_v39  ;;  %v7974_v10 = vpop.f32.mrf.mxu1  ;;  %v3692_v38 = vadd.f32 %v7864_v40, %v3418_v49 }
 0x1ed   : > { %v5991_v46 = vpop.f32.mrf.mxu0  ;;  %v3422_v53 = vadd.f32 %v7859_v23, %v3019_v21  ;;  %v3695_v23 = vadd.f32 %v7879_v11, %v7853_v32 }
 0x1ee   : > { %v7948_v14 = vadd.f32 %v5991_v46, %v3689_v13  ;;  %v7991_v62 = vpop.f32.mrf.mxu1 }
 0x1ef   : > { %v3930_v50 = vpop.f32.mrf.mxu0 }
 0x1f0   : > { %v7964_v30 = vadd.f32 %v3930_v50, %v3687_v33  ;;  %v8004_v54 = vpop.f32.mrf.mxu1 }
 0x1f1   : > { %v5992_v39 = vpop.f32.mrf.mxu0 }
 0x1f2   : > { %v7950_v35 = vadd.f32 %v5992_v39, %v3690_v52  ;;  %v3021_v39 = vadd.f32 %v7730_v51, %v7726_v5 }
 0x1f3   : > { %v3933_v12 = vpop.f32.mrf.mxu0 }
 0x1f4   : > { %v5201_v20 = vpack.c.bf16 %v7950_v35, %v7948_v14  ;;  %v7968_v29 = vadd.f32 %v3933_v12, %v3688_v4  ;;  %v3424_v52 = vadd.f32 %v7855_v63, %v3021_v39  ;;  %v3697_v63 = vadd.f32 %v7871_v61, %v7848_v25  ;;  %v5964_v61 = vpop.f32.mrf.mxu1 }
 0x1f5   : > { %v5995_v47 = vpop.f32.mrf.mxu0  ;;  %v3025_v4 = vadd.f32 %v7746_v7, %v7742_v0  ;;  %v3696_v12 = vadd.f32 %v7893_v18, %v3422_v53  ;;  %v3023_v25 = vadd.f32 %v7751_v55, %v7749_v24  ;;  %v3701_v55 = vadd.f32 %v7900_v36, %v7862_v43  ;;  %v8658_v53 = vld [vmem:[#allocation5_spill] sm:$0xff] }
 0x1f6   : > { %5288 = vst [vmem:[%s7961_s17 + $0x8] sm:$0xff] %v5201_v20   ;;  %v5196_v42 = vpack.c.bf16 %v7968_v29, %v7964_v30  ;;  %v7985_v46 = vadd.f32 %v5995_v47, %v3693_v6  ;;  %v3698_v33 = vadd.f32 %v7886_v19, %v3424_v52  ;;  %v3027_v43 = vadd.f32 %v7767_v45, %v7765_v41  ;;  %v8657_v45 = vld [vmem:[#allocation14_spill] sm:$0xff] }
 0x1f7   : > { %v3946_v8 = vpop.f32.mrf.mxu0  ;;  %v3428_v47 = vadd.f32 %v7869_v9, %v3025_v4  ;;  %v3426_v32 = vadd.f32 %v7873_v59, %v3023_v25  ;;  %v3699_v59 = vadd.f32 %v7907_v15, %v7867_v28  ;;  %v8656_v28 = vld [vmem:[#allocation19_spill] sm:$0xff]  ;;  %v8661_v25 = vld [vmem:[#allocation6_spill] sm:$0xff] }
 0x1f8   : > { %5197 = vst [vmem:[%s7961_s17] sm:$0xff] %v5196_v42   ;;  %v7994_v5 = vadd.f32 %v3946_v8, %v3691_v34  ;;  %v3643_v42 = vpop.f32.mrf.mxu1  ;;  %v3029_v8 = vadd.f32 %v7762_v37, %v7758_v17  ;;  %v8655_v34 = vld [vmem:[#allocation18_spill] sm:$0xff] }
 0x1f9   : > { %v5996_v13 = vpop.f32.mrf.mxu0  ;;  %v3702_v9 = vadd.f32 %v7914_v2, %v3428_v47 }
 0x1fa   : > { %v7987_v50 = vadd.f32 %v5996_v13, %v3694_v48  ;;  %v3700_v48 = vadd.f32 %v7921_v58, %v3426_v32  ;;  %v5967_v36 = vpop.f32.mrf.mxu1  ;;  %v3430_v58 = vadd.f32 %v8656_v28, %v3027_v43 }
 0x1fb   : > { %v3949_v31 = vpop.f32.mrf.mxu0 }
 0x1fc   : > { %v5211_v51 = vpack.c.bf16 %v7987_v50, %v7985_v46  ;;  %v7998_v44 = vadd.f32 %v3949_v31, %v3692_v38  ;;  %v3432_v38 = vadd.f32 %v8655_v34, %v3029_v8  ;;  %v3656_v52 = vpop.f32.mrf.mxu1  ;;  %v8667_v34 = vld [vmem:[#allocation8_spill] sm:$0xff] }
 0x1fd   : > { %v5999_v40 = vpop.f32.mrf.mxu0 }
 0x1fe   : > { %5290 = vst [vmem:[%s7961_s17 + $0x18] sm:$0xff] %v5211_v51   ;;  %v5206_v1 = vpack.c.bf16 %v7998_v44, %v7994_v5  ;;  %v8015_v22 = vadd.f32 %v5999_v40, %v3697_v63  ;;  %v3705_v51 = vadd.f32 %v7930_v16, %v8657_v45  ;;  %v3706_v40 = vadd.f32 %v7954_v27, %v3432_v38  ;;  %v5968_v27 = vpop.f32.mrf.mxu1  ;;  %v8669_v45 = vld [vmem:[#allocation10_spill] sm:$0xff] }
 0x1ff   : > { %v3962_v57 = vpop.f32.mrf.mxu0 }
 0x200   : > { %5289 = vst [vmem:[%s7961_s17 + $0x10] sm:$0xff] %v5206_v1   ;;  %v8022_v49 = vadd.f32 %v3962_v57, %v3695_v23  ;;  %v8659_v1 = vld [vmem:[#allocation3_spill] sm:$0xff]  ;;  %v3659_v8 = vpop.f32.mrf.mxu1 }
 0x201   : > { %v6000_v3 = vpop.f32.mrf.mxu0  ;;  %v3033_v57 = vadd.f32 %v8659_v1, %v8658_v53 }
 0x202   : > { %v8017_v20 = vadd.f32 %v6000_v3, %v3698_v33  ;;  %v8660_v33 = vld [vmem:[#allocation16_spill] sm:$0xff]  ;;  %v3704_v3 = vadd.f32 %v7974_v10, %v3430_v58 }
 0x203   : > { %v3965_v19 = vpop.f32.mrf.mxu0  ;;  %v3703_v4 = vadd.f32 %v7938_v60, %v8660_v33 }
 0x204   : > { %v5221_v0 = vpack.c.bf16 %v8017_v20, %v8015_v22  ;;  %v8026_v7 = vadd.f32 %v3965_v19, %v3696_v12  ;;  %v8662_v19 = vld [vmem:[#allocation9_spill] sm:$0xff] }
 0x205   : > { %v6003_v18 = vpop.f32.mrf.mxu0  ;;  %v3031_v16 = vadd.f32 %v8662_v19, %v8661_v25  ;;  %v8672_v19 = vld [vmem:[#allocation29_spill] sm:$0xff] }
 0x206   : > { %5292 = vst [vmem:[%s7961_s17 + $0x28] sm:$0xff] %v5221_v0   ;;  %v5216_v11 = vpack.c.bf16 %v8026_v7, %v8022_v49  ;;  %v8041_v39 = vadd.f32 %v6003_v18, %v3701_v55  ;;  %v8663_v0 = vld [vmem:[#allocation21_spill] sm:$0xff] }
 0x207   : > { %v3978_v24 = vpop.f32.mrf.mxu0  ;;  %v3436_v18 = vadd.f32 %v8663_v0, %v3033_v57  ;;  %v8674_v0 = vld [vmem:[#allocation15_spill] sm:$0xff] }
 0x208   : > { %5291 = vst [vmem:[%s7961_s17 + $0x20] sm:$0xff] %v5216_v11   ;;  %v8048_v21 = vadd.f32 %v3978_v24, %v3699_v59  ;;  %v8664_v24 = vld [vmem:[#allocation24_spill] sm:$0xff] }
 0x209   : > { %v6004_v6 = vpop.f32.mrf.mxu0  ;;  %v3434_v55 = vadd.f32 %v8664_v24, %v3031_v16  ;;  %v8665_v59 = vld [vmem:[#allocation20_spill] sm:$0xff]  ;;  %v3710_v43 = vadd.f32 %v5964_v61, %v3436_v18  ;;  %v3713_v16 = vadd.f32 %v5967_v36, %v8672_v19 }
 0x20a   : > { %v8043_v13 = vadd.f32 %v6004_v6, %v3702_v9 }
 0x20b   : > { %v3981_v2 = vpop.f32.mrf.mxu0  ;;  %v3708_v58 = vadd.f32 %v3643_v42, %v3434_v55  ;;  %v8671_v42 = vld [vmem:[#allocation31_spill] sm:$0xff] }
 0x20c   : > { %v5231_v17 = vpack.c.bf16 %v8043_v13, %v8041_v39  ;;  %v8052_v37 = vadd.f32 %v3981_v2, %v3700_v48  ;;  %v3709_v48 = vadd.f32 %v7991_v62, %v8665_v59  ;;  %v8666_v2 = vld [vmem:[#allocation7_spill] sm:$0xff]  ;;  %v5971_v62 = vpop.f32.mrf.mxu1  ;;  %v8676_v59 = vld [vmem:[#allocation13_spill] sm:$0xff] }
 0x20d   : > { %v6007_v15 = vpop.f32.mrf.mxu0  ;;  %v3037_v38 = vadd.f32 %v8667_v34, %v8666_v2 }
 0x20e   : > { %5294 = vst [vmem:[%s7961_s17 + $0x38] sm:$0xff] %v5231_v17   ;;  %v5226_v31 = vpack.c.bf16 %v8052_v37, %v8048_v21  ;;  %v8067_v23 = vadd.f32 %v6007_v15, %v3705_v51  ;;  %v8668_v15 = vld [vmem:[#allocation25_spill] sm:$0xff]  ;;  %v8670_v51 = vld [vmem:[#allocation11_spill] sm:$0xff] }
 0x20f   : > { %v3994_v41 = vpop.f32.mrf.mxu0  ;;  %v3707_v28 = vadd.f32 %v8004_v54, %v8668_v15  ;;  %v3440_v53 = vadd.f32 %v7912_v26, %v3037_v38  ;;  %v8673_v26 = vld [vmem:[#allocation12_spill] sm:$0xff] }
 0x210   : > { %5293 = vst [vmem:[%s7961_s17 + $0x30] sm:$0xff] %v5226_v31   ;;  %v8074_v32 = vadd.f32 %v3994_v41, %v3703_v4  ;;  %v3041_v18 = vadd.f32 %v8674_v0, %v8673_v26  ;;  %v8681_v26 = vmov 1.0  }
 0x211   : > { %v6008_v63 = vpop.f32.mrf.mxu0 }
 0x212   : > { %v8069_v12 = vadd.f32 %v6008_v63, %v3706_v40  ;;  %v3035_v40 = vadd.f32 %v8670_v51, %v8669_v45  ;;  %v8679_v51 = vld [vmem:[#allocation32_spill] sm:$0xff] }
 0x213   : > { %v3997_v47 = vpop.f32.mrf.mxu0 }
 0x214   : > { %v5241_v11 = vpack.c.bf16 %v8069_v12, %v8067_v23  ;;  %v8078_v60 = vadd.f32 %v3997_v47, %v3704_v3  ;;  %v3438_v33 = vadd.f32 %v8671_v42, %v3035_v40  ;;  %v3672_v3 = vpop.f32.mrf.mxu1  ;;  %v3714_v47 = vadd.f32 %v5968_v27, %v3440_v53  ;;  %v8680_v53 = vld [vmem:[#allocation22_spill] sm:$0xff] }
 0x215   : > { %v6011_v10 = vpop.f32.mrf.mxu0  ;;  %v3444_v27 = vadd.f32 %v7926_v56, %v3041_v18  ;;  %v3717_v40 = vadd.f32 %v5971_v62, %v8679_v51  ;;  %v4333_v18 = vmul.f32 %v8041_v39, %v8041_v39 }
 0x216   : > { %5296 = vst [vmem:[%s7961_s17 + $0x48] sm:$0xff] %v5241_v11   ;;  %v5236_v9 = vpack.c.bf16 %v8078_v60, %v8074_v32  ;;  %v8091_v31 = vadd.f32 %v6011_v10, %v3709_v48  ;;  %v8675_v10 = vld [vmem:[#allocation30_spill] sm:$0xff]  ;;  %v3712_v55 = vadd.f32 %v3659_v8, %v3438_v33  ;;  %v8677_v48 = vld [vmem:[#allocation17_spill] sm:$0xff]  ;;  %v5972_v2 = vpop.f32.mrf.mxu1 }
 0x217   : > { %v4010_v6 = vpop.f32.mrf.mxu0  ;;  %v3711_v24 = vadd.f32 %v3656_v52, %v8675_v10  ;;  %v8678_v8 = vld [vmem:[#allocation33_spill] sm:$0xff]  ;;  %v3718_v56 = vadd.f32 %v5972_v2, %v3444_v27  ;;  %v4332_v10 = vmul.f32 %v8052_v37, %v8052_v37  ;;  %v4324_v2 = vmul.f32 %v7998_v44, %v7998_v44 }
 0x218   : > { %5295 = vst [vmem:[%s7961_s17 + $0x40] sm:$0xff] %v5236_v9   ;;  %v8098_v1 = vadd.f32 %v4010_v6, %v3707_v28 }
 0x219   : > { %v6012_v17 = vpop.f32.mrf.mxu0 }
 0x21a   : > { %v8093_v41 = vadd.f32 %v6012_v17, %v3710_v43  ;;  %v3039_v43 = vadd.f32 %v8677_v48, %v8676_v59  ;;  %v4328_v48 = vmul.f32 %v8026_v7, %v8026_v7 }
 0x21b   : > { %v4013_v61 = vpop.f32.mrf.mxu0 }
 0x21c   : > { %v5251_v57 = vpack.c.bf16 %v8093_v41, %v8091_v31  ;;  %v8102_v63 = vadd.f32 %v4013_v61, %v3708_v58  ;;  %v3442_v15 = vadd.f32 %v8678_v8, %v3039_v43  ;;  %v3675_v58 = vpop.f32.mrf.mxu1  ;;  %v4325_v43 = vmul.f32 %v7985_v46, %v7985_v46 }
 0x21d   : > { %v6015_v54 = vpop.f32.mrf.mxu0 }
 0x21e   : > { %5298 = vst [vmem:[%s7961_s17 + $0x58] sm:$0xff] %v5251_v57   ;;  %v5246_v4 = vpack.c.bf16 %v8102_v63, %v8098_v1  ;;  %v8113_v9 = vadd.f32 %v6015_v54, %v3713_v16  ;;  %v3715_v57 = vadd.f32 %v3672_v3, %v8680_v53  ;;  %v3716_v54 = vadd.f32 %v3675_v58, %v3442_v15 }
 0x21f   : > { %v4026_v25 = vpop.f32.mrf.mxu0  ;;  %v4334_v3 = vmul.f32 %v8043_v13, %v8043_v13 }
 0x220   : > { %5297 = vst [vmem:[%s7961_s17 + $0x50] sm:$0xff] %v5246_v4   ;;  %v8120_v34 = vadd.f32 %v4026_v25, %v3711_v24  ;;  %v4331_v24 = vmul.f32 %v8048_v21, %v8048_v21  ;;  %v4345_v59 = vmul.f32 %v8113_v9, %v8113_v9 }
 0x221   : > { %v6016_v11 = vpop.f32.mrf.mxu0 }
 0x222   : > { %v8115_v6 = vadd.f32 %v6016_v11, %v3714_v47 }
 0x223   : > { %v4029_v36 = vpop.f32.mrf.mxu0 }
 0x224   : > { %v5261_v38 = vpack.c.bf16 %v8115_v6, %v8113_v9  ;;  %v8124_v17 = vadd.f32 %v4029_v36, %v3712_v55  ;;  %v4346_v55 = vmul.f32 %v8115_v6, %v8115_v6 }
 0x225   : > { %v6019_v52 = vpop.f32.mrf.mxu0 }
 0x226   : > { %5300 = vst [vmem:[%s7961_s17 + $0x68] sm:$0xff] %v5261_v38   ;;  %v5256_v28 = vpack.c.bf16 %v8124_v17, %v8120_v34  ;;  %v4087_v42 = vadd.f32 %v6019_v52, %v3717_v40 }
 0x227   : > { %v4042_v45 = vpop.f32.mrf.mxu0 }
 0x228   : > { %5299 = vst [vmem:[%s7961_s17 + $0x60] sm:$0xff] %v5256_v28   ;;  %v4085_v25 = vadd.f32 %v4042_v45, %v3715_v57  ;;  %v4349_v0 = vmul.f32 %v4087_v42, %v4087_v42 }
 0x229   : > { %v6020_v61 = vpop.f32.mrf.mxu0 }
 0x22a   : > { %v4088_v33 = vadd.f32 %v6020_v61, %v3718_v56 }
 0x22b   : > { %v4045_v4 = vpop.f32.mrf.mxu0 }
 0x22c   : > { %v5271_v19 = vpack.c.bf16 %v4088_v33, %v4087_v42  ;;  %v4086_v16 = vadd.f32 %v4045_v4, %v3716_v54  ;;  %5519 = vmatprep.subr.mxu1 %v4088_v33  ;;  %v4350_v62 = vmul.f32 %v4088_v33, %v4088_v33 }
 0x22d   : > { %5520 = vmatpush3.msra.mxu1 %v8043_v13  ;;  %v4347_v13 = vmul.f32 %v4085_v25, %v4085_v25 }
 0x22e   : > { %5302 = vst [vmem:[%s7961_s17 + $0x78] sm:$0xff] %v5271_v19   ;;  %v5266_v47 = vpack.c.bf16 %v4086_v16, %v4085_v25  ;;  %5521 = vmatprep.subr.mxu1 %v4087_v42  ;;  %v4348_v11 = vmul.f32 %v4086_v16, %v4086_v16 }
 0x22f   : > { %5522 = vmatpush3.msra.mxu1 %v8041_v39  ;;  %v4330_v39 = vmul.f32 %v8017_v20, %v8017_v20 }
 0x230   : > { %5301 = vst [vmem:[%s7961_s17 + $0x70] sm:$0xff] %v5266_v47   ;;  %5523 = vmatprep.subr.mxu1 %v4086_v16 }
 0x231   : > { %5524 = vmatpush3.msra.mxu1 %v8052_v37  ;;  %v4329_v37 = vmul.f32 %v8015_v22, %v8015_v22 }
 0x232   : > { %5525 = vmatprep.subr.mxu1 %v4085_v25 }
 0x233   : > { %5526 = vmatpush3.msra.mxu1 %v8048_v21  ;;  %v4344_v21 = vmul.f32 %v8124_v17, %v8124_v17 }
 0x234   : > { %5527 = vmatprep.subr.mxu1 %v8115_v6  ;;  %v4327_v6 = vmul.f32 %v8022_v49, %v8022_v49 }
 0x235   : > { %5528 = vmatpush3.msra.mxu1 %v8017_v20  ;;  %v4343_v20 = vmul.f32 %v8120_v34, %v8120_v34 }
 0x236   : > { %5529 = vmatprep.subr.mxu1 %v8113_v9  ;;  %v4326_v9 = vmul.f32 %v7987_v50, %v7987_v50 }
 0x237   : > { %5530 = vmatpush3.msra.mxu1 %v8015_v22  ;;  %v4342_v22 = vmul.f32 %v8093_v41, %v8093_v41 }
 0x238   : > { %5531 = vmatprep.subr.mxu1 %v8124_v17 }
 0x239   : > { %5532 = vmatpush3.msra.mxu1 %v8026_v7  ;;  %v4341_v7 = vmul.f32 %v8091_v31, %v8091_v31 }
 0x23a   : > { %5533 = vmatprep.subr.mxu1 %v8120_v34 }
 0x23b   : > { %5534 = vmatpush3.msra.mxu1 %v8022_v49  ;;  %v4340_v49 = vmul.f32 %v8102_v63, %v8102_v63 }
 0x23c   : > { %5535 = vmatprep.subr.mxu1 %v8093_v41  ;;  %v4323_v41 = vmul.f32 %v7994_v5, %v7994_v5 }
 0x23d   : > { %5536 = vmatpush3.msra.mxu1 %v7987_v50  ;;  %v4339_v50 = vmul.f32 %v8098_v1, %v8098_v1 }
 0x23e   : > { %5537 = vmatprep.subr.mxu1 %v8091_v31  ;;  %v4322_v31 = vmul.f32 %v7950_v35, %v7950_v35 }
 0x23f   : > { %5538 = vmatpush3.msra.mxu1 %v7985_v46  ;;  %v4338_v46 = vmul.f32 %v8069_v12, %v8069_v12 }
 0x240   : > { %5539 = vmatprep.subr.mxu1 %v8102_v63  ;;  %v4319_v63 = vmul.f32 %v7964_v30, %v7964_v30 }
 0x241   : > { %5540 = vmatpush3.msra.mxu1 %v7998_v44  ;;  %v4337_v44 = vmul.f32 %v8067_v23, %v8067_v23 }
 0x242   : > { %5541 = vmatprep.subr.mxu1 %v8098_v1  ;;  %v4321_v1 = vmul.f32 %v7948_v14, %v7948_v14 }
 0x243   : > { %5542 = vmatpush3.msra.mxu1 %v7994_v5  ;;  %v4336_v5 = vmul.f32 %v8078_v60, %v8078_v60 }
 0x244   : > { %5543 = vmatprep.subr.mxu1 %v8069_v12  ;;  %v4320_v12 = vmul.f32 %v7968_v29, %v7968_v29 }
 0x245   : > { %5544 = vmatpush3.msra.mxu1 %v7950_v35  ;;  %v4335_v35 = vmul.f32 %v8074_v32, %v8074_v32 }
 0x246   : > { %5545 = vmatprep.subr.mxu1 %v8067_v23 }
 0x247   : > { %5546 = vmatpush3.msra.mxu1 %v7948_v14 }
 0x248   : > { %5547 = vmatprep.subr.mxu1 %v8078_v60 }
 0x249   : > { %5548 = vmatpush3.msra.mxu1 %v7968_v29 }
 0x24a   : > { %5549 = vmatprep.subr.mxu1 %v8074_v32 }
 0x24b   : > { %5550 = vmatpush3.msra.mxu1 %v7964_v30 }
 0x24c   : > { %5554 = vmatprep.subr.mxu1 %v4350_v62  ;;  %4314 = vmatmul.mubr.f32.vlgmr.msra.gmra.mxu1 %v8681_v26 }
 0x24d   : > { %5555 = vmatpush3.msra.mxu1 %v4334_v3  ;;  %4415 = vmatprep.mubr.f32.mxu1 %v8681_v26 }
 0x24e   : > { %5556 = vmatprep.subr.mxu1 %v4349_v0 }
 0x24f   : > { %5557 = vmatpush3.msra.mxu1 %v4333_v18 }
 0x250   : > { %5558 = vmatprep.subr.mxu1 %v4348_v11 }
 0x251   : > { %5559 = vmatpush3.msra.mxu1 %v4332_v10 }
 0x252   : > { %5560 = vmatprep.subr.mxu1 %v4347_v13 }
 0x253   : > { %5561 = vmatpush3.msra.mxu1 %v4331_v24 }
 0x254   : > { %5562 = vmatprep.subr.mxu1 %v4346_v55 }
 0x255   : > { %5563 = vmatpush3.msra.mxu1 %v4330_v39 }
 0x256   : > { %5564 = vmatprep.subr.mxu1 %v4345_v59 }
 0x257   : > { %5565 = vmatpush3.msra.mxu1 %v4329_v37 }
 0x258   : > { %5566 = vmatprep.subr.mxu1 %v4344_v21 }
 0x259   : > { %5567 = vmatpush3.msra.mxu1 %v4328_v48 }
 0x25a   : > { %5568 = vmatprep.subr.mxu1 %v4343_v20 }
 0x25b   : > { %5569 = vmatpush3.msra.mxu1 %v4327_v6 }
 0x25c   : > { %5570 = vmatprep.subr.mxu1 %v4342_v22 }
 0x25d   : > { %5571 = vmatpush3.msra.mxu1 %v4326_v9 }
 0x25e   : > { %5572 = vmatprep.subr.mxu1 %v4341_v7 }
 0x25f   : > { %5573 = vmatpush3.msra.mxu1 %v4325_v43 }
 0x260   : > { %5574 = vmatprep.subr.mxu1 %v4340_v49 }
 0x261   : > { %5575 = vmatpush3.msra.mxu1 %v4324_v2 }
 0x262   : > { %5576 = vmatprep.subr.mxu1 %v4339_v50 }
 0x263   : > { %5577 = vmatpush3.msra.mxu1 %v4323_v41 }
 0x264   : > { %5578 = vmatprep.subr.mxu1 %v4338_v46 }
 0x265   : > { %5579 = vmatpush3.msra.mxu1 %v4322_v31 }
 0x266   : > { %5580 = vmatprep.subr.mxu1 %v4337_v44 }
 0x267   : > { %5581 = vmatpush3.msra.mxu1 %v4321_v1 }
 0x268   : > { %5582 = vmatprep.subr.mxu1 %v4336_v5 }
 0x269   : > { %5583 = vmatpush3.msra.mxu1 %v4320_v12 }
 0x26a   : > { %5584 = vmatprep.subr.mxu1 %v4335_v35 }
 0x26b   : > { %5585 = vmatpush3.msra.mxu1 %v4319_v63 }
 0x26c   : > { %4416 = vmatmul.mubr.f32.vlgmr.msra.gmra.mxu1 %v8681_v26 }
 0x30c   : > { %v5551_v14 = vpop.f32.mrf.mxu1 }
 0x30e   : > { %v5552_v29 = vpop.f32.mrf.mxu1 }
 0x30f   : > { %v5553_v23 = vadd.f32 %v5552_v29, %v5551_v14 }
 0x311   : > { %4421 = vst [vmem:[%s268_s23] sm:$0x1] %v5553_v23 }
 0x32c   : > { %v5586_v60 = vpop.f32.mrf.mxu1 }
 0x32e   : > { %v5587_v36 = vpop.f32.mrf.mxu1 }
 0x32f   : > { %v5588_v32 = vadd.f32 %v5587_v36, %v5586_v60 }
 0x331   : > { %4422 = vst [vmem:[%s268_s23 + $0x1] sm:$0x1] %v5588_v32 }
 0x332 PF: > { %s16_s20 = sadd.s32 1, %s6159_s20   ;;  %s8682_s18 = smov %s6155_s19 }
 0x333   : > { %p13_p5 = scmp.ge.s32.totalorder %s16_s20, 4   ;;  %s8683_s19 = smov %s8685_s1 }
 0x335   :  { %15 = sbr.rel (!%p13_p5) target bundleno = 2 (0x2), region = 100 }

// kernel: basic_block_pallas.4
= control target key start
LH: loop header
LB: loop body
LE: loop exit
PB: predicated region body
PF: predicated region fallthrough
CT: control target
= control target key end

     0   :  { %s6337_s18 = smov 0   ;;  %s6339_s19 = smov 0   ;;  %s8502_s0 = inlined_call_operand.vmem [shape: bf16[2,16,16,128], index: 0, kind: input, shape index: {}]   ;;  %s8503_s1 = inlined_call_operand.vmem [shape: f32[1,128], index: 1, kind: input, shape index: {}]   ;;  %s8504_s2 = inlined_call_operand.vmem [shape: f32[1,128], index: 2, kind: input, shape index: {}]   ;;  %s8505_s3 = inlined_call_operand.vmem [shape: bf16[9,128,128], index: 3, kind: input, shape index: {}]   ;;  %s8506_s4 = inlined_call_operand.vmem [shape: bf16[2,16,16,128], index: 4, kind: output, shape index: {0}]   ;;  %s8507_s5 = inlined_call_operand.vmem [shape: f32[2,1,2,128], index: 5, kind: output, shape index: {1}]  }
   0x1   :  { %s6341_s20 = smov 0  }
   0x2 LB: > { %s28_s21 = sadd.s32 1, %s6297_s19  ;;  %p4713_p0 = scmp.ge.s32.totalorder %s6301_s20, 1  ;;  %s6301_s20 = sphi %s6341_s20, %s16_s20   ;;  %s6297_s19 = sphi %s6339_s19, %s8983_s19   ;;  %s6293_s18 = sphi %s6337_s18, %s8982_s18  }
   0x3   : > { %p30_p1 = scmp.ge.s32.totalorder %s28_s21, 2  ;;  %p206_p2 = scmp.lt.s32.totalorder %s6301_s20, 3 }
   0x5   : > { %s8985_s21 = smov (%p30_p1, %s28_s21), 0  ;;  %p207_p3 = pnand %p4713_p0, %p206_p2 }
   0x7   : > { %210 = sbr.rel (%p207_p3) target bundleno = 818 (0x332), region = 36 }
   0xc   : > { %v6205_v0 = vld [vmem:[%s8505_s3 + $0x78] sm:$0xff]   ;;  %v8508_v2 = vmov 0.0|0.0   ;;  %v6207_v3 = vld [vmem:[%s8505_s3 + $0x70] sm:$0xff]   ;;  %p246_p4 = scmp.lt.s32.totalorder %s6293_s18, 1  ;;  %v554_v5 = vlaneseq  ;;  %v6209_v6 = vld [vmem:[%s8505_s3 + $0x68] sm:$0xff]   ;;  %v8509_v23 = vmov 0.0  }
   0xd   : > { %v6206_v1 = vld [vmem:[%s8505_s3 + $0x38] sm:$0xff]   ;;  %5761 = vmatprep.mubr.bf16.mxu0 %v8508_v2  ;;  %5745 = vmatprep.subr.bf16.mxu0 %v6205_v0  ;;  %v6208_v4 = vld [vmem:[%s8505_s3 + $0x30] sm:$0xff]   ;;  %v6210_v7 = vld [vmem:[%s8505_s3 + $0x28] sm:$0xff]   ;;  %v6421_v24 = vrot.slane %v8509_v23, 7  ;;  %vm8553_vm4 = vmmov 1   ;;  %v8658_v40 = vmov 0 }
   0xe   : > { %5793 = vmatprep.subr.bf16.mxu1 %v6206_v1  ;;  %5746 = vmatpush3.bf16.msra.mxu0 %v6205_v0  ;;  %s8987_s18 = smov (!%p246_p4, %s6293_s18), 1  ;;  %v6376_v8 = vshrl.u32 %v554_v5, 7  ;;  %v6211_v9 = vld [vmem:[%s8505_s3 + $0x60] sm:$0xff]   ;;  %v6213_v12 = vld [vmem:[%s8505_s3 + $0x58] sm:$0xff]   ;;  %v6215_v16 = vld [vmem:[%s8505_s3 + $0x50] sm:$0xff]  }
   0xf   : > { %5794 = vmatpush3.bf16.msra.mxu1 %v6206_v1  ;;  %5747 = vmatprep.subr.bf16.mxu0 %v6207_v3  ;;  %v6212_v10 = vld [vmem:[%s8505_s3 + $0x20] sm:$0xff]   ;;  %s5251_s13 = sshll.u32 %s8987_s18, 7  ;;  %v6214_v14 = vld [vmem:[%s8505_s3 + $0x18] sm:$0xff]   ;;  %v6216_v21 = vld [vmem:[%s8505_s3 + $0x10] sm:$0xff]   ;;  %8641 = vst [vmem:[#allocation3_spill] sm:$0xff] %v6421_v24 }
  0x10   : > { %5795 = vmatprep.subr.bf16.mxu1 %v6208_v4  ;;  %v591_v11 = vand.u32 15, %v6376_v8  ;;  %v557_v13 = vadd.s32 16, %v6376_v8  ;;  %s6398_s24 = scalar_lea.vmem %s8502_s0, %s5251_s13  ;;  %v559_v15 = vadd.s32 32, %v6376_v8  ;;  %v6410_v18 = vld [vmem:[%s8503_s1] ss:$0 sm:$0xff]  ;;  %vm8552_vm1 = vcmp.lt.s32.totalorder %v6376_v8, 1  ;;  %s8228_s16 = scalar_lea.vmem %s8506_s4, %s5251_s13 }
  0x11   : > { %v6405_v17 = vld [vmem:[%s6398_s24 + $0x70] sm:$0xff]   ;;  %v5286_v25 = vld [vmem:[%s6398_s24] sm:$0xff]   ;;  %v5429_v26 = vld [vmem:[%s6398_s24 + $0x8] sm:$0xff]   ;;  %v561_v42 = vadd.s32 48, %v6376_v8  ;;  %v6458_v52 = vadd.s32 64, %v6376_v8  ;;  %v567_v0 = vadd.s32 96, %v6376_v8 }
  0x12   : > { %5748 = vmatpush3.bf16.msra.mxu0 %v6207_v3  ;;  %vm6412_vm0 = vcmp.gt.s32.totalorder %v591_v11, 0  ;;  %v605_v20 = vand.u32 15, %v557_v13  ;;  %v5344_v22 = vunpack.c.h.bf16 %v6405_v17  ;;  %v6429_v27 = vld [vmem:[%s8504_s2] ss:$0 sm:$0xff]  ;;  %v5287_v28 = vunpack.c.l.bf16 %v5286_v25  ;;  %v5430_v32 = vld [vmem:[%s6398_s24 + $0x10] sm:$0xff]   ;;  %v6217_v37 = vld [vmem:[%s8505_s3 + $0x48] sm:$0xff]  }
  0x13   : > { %5796 = vmatpush3.bf16.msra.mxu1 %v6208_v4  ;;  %5749 = vmatprep.subr.bf16.mxu0 %v6209_v6  ;;  %v5288_v29 = vunpack.c.h.bf16 %v5286_v25  ;;  %v5291_v30 = vunpack.c.l.bf16 %v5429_v26  ;;  %v5292_v31 = vunpack.c.h.bf16 %v5429_v26  ;;  %v619_v34 = vand.u32 15, %v559_v15  ;;  %v6218_v43 = vld [vmem:[%s8505_s3 + $0x8] sm:$0xff]   ;;  %v6219_v48 = vld [vmem:[%s8505_s3 + $0x40] sm:$0xff]   ;;  %v5431_v61 = vld [vmem:[%s6398_s24 + $0x18] sm:$0xff]   ;;  %s4718_s13 = sshll.u32 %s8987_s18, 1 }
  0x14   : > { %5797 = vmatprep.subr.bf16.mxu1 %v6210_v7  ;;  %v380_v33 = vmul.f32 %v5344_v22, %v6410_v18  ;;  %v5295_v35 = vunpack.c.l.bf16 %v5430_v32  ;;  %v5296_v36 = vunpack.c.h.bf16 %v5430_v32  ;;  %v351_v38 = vmul.f32 %v5287_v28, %v6410_v18  ;;  %v6220_v53 = vld [vmem:[%s8505_s3] sm:$0xff]   ;;  %vm6487_vm5 = vmpackc.low %vm8553_vm4, %vm6412_vm0  ;;  %s268_s23 = scalar_lea.vmem %s8507_s5, %s4718_s13 }
  0x15   : > { %v352_v39 = vmul.f32 %v5288_v29, %v6410_v18  ;;  %vm6438_vm2 = vcmp.gt.s32.totalorder %v605_v20, 0  ;;  %v353_v41 = vmul.f32 %v5291_v30, %v6410_v18  ;;  %v354_v45 = vmul.f32 %v5292_v31, %v6410_v18  ;;  %v5432_v13 = vld [vmem:[%s6398_s24 + $0x20] sm:$0xff]   ;;  %v6221_v20 = vld [vmem:[%s8505_s3 + $0xb8] sm:$0xff]  }
  0x16   : > { %5750 = vmatpush3.bf16.msra.mxu0 %v6209_v6  ;;  %v418_v44 = vadd.f32 %v6429_v27, %v380_v33  ;;  %v355_v46 = vmul.f32 %v5295_v35, %v6410_v18  ;;  %v356_v47 = vmul.f32 %v5296_v36, %v6410_v18  ;;  %v389_v49 = vadd.f32 %v6429_v27, %v351_v38  ;;  %v6222_v29 = vld [vmem:[%s8505_s3 + $0xf8] sm:$0xff]   ;;  %vm6556_vm7 = vmpackc.low %vm8553_vm4, %vm6438_vm2 }
  0x17   : > { %5798 = vmatpush3.bf16.msra.mxu1 %v6210_v7  ;;  %5751 = vmatprep.subr.bf16.mxu0 %v6211_v9  ;;  %v390_v50 = vadd.f32 %v6429_v27, %v352_v39  ;;  %v391_v51 = vadd.f32 %v6429_v27, %v353_v41  ;;  %v392_v55 = vadd.f32 %v6429_v27, %v354_v45  ;;  %vm6480_vm3 = vcmp.gt.s32.totalorder %v619_v34, 0  ;;  %v5433_v39 = vld [vmem:[%s6398_s24 + $0x28] sm:$0xff]  }
  0x18   : > { %5799 = vmatprep.subr.bf16.mxu1 %v6212_v10  ;;  %v6463_v54 = vmax.f32 %v418_v44, 0.0  ;;  %v393_v56 = vadd.f32 %v6429_v27, %v355_v46  ;;  %v394_v57 = vadd.f32 %v6429_v27, %v356_v47  ;;  %v6468_v58 = vmax.f32 %v389_v49, 0.0  ;;  %vm6569_vm8 = vmpackc.low %vm8553_vm4, %vm6480_vm3  ;;  %v6223_v49 = vld [vmem:[%s8505_s3 + $0xb0] sm:$0xff]  }
  0x19   : > { %v6470_v59 = vmax.f32 %v390_v50, 0.0  ;;  %v6472_v60 = vmax.f32 %v391_v51, 0.0  ;;  %v6478_v63 = vmax.f32 %v392_v55, 0.0  ;;  %v633_v1 = vand.u32 15, %v561_v42  ;;  %v6224_v55 = vld [vmem:[%s8505_s3 + $0xf0] sm:$0xff]  }
  0x1a   : > { %5752 = vmatpush3.bf16.msra.mxu0 %v6211_v9  ;;  %v6476_v62 = vrot.slane %v6463_v54, 7  ;;  %v8647_v3 = vmov 0  ;;  %v6492_v4 = vrot.slane %v6468_v58, 7  ;;  %v6495_v6 = vmax.f32 %v393_v56, 0.0 }
  0x1b   : > { %5800 = vmatpush3.bf16.msra.mxu1 %v6212_v10  ;;  %5753 = vmatprep.subr.bf16.mxu0 %v6213_v12  ;;  %v8648_v3 = vsel %vm6487_vm5, 4294967295, %v8647_v3  ;;  %v1070_v5 = vrot.slane %v6470_v59, 7  ;;  %v6497_v7 = vmax.f32 %v394_v57, 0.0  ;;  %v6505_v10 = vpack.c.bf16 %v6470_v59, %v6468_v58 }
  0x1c   : > { %5801 = vmatprep.subr.bf16.mxu1 %v6214_v14  ;;  %8644 = vst [vmem:[#allocation4_spill] sm:$0xff] %v6476_v62  ;;  %v1131_v9 = vsel %vm8552_vm1, %v6476_v62, %v6421_v24  ;;  %v6508_v11 = vrot.slane %v6472_v60, 7  ;;  %v1072_v19 = vrot.slane %v6478_v63, 7  ;;  %v6528_v22 = vpack.c.bf16 %v6478_v63, %v6472_v60 }
  0x1d   : > { %8649 = vst [vmem:[#allocation5_spill] sm:$0xff] %v6505_v10  ;;  %v6515_v15 = vsel %vm8552_vm1, %v6492_v4, %v1070_v5  ;;  %v6535_v26 = vpack.c.bf16 %v6497_v7, %v6495_v6  ;;  %vm6537_vm6 = vcmp.gt.s32.totalorder %v633_v1, 0  ;;  %v1073_v31 = vrot.slane %v6495_v6, 7 }
  0x1e   : > { %5754 = vmatpush3.bf16.msra.mxu0 %v6213_v12  ;;  %8650 = vst [vmem:[#allocation6_spill] sm:$0xff] %v6508_v11  ;;  %v5299_v12 = vunpack.c.l.bf16 %v5431_v61  ;;  %8651 = vst [vmem:[#allocation7_spill] sm:$0xff] %v6528_v22  ;;  %v1127_v25 = vsel %vm8552_vm1, %v1070_v5, %v6508_v11  ;;  %v6549_v30 = vsel %vm8552_vm1, %v6508_v11, %v1072_v19  ;;  %v1074_v32 = vrot.slane %v6497_v7, 7 }
  0x1f   : > { %5802 = vmatpush3.bf16.msra.mxu1 %v6214_v14  ;;  %5755 = vmatprep.subr.bf16.mxu0 %v6215_v16  ;;  %v4762_v14 = vpack.c.bf16 %v6421_v24, %v1131_v9  ;;  %8652 = vst [vmem:[#allocation8_spill] sm:$0xff] %v6535_v26  ;;  %8655 = vst [vmem:[#allocation9_spill] sm:$0xff] %v6549_v30  ;;  %v5300_v33 = vunpack.c.h.bf16 %v5431_v61  ;;  %v8656_v34 = vmov 0  ;;  %v6561_v35 = vpack.c.bf16 %v6549_v30, %v1127_v25  ;;  %v6225_v25 = vld [vmem:[%s8505_s3 + $0xa8] sm:$0xff]  }
  0x20   : > { %5803 = vmatprep.subr.bf16.mxu1 %v6216_v21  ;;  %v8657_v34 = vsel %vm6556_vm7, 4294967295, %v8656_v34  ;;  %v357_v36 = vmul.f32 %v5299_v12, %v6410_v18  ;;  %v5303_v38 = vunpack.c.l.bf16 %v5432_v13  ;;  %v8659_v40 = vsel %vm6569_vm8, 4294967295, %v8658_v40  ;;  %vm6644_vm11 = vmpackc.low %vm8553_vm4, %vm6537_vm6 }
  0x21   : > { %5809 = vmatprep.mubr.msk.bf16.mxu1 %vm6487_vm5, %v4762_v14  ;;  %v1124_v41 = vsel %vm8552_vm1, %v1073_v31, %v1074_v32  ;;  %v1125_v42 = vsel %vm8552_vm1, %v1072_v19, %v1073_v31  ;;  %v5304_v44 = vunpack.c.h.bf16 %v5432_v13  ;;  %v5308_v61 = vunpack.c.h.bf16 %v5433_v39 }
  0x22   : > { %5756 = vmatpush3.bf16.msra.mxu0 %v6215_v16  ;;  %v1129_v16 = vsel %vm8552_vm1, %v6421_v24, %v6492_v4  ;;  %v6578_v45 = vpack.c.bf16 %v1124_v41, %v1125_v42  ;;  %v395_v46 = vadd.f32 %v6429_v27, %v357_v36  ;;  %v675_v19 = vand.u32 15, %v567_v0  ;;  %v5435_v42 = vld [vmem:[%s6398_s24 + $0x38] sm:$0xff]  }
  0x23   : > { %5804 = vmatpush3.bf16.msra.mxu1 %v6216_v21  ;;  %5757 = vmatprep.subr.bf16.mxu0 %v6217_v37  ;;  %v4765_v21 = vpack.c.bf16 %v6515_v15, %v1129_v16  ;;  %v360_v51 = vmul.f32 %v5304_v44, %v6410_v18  ;;  %v362_v16 = vmul.f32 %v5308_v61, %v6410_v18  ;;  %v8665_v44 = vmov 0 }
  0x24   : > { %5805 = vmatprep.subr.bf16.mxu1 %v6218_v43  ;;  %v6599_v56 = vmax.f32 %v395_v46, 0.0  ;;  %v8666_v44 = vsel %vm6644_vm11, 4294967295, %v8665_v44  ;;  %vm6655_vm12 = vcmp.gt.s32.totalorder %v675_v19, 0  ;;  %v8670_v28 = vmov 0 }
  0x25   : > { %v398_v5 = vadd.f32 %v6429_v27, %v360_v51  ;;  %v400_v41 = vadd.f32 %v6429_v27, %v362_v16  ;;  %v569_v0 = vadd.s32 112, %v6376_v8  ;;  %vm6742_vm0 = vmpackc.low %vm8553_vm4, %vm6655_vm12  ;;  %v8679_v36 = vmov 0 }
  0x26   : > { %5758 = vmatpush3.bf16.msra.mxu0 %v6217_v37  ;;  %v647_v37 = vand.u32 15, %v6458_v52  ;;  %v565_v52 = vadd.s32 80, %v6376_v8  ;;  %v1075_v13 = vrot.slane %v6599_v56, 7  ;;  %v8680_v36 = vsel %vm6742_vm0, 4294967295, %v8679_v36 }
  0x27   : > { %5806 = vmatpush3.bf16.msra.mxu1 %v6218_v43  ;;  %5759 = vmatprep.subr.bf16.mxu0 %v6219_v48  ;;  %v358_v43 = vmul.f32 %v5300_v33, %v6410_v18  ;;  %v6623_v33 = vmax.f32 %v398_v5, 0.0  ;;  %v6228_v5 = vld [vmem:[%s8505_s3 + $0xe0] sm:$0xff]   ;;  %8681 = vst [vmem:[#allocation15_spill] sm:$0xff] %v8680_v36  ;;  %v577_v36 = vadd.s32 176, %v6376_v8 }
  0x28   : > { %5807 = vmatprep.subr.bf16.mxu1 %v6220_v53  ;;  %vm6581_vm9 = vcmp.gt.s32.totalorder %v647_v37, 0  ;;  %v661_v9 = vand.u32 15, %v565_v52  ;;  %v1123_v37 = vsel %vm8552_vm1, %v1074_v32, %v1075_v13 }
  0x29   : > { %v396_v50 = vadd.f32 %v6429_v27, %v358_v43  ;;  %v6227_v43 = vld [vmem:[%s8505_s3 + $0xa0] sm:$0xff]   ;;  %vm6662_vm13 = vmpackc.low %vm8553_vm4, %vm6581_vm9 }
  0x2a   : > { %5760 = vmatpush3.bf16.msra.mxu0 %v6219_v48  ;;  %v359_v48 = vmul.f32 %v5303_v38, %v6410_v18  ;;  %vm6625_vm10 = vcmp.gt.s32.totalorder %v661_v9, 0  ;;  %v8671_v28 = vsel %vm6662_vm13, 4294967295, %v8670_v28 }
  0x2b   : > { %5808 = vmatpush3.bf16.msra.mxu1 %v6220_v53  ;;  %5841 = vmatprep.subr.bf16.mxu0 %v6221_v20  ;;  %v5307_v53 = vunpack.c.l.bf16 %v5433_v39  ;;  %v6606_v1 = vmax.f32 %v396_v50, 0.0  ;;  %8672 = vst [vmem:[#allocation12_spill] sm:$0xff] %v8671_v28  ;;  %vm6727_vm15 = vmpackc.low %vm8553_vm4, %vm6625_vm10 }
  0x2c   : > { %5889 = vmatprep.subr.bf16.mxu1 %v6222_v29  ;;  %v397_v57 = vadd.f32 %v6429_v27, %v359_v48  ;;  %v1078_v48 = vrot.slane %v6623_v33, 7 }
  0x2d   : > { %5762 = vmatmul.mubr.bf16.vlgmr.msra.gmra.mxu0 %v6505_v10  ;;  %v361_v12 = vmul.f32 %v5307_v53, %v6410_v18  ;;  %v6620_v31 = vpack.c.bf16 %v6606_v1, %v6599_v56 }
  0x2e   : > { %5810 = vmatmul.mubr.msk.bf16.vlgmr.msra.gmra.mxu1 %vm6556_vm7, %v4765_v21  ;;  %5765 = vmatprep.mubr.bf16.mxu0 %v6528_v22  ;;  %v6611_v14 = vmax.f32 %v397_v57, 0.0  ;;  %v5434_v21 = vld [vmem:[%s6398_s24 + $0x30] sm:$0xff]   ;;  %v6672_v57 = vmax.f32 %v400_v41, 0.0  ;;  %v5316_v41 = vunpack.c.h.bf16 %v5435_v42 }
  0x2f   : > { %5813 = vmatprep.mubr.msk.bf16.mxu1 %vm6569_vm8, %v6561_v35  ;;  %5842 = vmatpush3.bf16.msra.mxu0 %v6221_v20  ;;  %8662 = vst [vmem:[#allocation10_spill] sm:$0xff] %v6620_v31  ;;  %v1076_v20 = vrot.slane %v6606_v1, 7  ;;  %v399_v39 = vadd.f32 %v6429_v27, %v361_v12  ;;  %v5312_v61 = vunpack.c.h.bf16 %v5434_v21 }
  0x30   : > { %5890 = vmatpush3.bf16.msra.mxu1 %v6222_v29  ;;  %5843 = vmatprep.subr.bf16.mxu0 %v6223_v49  ;;  %v6226_v29 = vld [vmem:[%s8505_s3 + $0xe8] sm:$0xff]   ;;  %v1077_v38 = vrot.slane %v6611_v14, 7  ;;  %v6652_v46 = vpack.c.bf16 %v6623_v33, %v6611_v14 }
  0x31   : > { %5891 = vmatprep.subr.bf16.mxu1 %v6224_v55  ;;  %v1122_v32 = vsel %vm8552_vm1, %v1075_v13, %v1076_v20  ;;  %v6670_v53 = vmax.f32 %v399_v39, 0.0  ;;  %v1080_v13 = vrot.slane %v6672_v57, 7  ;;  %v364_v19 = vmul.f32 %v5312_v61, %v6410_v18 }
  0x32   : > { %8667 = vst [vmem:[#allocation11_spill] sm:$0xff] %v6652_v46  ;;  %v6666_v51 = vpack.c.bf16 %v1122_v32, %v1123_v37  ;;  %v1121_v52 = vsel %vm8552_vm1, %v1076_v20, %v1077_v38  ;;  %v1120_v47 = vsel %vm8552_vm1, %v1077_v38, %v1078_v48  ;;  %v5315_v20 = vunpack.c.l.bf16 %v5435_v42  ;;  %v5436_v37 = vld [vmem:[%s6398_s24 + $0x40] sm:$0xff]  }
  0x33   : > { %5844 = vmatpush3.bf16.msra.mxu0 %v6223_v49  ;;  %v5311_v49 = vunpack.c.l.bf16 %v5434_v21  ;;  %v6689_v9 = vpack.c.bf16 %v6672_v57, %v6670_v53  ;;  %v1079_v12 = vrot.slane %v6670_v53, 7  ;;  %v689_v21 = vand.u32 15, %v569_v0 }
  0x34   : > { %5892 = vmatpush3.bf16.msra.mxu1 %v6224_v55  ;;  %5845 = vmatprep.subr.bf16.mxu0 %v6225_v25  ;;  %v6685_v55 = vpack.c.bf16 %v1120_v47, %v1121_v52  ;;  %v571_v32 = vadd.s32 128, %v6376_v8  ;;  %v6229_v52 = vld [vmem:[%s8505_s3 + $0x98] sm:$0xff]   ;;  %v365_v42 = vmul.f32 %v5315_v20, %v6410_v18  ;;  %v5320_v20 = vunpack.c.h.bf16 %v5436_v37 }
  0x35   : > { %5766 = vmatmul.mubr.bf16.gmra.mxu0 %v6535_v26  ;;  %5893 = vmatprep.subr.bf16.mxu1 %v6226_v29  ;;  %8673 = vst [vmem:[#allocation13_spill] sm:$0xff] %v6689_v9  ;;  %v363_v16 = vmul.f32 %v5311_v49, %v6410_v18  ;;  %v1118_v38 = vsel %vm8552_vm1, %v1079_v12, %v1080_v13  ;;  %vm6711_vm14 = vcmp.gt.s32.totalorder %v689_v21, 0  ;;  %v8695_v61 = vmov 0 }
  0x36   : > { %5814 = vmatmul.mubr.msk.bf16.gmra.mxu1 %vm6644_vm11, %v6578_v45  ;;  %5769 = vmatprep.mubr.bf16.mxu0 %v6620_v31  ;;  %v1119_v39 = vsel %vm8552_vm1, %v1078_v48, %v1079_v12  ;;  %v402_v49 = vadd.f32 %v6429_v27, %v364_v19  ;;  %v366_v48 = vmul.f32 %v5316_v41, %v6410_v18  ;;  %v703_v0 = vand.u32 15, %v571_v32  ;;  %v6232_v32 = vld [vmem:[%s8505_s3 + $0xd0] sm:$0xff]   ;;  %vm6814_vm6 = vmpackc.low %vm8553_vm4, %vm6711_vm14 }
  0x37   : > { %5817 = vmatprep.mubr.msk.bf16.mxu1 %vm6662_vm13, %v6666_v51  ;;  %5846 = vmatpush3.bf16.msra.mxu0 %v6225_v25  ;;  %v6707_v47 = vpack.c.bf16 %v1118_v38, %v1119_v39  ;;  %v401_v25 = vadd.f32 %v6429_v27, %v363_v16  ;;  %v5319_v12 = vunpack.c.l.bf16 %v5436_v37  ;;  %v5437_v38 = vld [vmem:[%s6398_s24 + $0x48] sm:$0xff]   ;;  %v6231_v16 = vld [vmem:[%s8505_s3 + $0x90] sm:$0xff]   ;;  %v8676_v19 = vmov 0 }
  0x38   : > { %5894 = vmatpush3.bf16.msra.mxu1 %v6226_v29  ;;  %5847 = vmatprep.subr.bf16.mxu0 %v6227_v43  ;;  %v6230_v29 = vld [vmem:[%s8505_s3 + $0xd8] sm:$0xff]   ;;  %v8677_v19 = vsel %vm6727_vm15, 4294967295, %v8676_v19  ;;  %v6733_v39 = vmax.f32 %v402_v49, 0.0  ;;  %v573_v41 = vadd.s32 144, %v6376_v8  ;;  %v404_v49 = vadd.f32 %v6429_v27, %v366_v48 }
  0x39   : > { %5895 = vmatprep.subr.bf16.mxu1 %v6228_v5  ;;  %8678 = vst [vmem:[#allocation14_spill] sm:$0xff] %v8677_v19  ;;  %v6731_v21 = vmax.f32 %v401_v25, 0.0  ;;  %v403_v25 = vadd.f32 %v6429_v27, %v365_v42  ;;  %vm6748_vm2 = vcmp.gt.s32.totalorder %v703_v0, 0  ;;  %v368_v48 = vmul.f32 %v5320_v20, %v6410_v18 }
  0x3a   : > { %v1082_v42 = vrot.slane %v6733_v39, 7  ;;  %v6767_v0 = vmax.f32 %v404_v49, 0.0  ;;  %v717_v23 = vand.u32 15, %v573_v41  ;;  %v5323_v11 = vunpack.c.l.bf16 %v5437_v38  ;;  %v6233_v49 = vld [vmem:[%s8505_s3 + $0x88] sm:$0xff]   ;;  %vm6829_vm9 = vmpackc.low %vm8553_vm4, %vm6748_vm2 }
  0x3b   : > { %5848 = vmatpush3.bf16.msra.mxu0 %v6227_v43  ;;  %v367_v43 = vmul.f32 %v5319_v12, %v6410_v18  ;;  %v6756_v50 = vpack.c.bf16 %v6733_v39, %v6731_v21  ;;  %v1081_v2 = vrot.slane %v6731_v21, 7  ;;  %v406_v24 = vadd.f32 %v6429_v27, %v368_v48 }
  0x3c   : > { %5896 = vmatpush3.bf16.msra.mxu1 %v6228_v5  ;;  %5849 = vmatprep.subr.bf16.mxu0 %v6229_v52  ;;  %v6765_v5 = vmax.f32 %v403_v25, 0.0  ;;  %v5438_v25 = vld [vmem:[%s6398_s24 + $0x50] sm:$0xff]   ;;  %vm6794_vm3 = vcmp.gt.s32.totalorder %v717_v23, 0  ;;  %v5439_v23 = vld [vmem:[%s6398_s24 + $0x58] sm:$0xff]   ;;  %v8690_v31 = vmov 0  ;;  %v8696_v61 = vsel %vm6829_vm9, 4294967295, %v8695_v61 }
  0x3d   : > { %5770 = vmatmul.mubr.bf16.gmra.mxu0 %v6652_v46  ;;  %8684 = vst [vmem:[#allocation16_spill] sm:$0xff] %v6756_v50  ;;  %5897 = vmatprep.subr.bf16.mxu1 %v6230_v29  ;;  %v405_v12 = vadd.f32 %v6429_v27, %v367_v43  ;;  %v1116_v20 = vsel %vm8552_vm1, %v1081_v2, %v1082_v42  ;;  %v8691_v31 = vsel %vm6814_vm6, 4294967295, %v8690_v31  ;;  %8697 = vst [vmem:[#allocation23_spill] sm:$0xff] %v8696_v61  ;;  %v6870_v61 = vld [vmem:[%s8505_s3 + $0x138] sm:$0xff]   ;;  %v8709_v48 = vmov 0 }
  0x3e   : > { %5818 = vmatmul.mubr.msk.bf16.gmra.mxu1 %vm6727_vm15, %v6685_v55  ;;  %5773 = vmatprep.mubr.bf16.mxu0 %v6689_v9  ;;  %v1117_v30 = vsel %vm8552_vm1, %v1080_v13, %v1081_v2  ;;  %v6786_v43 = vpack.c.bf16 %v6767_v0, %v6765_v5  ;;  %v1083_v9 = vrot.slane %v6765_v5, 7  ;;  %v1084_v2 = vrot.slane %v6767_v0, 7  ;;  %8692 = vst [vmem:[#allocation20_spill] sm:$0xff] %v8691_v31  ;;  %vm6887_vm14 = vmpackc.low %vm8553_vm4, %vm6794_vm3 }
  0x3f   : > { %5821 = vmatprep.mubr.msk.bf16.mxu1 %vm6742_vm0, %v6707_v47  ;;  %5850 = vmatpush3.bf16.msra.mxu0 %v6229_v52  ;;  %v6782_v41 = vpack.c.bf16 %v1116_v20, %v1117_v30  ;;  %v6790_v13 = vmax.f32 %v405_v12, 0.0  ;;  %v6792_v52 = vmax.f32 %v406_v24, 0.0  ;;  %v5324_v30 = vunpack.c.h.bf16 %v5437_v38  ;;  %v6234_v20 = vld [vmem:[%s8505_s3 + $0xc8] sm:$0xff]   ;;  %v6235_v38 = vld [vmem:[%s8505_s3 + $0x80] sm:$0xff]  }
  0x40   : > { %8686 = vst [vmem:[#allocation18_spill] sm:$0xff] %v6786_v43  ;;  %5898 = vmatpush3.bf16.msra.mxu1 %v6230_v29  ;;  %5851 = vmatprep.subr.bf16.mxu0 %v6231_v16  ;;  %v1114_v46 = vsel %vm8552_vm1, %v1083_v9, %v1084_v2  ;;  %v1115_v29 = vsel %vm8552_vm1, %v1082_v42, %v1083_v9  ;;  %v575_v24 = vadd.s32 160, %v6376_v8  ;;  %v5327_v10 = vunpack.c.l.bf16 %v5438_v25 }
  0x41   : > { %8685 = vst [vmem:[#allocation17_spill] sm:$0xff] %v6782_v41  ;;  %8687 = vst [vmem:[#allocation19_spill] sm:$0xff] %v6792_v52  ;;  %5899 = vmatprep.subr.bf16.mxu1 %v6232_v32  ;;  %v369_v12 = vmul.f32 %v5323_v11, %v6410_v18  ;;  %v6818_v26 = vpack.c.bf16 %v1114_v46, %v1115_v29  ;;  %v6822_v9 = vpack.c.bf16 %v6792_v52, %v6790_v13 }
  0x42   : > { %v1085_v11 = vrot.slane %v6790_v13, 7  ;;  %v1086_v42 = vrot.slane %v6792_v52, 7  ;;  %v370_v22 = vmul.f32 %v5324_v30, %v6410_v18  ;;  %v731_v29 = vand.u32 15, %v575_v24  ;;  %v6236_v30 = vld [vmem:[%s8505_s3 + $0xc0] sm:$0xff]  }
  0x43   : > { %8693 = vst [vmem:[#allocation21_spill] sm:$0xff] %v6818_v26  ;;  %8694 = vst [vmem:[#allocation22_spill] sm:$0xff] %v6822_v9  ;;  %5852 = vmatpush3.bf16.msra.mxu0 %v6231_v16  ;;  %v407_v46 = vadd.f32 %v6429_v27, %v369_v12  ;;  %v5328_v52 = vunpack.c.h.bf16 %v5438_v25  ;;  %v371_v24 = vmul.f32 %v5327_v10, %v6410_v18 }
  0x44   : > { %5900 = vmatpush3.bf16.msra.mxu1 %v6232_v32  ;;  %5853 = vmatprep.subr.bf16.mxu0 %v6233_v49  ;;  %v1112_v16 = vsel %vm8552_vm1, %v1085_v11, %v1086_v42  ;;  %v1113_v37 = vsel %vm8552_vm1, %v1084_v2, %v1085_v11  ;;  %v408_v12 = vadd.f32 %v6429_v27, %v370_v22  ;;  %vm6853_vm10 = vcmp.gt.s32.totalorder %v731_v29, 0 }
  0x45   : > { %5774 = vmatmul.mubr.bf16.gmra.mxu0 %v6756_v50  ;;  %5901 = vmatprep.subr.bf16.mxu1 %v6234_v20  ;;  %v6848_v32 = vpack.c.bf16 %v1112_v16, %v1113_v37  ;;  %v6851_v2 = vmax.f32 %v407_v46, 0.0  ;;  %v372_v11 = vmul.f32 %v5328_v52, %v6410_v18  ;;  %v745_v50 = vand.u32 15, %v577_v36  ;;  %v5440_v16 = vld [vmem:[%s6398_s24 + $0x60] sm:$0xff]   ;;  %vm6902_vm2 = vmpackc.low %vm8553_vm4, %vm6853_vm10 }
  0x46   : > { %5822 = vmatmul.mubr.msk.bf16.gmra.mxu1 %vm6814_vm6, %v6782_v41  ;;  %5777 = vmatprep.mubr.bf16.mxu0 %v6786_v43  ;;  %v5331_v43 = vunpack.c.l.bf16 %v5439_v23  ;;  %v6863_v37 = vmax.f32 %v408_v12, 0.0  ;;  %v5332_v46 = vunpack.c.h.bf16 %v5439_v23  ;;  %v579_v29 = vadd.s32 192, %v6376_v8 }
  0x47   : > { %8698 = vst [vmem:[#allocation24_spill] sm:$0xff] %v6848_v32  ;;  %8699 = vst [vmem:[#allocation25_spill] sm:$0xff] %v6851_v2  ;;  %5825 = vmatprep.mubr.msk.bf16.mxu1 %vm6829_vm9, %v6818_v26  ;;  %5854 = vmatpush3.bf16.msra.mxu0 %v6233_v49  ;;  %v1087_v22 = vrot.slane %v6851_v2, 7  ;;  %v409_v10 = vadd.f32 %v6429_v27, %v371_v24  ;;  %v410_v36 = vadd.f32 %v6429_v27, %v372_v11  ;;  %v8705_v23 = vmov 0 }
  0x48   : > { %8702 = vst [vmem:[#allocation26_spill] sm:$0xff] %v6863_v37  ;;  %5902 = vmatpush3.bf16.msra.mxu1 %v6234_v20  ;;  %5855 = vmatprep.subr.bf16.mxu0 %v6235_v38  ;;  %vm6874_vm12 = vcmp.gt.s32.totalorder %v745_v50, 0  ;;  %v373_v52 = vmul.f32 %v5331_v43, %v6410_v18  ;;  %v6882_v20 = vld [vmem:[%s8505_s3 + $0x178] sm:$0xff]   ;;  %v8706_v23 = vsel %vm6887_vm14, 4294967295, %v8705_v23  ;;  %v6893_v50 = vpack.c.bf16 %v6863_v37, %v6851_v2 }
  0x49   : > { %5903 = vmatprep.subr.bf16.mxu1 %v6236_v30  ;;  %8707 = vst [vmem:[#allocation27_spill] sm:$0xff] %v8706_v23  ;;  %v1088_v12 = vrot.slane %v6863_v37, 7  ;;  %v1111_v43 = vsel %vm8552_vm1, %v1086_v42, %v1087_v22  ;;  %v374_v24 = vmul.f32 %v5332_v46, %v6410_v18  ;;  %v8710_v48 = vsel %vm6902_vm2, 4294967295, %v8709_v48  ;;  %vm6966_vm10 = vmpackc.low %vm8553_vm4, %vm6874_vm12 }
  0x4a   : > { %8708 = vst [vmem:[#allocation28_spill] sm:$0xff] %v6893_v50  ;;  %8711 = vst [vmem:[#allocation29_spill] sm:$0xff] %v8710_v48  ;;  %v6906_v11 = vmax.f32 %v409_v10, 0.0  ;;  %v6908_v31 = vmax.f32 %v410_v36, 0.0  ;;  %v411_v26 = vadd.f32 %v6429_v27, %v373_v52  ;;  %v759_v2 = vand.u32 15, %v579_v29  ;;  %v5441_v52 = vld [vmem:[%s6398_s24 + $0x68] sm:$0xff]  }
  0x4b   : > { %5856 = vmatpush3.bf16.msra.mxu0 %v6235_v38  ;;  %v1110_v42 = vsel %vm8552_vm1, %v1087_v22, %v1088_v12  ;;  %v412_v46 = vadd.f32 %v6429_v27, %v374_v24  ;;  %v5335_v25 = vunpack.c.l.bf16 %v5440_v16  ;;  %v5336_v37 = vunpack.c.h.bf16 %v5440_v16 }
  0x4c   : > { %5904 = vmatpush3.bf16.msra.mxu1 %v6236_v30  ;;  %5937 = vmatprep.subr.bf16.mxu0 %v6870_v61  ;;  %v6916_v10 = vpack.c.bf16 %v1110_v42, %v1111_v43  ;;  %v1089_v36 = vrot.slane %v6906_v11, 7  ;;  %v1090_v29 = vrot.slane %v6908_v31, 7  ;;  %v6925_v38 = vmax.f32 %v411_v26, 0.0 }
  0x4d   : > { %5778 = vmatmul.mubr.bf16.gmra.mxu0 %v6822_v9  ;;  %5985 = vmatprep.subr.bf16.mxu1 %v6882_v20  ;;  %v6927_v30 = vmax.f32 %v412_v46, 0.0  ;;  %vm6929_vm3 = vcmp.gt.s32.totalorder %v759_v2, 0  ;;  %v375_v22 = vmul.f32 %v5335_v25, %v6410_v18  ;;  %v376_v24 = vmul.f32 %v5336_v37, %v6410_v18 }
  0x4e   : > { %8712 = vst [vmem:[#allocation30_spill] sm:$0xff] %v6916_v10  ;;  %5826 = vmatmul.mubr.msk.bf16.gmra.mxu1 %vm6887_vm14, %v6848_v32  ;;  %5781 = vmatprep.mubr.bf16.mxu0 %v6893_v50  ;;  %8713 = vst [vmem:[#allocation31_spill] sm:$0xff] %v6925_v38  ;;  %v1108_v43 = vsel %vm8552_vm1, %v1089_v36, %v1090_v29  ;;  %v1109_v26 = vsel %vm8552_vm1, %v1088_v12, %v1089_v36  ;;  %v581_v2 = vadd.s32 208, %v6376_v8 }
  0x4f   : > { %8714 = vst [vmem:[#allocation32_spill] sm:$0xff] %v6927_v30  ;;  %5829 = vmatprep.mubr.msk.bf16.mxu1 %vm6902_vm2, %v6916_v10  ;;  %v6946_v42 = vpack.c.bf16 %v6908_v31, %v6906_v11  ;;  %v6948_v46 = vpack.c.bf16 %v1108_v43, %v1109_v26  ;;  %v1091_v25 = vrot.slane %v6925_v38, 7  ;;  %v1092_v50 = vrot.slane %v6927_v30, 7 }
  0x50   : > { %v6954_v9 = vpack.c.bf16 %v6927_v30, %v6925_v38  ;;  %v413_v12 = vadd.f32 %v6429_v27, %v375_v22  ;;  %v414_v37 = vadd.f32 %v6429_v27, %v376_v24  ;;  %v5339_v36 = vunpack.c.l.bf16 %v5441_v52 }
  0x51   : > { %8717 = vst [vmem:[#allocation33_spill] sm:$0xff] %v6946_v42  ;;  %v1106_v48 = vsel %vm8552_vm1, %v1091_v25, %v1092_v50  ;;  %v1107_v43 = vsel %vm8552_vm1, %v1090_v29, %v1091_v25  ;;  %v5340_v26 = vunpack.c.h.bf16 %v5441_v52  ;;  %v583_v23 = vadd.s32 224, %v6376_v8  ;;  %vm6979_vm1 = vmpackc.low %vm8553_vm4, %vm6929_vm3 }
  0x52   : > { %8718 = vst [vmem:[#allocation34_spill] sm:$0xff] %v6954_v9  ;;  %v8719_v10 = vmov 0  ;;  %v6970_v22 = vpack.c.bf16 %v1106_v48, %v1107_v43  ;;  %v6972_v24 = vmax.f32 %v413_v12, 0.0  ;;  %v6974_v30 = vmax.f32 %v414_v37, 0.0 }
  0x53   : > { %v8720_v10 = vsel %vm6966_vm10, 4294967295, %v8719_v10  ;;  %v773_v38 = vand.u32 15, %v581_v2  ;;  %v8723_v29 = vmov 0  ;;  %v377_v49 = vmul.f32 %v5339_v36, %v6410_v18 }
  0x54   : > { %8721 = vst [vmem:[#allocation35_spill] sm:$0xff] %v8720_v10  ;;  %8722 = vst [vmem:[#allocation36_spill] sm:$0xff] %v6970_v22  ;;  %v8724_v29 = vsel %vm6979_vm1, 4294967295, %v8723_v29  ;;  %v378_v52 = vmul.f32 %v5340_v26, %v6410_v18  ;;  %v5343_v25 = vunpack.c.l.bf16 %v6405_v17  ;;  %v1093_v48 = vrot.slane %v6972_v24, 7 }
  0x55   : > { %8725 = vst [vmem:[#allocation37_spill] sm:$0xff] %v8724_v29  ;;  %5782 = vmatmul.mubr.bf16.gmra.mxu0 %v6946_v42  ;;  %v1094_v12 = vrot.slane %v6974_v30, 7  ;;  %v787_v2 = vand.u32 15, %v583_v23  ;;  %v585_v16 = vadd.s32 240, %v6376_v8  ;;  %v8726_v37 = vmov 0.0  }
  0x56   : > { %v6991_v43 = vrot.slane %v8726_v37, 1  ;;  %5830 = vmatmul.mubr.msk.bf16.gmra.mxu1 %vm6966_vm10, %v6948_v46  ;;  %5785 = vmatprep.mubr.bf16.mxu0 %v6954_v9  ;;  %v415_v17 = vadd.f32 %v6429_v27, %v377_v49  ;;  %v416_v36 = vadd.f32 %v6429_v27, %v378_v52  ;;  %v379_v26 = vmul.f32 %v5343_v25, %v6410_v18 }
  0x57   : > { %5833 = vmatprep.mubr.msk.bf16.mxu1 %vm6979_vm1, %v6970_v22  ;;  %vm7003_vm12 = vcmp.gt.s32.totalorder %v773_v38, 0  ;;  %vm8730_vm3 = vcmp.lt.s32.totalorder %v6376_v8, 1  ;;  %v556_v49 = vadd.s32 8, %v6376_v8  ;;  %v7019_v38 = vpack.c.bf16 %v6974_v30, %v6972_v24 }
  0x58   : > { %8727 = vst [vmem:[#allocation38_spill] sm:$0xff] %v6991_v43  ;;  %v1104_v37 = vsel %vm8730_vm3, %v1093_v48, %v1094_v12  ;;  %vm8731_vm4 = vmmov %vm8730_vm3  ;;  %v7012_v52 = vmax.f32 %v415_v17, 0.0  ;;  %v7014_v25 = vmax.f32 %v416_v36, 0.0  ;;  %v417_v42 = vadd.f32 %v6429_v27, %v379_v26  ;;  %v7032_v36 = vld [vmem:[%s6398_s24 + $0x78] sm:$0xff]  }
  0x59   : > { %v1105_v9 = vsel %vm8731_vm4, %v1092_v50, %v1093_v48  ;;  %8733 = vst [vmem:[#allocation40_spill] sm:$0xff] %v7019_v38  ;;  %vm999_vm1 = vcmp.gt.s32.totalorder %v787_v2, 0  ;;  %v801_v10 = vand.u32 15, %v585_v16  ;;  %vm8591_vm4 = vcmp.lt.s32.totalorder %v6376_v8, 7 }
  0x5a   : > { %8732 = vst [vmem:[#allocation39_spill] sm:$0xff] %v7014_v25  ;;  %v7021_v29 = vpack.c.bf16 %v1104_v37, %v1105_v9  ;;  %v7025_v22 = vpack.c.bf16 %v7014_v25, %v7012_v52  ;;  %v1095_v50 = vrot.slane %v7012_v52, 7  ;;  %v1096_v48 = vrot.slane %v7014_v25, 7 }
  0x5b   : > { %v7029_v17 = vmax.f32 %v417_v42, 0.0  ;;  %vm8735_vm3 = vmmov 1   ;;  %v8736_v9 = vmov 0  ;;  %v7043_v2 = vrot.slane %v6468_v58, 1 }
  0x5c   : > { %8734 = vst [vmem:[#allocation41_spill] sm:$0xff] %v7025_v22  ;;  %vm7038_vm10 = vmpackc.low %vm8735_vm3, %vm7003_vm12  ;;  %vm8739_vm2 = vcmp.lt.s32.totalorder %v6376_v8, 1  ;;  %v8741_v26 = vmov 0  ;;  %v598_v37 = vand.u32 15, %v556_v49  ;;  %v5348_v58 = vunpack.c.h.bf16 %v7032_v36 }
  0x5d   : > { %v8737_v9 = vsel %vm7038_vm10, 4294967295, %v8736_v9  ;;  %v1102_v16 = vsel %vm8739_vm2, %v1095_v50, %v1096_v48  ;;  %vm8740_vm14 = vmmov %vm8739_vm2  ;;  %v1097_v23 = vrot.slane %v7029_v17, 7  ;;  %5786 = vmatmul.mubr.bf16.gmra.mxu0 %v7019_v38  ;;  %vm1001_vm2 = vcmp.gt.s32.totalorder %v801_v10, 0 }
  0x5e   : > { %8738 = vst [vmem:[#allocation42_spill] sm:$0xff] %v8737_v9  ;;  %v1103_v42 = vsel %vm8740_vm14, %v1094_v12, %v1095_v50  ;;  %vm7050_vm9 = vmpackc.low %vm8735_vm3, %vm999_vm1  ;;  %5834 = vmatmul.mubr.msk.bf16.gmra.mxu1 %vm7038_vm10, %v7021_v29  ;;  %5789 = vmatprep.mubr.bf16.mxu0 %v7025_v22  ;;  %v1773_v50 = vsel %vm8591_vm4, %v6991_v43, %v7043_v2  ;;  %v558_v10 = vadd.s32 24, %v6376_v8  ;;  %vm1004_vm12 = vcmp.lt.s32.totalorder %v598_v37, 15 }
  0x5f   : > { %v8742_v26 = vsel %vm7050_vm9, 4294967295, %v8741_v26  ;;  %v7056_v25 = vpack.c.bf16 %v1102_v16, %v1103_v42  ;;  %vm8745_vm1 = vmmov %vm8740_vm14  ;;  %v382_v16 = vmul.f32 %v5348_v58, %v6410_v18  ;;  %v560_v42 = vadd.s32 40, %v6376_v8 }
  0x60   : > { %8743 = vst [vmem:[#allocation43_spill] sm:$0xff] %v8742_v26  ;;  %v1100_v12 = vsel %vm8745_vm1, %v1097_v23, %v6476_v62  ;;  %vm8746_vm14 = vmmov %vm8745_vm1  ;;  %v1714_v22 = vrot.slane %v6470_v59, 1  ;;  %v7081_v38 = vpack.c.bf16 %v6463_v54, %v7029_v17  ;;  %v4834_v18 = vpack.c.bf16 %v1773_v50, %v6991_v43 }
  0x61   : > { %8744 = vst [vmem:[#allocation44_spill] sm:$0xff] %v7056_v25  ;;  %5837 = vmatprep.mubr.msk.bf16.mxu1 %vm7050_vm9, %v7056_v25  ;;  %v1101_v49 = vsel %vm8746_vm14, %v1096_v48, %v1097_v23  ;;  %v7084_v48 = vrot.slane %v6472_v60, 1  ;;  %vm7087_vm1 = vmpackc.low %vm8735_vm3, %vm1001_vm2  ;;  %v8748_v23 = vmov 0  ;;  %v420_v37 = vadd.f32 %v6429_v27, %v382_v16 }
  0x62   : > { %v8749_v23 = vsel %vm7087_vm1, 4294967295, %v8748_v23  ;;  %v7091_v62 = vpack.c.bf16 %v1100_v12, %v1101_v49  ;;  %vm7096_vm14 = vmpackc.low %vm1004_vm12, %vm8735_vm3  ;;  %v8750_v59 = vmov 0  ;;  %v612_v58 = vand.u32 15, %v558_v10 }
  0x63   : > { %8747 = vst [vmem:[#allocation45_spill] sm:$0xff] %v7084_v48  ;;  %v8751_v59 = vsel %vm7096_vm14, 4294967295, %v8750_v59  ;;  %v1716_v60 = vrot.slane %v6478_v63, 1  ;;  %v1717_v26 = vrot.slane %v6495_v6, 1  ;;  %v7102_v9 = vmax.f32 %v420_v37, 0.0 }
  0x64   : > { %v626_v25 = vand.u32 15, %v560_v42  ;;  %v1771_v12 = vsel %vm8591_vm4, %v1714_v22, %v7084_v48  ;;  %v1772_v27 = vsel %vm8591_vm4, %v7043_v2, %v1714_v22  ;;  %vm1006_vm2 = vcmp.lt.s32.totalorder %v612_v58, 15 }
  0x65   : > { %5790 = vmatmul.mubr.bf16.gmra.mxu0 %v7081_v38  ;;  %v7117_v63 = vrot.slane %v7102_v9, 7  ;;  %v1769_v6 = vsel %vm8591_vm4, %v1716_v60, %v1717_v26  ;;  %v1770_v49 = vsel %vm8591_vm4, %v7084_v48, %v1716_v60  ;;  %v562_v50 = vadd.s32 56, %v6376_v8  ;;  %v8788_v48 = vld [vmem:[#allocation26_spill] sm:$0xff] }
  0x66   : > { %5838 = vmatmul.mubr.msk.bf16.gmra.mxu1 %vm7087_vm1, %v7091_v62  ;;  %5857 = vmatprep.mubr.msk.bf16.mxu0 %vm7096_vm14, %v4834_v18  ;;  %vm8752_vm12 = vcmp.lt.s32.totalorder %v6376_v8, 1  ;;  %vm1008_vm1 = vcmp.lt.s32.totalorder %v626_v25, 15  ;;  %v564_v10 = vadd.s32 72, %v6376_v8  ;;  %v7130_v16 = vpack.c.bf16 %v1771_v12, %v1772_v27  ;;  %vm7134_vm14 = vmpackc.low %vm1006_vm2, %vm8735_vm3 }
  0x67   : > { %v2241_v22 = vsel %vm8752_vm12, %v7117_v63, %v6492_v4  ;;  %v7138_v37 = vpack.c.bf16 %v1769_v6, %v1770_v49  ;;  %v1718_v58 = vrot.slane %v6497_v7, 1  ;;  %v1719_v60 = vrot.slane %v6599_v56, 1  ;;  %vm7145_vm12 = vmpackc.low %vm1008_vm1, %vm8735_vm3  ;;  %v6239_v7 = vld [vmem:[%s8505_s3 + $0x130] sm:$0xff]  }
  0x68   : > { %v4906_v42 = vpack.c.bf16 %v6515_v15, %v2241_v22  ;;  %v640_v15 = vand.u32 15, %v562_v50  ;;  %v1720_v25 = vrot.slane %v6606_v1, 1  ;;  %v1721_v12 = vrot.slane %v6611_v14, 1  ;;  %v6240_v56 = vld [vmem:[%s8505_s3 + $0x170] sm:$0xff]  }
  0x69   : > { %v654_v27 = vand.u32 15, %v564_v10  ;;  %v1767_v1 = vsel %vm8591_vm4, %v1718_v58, %v1719_v60  ;;  %v1768_v14 = vsel %vm8591_vm4, %v1717_v26, %v1718_v58  ;;  %v566_v49 = vadd.s32 88, %v6376_v8  ;;  %v6241_v26 = vld [vmem:[%s8505_s3 + $0x128] sm:$0xff]  }
  0x6a   : > { %5905 = vmatprep.mubr.msk.bf16.mxu1 %vm6487_vm5, %v4906_v42  ;;  %vm1010_vm1 = vcmp.lt.s32.totalorder %v640_v15, 15  ;;  %v1765_v6 = vsel %vm8591_vm4, %v1720_v25, %v1721_v12  ;;  %v568_v50 = vadd.s32 104, %v6376_v8  ;;  %v7184_v22 = vpack.c.bf16 %v1767_v1, %v1768_v14  ;;  %v6242_v10 = vld [vmem:[%s8505_s3 + $0x168] sm:$0xff]  }
  0x6b   : > { %vm1012_vm2 = vcmp.lt.s32.totalorder %v654_v27, 15  ;;  %v1723_v58 = vrot.slane %v6670_v53, 1  ;;  %v668_v15 = vand.u32 15, %v566_v49  ;;  %v1725_v27 = vrot.slane %v6731_v21, 1  ;;  %v6244_v53 = vld [vmem:[%s8505_s3 + $0x160] sm:$0xff]  }
  0x6c   : > { %v682_v1 = vand.u32 15, %v568_v50  ;;  %v6246_v50 = vld [vmem:[%s8505_s3 + $0x158] sm:$0xff]   ;;  %v1733_v19 = vrot.slane %v6906_v11, 1 }
  0x6d   : > { %5858 = vmatmul.mubr.msk.bf16.vlgmr.msra.gmra.mxu0 %vm7134_vm14, %v7130_v16 }
  0x6e   : > { %5906 = vmatmul.mubr.msk.bf16.vlgmr.msra.gmra.mxu1 %vm6556_vm7, %v6561_v35  ;;  %5861 = vmatprep.mubr.msk.bf16.mxu0 %vm7145_vm12, %v7138_v37  ;;  %v1766_v35 = vsel %vm8591_vm4, %v1719_v60, %v1720_v25  ;;  %vm7190_vm4 = vmpackc.low %vm1010_vm1, %vm8735_vm3  ;;  %v8760_v60 = vmov 0  ;;  %v1724_v25 = vrot.slane %v6672_v57, 1  ;;  %vm8763_vm1 = vcmp.lt.s32.totalorder %v6376_v8, 7 }
  0x6f   : > { %5909 = vmatprep.mubr.msk.bf16.mxu1 %vm6569_vm8, %v6578_v45  ;;  %5938 = vmatpush3.bf16.msra.mxu0 %v6870_v61  ;;  %v8757_v61 = vmov 0  ;;  %v7194_v42 = vpack.c.bf16 %v1765_v6, %v1766_v35  ;;  %vm7199_vm8 = vmpackc.low %vm1012_vm2, %vm8735_vm3  ;;  %vm7224_vm7 = vcmp.lt.s32.totalorder %v668_v15, 15  ;;  %v570_v6 = vadd.s32 120, %v6376_v8  ;;  %v6245_v35 = vld [vmem:[%s8505_s3 + $0x118] sm:$0xff]  }
  0x70   : > { %5986 = vmatpush3.bf16.msra.mxu1 %v6882_v20  ;;  %5939 = vmatprep.subr.bf16.mxu0 %v6239_v7  ;;  %v8758_v61 = vsel %vm7190_vm4, 4294967295, %v8757_v61  ;;  %v1722_v20 = vrot.slane %v6623_v33, 1  ;;  %v8761_v60 = vsel %vm7199_vm8, 4294967295, %v8760_v60  ;;  %v6243_v33 = vld [vmem:[%s8505_s3 + $0x120] sm:$0xff]   ;;  %vm8764_vm2 = vmmov %vm8763_vm1  ;;  %v1727_v15 = vrot.slane %v6765_v5, 1 }
  0x71   : > { %5987 = vmatprep.subr.bf16.mxu1 %v6240_v56  ;;  %8759 = vst [vmem:[#allocation46_spill] sm:$0xff] %v8758_v61  ;;  %8762 = vst [vmem:[#allocation47_spill] sm:$0xff] %v8761_v60  ;;  %v6277_v5 = vld [vmem:[%s8503_s1] ss:$0 sm:$0xff]  ;;  %v6263_v60 = vld [vmem:[%s8505_s3 + $0x190] sm:$0xff]  }
  0x72   : > { %v1763_v57 = vsel %vm8763_vm1, %v1722_v20, %v1723_v58  ;;  %v1764_v21 = vsel %vm8764_vm2, %v1721_v12, %v1722_v20  ;;  %vm8768_vm5 = vmmov %vm8763_vm1  ;;  %v572_v12 = vadd.s32 136, %v6376_v8  ;;  %v5347_v20 = vunpack.c.l.bf16 %v7032_v36  ;;  %v8851_v61 = vld [vmem:[#allocation13_spill] sm:$0xff] }
  0x73   : > { %5940 = vmatpush3.bf16.msra.mxu0 %v6239_v7  ;;  %v1762_v14 = vsel %vm8768_vm5, %v1723_v58, %v1724_v25  ;;  %v7240_v49 = vpack.c.bf16 %v1763_v57, %v1764_v21  ;;  %vm7249_vm5 = vmpackc.low %vm7224_vm7, %vm8735_vm3  ;;  %v1726_v58 = vrot.slane %v6733_v39, 1  ;;  %v1728_v36 = vrot.slane %v6767_v0, 1  ;;  %v6247_v39 = vld [vmem:[%s8505_s3 + $0x110] sm:$0xff]  }
  0x74   : > { %5988 = vmatpush3.bf16.msra.mxu1 %v6240_v56  ;;  %5941 = vmatprep.subr.bf16.mxu0 %v6241_v26  ;;  %v1729_v57 = vrot.slane %v6790_v13, 1  ;;  %v710_v21 = vand.u32 15, %v572_v12  ;;  %v381_v7 = vmul.f32 %v6277_v5, %v5347_v20  ;;  %v6248_v0 = vld [vmem:[%s8505_s3 + $0x150] sm:$0xff]   ;;  %vm8775_vm7 = vmmov %vm8764_vm2 }
  0x75   : > { %5862 = vmatmul.mubr.msk.bf16.gmra.mxu0 %vm7190_vm4, %v7184_v22  ;;  %5989 = vmatprep.subr.bf16.mxu1 %v6242_v10  ;;  %v1759_v13 = vsel %vm8775_vm7, %v1726_v58, %v1727_v15  ;;  %vm8780_vm7 = vmmov %vm8764_vm2 }
  0x76   : > { %5910 = vmatmul.mubr.msk.bf16.gmra.mxu1 %vm6644_vm11, %v6666_v51  ;;  %5865 = vmatprep.mubr.msk.bf16.mxu0 %vm7199_vm8, %v7194_v42  ;;  %vm8767_vm11 = vmmov %vm8763_vm1  ;;  %vm1016_vm1 = vcmp.lt.s32.totalorder %v682_v1, 15  ;;  %v696_v1 = vand.u32 15, %v570_v6  ;;  %v1758_v20 = vsel %vm8780_vm7, %v1727_v15, %v1728_v36  ;;  %v6250_v15 = vld [vmem:[%s8505_s3 + $0x148] sm:$0xff]   ;;  %v1732_v6 = vrot.slane %v8788_v48, 1  ;;  %v8789_v48 = vld [vmem:[#allocation21_spill] sm:$0xff] }
  0x77   : > { %5913 = vmatprep.mubr.msk.bf16.mxu1 %vm6662_vm13, %v6685_v55  ;;  %v1761_v56 = vsel %vm8767_vm11, %v1724_v25, %v1725_v27  ;;  %5942 = vmatpush3.bf16.msra.mxu0 %v6241_v26  ;;  %v8769_v26 = vmov 0  ;;  %vm7258_vm11 = vmpackc.low %vm1016_vm1, %vm8735_vm3  ;;  %v8772_v25 = vmov 0 }
  0x78   : > { %5990 = vmatpush3.bf16.msra.mxu1 %v6242_v10  ;;  %5943 = vmatprep.subr.bf16.mxu0 %v6243_v33  ;;  %v8770_v26 = vsel %vm7249_vm5, 4294967295, %v8769_v26  ;;  %v7253_v10 = vpack.c.bf16 %v1761_v56, %v1762_v14  ;;  %v8773_v25 = vsel %vm7258_vm11, 4294967295, %v8772_v25  ;;  %vm7289_vm1 = vcmp.lt.s32.totalorder %v696_v1, 15  ;;  %v6249_v1 = vld [vmem:[%s8505_s3 + $0x108] sm:$0xff]  }
  0x79   : > { %5991 = vmatprep.subr.bf16.mxu1 %v6244_v53  ;;  %8771 = vst [vmem:[#allocation48_spill] sm:$0xff] %v8770_v26  ;;  %8774 = vst [vmem:[#allocation49_spill] sm:$0xff] %v8773_v25  ;;  %v6267_v25 = vld [vmem:[%s8505_s3 + $0x180] sm:$0xff]   ;;  %v8853_v26 = vld [vmem:[#allocation18_spill] sm:$0xff] }
  0x7b   : > { %5944 = vmatpush3.bf16.msra.mxu0 %v6243_v33  ;;  %v1760_v33 = vsel %vm8764_vm2, %v1725_v27, %v1726_v58  ;;  %v574_v27 = vadd.s32 152, %v6376_v8  ;;  %v576_v58 = vadd.s32 168, %v6376_v8 }
  0x7c   : > { %5992 = vmatpush3.bf16.msra.mxu1 %v6244_v53  ;;  %5945 = vmatprep.subr.bf16.mxu0 %v6245_v35  ;;  %v6278_v53 = vld [vmem:[%s8504_s2] ss:$0 sm:$0xff] }
  0x7d   : > { %5866 = vmatmul.mubr.msk.bf16.gmra.mxu0 %vm7249_vm5, %v7240_v49  ;;  %5993 = vmatprep.subr.bf16.mxu1 %v6246_v50  ;;  %v419_v56 = vadd.f32 %v6278_v53, %v381_v7  ;;  %v7307_v7 = vpack.c.bf16 %v1759_v13, %v1760_v33  ;;  %v8785_v53 = vld [vmem:[#allocation25_spill] sm:$0xff]  ;;  %v8786_v33 = vmov 0  ;;  %v724_v14 = vand.u32 15, %v574_v27  ;;  %v6252_v27 = vld [vmem:[%s8505_s3 + $0x140] sm:$0xff]  }
  0x7e   : > { %5914 = vmatmul.mubr.msk.bf16.gmra.mxu1 %vm6727_vm15, %v6707_v47  ;;  %5869 = vmatprep.mubr.msk.bf16.mxu0 %vm7258_vm11, %v7253_v10  ;;  %vm8779_vm15 = vmmov %vm8764_vm2  ;;  %vm1020_vm2 = vcmp.lt.s32.totalorder %v710_v21, 15 }
  0x7f   : > { %5917 = vmatprep.mubr.msk.bf16.mxu1 %vm6742_vm0, %v6782_v41  ;;  %v1757_v12 = vsel %vm8779_vm15, %v1728_v36, %v1729_v57  ;;  %5946 = vmatpush3.bf16.msra.mxu0 %v6245_v35  ;;  %v7305_v5 = vmax.f32 %v419_v56, 0.0  ;;  %vm7315_vm15 = vmpackc.low %vm7289_vm1, %vm8735_vm3  ;;  %v8781_v35 = vmov 0  ;;  %v8784_v36 = vld [vmem:[#allocation19_spill] sm:$0xff]  ;;  %v1731_v56 = vrot.slane %v8785_v53, 1 }
  0x80   : > { %5994 = vmatpush3.bf16.msra.mxu1 %v6246_v50  ;;  %5947 = vmatprep.subr.bf16.mxu0 %v6247_v39  ;;  %v8782_v35 = vsel %vm7315_vm15, 4294967295, %v8781_v35  ;;  %v7319_v50 = vpack.c.bf16 %v1757_v12, %v1758_v20  ;;  %v1730_v21 = vrot.slane %v8784_v36, 1  ;;  %vm7328_vm7 = vmpackc.low %vm1020_vm2, %vm8735_vm3  ;;  %v738_v12 = vand.u32 15, %v576_v58  ;;  %v6251_v20 = vld [vmem:[%s8505_s3 + $0x100] sm:$0xff]  }
  0x81   : > { %5995 = vmatprep.subr.bf16.mxu1 %v6248_v0  ;;  %8783 = vst [vmem:[#allocation50_spill] sm:$0xff] %v8782_v35  ;;  %v7325_v13 = vpack.c.bf16 %v7102_v9, %v7305_v5  ;;  %v8787_v33 = vsel %vm7328_vm7, 4294967295, %v8786_v33  ;;  %vm8791_vm1 = vcmp.lt.s32.totalorder %v6376_v8, 7  ;;  %vm1022_vm0 = vcmp.lt.s32.totalorder %v724_v14, 15  ;;  %v8800_v14 = vld [vmem:[#allocation31_spill] sm:$0xff] }
  0x82   : > { %v1755_v11 = vsel %vm8791_vm1, %v1730_v21, %v1731_v56  ;;  %vm8792_vm2 = vmmov %vm8791_vm1  ;;  %v578_v36 = vadd.s32 184, %v6376_v8  ;;  %v1737_v41 = vrot.slane %v6972_v24, 1 }
  0x83   : > { %5948 = vmatpush3.bf16.msra.mxu0 %v6247_v39  ;;  %v1756_v39 = vsel %vm8792_vm2, %v1729_v57, %v1730_v21  ;;  %v7365_v57 = vld [vmem:[%s8505_s3 + $0x1b8] sm:$0xff]  }
  0x84   : > { %5996 = vmatpush3.bf16.msra.mxu1 %v6248_v0  ;;  %5949 = vmatprep.subr.bf16.mxu0 %v6249_v1  ;;  %v8793_v0 = vld [vmem:[#allocation23_spill] sm:$0xff]  ;;  %v7367_v21 = vpack.c.bf16 %v1755_v11, %v1756_v39  ;;  %v8801_v11 = vmov 0  ;;  %v752_v39 = vand.u32 15, %v578_v36 }
  0x85   : > { %5870 = vmatmul.mubr.msk.bf16.gmra.mxu0 %vm7315_vm15, %v7307_v7  ;;  %5997 = vmatprep.subr.bf16.mxu1 %v6250_v15  ;;  %vm8794_vm13 = vnez %v8793_v0  ;;  %vm8795_vm15 = vmmov %vm8791_vm1  ;;  %v8804_v0 = vld [vmem:[#allocation32_spill] sm:$0xff] }
  0x86   : > { %5918 = vmatmul.mubr.msk.bf16.gmra.mxu1 %vm6814_vm6, %v8789_v48  ;;  %5873 = vmatprep.mubr.msk.bf16.mxu0 %vm7328_vm7, %v7319_v50  ;;  %v1753_v58 = vsel %vm8795_vm15, %v1732_v6, %v1733_v19  ;;  %vm8796_vm6 = vmmov %vm8791_vm1  ;;  %vm1024_vm7 = vcmp.lt.s32.totalorder %v738_v12, 15  ;;  %v580_v48 = vadd.s32 200, %v6376_v8  ;;  %v1735_v12 = vrot.slane %v8800_v14, 1 }
  0x87   : > { %5921 = vmatprep.mubr.msk.bf16.mxu1 %vm8794_vm13, %v6848_v32  ;;  %v1754_v53 = vsel %vm8796_vm6, %v1731_v56, %v1732_v6  ;;  %5950 = vmatpush3.bf16.msra.mxu0 %v6249_v1  ;;  %v7372_v6 = vld [vmem:[%s8505_s3 + $0x1f8] sm:$0xff]   ;;  %vm7375_vm6 = vmpackc.low %vm1022_vm0, %vm8735_vm3  ;;  %v8797_v1 = vmov 0  ;;  %v1734_v56 = vrot.slane %v6908_v31, 1  ;;  %v1736_v32 = vrot.slane %v8804_v0, 1 }
  0x88   : > { %5998 = vmatpush3.bf16.msra.mxu1 %v6250_v15  ;;  %5951 = vmatprep.subr.bf16.mxu0 %v6251_v20  ;;  %v8798_v1 = vsel %vm7375_vm6, 4294967295, %v8797_v1  ;;  %v7379_v15 = vpack.c.bf16 %v1753_v58, %v1754_v53  ;;  %vm7384_vm15 = vmpackc.low %vm1024_vm7, %vm8735_vm3  ;;  %v766_v28 = vand.u32 15, %v580_v48  ;;  %v8805_v31 = vld [vmem:[#allocation30_spill] sm:$0xff]  ;;  %v8806_v58 = vld [vmem:[#allocation27_spill] sm:$0xff]  ;;  %vm1026_vm2 = vcmp.lt.s32.totalorder %v752_v39, 15 }
  0x89   : > { %5999 = vmatprep.subr.bf16.mxu1 %v6252_v27  ;;  %8799 = vst [vmem:[#allocation19_spill] sm:$0xff] %v8798_v1  ;;  %v8802_v11 = vsel %vm7384_vm15, 4294967295, %v8801_v11  ;;  %vm8807_vm0 = vnez %v8806_v58  ;;  %vm8808_vm7 = vmmov %vm8791_vm1  ;;  %v582_v0 = vadd.s32 216, %v6376_v8  ;;  %v584_v53 = vadd.s32 232, %v6376_v8 }
  0x8a   : > { %8803 = vst [vmem:[#allocation25_spill] sm:$0xff] %v8802_v11  ;;  %v1751_v24 = vsel %vm8808_vm7, %v1734_v56, %v1735_v12  ;;  %vm7417_vm7 = vmpackc.low %vm1026_vm2, %vm8735_vm3  ;;  %v1738_v39 = vrot.slane %v6974_v30, 1 }
  0x8b   : > { %5952 = vmatpush3.bf16.msra.mxu0 %v6251_v20  ;;  %v1752_v20 = vsel %vm8791_vm1, %v1733_v19, %v1734_v56  ;;  %v8813_v19 = vmov 0  ;;  %v794_v58 = vand.u32 15, %v584_v53 }
  0x8c   : > { %6000 = vmatpush3.bf16.msra.mxu1 %v6252_v27  ;;  %6033 = vmatprep.subr.bf16.mxu0 %v7365_v57  ;;  %v8809_v27 = vld [vmem:[#allocation29_spill] sm:$0xff]  ;;  %v7414_v14 = vpack.c.bf16 %v1751_v24, %v1752_v20  ;;  %v8814_v19 = vsel %vm7417_vm7, 4294967295, %v8813_v19  ;;  %v1741_v20 = vrot.slane %v7029_v17, 1 }
  0x8d   : > { %5874 = vmatmul.mubr.msk.bf16.gmra.mxu0 %vm7375_vm6, %v7367_v21  ;;  %6081 = vmatprep.subr.bf16.mxu1 %v7372_v6  ;;  %vm8810_vm13 = vnez %v8809_v27  ;;  %vm8811_vm6 = vmmov %vm8791_vm1  ;;  %v1739_v27 = vrot.slane %v7012_v52, 1  ;;  %v1748_v52 = vsel %vm8791_vm1, %v1737_v41, %v1738_v39  ;;  %v8823_v17 = vld [vmem:[#allocation37_spill] sm:$0xff] }
  0x8e   : > { %5922 = vmatmul.mubr.msk.bf16.gmra.mxu1 %vm8807_vm0, %v8805_v31  ;;  %5877 = vmatprep.mubr.msk.bf16.mxu0 %vm7384_vm15, %v7379_v15  ;;  %v1749_v48 = vsel %vm8811_vm6, %v1736_v32, %v1737_v41  ;;  %vm8812_vm0 = vmmov %vm8791_vm1  ;;  %vm1028_vm15 = vcmp.lt.s32.totalorder %v766_v28, 15  ;;  %v780_v28 = vand.u32 15, %v582_v0 }
  0x8f   : > { %5925 = vmatprep.mubr.msk.bf16.mxu1 %vm8810_vm13, %v6948_v46  ;;  %v1750_v36 = vsel %vm8812_vm0, %v1735_v12, %v1736_v32  ;;  %vm7426_vm6 = vmpackc.low %vm1028_vm15, %vm8735_vm3  ;;  %v8815_v32 = vmov 0  ;;  %v8818_v12 = vld [vmem:[#allocation39_spill] sm:$0xff]  ;;  %vm8824_vm13 = vnez %v8823_v17  ;;  %v8841_v17 = vmov 0 }
  0x90   : > { %v7421_v56 = vpack.c.bf16 %v1749_v48, %v1750_v36  ;;  %v8816_v32 = vsel %vm7426_vm6, 4294967295, %v8815_v32  ;;  %v1740_v24 = vrot.slane %v8818_v12, 1  ;;  %v8819_v48 = vld [vmem:[#allocation36_spill] sm:$0xff]  ;;  %v8820_v36 = vld [vmem:[#allocation35_spill] sm:$0xff]  ;;  %vm8822_vm15 = vmmov %vm8791_vm1  ;;  %vm1030_vm2 = vcmp.lt.s32.totalorder %v780_v28, 15 }
  0x91   : > { %8817 = vst [vmem:[#allocation26_spill] sm:$0xff] %v8816_v32  ;;  %vm8821_vm0 = vnez %v8820_v36  ;;  %v1747_v30 = vsel %vm8822_vm15, %v1738_v39, %v1739_v27  ;;  %v586_v12 = vadd.s32 248, %v6376_v8  ;;  %vm7456_vm15 = vmpackc.low %vm1030_vm2, %vm8735_vm3  ;;  %v7463_v39 = vrot.slane %v6463_v54, 1 }
  0x92   : > { %v7453_v36 = vpack.c.bf16 %v1747_v30, %v1748_v52  ;;  %v8831_v28 = vmov 0  ;;  %vm8838_vm2 = vcmp.lt.s32.totalorder %v6376_v8, 1 }
  0x95   : > { %5878 = vmatmul.mubr.msk.bf16.gmra.mxu0 %vm7417_vm7, %v7414_v14  ;;  %vm8825_vm7 = vmmov %vm8791_vm1 }
  0x96   : > { %5926 = vmatmul.mubr.msk.bf16.gmra.mxu1 %vm8821_vm0, %v8819_v48  ;;  %5881 = vmatprep.mubr.msk.bf16.mxu0 %vm7426_vm6, %v7421_v56  ;;  %v1745_v0 = vsel %vm8825_vm7, %v1740_v24, %v1741_v20  ;;  %vm8826_vm0 = vmmov %vm8791_vm1  ;;  %vm1032_vm6 = vcmp.lt.s32.totalorder %v794_v58, 15  ;;  %v8827_v48 = vmov 0  ;;  %v2208_v58 = vrot.slane %v7305_v5, 7 }
  0x97   : > { %5929 = vmatprep.mubr.msk.bf16.mxu1 %vm8824_vm13, %v7021_v29  ;;  %v1746_v53 = vsel %vm8826_vm0, %v1739_v27, %v1740_v24  ;;  %v8828_v48 = vsel %vm7456_vm15, 4294967295, %v8827_v48  ;;  %vm7466_vm7 = vmpackc.low %vm1032_vm6, %vm8735_vm3  ;;  %v808_v27 = vand.u32 15, %v586_v12  ;;  %v8834_v24 = vld [vmem:[#allocation44_spill] sm:$0xff]  ;;  %v1775_v52 = vsel %vm8826_vm0, %v7463_v39, %v6991_v43  ;;  %v8845_v43 = vld [vmem:[#allocation5_spill] sm:$0xff] }
  0x98   : > { %8829 = vst [vmem:[#allocation31_spill] sm:$0xff] %v8828_v48  ;;  %v7460_v41 = vpack.c.bf16 %v1745_v0, %v1746_v53  ;;  %v8832_v28 = vsel %vm7466_vm7, 4294967295, %v8831_v28  ;;  %vm8836_vm6 = vmmov %vm8826_vm0  ;;  %v2210_v53 = vsel %vm8838_vm2, %v2208_v58, %v7117_v63  ;;  %v8839_v12 = vld [vmem:[#allocation4_spill] sm:$0xff]  ;;  %vm8844_vm0 = vnez %v8749_v23 }
  0x99   : > { %8833 = vst [vmem:[#allocation30_spill] sm:$0xff] %v8832_v28  ;;  %v7483_v54 = vsel %vm8836_vm6, %v1741_v20, %v7463_v39  ;;  %vm1034_vm1 = vcmp.lt.s32.totalorder %v808_v27, 15 }
  0x9a   : > { %8830 = vst [vmem:[#allocation32_spill] sm:$0xff] %v7460_v41  ;;  %v4879_v20 = vpack.c.bf16 %v1775_v52, %v7483_v54  ;;  %vm7500_vm6 = vmpackc.low %vm1034_vm1, %vm8735_vm3  ;;  %v8847_v52 = vld [vmem:[#allocation7_spill] sm:$0xff]  ;;  %vm8854_vm3 = vnez %v8782_v35  ;;  %vm8856_vm1 = vnez %v8787_v33  ;;  %v8859_v35 = vld [vmem:[#allocation33_spill] sm:$0xff] }
  0x9b   : > { %v8842_v17 = vsel %vm7500_vm6, 4294967295, %v8841_v17 }
  0x9c   : > { %8843 = vst [vmem:[#allocation39_spill] sm:$0xff] %v8842_v17 }
  0x9d   : > { %5882 = vmatmul.mubr.msk.bf16.gmra.mxu0 %vm7456_vm15, %v7453_v36 }
  0x9e   : > { %5930 = vmatmul.mubr.msk.bf16.gmra.mxu1 %vm7038_vm10, %v8834_v24  ;;  %5885 = vmatprep.mubr.msk.bf16.mxu0 %vm7466_vm7, %v7460_v41  ;;  %vm8840_vm10 = vmmov %vm8838_vm2  ;;  %vm8858_vm2 = vnez %v8798_v1  ;;  %v8868_v1 = vld [vmem:[#allocation41_spill] sm:$0xff] }
  0x9f   : > { %5933 = vmatprep.mubr.msk.bf16.mxu1 %vm7050_vm9, %v7091_v62  ;;  %v2211_v30 = vsel %vm8840_vm10, %v8839_v12, %v2208_v58  ;;  %vm8846_vm10 = vnez %v8751_v59  ;;  %v6255_v58 = vld [vmem:[%s8505_s3 + $0x1b0] sm:$0xff]   ;;  %v6259_v12 = vld [vmem:[%s8505_s3 + $0x1a0] sm:$0xff]  }
  0xa0   : > { %v7504_v27 = vpack.c.bf16 %v2210_v53, %v2211_v30  ;;  %v6256_v30 = vld [vmem:[%s8505_s3 + $0x1f0] sm:$0xff]   ;;  %v8848_v53 = vld [vmem:[#allocation8_spill] sm:$0xff] }
  0xa5   : > { %5886 = vmatmul.mubr.msk.bf16.gmra.mxu0 %vm7500_vm6, %v4879_v20  ;;  %v8850_v20 = vld [vmem:[#allocation11_spill] sm:$0xff] }
  0xa6   : > { %5934 = vmatmul.mubr.msk.bf16.gmra.mxu1 %vm8844_vm0, %v7504_v27  ;;  %5953 = vmatprep.mubr.bf16.mxu0 %v8845_v43  ;;  %v6257_v43 = vld [vmem:[%s8505_s3 + $0x1a8] sm:$0xff]  }
  0xa7   : > { %6001 = vmatprep.mubr.msk.bf16.mxu1 %vm8846_vm10, %v7130_v16  ;;  %v6258_v16 = vld [vmem:[%s8505_s3 + $0x1e8] sm:$0xff]  }
  0xad   : > { %5954 = vmatmul.mubr.bf16.vlgmr.msra.gmra.mxu0 %v8847_v52 }
  0xae   : > { %6002 = vmatmul.mubr.msk.bf16.vlgmr.msra.gmra.mxu1 %vm7134_vm14, %v7138_v37  ;;  %5957 = vmatprep.mubr.bf16.mxu0 %v8848_v53 }
  0xaf   : > { %6005 = vmatprep.mubr.msk.bf16.mxu1 %vm7145_vm12, %v7184_v22  ;;  %6034 = vmatpush3.bf16.msra.mxu0 %v7365_v57  ;;  %v8849_v57 = vld [vmem:[#allocation10_spill] sm:$0xff] }
  0xb0   : > { %6082 = vmatpush3.bf16.msra.mxu1 %v7372_v6  ;;  %6035 = vmatprep.subr.bf16.mxu0 %v6255_v58  ;;  %v6260_v6 = vld [vmem:[%s8505_s3 + $0x1e0] sm:$0xff]  }
  0xb1   : > { %6083 = vmatprep.subr.bf16.mxu1 %v6256_v30 }
  0xb3   : > { %6036 = vmatpush3.bf16.msra.mxu0 %v6255_v58  ;;  %v6261_v58 = vld [vmem:[%s8505_s3 + $0x198] sm:$0xff]  }
  0xb4   : > { %6084 = vmatpush3.bf16.msra.mxu1 %v6256_v30  ;;  %6037 = vmatprep.subr.bf16.mxu0 %v6257_v43  ;;  %v6262_v30 = vld [vmem:[%s8505_s3 + $0x1d8] sm:$0xff]  }
  0xb5   : > { %5958 = vmatmul.mubr.bf16.gmra.mxu0 %v8849_v57  ;;  %6085 = vmatprep.subr.bf16.mxu1 %v6258_v16 }
  0xb6   : > { %6006 = vmatmul.mubr.msk.bf16.gmra.mxu1 %vm7190_vm4, %v7194_v42  ;;  %5961 = vmatprep.mubr.bf16.mxu0 %v8850_v20 }
  0xb7   : > { %6009 = vmatprep.mubr.msk.bf16.mxu1 %vm7199_vm8, %v7240_v49  ;;  %6038 = vmatpush3.bf16.msra.mxu0 %v6257_v43  ;;  %v6264_v43 = vld [vmem:[%s8505_s3 + $0x1d0] sm:$0xff]  }
  0xb8   : > { %6086 = vmatpush3.bf16.msra.mxu1 %v6258_v16  ;;  %6039 = vmatprep.subr.bf16.mxu0 %v6259_v12  ;;  %v8852_v16 = vld [vmem:[#allocation16_spill] sm:$0xff] }
  0xb9   : > { %6087 = vmatprep.subr.bf16.mxu1 %v6260_v6 }
  0xbb   : > { %6040 = vmatpush3.bf16.msra.mxu0 %v6259_v12  ;;  %v6265_v12 = vld [vmem:[%s8505_s3 + $0x188] sm:$0xff]  }
  0xbc   : > { %6088 = vmatpush3.bf16.msra.mxu1 %v6260_v6  ;;  %6041 = vmatprep.subr.bf16.mxu0 %v6261_v58  ;;  %v6266_v6 = vld [vmem:[%s8505_s3 + $0x1c8] sm:$0xff]  }
  0xbd   : > { %5962 = vmatmul.mubr.bf16.gmra.mxu0 %v8851_v61  ;;  %6089 = vmatprep.subr.bf16.mxu1 %v6262_v30 }
  0xbe   : > { %6010 = vmatmul.mubr.msk.bf16.gmra.mxu1 %vm7249_vm5, %v7253_v10  ;;  %5965 = vmatprep.mubr.bf16.mxu0 %v8852_v16 }
  0xbf   : > { %6013 = vmatprep.mubr.msk.bf16.mxu1 %vm7258_vm11, %v7307_v7  ;;  %6042 = vmatpush3.bf16.msra.mxu0 %v6261_v58  ;;  %v6268_v58 = vld [vmem:[%s8505_s3 + $0x1c0] sm:$0xff]   ;;  %vm8864_vm11 = vnez %v8816_v32 }
  0xc0   : > { %6090 = vmatpush3.bf16.msra.mxu1 %v6262_v30  ;;  %6043 = vmatprep.subr.bf16.mxu0 %v6263_v60  ;;  %v8855_v30 = vld [vmem:[#allocation22_spill] sm:$0xff] }
  0xc1   : > { %6091 = vmatprep.subr.bf16.mxu1 %v6264_v43 }
  0xc3   : > { %6044 = vmatpush3.bf16.msra.mxu0 %v6263_v60  ;;  %v6269_v60 = vld [vmem:[%s8505_s3 + $0x238] sm:$0xff]  }
  0xc4   : > { %6092 = vmatpush3.bf16.msra.mxu1 %v6264_v43  ;;  %6045 = vmatprep.subr.bf16.mxu0 %v6265_v12  ;;  %v8857_v43 = vld [vmem:[#allocation28_spill] sm:$0xff] }
  0xc5   : > { %5966 = vmatmul.mubr.bf16.gmra.mxu0 %v8853_v26  ;;  %6093 = vmatprep.subr.bf16.mxu1 %v6266_v6 }
  0xc6   : > { %6014 = vmatmul.mubr.msk.bf16.gmra.mxu1 %vm8854_vm3, %v7319_v50  ;;  %5969 = vmatprep.mubr.bf16.mxu0 %v8855_v30  ;;  %vm8862_vm3 = vnez %v8814_v19 }
  0xc7   : > { %6017 = vmatprep.mubr.msk.bf16.mxu1 %vm8856_vm1, %v7367_v21  ;;  %6046 = vmatpush3.bf16.msra.mxu0 %v6265_v12  ;;  %vm8860_vm1 = vnez %v8802_v11  ;;  %v2852_v12 = vrot.slane %v7305_v5, 1  ;;  %v7618_v5 = vrot.slane %v7102_v9, 1 }
  0xc8   : > { %6094 = vmatpush3.bf16.msra.mxu1 %v6266_v6  ;;  %6047 = vmatprep.subr.bf16.mxu0 %v6267_v25  ;;  %v8861_v6 = vld [vmem:[#allocation34_spill] sm:$0xff] }
  0xc9   : > { %6095 = vmatprep.subr.bf16.mxu1 %v6268_v58  ;;  %8867 = vst [vmem:[#allocation43_spill] sm:$0xff] %v7618_v5 }
  0xcb   : > { %6048 = vmatpush3.bf16.msra.mxu0 %v6267_v25  ;;  %v8863_v25 = vld [vmem:[#allocation40_spill] sm:$0xff] }
  0xcc   : > { %6096 = vmatpush3.bf16.msra.mxu1 %v6268_v58  ;;  %6129 = vmatprep.subr.bf16.mxu0 %v6269_v60 }
  0xcd   : > { %5970 = vmatmul.mubr.bf16.gmra.mxu0 %v8857_v43 }
  0xce   : > { %6018 = vmatmul.mubr.msk.bf16.gmra.mxu1 %vm8858_vm2, %v7379_v15  ;;  %5973 = vmatprep.mubr.bf16.mxu0 %v8859_v35  ;;  %vm8865_vm2 = vcmp.lt.s32.totalorder %v6376_v8, 7 }
  0xcf   : > { %6021 = vmatprep.mubr.msk.bf16.mxu1 %vm8860_vm1, %v7414_v14  ;;  %v2855_v58 = vsel %vm8865_vm2, %v7463_v39, %v2852_v12  ;;  %v7631_v39 = vsel %vm8865_vm2, %v2852_v12, %v7618_v5 }
  0xd0   : > { %v7615_v11 = vpack.c.bf16 %v2855_v58, %v7483_v54  ;;  %8869 = vst [vmem:[#allocation4_spill] sm:$0xff] %v7631_v39  ;;  %v8871_v54 = vld [vmem:[#allocation6_spill] sm:$0xff]  ;;  %v8872_v58 = vld [vmem:[#allocation3_spill] sm:$0xff] }
  0xd2   : > { %8866 = vst [vmem:[#allocation44_spill] sm:$0xff] %v7615_v11 }
  0xd5   : > { %5974 = vmatmul.mubr.bf16.gmra.mxu0 %v8861_v6 }
  0xd6   : > { %6022 = vmatmul.mubr.msk.bf16.gmra.mxu1 %vm8862_vm3, %v7421_v56  ;;  %5977 = vmatprep.mubr.bf16.mxu0 %v8863_v25 }
  0xd7   : > { %6025 = vmatprep.mubr.msk.bf16.mxu1 %vm8864_vm11, %v7453_v36  ;;  %vm8870_vm11 = vmmov %vm8865_vm2  ;;  %vm8875_vm2 = vnez %v8648_v3 }
  0xd8   : > { %v2885_v9 = vsel %vm8870_vm11, %v7618_v5, %v7043_v2  ;;  %v6270_v2 = vld [vmem:[%s8505_s3 + $0x230] sm:$0xff]   ;;  %vm8876_vm11 = vnez %v8657_v34  ;;  %v6271_v34 = vld [vmem:[%s8505_s3 + $0x228] sm:$0xff]  }
  0xd9   : > { %v5047_v32 = vpack.c.bf16 %v2885_v9, %v7631_v39 }
  0xdd   : > { %5978 = vmatmul.mubr.bf16.gmra.mxu0 %v8868_v1 }
  0xde   : > { %6026 = vmatmul.mubr.msk.bf16.gmra.mxu1 %vm7456_vm15, %v7460_v41  ;;  %5981 = vmatprep.mubr.bf16.mxu0 %v7081_v38  ;;  %vm8873_vm15 = vcmp.lt.s32.totalorder %v6376_v8, 1  ;;  %v8874_v41 = vld [vmem:[#allocation9_spill] sm:$0xff] }
  0xdf   : > { %6029 = vmatprep.mubr.msk.bf16.mxu1 %vm7466_vm7, %v7615_v11  ;;  %v3288_v48 = vsel %vm8873_vm15, %v8872_v58, %v8871_v54  ;;  %vm8877_vm15 = vnez %v8659_v40 }
  0xe0   : > { %v5074_v28 = vpack.c.bf16 %v8874_v41, %v3288_v48 }
  0xe5   : > { %5982 = vmatmul.mubr.bf16.gmra.mxu0 %v7325_v13 }
  0xe6   : > { %6030 = vmatmul.mubr.msk.bf16.gmra.mxu1 %vm7500_vm6, %v5047_v32  ;;  %6049 = vmatprep.mubr.msk.bf16.mxu0 %vm8875_vm2, %v5074_v28  ;;  %vm8878_vm2 = vnez %v8666_v44  ;;  %v6273_v44 = vld [vmem:[%s8505_s3 + $0x218] sm:$0xff]  }
  0xe7   : > { %6097 = vmatprep.mubr.bf16.mxu1 %v8847_v52 }
  0xed   : > { %v5763_v12 = vpop.f32.mrf.mxu0  ;;  %6050 = vmatmul.mubr.msk.bf16.vlgmr.msra.gmra.mxu0 %vm8876_vm11, %v6578_v45 }
  0xee   : > { %v5811_v48 = vpop.f32.mrf.mxu1  ;;  %6098 = vmatmul.mubr.bf16.vlgmr.msra.gmra.mxu1 %v8848_v53  ;;  %6053 = vmatprep.mubr.msk.bf16.mxu0 %vm8877_vm15, %v6666_v51 }
  0xef   : > { %v7659_v3 = vadd.f32 %v5811_v48, %v5763_v12  ;;  %v1375_v32 = vpop.f32.mrf.mxu0  ;;  %6101 = vmatprep.mubr.bf16.mxu1 %v8849_v57  ;;  %6130 = vmatpush3.bf16.msra.mxu0 %v6269_v60  ;;  %v6272_v57 = vld [vmem:[%s8505_s3 + $0x220] sm:$0xff]   ;;  %v8879_v12 = vld [vmem:[#allocation12_spill] sm:$0xff] }
  0xf0   : > { %v1584_v41 = vpop.f32.mrf.mxu1  ;;  %6131 = vmatprep.subr.bf16.mxu0 %v6270_v2  ;;  %vm8880_vm11 = vnez %v8879_v12  ;;  %v8884_v12 = vld [vmem:[#allocation21_spill] sm:$0xff] }
  0xf1   : > { %v7665_v45 = vadd.f32 %v1584_v41, %v1375_v32  ;;  %v5764_v28 = vpop.f32.mrf.mxu0 }
  0xf2   : > { %v5812_v52 = vpop.f32.mrf.mxu1 }
  0xf3   : > { %v7667_v53 = vadd.f32 %v5812_v52, %v5764_v28  ;;  %v1378_v40 = vpop.f32.mrf.mxu0  ;;  %6132 = vmatpush3.bf16.msra.mxu0 %v6270_v2 }
  0xf4   : > { %v1587_v51 = vpop.f32.mrf.mxu1  ;;  %6133 = vmatprep.subr.bf16.mxu0 %v6271_v34 }
  0xf5   : > { %v7672_v60 = vadd.f32 %v1587_v51, %v1378_v40  ;;  %v5767_v9 = vpop.f32.mrf.mxu0  ;;  %6054 = vmatmul.mubr.msk.bf16.gmra.mxu0 %vm8878_vm2, %v6685_v55  ;;  %v8881_v51 = vld [vmem:[#allocation17_spill] sm:$0xff] }
  0xf6   : > { %v5815_v54 = vpop.f32.mrf.mxu1  ;;  %6102 = vmatmul.mubr.bf16.gmra.mxu1 %v8850_v20  ;;  %6057 = vmatprep.mubr.msk.bf16.mxu0 %vm8880_vm11, %v6707_v47 }
  0xf7   : > { %v7681_v2 = vadd.f32 %v5815_v54, %v5767_v9  ;;  %v1391_v48 = vpop.f32.mrf.mxu0  ;;  %6105 = vmatprep.mubr.bf16.mxu1 %v8851_v61  ;;  %6134 = vmatpush3.bf16.msra.mxu0 %v6271_v34  ;;  %v6274_v61 = vld [vmem:[%s8505_s3 + $0x210] sm:$0xff]   ;;  %v8882_v9 = vld [vmem:[#allocation14_spill] sm:$0xff] }
  0xf8   : > { %v1600_v32 = vpop.f32.mrf.mxu1  ;;  %6135 = vmatprep.subr.bf16.mxu0 %v6272_v57  ;;  %vm8883_vm15 = vnez %v8882_v9 }
  0xf9   : > { %v7687_v55 = vadd.f32 %v1600_v32, %v1391_v48  ;;  %v5768_v41 = vpop.f32.mrf.mxu0  ;;  %v8885_v48 = vld [vmem:[#allocation15_spill] sm:$0xff] }
  0xfa   : > { %v5816_v20 = vpop.f32.mrf.mxu1  ;;  %vm8886_vm2 = vnez %v8885_v48  ;;  %v8888_v48 = vld [vmem:[#allocation20_spill] sm:$0xff] }
  0xfb   : > { %v7689_v28 = vadd.f32 %v5816_v20, %v5768_v41  ;;  %v1394_v52 = vpop.f32.mrf.mxu0  ;;  %6136 = vmatpush3.bf16.msra.mxu0 %v6272_v57  ;;  %v6275_v20 = vld [vmem:[%s8505_s3 + $0x208] sm:$0xff]   ;;  %vm8889_vm11 = vnez %v8888_v48 }
  0xfc   : > { %v1603_v47 = vpop.f32.mrf.mxu1  ;;  %6137 = vmatprep.subr.bf16.mxu0 %v6273_v44 }
  0xfd   : > { %v7694_v34 = vadd.f32 %v1603_v47, %v1394_v52  ;;  %v5771_v40 = vpop.f32.mrf.mxu0  ;;  %6058 = vmatmul.mubr.msk.bf16.gmra.mxu0 %vm8883_vm15, %v8881_v51 }
  0xfe   : > { %v5819_v54 = vpop.f32.mrf.mxu1  ;;  %6106 = vmatmul.mubr.bf16.gmra.mxu1 %v8852_v16  ;;  %6061 = vmatprep.mubr.msk.bf16.mxu0 %vm8886_vm2, %v8884_v12  ;;  %v8887_v12 = vld [vmem:[#allocation24_spill] sm:$0xff] }
  0xff   : > { %v7703_v57 = vadd.f32 %v5819_v54, %v5771_v40  ;;  %v1407_v32 = vpop.f32.mrf.mxu0  ;;  %6109 = vmatprep.mubr.bf16.mxu1 %v8853_v26  ;;  %6138 = vmatpush3.bf16.msra.mxu0 %v6273_v44  ;;  %v6276_v26 = vld [vmem:[%s8505_s3 + $0x200] sm:$0xff]  }
 0x100   : > { %v1616_v41 = vpop.f32.mrf.mxu1  ;;  %6139 = vmatprep.subr.bf16.mxu0 %v6274_v61 }
 0x101   : > { %v7709_v52 = vadd.f32 %v1616_v41, %v1407_v32  ;;  %v5772_v47 = vpop.f32.mrf.mxu0  ;;  %v8890_v41 = vld [vmem:[#allocation23_spill] sm:$0xff] }
 0x102   : > { %v5820_v16 = vpop.f32.mrf.mxu1  ;;  %vm8891_vm15 = vnez %v8890_v41 }
 0x103   : > { %v7711_v51 = vadd.f32 %v5820_v16, %v5772_v47  ;;  %v1410_v9 = vpop.f32.mrf.mxu0  ;;  %6140 = vmatpush3.bf16.msra.mxu0 %v6274_v61 }
 0x104   : > { %v1619_v40 = vpop.f32.mrf.mxu1  ;;  %6141 = vmatprep.subr.bf16.mxu0 %v6275_v20 }
 0x105   : > { %v7716_v44 = vadd.f32 %v1619_v40, %v1410_v9  ;;  %v5775_v54 = vpop.f32.mrf.mxu0  ;;  %6062 = vmatmul.mubr.msk.bf16.gmra.mxu0 %vm8889_vm11, %v8887_v12 }
 0x106   : > { %v5823_v32 = vpop.f32.mrf.mxu1  ;;  %6110 = vmatmul.mubr.bf16.gmra.mxu1 %v8855_v30  ;;  %6065 = vmatprep.mubr.msk.bf16.mxu0 %vm8891_vm15, %v8805_v31 }
 0x107   : > { %v7725_v61 = vadd.f32 %v5823_v32, %v5775_v54  ;;  %v1423_v47 = vpop.f32.mrf.mxu0  ;;  %6113 = vmatprep.mubr.bf16.mxu1 %v8857_v43  ;;  %6142 = vmatpush3.bf16.msra.mxu0 %v6275_v20  ;;  %v8892_v54 = vld [vmem:[#allocation27_spill] sm:$0xff]  ;;  %v8894_v20 = vld [vmem:[#allocation36_spill] sm:$0xff]  ;;  %v8895_v32 = vld [vmem:[#allocation29_spill] sm:$0xff] }
 0x108   : > { %v1632_v16 = vpop.f32.mrf.mxu1  ;;  %6143 = vmatprep.subr.bf16.mxu0 %v6276_v26  ;;  %vm8893_vm2 = vnez %v8892_v54  ;;  %vm8896_vm11 = vnez %v8895_v32 }
 0x109   : > { %v7728_v9 = vadd.f32 %v1632_v16, %v1423_v47  ;;  %v5776_v40 = vpop.f32.mrf.mxu0 }
 0x10a   : > { %v5824_v48 = vpop.f32.mrf.mxu1 }
 0x10b   : > { %v7730_v12 = vadd.f32 %v5824_v48, %v5776_v40  ;;  %v1426_v17 = vpop.f32.mrf.mxu0  ;;  %6144 = vmatpush3.bf16.msra.mxu0 %v6276_v26 }
 0x10c   : > { %v1635_v30 = vpop.f32.mrf.mxu1 }
 0x10d   : > { %v7732_v11 = vadd.f32 %v1635_v30, %v1426_v17  ;;  %v5779_v31 = vpop.f32.mrf.mxu0  ;;  %6066 = vmatmul.mubr.msk.bf16.gmra.mxu0 %vm8893_vm2, %v6948_v46  ;;  %v8897_v30 = vld [vmem:[#allocation35_spill] sm:$0xff]  ;;  %vm8902_vm2 = vcmp.lt.s32.totalorder %v6376_v8, 1 }
 0x10e   : > { %v5827_v43 = vpop.f32.mrf.mxu1  ;;  %6114 = vmatmul.mubr.bf16.gmra.mxu1 %v8859_v35  ;;  %6069 = vmatprep.mubr.msk.bf16.mxu0 %vm8896_vm11, %v8894_v20  ;;  %vm8898_vm15 = vnez %v8897_v30 }
 0x10f   : > { %v7741_v41 = vadd.f32 %v5827_v43, %v5779_v31  ;;  %v7743_v47 = vpop.f32.mrf.mxu0  ;;  %6117 = vmatprep.mubr.bf16.mxu1 %v8861_v6  ;;  %v8900_v6 = vld [vmem:[#allocation42_spill] sm:$0xff] }
 0x110   : > { %v7746_v17 = vpop.f32.mrf.mxu1 }
 0x111   : > { %v5780_v26 = vpop.f32.mrf.mxu0 }
 0x112   : > { %v5828_v16 = vpop.f32.mrf.mxu1 }
 0x113   : > { %v7748_v40 = vadd.f32 %v5828_v16, %v5780_v26  ;;  %v7750_v46 = vpop.f32.mrf.mxu0 }
 0x114   : > { %v7752_v48 = vpop.f32.mrf.mxu1 }
 0x115   : > { %v5783_v35 = vpop.f32.mrf.mxu0  ;;  %6070 = vmatmul.mubr.msk.bf16.gmra.mxu0 %vm8898_vm15, %v7021_v29 }
 0x116   : > { %v5831_v31 = vpop.f32.mrf.mxu1  ;;  %6118 = vmatmul.mubr.bf16.gmra.mxu1 %v8863_v25  ;;  %6073 = vmatprep.mubr.msk.bf16.mxu0 %vm8824_vm13, %v8834_v24  ;;  %vm8901_vm13 = vnez %v8900_v6 }
 0x117   : > { %v7761_v54 = vadd.f32 %v5831_v31, %v5783_v35  ;;  %v1455_v43 = vpop.f32.mrf.mxu0  ;;  %6121 = vmatprep.mubr.bf16.mxu1 %v8868_v1  ;;  %v3258_v1 = vsel %vm8902_vm2, %v7117_v63, %v8872_v58 }
 0x118   : > { %v1664_v20 = vpop.f32.mrf.mxu1 }
 0x119   : > { %v7764_v32 = vadd.f32 %v1664_v20, %v1455_v43  ;;  %v5784_v26 = vpop.f32.mrf.mxu0 }
 0x11a   : > { %v5832_v16 = vpop.f32.mrf.mxu1 }
 0x11b   : > { %v7766_v39 = vadd.f32 %v5832_v16, %v5784_v26  ;;  %v1458_v29 = vpop.f32.mrf.mxu0 }
 0x11c   : > { %v1667_v30 = vpop.f32.mrf.mxu1 }
 0x11d   : > { %v7768_v5 = vadd.f32 %v1667_v30, %v1458_v29  ;;  %v5787_v25 = vpop.f32.mrf.mxu0  ;;  %6074 = vmatmul.mubr.msk.bf16.gmra.mxu0 %vm8901_vm13, %v7091_v62 }
 0x11e   : > { %v5835_v24 = vpop.f32.mrf.mxu1  ;;  %6122 = vmatmul.mubr.bf16.gmra.mxu1 %v7081_v38  ;;  %6077 = vmatprep.mubr.msk.bf16.mxu0 %vm7050_vm9, %v7504_v27  ;;  %v5119_v38 = vpack.c.bf16 %v8872_v58, %v3258_v1 }
 0x11f   : > { %v7781_v35 = vadd.f32 %v5835_v24, %v5787_v25  ;;  %v1471_v31 = vpop.f32.mrf.mxu0  ;;  %6125 = vmatprep.mubr.bf16.mxu1 %v7325_v13  ;;  %v8903_v25 = vmov 0.0|0.0  }
 0x120   : > { %v1680_v43 = vpop.f32.mrf.mxu1 }
 0x121   : > { %v7784_v20 = vadd.f32 %v1680_v43, %v1471_v31  ;;  %v5788_v62 = vpop.f32.mrf.mxu0 }
 0x122   : > { %v5836_v26 = vpop.f32.mrf.mxu1 }
 0x123   : > { %v7787_v16 = vadd.f32 %v5836_v26, %v5788_v62  ;;  %v1474_v0 = vpop.f32.mrf.mxu0 }
 0x124   : > { %v1683_v27 = vpop.f32.mrf.mxu1 }
 0x125   : > { %v7789_v29 = vadd.f32 %v1683_v27, %v1474_v0  ;;  %v5791_v30 = vpop.f32.mrf.mxu0  ;;  %6078 = vmatmul.mubr.msk.bf16.gmra.mxu0 %vm8844_vm0, %v5119_v38 }
 0x126   : > { %v5839_v63 = vpop.f32.mrf.mxu1  ;;  %6126 = vmatmul.mubr.bf16.gmra.mxu1 %v8903_v25  ;;  %6145 = vmatprep.mubr.msk.bf16.mxu0 %vm8846_vm10, %v7138_v37 }
 0x127   : > { %v7797_v13 = vadd.f32 %v5839_v63, %v5791_v30  ;;  %v1487_v58 = vpop.f32.mrf.mxu0 }
 0x128   : > { %v1696_v6 = vpop.f32.mrf.mxu1 }
 0x129   : > { %v7799_v24 = vadd.f32 %v1696_v6, %v1487_v58  ;;  %v5792_v1 = vpop.f32.mrf.mxu0 }
 0x12a   : > { %v5840_v31 = vpop.f32.mrf.mxu1 }
 0x12b   : > { %v7801_v43 = vadd.f32 %v5840_v31, %v5792_v1  ;;  %v1490_v62 = vpop.f32.mrf.mxu0 }
 0x12c   : > { %v1699_v23 = vpop.f32.mrf.mxu1 }
 0x12d   : > { %v7803_v38 = vadd.f32 %v1699_v23, %v1490_v62  ;;  %v5859_v26 = vpop.f32.mrf.mxu0  ;;  %6146 = vmatmul.mubr.msk.bf16.vlgmr.msra.gmra.mxu0 %vm7134_vm14, %v7184_v22 }
 0x12e   : > { %v2116_v59 = vadd.f32 %v5859_v26, %v7659_v3  ;;  %v5907_v37 = vpop.f32.mrf.mxu1  ;;  %6149 = vmatprep.mubr.msk.bf16.mxu0 %vm7145_vm12, %v7194_v42 }
 0x12f   : > { %v1987_v0 = vpop.f32.mrf.mxu0 }
 0x130   : > { %v2114_v27 = vadd.f32 %v1987_v0, %v7665_v45  ;;  %v7813_v30 = vadd.f32 %v5907_v37, %v2116_v59  ;;  %v2389_v63 = vpop.f32.mrf.mxu1 }
 0x131   : > { %v5860_v25 = vpop.f32.mrf.mxu0 }
 0x132   : > { %v2117_v58 = vadd.f32 %v5860_v25, %v7667_v53  ;;  %v7816_v6 = vadd.f32 %v2389_v63, %v2114_v27  ;;  %v5908_v18 = vpop.f32.mrf.mxu1 }
 0x133   : > { %v1990_v22 = vpop.f32.mrf.mxu0 }
 0x134   : > { %v2115_v3 = vadd.f32 %v1990_v22, %v7672_v60  ;;  %v7819_v1 = vadd.f32 %v5908_v18, %v2117_v58  ;;  %v2392_v31 = vpop.f32.mrf.mxu1 }
 0x135   : > { %v5863_v4 = vpop.f32.mrf.mxu0  ;;  %6150 = vmatmul.mubr.msk.bf16.gmra.mxu0 %vm7190_vm4, %v7240_v49  ;;  %vm8911_vm4 = vnez %v8787_v33 }
 0x136   : > { %v2120_v45 = vadd.f32 %v5863_v4, %v7681_v2  ;;  %v7825_v62 = vadd.f32 %v2392_v31, %v2115_v3  ;;  %v5911_v23 = vpop.f32.mrf.mxu1  ;;  %6153 = vmatprep.mubr.msk.bf16.mxu0 %vm7199_vm8, %v7253_v10 }
 0x137   : > { %v2003_v26 = vpop.f32.mrf.mxu0 }
 0x138   : > { %v2118_v60 = vadd.f32 %v2003_v26, %v7687_v55  ;;  %v7831_v59 = vadd.f32 %v5911_v23, %v2120_v45  ;;  %v2405_v37 = vpop.f32.mrf.mxu1 }
 0x139   : > { %v5864_v0 = vpop.f32.mrf.mxu0 }
 0x13a   : > { %v2121_v27 = vadd.f32 %v5864_v0, %v7689_v28  ;;  %v7834_v63 = vadd.f32 %v2405_v37, %v2118_v60  ;;  %v5912_v49 = vpop.f32.mrf.mxu1  ;;  %v8907_v28 = vld [vmem:[#allocation49_spill] sm:$0xff] }
 0x13b   : > { %v2006_v2 = vpop.f32.mrf.mxu0  ;;  %vm8908_vm8 = vnez %v8907_v28 }
 0x13c   : > { %v2119_v25 = vadd.f32 %v2006_v2, %v7694_v34  ;;  %v7837_v58 = vadd.f32 %v5912_v49, %v2121_v27  ;;  %v2408_v18 = vpop.f32.mrf.mxu1 }
 0x13d   : > { %v5867_v22 = vpop.f32.mrf.mxu0  ;;  %6154 = vmatmul.mubr.msk.bf16.gmra.mxu0 %vm7249_vm5, %v7307_v7  ;;  %vm8920_vm5 = vcmp.lt.s32.totalorder %v6376_v8, 7 }
 0x13e   : > { %v2124_v55 = vadd.f32 %v5867_v22, %v7703_v57  ;;  %v7843_v3 = vadd.f32 %v2408_v18, %v2119_v25  ;;  %v5915_v31 = vpop.f32.mrf.mxu1  ;;  %6157 = vmatprep.mubr.msk.bf16.mxu0 %vm8908_vm8, %v7319_v50  ;;  %v8909_v50 = vld [vmem:[#allocation50_spill] sm:$0xff]  ;;  %vm8927_vm10 = vmmov %vm8920_vm5 }
 0x13f   : > { %v2019_v4 = vpop.f32.mrf.mxu0  ;;  %vm8910_vm9 = vnez %v8909_v50 }
 0x140   : > { %v2122_v34 = vadd.f32 %v2019_v4, %v7709_v52  ;;  %v7849_v42 = vadd.f32 %v5915_v31, %v2124_v55  ;;  %v2421_v45 = vpop.f32.mrf.mxu1 }
 0x141   : > { %v5868_v23 = vpop.f32.mrf.mxu0 }
 0x142   : > { %v2125_v53 = vadd.f32 %v5868_v23, %v7711_v51  ;;  %v7852_v26 = vadd.f32 %v2421_v45, %v2122_v34  ;;  %v5916_v7 = vpop.f32.mrf.mxu1 }
 0x143   : > { %v2022_v57 = vpop.f32.mrf.mxu0 }
 0x144   : > { %v2123_v60 = vadd.f32 %v2022_v57, %v7716_v44  ;;  %v7855_v37 = vadd.f32 %v5916_v7, %v2125_v53  ;;  %v2424_v0 = vpop.f32.mrf.mxu1 }
 0x145   : > { %v5871_v27 = vpop.f32.mrf.mxu0  ;;  %6158 = vmatmul.mubr.msk.bf16.gmra.mxu0 %vm8910_vm9, %v7367_v21 }
 0x146   : > { %v2128_v52 = vadd.f32 %v5871_v27, %v7725_v61  ;;  %v7861_v49 = vadd.f32 %v2424_v0, %v2123_v60  ;;  %v5919_v2 = vpop.f32.mrf.mxu1  ;;  %6161 = vmatprep.mubr.msk.bf16.mxu0 %vm8911_vm4, %v7379_v15  ;;  %v8912_v15 = vld [vmem:[#allocation19_spill] sm:$0xff] }
 0x147   : > { %v2035_v51 = vpop.f32.mrf.mxu0  ;;  %vm8913_vm14 = vnez %v8912_v15 }
 0x148   : > { %v2126_v44 = vadd.f32 %v2035_v51, %v7728_v9  ;;  %v7867_v25 = vadd.f32 %v5919_v2, %v2128_v52  ;;  %v2437_v18 = vpop.f32.mrf.mxu1  ;;  %v1649_v9 = vadd.f32 %v7746_v17, %v7743_v47 }
 0x149   : > { %v5872_v22 = vpop.f32.mrf.mxu0 }
 0x14a   : > { %v2129_v10 = vadd.f32 %v5872_v22, %v7730_v12  ;;  %v7870_v55 = vadd.f32 %v2437_v18, %v2126_v44  ;;  %v5920_v21 = vpop.f32.mrf.mxu1  ;;  %v8918_v18 = vld [vmem:[#allocation38_spill] sm:$0xff]  ;;  %v8919_v22 = vld [vmem:[#allocation43_spill] sm:$0xff] }
 0x14b   : > { %v2038_v61 = vpop.f32.mrf.mxu0 }
 0x14c   : > { %v2127_v31 = vadd.f32 %v2038_v61, %v7732_v11  ;;  %v7873_v28 = vadd.f32 %v5920_v21, %v2129_v10  ;;  %v2440_v4 = vpop.f32.mrf.mxu1  ;;  %v3902_v10 = vsel %vm8920_vm5, %v8919_v22, %v8918_v18 }
 0x14d   : > { %v5875_v33 = vpop.f32.mrf.mxu0  ;;  %6162 = vmatmul.mubr.msk.bf16.gmra.mxu0 %vm8913_vm14, %v7414_v14  ;;  %v1652_v14 = vadd.f32 %v7752_v48, %v7750_v46  ;;  %v8915_v48 = vld [vmem:[#allocation32_spill] sm:$0xff] }
 0x14e   : > { %v2132_v34 = vadd.f32 %v5875_v33, %v7741_v41  ;;  %v7881_v12 = vadd.f32 %v2440_v4, %v2127_v31  ;;  %v5923_v45 = vpop.f32.mrf.mxu1  ;;  %6165 = vmatprep.mubr.msk.bf16.mxu0 %vm8860_vm1, %v7421_v56  ;;  %v8921_v33 = vld [vmem:[#allocation4_spill] sm:$0xff] }
 0x14f   : > { %v2051_v11 = vpop.f32.mrf.mxu0  ;;  %v5212_v15 = vpack.c.bf16 %v3902_v10, %v8921_v33 }
 0x150   : > { %v2130_v53 = vadd.f32 %v2051_v11, %v1649_v9  ;;  %v7886_v7 = vadd.f32 %v5923_v45, %v2132_v34  ;;  %v2453_v57 = vpop.f32.mrf.mxu1 }
 0x151   : > { %v5876_v60 = vpop.f32.mrf.mxu0 }
 0x152   : > { %v2133_v47 = vadd.f32 %v5876_v60, %v7748_v40  ;;  %v7891_v17 = vadd.f32 %v2453_v57, %v2130_v53  ;;  %v5924_v41 = vpop.f32.mrf.mxu1  ;;  %v8916_v40 = vld [vmem:[#allocation26_spill] sm:$0xff]  ;;  %v8922_v53 = vld [vmem:[#allocation44_spill] sm:$0xff] }
 0x153   : > { %v2054_v0 = vpop.f32.mrf.mxu0  ;;  %vm8917_vm12 = vnez %v8916_v40 }
 0x154   : > { %v2131_v27 = vadd.f32 %v2054_v0, %v1652_v14  ;;  %v7893_v50 = vadd.f32 %v5924_v41, %v2133_v47  ;;  %v2456_v52 = vpop.f32.mrf.mxu1  ;;  %v8926_v47 = vld [vmem:[#allocation45_spill] sm:$0xff] }
 0x155   : > { %v5879_v56 = vpop.f32.mrf.mxu0  ;;  %6166 = vmatmul.mubr.msk.bf16.gmra.mxu0 %vm8862_vm3, %v7453_v36 }
 0x156   : > { %v2136_v2 = vadd.f32 %v5879_v56, %v7761_v54  ;;  %v7899_v51 = vadd.f32 %v2456_v52, %v2131_v27  ;;  %v5927_v46 = vpop.f32.mrf.mxu1  ;;  %6169 = vmatprep.mubr.msk.bf16.mxu0 %vm8917_vm12, %v8915_v48 }
 0x157   : > { %v2067_v44 = vpop.f32.mrf.mxu0 }
 0x158   : > { %v2134_v21 = vadd.f32 %v2067_v44, %v7764_v32  ;;  %v7909_v61 = vadd.f32 %v5927_v46, %v2136_v2  ;;  %v2469_v19 = vpop.f32.mrf.mxu1  ;;  %v8923_v32 = vld [vmem:[#allocation31_spill] sm:$0xff] }
 0x159   : > { %v5880_v36 = vpop.f32.mrf.mxu0  ;;  %vm8924_vm0 = vnez %v8923_v32 }
 0x15a   : > { %v2137_v54 = vadd.f32 %v5880_v36, %v7766_v39  ;;  %v7912_v31 = vadd.f32 %v2469_v19, %v2134_v21  ;;  %v5928_v4 = vpop.f32.mrf.mxu1 }
 0x15b   : > { %v2070_v9 = vpop.f32.mrf.mxu0 }
 0x15c   : > { %v2135_v34 = vadd.f32 %v2070_v9, %v7768_v5  ;;  %v7916_v45 = vadd.f32 %v5928_v4, %v2137_v54  ;;  %v2472_v23 = vpop.f32.mrf.mxu1  ;;  %v3932_v5 = vsel %vm8927_vm10, %v8918_v18, %v8926_v47 }
 0x15d   : > { %v5883_v11 = vpop.f32.mrf.mxu0  ;;  %6170 = vmatmul.mubr.msk.bf16.gmra.mxu0 %vm8924_vm0, %v8922_v53 }
 0x15e   : > { %v2140_v57 = vadd.f32 %v5883_v11, %v7781_v35  ;;  %v7922_v60 = vadd.f32 %v2472_v23, %v2135_v34  ;;  %v5931_v39 = vpop.f32.mrf.mxu1  ;;  %6173 = vmatprep.mubr.msk.bf16.mxu0 %vm7466_vm7, %v5212_v15  ;;  %v5215_v35 = vpack.c.bf16 %v3932_v5, %v8918_v18 }
 0x15f   : > { %v2083_v41 = vpop.f32.mrf.mxu0 }
 0x160   : > { %v2138_v0 = vadd.f32 %v2083_v41, %v7784_v20  ;;  %v7931_v27 = vadd.f32 %v5931_v39, %v2140_v57  ;;  %v2485_v52 = vpop.f32.mrf.mxu1 }
 0x161   : > { %v5884_v56 = vpop.f32.mrf.mxu0 }
 0x162   : > { %v2141_v2 = vadd.f32 %v5884_v56, %v7787_v16  ;;  %v7935_v46 = vadd.f32 %v2485_v52, %v2138_v0  ;;  %v5932_v48 = vpop.f32.mrf.mxu1 }
 0x163   : > { %v2086_v40 = vpop.f32.mrf.mxu0 }
 0x164   : > { %v2139_v44 = vadd.f32 %v2086_v40, %v7789_v29  ;;  %v7938_v22 = vadd.f32 %v5932_v48, %v2141_v2  ;;  %v2488_v8 = vpop.f32.mrf.mxu1 }
 0x165   : > { %v5887_v10 = vpop.f32.mrf.mxu0  ;;  %6174 = vmatmul.mubr.msk.bf16.gmra.mxu0 %vm7500_vm6, %v5215_v35 }
 0x166   : > { %v2144_v20 = vadd.f32 %v5887_v10, %v7797_v13  ;;  %v7943_v19 = vadd.f32 %v2488_v8, %v2139_v44  ;;  %v5935_v18 = vpop.f32.mrf.mxu1 }
 0x167   : > { %v2099_v36 = vpop.f32.mrf.mxu0 }
 0x168   : > { %v2142_v16 = vadd.f32 %v2099_v36, %v7799_v24  ;;  %v7946_v54 = vadd.f32 %v5935_v18, %v2144_v20  ;;  %v2501_v4 = vpop.f32.mrf.mxu1 }
 0x169   : > { %v5888_v33 = vpop.f32.mrf.mxu0 }
 0x16a   : > { %v2145_v29 = vadd.f32 %v5888_v33, %v7801_v43  ;;  %v7949_v15 = vadd.f32 %v2501_v4, %v2142_v16  ;;  %v5936_v9 = vpop.f32.mrf.mxu1 }
 0x16b   : > { %v2102_v34 = vpop.f32.mrf.mxu0 }
 0x16c   : > { %v2143_v23 = vadd.f32 %v2102_v34, %v7803_v38  ;;  %v7952_v11 = vadd.f32 %v5936_v9, %v2145_v29  ;;  %v2504_v13 = vpop.f32.mrf.mxu1 }
 0x16d   : > { %v5955_v53 = vpop.f32.mrf.mxu0 }
 0x16e   : > { %v7954_v32 = vadd.f32 %v2504_v13, %v2143_v23  ;;  %v2792_v24 = vadd.f32 %v5955_v53, %v7813_v30  ;;  %v6003_v57 = vpop.f32.mrf.mxu1 }
 0x16f   : > { %v2663_v39 = vpop.f32.mrf.mxu0 }
 0x170   : > { %v2790_v14 = vadd.f32 %v2663_v39, %v7816_v6  ;;  %v7958_v47 = vadd.f32 %v6003_v57, %v2792_v24  ;;  %v3033_v43 = vpop.f32.mrf.mxu1 }
 0x171   : > { %v5956_v5 = vpop.f32.mrf.mxu0 }
 0x172   : > { %v7961_v41 = vadd.f32 %v5956_v5, %v7819_v1  ;;  %v7963_v38 = vadd.f32 %v3033_v43, %v2790_v14  ;;  %v7965_v0 = vpop.f32.mrf.mxu1 }
 0x173   : > { %v2666_v52 = vpop.f32.mrf.mxu0 }
 0x174   : > { %v7968_v56 = vadd.f32 %v2666_v52, %v7825_v62  ;;  %v7970_v30 = vpop.f32.mrf.mxu1 }
 0x175   : > { %v5959_v35 = vpop.f32.mrf.mxu0 }
 0x176   : > { %v2796_v6 = vadd.f32 %v5959_v35, %v7831_v59  ;;  %v6007_v2 = vpop.f32.mrf.mxu1 }
 0x177   : > { %v2679_v48 = vpop.f32.mrf.mxu0 }
 0x178   : > { %v2794_v40 = vadd.f32 %v2679_v48, %v7834_v63  ;;  %v7974_v44 = vadd.f32 %v6007_v2, %v2796_v6  ;;  %v3049_v1 = vpop.f32.mrf.mxu1 }
 0x179   : > { %v5960_v8 = vpop.f32.mrf.mxu0 }
 0x17a   : > { %v7977_v10 = vadd.f32 %v5960_v8, %v7837_v58  ;;  %v7979_v21 = vadd.f32 %v3049_v1, %v2794_v40  ;;  %v7981_v62 = vpop.f32.mrf.mxu1 }
 0x17b   : > { %v2682_v20 = vpop.f32.mrf.mxu0 }
 0x17c   : > { %v7984_v18 = vadd.f32 %v2682_v20, %v7843_v3  ;;  %v7986_v59 = vpop.f32.mrf.mxu1 }
 0x17d   : > { %v5963_v36 = vpop.f32.mrf.mxu0 }
 0x17e   : > { %v2800_v63 = vadd.f32 %v5963_v36, %v7849_v42  ;;  %v6011_v16 = vpop.f32.mrf.mxu1 }
 0x17f   : > { %v2695_v4 = vpop.f32.mrf.mxu0 }
 0x180   : > { %v2798_v33 = vadd.f32 %v2695_v4, %v7852_v26  ;;  %v7990_v29 = vadd.f32 %v6011_v16, %v2800_v63  ;;  %v3065_v58 = vpop.f32.mrf.mxu1 }
 0x181   : > { %v5964_v9 = vpop.f32.mrf.mxu0 }
 0x182   : > { %v7993_v34 = vadd.f32 %v5964_v9, %v7855_v37  ;;  %v7995_v23 = vadd.f32 %v3065_v58, %v2798_v33  ;;  %v7997_v3 = vpop.f32.mrf.mxu1 }
 0x183   : > { %v2698_v13 = vpop.f32.mrf.mxu0 }
 0x184   : > { %v8000_v53 = vadd.f32 %v2698_v13, %v7861_v49  ;;  %v8002_v42 = vpop.f32.mrf.mxu1 }
 0x185   : > { %v5967_v24 = vpop.f32.mrf.mxu0 }
 0x186   : > { %v2804_v26 = vadd.f32 %v5967_v24, %v7867_v25  ;;  %v6015_v57 = vpop.f32.mrf.mxu1 }
 0x187   : > { %v2711_v39 = vpop.f32.mrf.mxu0 }
 0x188   : > { %v2802_v14 = vadd.f32 %v2711_v39, %v7870_v55  ;;  %v8006_v43 = vadd.f32 %v6015_v57, %v2804_v26  ;;  %v3081_v37 = vpop.f32.mrf.mxu1 }
 0x189   : > { %v5968_v5 = vpop.f32.mrf.mxu0 }
 0x18a   : > { %v8009_v52 = vadd.f32 %v5968_v5, %v7873_v28  ;;  %v8011_v35 = vadd.f32 %v3081_v37, %v2802_v14  ;;  %v8013_v49 = vpop.f32.mrf.mxu1 }
 0x18b   : > { %v2714_v6 = vpop.f32.mrf.mxu0 }
 0x18c   : > { %v8016_v2 = vadd.f32 %v2714_v6, %v7881_v12  ;;  %v8018_v25 = vpop.f32.mrf.mxu1 }
 0x18d   : > { %v5971_v48 = vpop.f32.mrf.mxu0 }
 0x18e   : > { %v2808_v55 = vadd.f32 %v5971_v48, %v7886_v7  ;;  %v6019_v40 = vpop.f32.mrf.mxu1 }
 0x18f   : > { %v2727_v1 = vpop.f32.mrf.mxu0 }
 0x190   : > { %v2806_v8 = vadd.f32 %v2727_v1, %v7891_v17  ;;  %v8022_v20 = vadd.f32 %v6019_v40, %v2808_v55  ;;  %v3097_v28 = vpop.f32.mrf.mxu1 }
 0x191   : > { %v5972_v36 = vpop.f32.mrf.mxu0 }
 0x192   : > { %v8025_v63 = vadd.f32 %v5972_v36, %v7893_v50  ;;  %v8027_v16 = vadd.f32 %v3097_v28, %v2806_v8  ;;  %v8029_v12 = vpop.f32.mrf.mxu1 }
 0x193   : > { %v2730_v4 = vpop.f32.mrf.mxu0 }
 0x194   : > { %v8032_v33 = vadd.f32 %v2730_v4, %v7899_v51  ;;  %v8034_v7 = vpop.f32.mrf.mxu1 }
 0x195   : > { %v5975_v58 = vpop.f32.mrf.mxu0 }
 0x196   : > { %v2812_v17 = vadd.f32 %v5975_v58, %v7909_v61  ;;  %v6023_v9 = vpop.f32.mrf.mxu1 }
 0x197   : > { %v2743_v13 = vpop.f32.mrf.mxu0 }
 0x198   : > { %v2810_v24 = vadd.f32 %v2743_v13, %v7912_v31  ;;  %v8038_v26 = vadd.f32 %v6023_v9, %v2812_v17  ;;  %v3113_v50 = vpop.f32.mrf.mxu1 }
 0x199   : > { %v5976_v57 = vpop.f32.mrf.mxu0 }
 0x19a   : > { %v8041_v39 = vadd.f32 %v5976_v57, %v7916_v45  ;;  %v8043_v14 = vadd.f32 %v3113_v50, %v2810_v24  ;;  %v8045_v51 = vpop.f32.mrf.mxu1 }
 0x19b   : > { %8930 = vst [vmem:[#allocation7_spill] sm:$0xff] %v8045_v51  ;;  %v2746_v37 = vpop.f32.mrf.mxu0 }
 0x19c   : > { %8929 = vst [vmem:[#allocation5_spill] sm:$0xff] %v8041_v39  ;;  %v8048_v5 = vadd.f32 %v2746_v37, %v7922_v60  ;;  %v8050_v61 = vpop.f32.mrf.mxu1 }
 0x19d   : > { %8932 = vst [vmem:[#allocation10_spill] sm:$0xff] %v8050_v61  ;;  %v5979_v6 = vpop.f32.mrf.mxu0 }
 0x19e   : > { %8931 = vst [vmem:[#allocation8_spill] sm:$0xff] %v8048_v5  ;;  %v2816_v31 = vadd.f32 %v5979_v6, %v7931_v27  ;;  %v6027_v48 = vpop.f32.mrf.mxu1 }
 0x19f   : > { %v2759_v55 = vpop.f32.mrf.mxu0 }
 0x1a0   : > { %v2814_v40 = vadd.f32 %v2759_v55, %v7935_v46  ;;  %v8054_v1 = vadd.f32 %v6027_v48, %v2816_v31  ;;  %v3129_v45 = vpop.f32.mrf.mxu1 }
 0x1a1   : > { %v5980_v8 = vpop.f32.mrf.mxu0 }
 0x1a2   : > { %v8057_v28 = vadd.f32 %v5980_v8, %v7938_v22  ;;  %v8059_v36 = vadd.f32 %v3129_v45, %v2814_v40  ;;  %v8061_v60 = vpop.f32.mrf.mxu1 }
 0x1a3   : > { %8934 = vst [vmem:[#allocation13_spill] sm:$0xff] %v8061_v60  ;;  %v2762_v4 = vpop.f32.mrf.mxu0 }
 0x1a4   : > { %8933 = vst [vmem:[#allocation11_spill] sm:$0xff] %v8057_v28  ;;  %v8064_v58 = vadd.f32 %v2762_v4, %v7943_v19  ;;  %v8066_v27 = vpop.f32.mrf.mxu1 }
 0x1a5   : > { %8936 = vst [vmem:[#allocation18_spill] sm:$0xff] %v8066_v27  ;;  %v5983_v17 = vpop.f32.mrf.mxu0 }
 0x1a6   : > { %8935 = vst [vmem:[#allocation16_spill] sm:$0xff] %v8064_v58  ;;  %v2820_v46 = vadd.f32 %v5983_v17, %v7946_v54  ;;  %v6031_v9 = vpop.f32.mrf.mxu1  ;;  %v8637_v58 = vmov 1.0  }
 0x1a7   : > { %v2775_v13 = vpop.f32.mrf.mxu0  ;;  %4463 = vmatprep.mubr.f32.mxu1 %v8637_v58 }
 0x1a8   : > { %v2818_v24 = vadd.f32 %v2775_v13, %v7949_v15  ;;  %v8070_v50 = vadd.f32 %v6031_v9, %v2820_v46  ;;  %v3145_v22 = vpop.f32.mrf.mxu1 }
 0x1a9   : > { %v5984_v57 = vpop.f32.mrf.mxu0 }
 0x1aa   : > { %v8073_v37 = vadd.f32 %v5984_v57, %v7952_v11  ;;  %v8075_v6 = vadd.f32 %v3145_v22, %v2818_v24  ;;  %v8077_v19 = vpop.f32.mrf.mxu1 }
 0x1ab   : > { %8938 = vst [vmem:[#allocation28_spill] sm:$0xff] %v8077_v19  ;;  %v2778_v31 = vpop.f32.mrf.mxu0 }
 0x1ac   : > { %8937 = vst [vmem:[#allocation22_spill] sm:$0xff] %v8073_v37  ;;  %v8080_v48 = vadd.f32 %v2778_v31, %v7954_v32  ;;  %v8082_v54 = vpop.f32.mrf.mxu1 }
 0x1ad   : > { %8940 = vst [vmem:[#allocation34_spill] sm:$0xff] %v8082_v54  ;;  %v6051_v55 = vpop.f32.mrf.mxu0 }
 0x1ae   : > { %8939 = vst [vmem:[#allocation33_spill] sm:$0xff] %v8080_v48  ;;  %v8085_v15 = vadd.f32 %v6051_v55, %v7958_v47  ;;  %v8087_v40 = vpop.f32.mrf.mxu1 }
 0x1af   : > { %v3436_v45 = vpop.f32.mrf.mxu0 }
 0x1b0   : > { %v8090_v11 = vadd.f32 %v3436_v45, %v7963_v38  ;;  %v8092_v8 = vpop.f32.mrf.mxu1 }
 0x1b1   : > { %v8094_v4 = vpop.f32.mrf.mxu0 }
 0x1b2   : > { %v8098_v32 = vpop.f32.mrf.mxu1 }
 0x1b3   : > { %v8096_v17 = vpop.f32.mrf.mxu0 }
 0x1b4   : > { %v8103_v47 = vpop.f32.mrf.mxu1 }
 0x1b5   : > { %v6055_v46 = vpop.f32.mrf.mxu0 }
 0x1b6   : > { %v8101_v9 = vadd.f32 %v6055_v46, %v7974_v44  ;;  %v8110_v22 = vpop.f32.mrf.mxu1 }
 0x1b7   : > { %v3452_v13 = vpop.f32.mrf.mxu0 }
 0x1b8   : > { %v8106_v24 = vadd.f32 %v3452_v13, %v7979_v21  ;;  %v8117_v45 = vpop.f32.mrf.mxu1 }
 0x1b9   : > { %v8108_v38 = vpop.f32.mrf.mxu0 }
 0x1ba   : > { %v8124_v21 = vpop.f32.mrf.mxu1 }
 0x1bb   : > { %v8112_v57 = vpop.f32.mrf.mxu0 }
 0x1bc   : > { %v8131_v37 = vpop.f32.mrf.mxu1 }
 0x1bd   : > { %v6059_v31 = vpop.f32.mrf.mxu0 }
 0x1be   : > { %v8115_v55 = vadd.f32 %v6059_v31, %v7990_v29 }
 0x1bf   : > { %v3468_v44 = vpop.f32.mrf.mxu0 }
 0x1c0   : > { %v8120_v46 = vadd.f32 %v3468_v44, %v7995_v23  ;;  %v8138_v23 = vpop.f32.mrf.mxu1 }
 0x1c1   : > { %v8122_v54 = vpop.f32.mrf.mxu0 }
 0x1c3   : > { %v8126_v13 = vpop.f32.mrf.mxu0 }
 0x1c5   : > { %v6063_v48 = vpop.f32.mrf.mxu0 }
 0x1c6   : > { %v8129_v19 = vadd.f32 %v6063_v48, %v8006_v43  ;;  %v8146_v43 = vpop.f32.mrf.mxu1 }
 0x1c7   : > { %v3484_v29 = vpop.f32.mrf.mxu0 }
 0x1c8   : > { %v8134_v31 = vadd.f32 %v3484_v29, %v8011_v35  ;;  %v8153_v29 = vpop.f32.mrf.mxu1 }
 0x1c9   : > { %v8136_v27 = vpop.f32.mrf.mxu0 }
 0x1ca   : > { %v8160_v58 = vpop.f32.mrf.mxu1 }
 0x1cb   : > { %v8140_v44 = vpop.f32.mrf.mxu0 }
 0x1cd   : > { %v6067_v60 = vpop.f32.mrf.mxu0 }
 0x1ce   : > { %v8144_v28 = vadd.f32 %v6067_v60, %v8022_v20 }
 0x1cf   : > { %v3500_v48 = vpop.f32.mrf.mxu0 }
 0x1d0   : > { %8941 = vst [vmem:[#allocation40_spill] sm:$0xff] %v8144_v28  ;;  %v8149_v61 = vadd.f32 %v3500_v48, %v8027_v16  ;;  %v8167_v16 = vpop.f32.mrf.mxu1 }
 0x1d1   : > { %v8151_v35 = vpop.f32.mrf.mxu0 }
 0x1d2   : > { %8942 = vst [vmem:[#allocation41_spill] sm:$0xff] %v8149_v61  ;;  %8943 = vst [vmem:[#allocation6_spill] sm:$0xff] %v8151_v35 }
 0x1d3   : > { %v8155_v5 = vpop.f32.mrf.mxu0 }
 0x1d4   : > { %8944 = vst [vmem:[#allocation3_spill] sm:$0xff] %v8155_v5  ;;  %v8174_v5 = vpop.f32.mrf.mxu1 }
 0x1d5   : > { %v6071_v51 = vpop.f32.mrf.mxu0 }
 0x1d6   : > { %v8158_v39 = vadd.f32 %v6071_v51, %v8038_v26 }
 0x1d7   : > { %v3516_v20 = vpop.f32.mrf.mxu0 }
 0x1d8   : > { %8945 = vst [vmem:[#allocation9_spill] sm:$0xff] %v8158_v39  ;;  %v8163_v60 = vadd.f32 %v3516_v20, %v8043_v14  ;;  %v8181_v14 = vpop.f32.mrf.mxu1 }
 0x1d9   : > { %v8165_v28 = vpop.f32.mrf.mxu0 }
 0x1da   : > { %8946 = vst [vmem:[#allocation12_spill] sm:$0xff] %v8163_v60  ;;  %8947 = vst [vmem:[#allocation17_spill] sm:$0xff] %v8165_v28 }
 0x1db   : > { %v8169_v48 = vpop.f32.mrf.mxu0 }
 0x1dc   : > { %8948 = vst [vmem:[#allocation14_spill] sm:$0xff] %v8169_v48  ;;  %v8188_v48 = vpop.f32.mrf.mxu1 }
 0x1dd   : > { %v6075_v61 = vpop.f32.mrf.mxu0 }
 0x1de   : > { %v8172_v35 = vadd.f32 %v6075_v61, %v8054_v1 }
 0x1df   : > { %v3532_v26 = vpop.f32.mrf.mxu0 }
 0x1e0   : > { %8949 = vst [vmem:[#allocation21_spill] sm:$0xff] %v8172_v35  ;;  %v8177_v51 = vadd.f32 %v3532_v26, %v8059_v36  ;;  %v3163_v36 = vadd.f32 %v7965_v0, %v7961_v41  ;;  %v8197_v26 = vpop.f32.mrf.mxu1  ;;  %v3167_v0 = vadd.f32 %v7981_v62, %v7977_v10 }
 0x1e1   : > { %v8179_v39 = vpop.f32.mrf.mxu0 }
 0x1e2   : > { %8950 = vst [vmem:[#allocation15_spill] sm:$0xff] %v8177_v51  ;;  %v3570_v62 = vadd.f32 %v8108_v38, %v3167_v0 }
 0x1e3   : > { %v8183_v20 = vpop.f32.mrf.mxu0 }
 0x1e4   : > { %8951 = vst [vmem:[#allocation24_spill] sm:$0xff] %v8183_v20  ;;  %v3161_v20 = vadd.f32 %v7970_v30, %v7968_v56  ;;  %v3837_v56 = vadd.f32 %v8092_v8, %v8090_v11  ;;  %v3844_v38 = vadd.f32 %v8124_v21, %v3570_v62 }
 0x1e5   : > { %v6079_v60 = vpop.f32.mrf.mxu0 }
 0x1e6   : > { %v8186_v28 = vadd.f32 %v6079_v60, %v8070_v50  ;;  %v3566_v50 = vadd.f32 %v8094_v4, %v3163_v36 }
 0x1e7   : > { %v3548_v61 = vpop.f32.mrf.mxu0 }
 0x1e8   : > { %8952 = vst [vmem:[#allocation20_spill] sm:$0xff] %v8186_v28  ;;  %v8191_v1 = vadd.f32 %v3548_v61, %v8075_v6  ;;  %v3564_v28 = vadd.f32 %v8096_v17, %v3161_v20  ;;  %v8205_v6 = vpop.f32.mrf.mxu1  ;;  %v3840_v41 = vadd.f32 %v8098_v32, %v3566_v50  ;;  %v3165_v20 = vadd.f32 %v7986_v59, %v7984_v18 }
 0x1e9   : > { %v8193_v35 = vpop.f32.mrf.mxu0 }
 0x1ea   : > { %8953 = vst [vmem:[#allocation23_spill] sm:$0xff] %v8191_v1  ;;  %v3839_v1 = vadd.f32 %v8087_v40, %v8085_v15  ;;  %v3838_v30 = vadd.f32 %v8103_v47, %v3564_v28  ;;  %v8221_v36 = vpop.f32.mrf.mxu1  ;;  %v3568_v59 = vadd.f32 %v8112_v57, %v3165_v20  ;;  %v3843_v47 = vadd.f32 %v8110_v22, %v8101_v9 }
 0x1eb   : > { %v8199_v51 = vpop.f32.mrf.mxu0  ;;  %v3841_v57 = vadd.f32 %v8117_v45, %v8106_v24  ;;  %v3169_v9 = vadd.f32 %v8002_v42, %v8000_v53 }
 0x1ec   : > { %8954 = vst [vmem:[#allocation27_spill] sm:$0xff] %v8199_v51  ;;  %v8241_v8 = vpop.f32.mrf.mxu1  ;;  %v3842_v50 = vadd.f32 %v8131_v37, %v3568_v59 }
 0x1ed   : > { %v6147_v60 = vpop.f32.mrf.mxu0  ;;  %v3572_v45 = vadd.f32 %v8126_v13, %v3169_v9  ;;  %v3845_v13 = vadd.f32 %v8146_v43, %v8120_v46 }
 0x1ee   : > { %v8215_v4 = vadd.f32 %v6147_v60, %v3839_v1  ;;  %v8258_v22 = vpop.f32.mrf.mxu1 }
 0x1ef   : > { %v4080_v61 = vpop.f32.mrf.mxu0 }
 0x1f0   : > { %v8231_v28 = vadd.f32 %v4080_v61, %v3837_v56  ;;  %v8271_v53 = vpop.f32.mrf.mxu1 }
 0x1f1   : > { %v6148_v51 = vpop.f32.mrf.mxu0 }
 0x1f2   : > { %v8217_v17 = vadd.f32 %v6148_v51, %v3840_v41  ;;  %v3171_v51 = vadd.f32 %v7997_v3, %v7993_v34 }
 0x1f3   : > { %v4083_v10 = vpop.f32.mrf.mxu0 }
 0x1f4   : > { %v5357_v15 = vpack.c.bf16 %v8217_v17, %v8215_v4  ;;  %v8235_v40 = vadd.f32 %v4083_v10, %v3838_v30  ;;  %v3574_v41 = vadd.f32 %v8122_v54, %v3171_v51  ;;  %v3847_v54 = vadd.f32 %v8138_v23, %v8115_v55  ;;  %v6120_v23 = vpop.f32.mrf.mxu1 }
 0x1f5   : > { %v6151_v18 = vpop.f32.mrf.mxu0  ;;  %v3175_v30 = vadd.f32 %v8013_v49, %v8009_v52  ;;  %v3846_v10 = vadd.f32 %v8160_v58, %v3572_v45  ;;  %v3173_v55 = vadd.f32 %v8018_v25, %v8016_v2  ;;  %v3851_v25 = vadd.f32 %v8167_v16, %v8129_v19  ;;  %v8958_v45 = vld [vmem:[#allocation5_spill] sm:$0xff] }
 0x1f6   : > { %5444 = vst [vmem:[%s8228_s16 + $0x8] sm:$0xff] %v5357_v15   ;;  %v5352_v11 = vpack.c.bf16 %v8235_v40, %v8231_v28  ;;  %v8252_v60 = vadd.f32 %v6151_v18, %v3843_v47  ;;  %v3848_v56 = vadd.f32 %v8153_v29, %v3574_v41  ;;  %v3177_v19 = vadd.f32 %v8034_v7, %v8032_v33  ;;  %v8957_v7 = vld [vmem:[#allocation40_spill] sm:$0xff] }
 0x1f7   : > { %v4096_v32 = vpop.f32.mrf.mxu0  ;;  %v3578_v18 = vadd.f32 %v8136_v27, %v3175_v30  ;;  %v3576_v46 = vadd.f32 %v8140_v44, %v3173_v55  ;;  %v3849_v44 = vadd.f32 %v8174_v5, %v8134_v31  ;;  %v8956_v31 = vld [vmem:[#allocation3_spill] sm:$0xff]  ;;  %v8961_v55 = vld [vmem:[#allocation8_spill] sm:$0xff] }
 0x1f8   : > { %5353 = vst [vmem:[%s8228_s16] sm:$0xff] %v5352_v11   ;;  %v8261_v34 = vadd.f32 %v4096_v32, %v3841_v57  ;;  %v3793_v11 = vpop.f32.mrf.mxu1  ;;  %v3179_v32 = vadd.f32 %v8029_v12, %v8025_v63  ;;  %v8955_v57 = vld [vmem:[#allocation6_spill] sm:$0xff] }
 0x1f9   : > { %v6152_v1 = vpop.f32.mrf.mxu0  ;;  %v3852_v27 = vadd.f32 %v8181_v14, %v3578_v18 }
 0x1fa   : > { %v8254_v61 = vadd.f32 %v6152_v1, %v3844_v38  ;;  %v3850_v38 = vadd.f32 %v8188_v48, %v3576_v46  ;;  %v6123_v16 = vpop.f32.mrf.mxu1  ;;  %v3580_v48 = vadd.f32 %v8956_v31, %v3177_v19 }
 0x1fb   : > { %v4099_v21 = vpop.f32.mrf.mxu0 }
 0x1fc   : > { %v5367_v3 = vpack.c.bf16 %v8254_v61, %v8252_v60  ;;  %v8265_v24 = vadd.f32 %v4099_v21, %v3842_v50  ;;  %v3582_v50 = vadd.f32 %v8955_v57, %v3179_v32  ;;  %v3806_v41 = vpop.f32.mrf.mxu1  ;;  %v8967_v57 = vld [vmem:[#allocation13_spill] sm:$0xff] }
 0x1fd   : > { %v6155_v37 = vpop.f32.mrf.mxu0 }
 0x1fe   : > { %5446 = vst [vmem:[%s8228_s16 + $0x18] sm:$0xff] %v5367_v3   ;;  %v5362_v0 = vpack.c.bf16 %v8265_v24, %v8261_v34  ;;  %v8282_v62 = vadd.f32 %v6155_v37, %v3847_v54  ;;  %v3855_v3 = vadd.f32 %v8197_v26, %v8957_v7  ;;  %v3856_v37 = vadd.f32 %v8221_v36, %v3582_v50  ;;  %v6124_v36 = vpop.f32.mrf.mxu1  ;;  %v8969_v7 = vld [vmem:[#allocation16_spill] sm:$0xff] }
 0x1ff   : > { %v4112_v42 = vpop.f32.mrf.mxu0 }
 0x200   : > { %5445 = vst [vmem:[%s8228_s16 + $0x10] sm:$0xff] %v5362_v0   ;;  %v8289_v59 = vadd.f32 %v4112_v42, %v3845_v13  ;;  %v8959_v0 = vld [vmem:[#allocation7_spill] sm:$0xff]  ;;  %v3809_v32 = vpop.f32.mrf.mxu1 }
 0x201   : > { %v6156_v20 = vpop.f32.mrf.mxu0  ;;  %v3183_v42 = vadd.f32 %v8959_v0, %v8958_v45 }
 0x202   : > { %v8284_v15 = vadd.f32 %v6156_v20, %v3848_v56  ;;  %v8960_v56 = vld [vmem:[#allocation41_spill] sm:$0xff]  ;;  %v3854_v20 = vadd.f32 %v8241_v8, %v3580_v48 }
 0x203   : > { %v4115_v29 = vpop.f32.mrf.mxu0  ;;  %v3853_v30 = vadd.f32 %v8205_v6, %v8960_v56 }
 0x204   : > { %v5377_v52 = vpack.c.bf16 %v8284_v15, %v8282_v62  ;;  %v8293_v49 = vadd.f32 %v4115_v29, %v3846_v10  ;;  %v8962_v29 = vld [vmem:[#allocation10_spill] sm:$0xff] }
 0x205   : > { %v6159_v58 = vpop.f32.mrf.mxu0  ;;  %v3181_v26 = vadd.f32 %v8962_v29, %v8961_v55  ;;  %v8972_v29 = vld [vmem:[#allocation21_spill] sm:$0xff] }
 0x206   : > { %5448 = vst [vmem:[%s8228_s16 + $0x28] sm:$0xff] %v5377_v52   ;;  %v5372_v43 = vpack.c.bf16 %v8293_v49, %v8289_v59  ;;  %v8308_v51 = vadd.f32 %v6159_v58, %v3851_v25  ;;  %v8963_v52 = vld [vmem:[#allocation17_spill] sm:$0xff] }
 0x207   : > { %v4128_v2 = vpop.f32.mrf.mxu0  ;;  %v3586_v58 = vadd.f32 %v8963_v52, %v3183_v42  ;;  %v8974_v52 = vld [vmem:[#allocation28_spill] sm:$0xff] }
 0x208   : > { %5447 = vst [vmem:[%s8228_s16 + $0x20] sm:$0xff] %v5372_v43   ;;  %v8315_v9 = vadd.f32 %v4128_v2, %v3849_v44  ;;  %v8964_v2 = vld [vmem:[#allocation14_spill] sm:$0xff]  ;;  %v8965_v44 = vld [vmem:[#allocation9_spill] sm:$0xff] }
 0x209   : > { %v6160_v47 = vpop.f32.mrf.mxu0  ;;  %v3584_v25 = vadd.f32 %v8964_v2, %v3181_v26  ;;  %v3860_v19 = vadd.f32 %v6120_v23, %v3586_v58  ;;  %v3863_v26 = vadd.f32 %v6123_v16, %v8972_v29 }
 0x20a   : > { %v8310_v1 = vadd.f32 %v6160_v47, %v3852_v27 }
 0x20b   : > { %v4131_v14 = vpop.f32.mrf.mxu0  ;;  %v3858_v48 = vadd.f32 %v3793_v11, %v3584_v25  ;;  %v8971_v11 = vld [vmem:[#allocation24_spill] sm:$0xff] }
 0x20c   : > { %v5387_v63 = vpack.c.bf16 %v8310_v1, %v8308_v51  ;;  %v8319_v12 = vadd.f32 %v4131_v14, %v3850_v38  ;;  %v3859_v38 = vadd.f32 %v8258_v22, %v8965_v44  ;;  %v8966_v14 = vld [vmem:[#allocation11_spill] sm:$0xff]  ;;  %v6127_v22 = vpop.f32.mrf.mxu1  ;;  %v8976_v44 = vld [vmem:[#allocation33_spill] sm:$0xff] }
 0x20d   : > { %v6163_v5 = vpop.f32.mrf.mxu0  ;;  %v3187_v50 = vadd.f32 %v8967_v57, %v8966_v14 }
 0x20e   : > { %5450 = vst [vmem:[%s8228_s16 + $0x38] sm:$0xff] %v5387_v63   ;;  %v5382_v21 = vpack.c.bf16 %v8319_v12, %v8315_v9  ;;  %v8334_v13 = vadd.f32 %v6163_v5, %v3855_v3  ;;  %v8968_v5 = vld [vmem:[#allocation12_spill] sm:$0xff]  ;;  %v8970_v3 = vld [vmem:[#allocation18_spill] sm:$0xff] }
 0x20f   : > { %v4144_v33 = vpop.f32.mrf.mxu0  ;;  %v3857_v31 = vadd.f32 %v8271_v53, %v8968_v5  ;;  %v3590_v45 = vadd.f32 %v8179_v39, %v3187_v50  ;;  %v8973_v39 = vld [vmem:[#allocation22_spill] sm:$0xff] }
 0x210   : > { %5449 = vst [vmem:[%s8228_s16 + $0x30] sm:$0xff] %v5382_v21   ;;  %v8341_v46 = vadd.f32 %v4144_v33, %v3853_v30  ;;  %v3191_v58 = vadd.f32 %v8974_v52, %v8973_v39  ;;  %v8981_v39 = vmov 1.0  }
 0x211   : > { %v6164_v54 = vpop.f32.mrf.mxu0 }
 0x212   : > { %v8336_v10 = vadd.f32 %v6164_v54, %v3856_v37  ;;  %v3185_v37 = vadd.f32 %v8970_v3, %v8969_v7  ;;  %v8979_v3 = vld [vmem:[#allocation20_spill] sm:$0xff] }
 0x213   : > { %v4147_v18 = vpop.f32.mrf.mxu0 }
 0x214   : > { %v5397_v43 = vpack.c.bf16 %v8336_v10, %v8334_v13  ;;  %v8345_v6 = vadd.f32 %v4147_v18, %v3854_v20  ;;  %v3588_v56 = vadd.f32 %v8971_v11, %v3185_v37  ;;  %v3822_v20 = vpop.f32.mrf.mxu1  ;;  %v3864_v18 = vadd.f32 %v6124_v36, %v3590_v45  ;;  %v8980_v45 = vld [vmem:[#allocation23_spill] sm:$0xff] }
 0x215   : > { %v6167_v8 = vpop.f32.mrf.mxu0  ;;  %v3594_v36 = vadd.f32 %v8193_v35, %v3191_v58  ;;  %v3867_v37 = vadd.f32 %v6127_v22, %v8979_v3  ;;  %v4483_v58 = vmul.f32 %v8308_v51, %v8308_v51 }
 0x216   : > { %5452 = vst [vmem:[%s8228_s16 + $0x48] sm:$0xff] %v5397_v43   ;;  %v5392_v27 = vpack.c.bf16 %v8345_v6, %v8341_v46  ;;  %v8358_v21 = vadd.f32 %v6167_v8, %v3859_v38  ;;  %v8975_v8 = vld [vmem:[#allocation15_spill] sm:$0xff]  ;;  %v3862_v25 = vadd.f32 %v3809_v32, %v3588_v56  ;;  %v8977_v38 = vld [vmem:[#allocation34_spill] sm:$0xff]  ;;  %v6128_v14 = vpop.f32.mrf.mxu1 }
 0x217   : > { %v4160_v47 = vpop.f32.mrf.mxu0  ;;  %v3861_v2 = vadd.f32 %v3806_v41, %v8975_v8  ;;  %v8978_v32 = vld [vmem:[#allocation27_spill] sm:$0xff]  ;;  %v3868_v35 = vadd.f32 %v6128_v14, %v3594_v36  ;;  %v4482_v8 = vmul.f32 %v8319_v12, %v8319_v12  ;;  %v4474_v14 = vmul.f32 %v8265_v24, %v8265_v24 }
 0x218   : > { %5451 = vst [vmem:[%s8228_s16 + $0x40] sm:$0xff] %v5392_v27   ;;  %v8365_v0 = vadd.f32 %v4160_v47, %v3857_v31 }
 0x219   : > { %v6168_v63 = vpop.f32.mrf.mxu0 }
 0x21a   : > { %v8360_v33 = vadd.f32 %v6168_v63, %v3860_v19  ;;  %v3189_v19 = vadd.f32 %v8977_v38, %v8976_v44  ;;  %v4478_v38 = vmul.f32 %v8293_v49, %v8293_v49 }
 0x21b   : > { %v4163_v23 = vpop.f32.mrf.mxu0 }
 0x21c   : > { %v5407_v42 = vpack.c.bf16 %v8360_v33, %v8358_v21  ;;  %v8369_v54 = vadd.f32 %v4163_v23, %v3858_v48  ;;  %v3592_v5 = vadd.f32 %v8978_v32, %v3189_v19  ;;  %v3825_v48 = vpop.f32.mrf.mxu1  ;;  %v4475_v19 = vmul.f32 %v8252_v60, %v8252_v60 }
 0x21d   : > { %v6171_v53 = vpop.f32.mrf.mxu0 }
 0x21e   : > { %5454 = vst [vmem:[%s8228_s16 + $0x58] sm:$0xff] %v5407_v42   ;;  %v5402_v30 = vpack.c.bf16 %v8369_v54, %v8365_v0  ;;  %v8380_v27 = vadd.f32 %v6171_v53, %v3863_v26  ;;  %v3865_v42 = vadd.f32 %v3822_v20, %v8980_v45  ;;  %v3866_v53 = vadd.f32 %v3825_v48, %v3592_v5 }
 0x21f   : > { %v4176_v55 = vpop.f32.mrf.mxu0  ;;  %v4484_v20 = vmul.f32 %v8310_v1, %v8310_v1 }
 0x220   : > { %5453 = vst [vmem:[%s8228_s16 + $0x50] sm:$0xff] %v5402_v30   ;;  %v8387_v57 = vadd.f32 %v4176_v55, %v3861_v2  ;;  %v4481_v2 = vmul.f32 %v8315_v9, %v8315_v9  ;;  %v4495_v44 = vmul.f32 %v8380_v27, %v8380_v27 }
 0x221   : > { %v6172_v43 = vpop.f32.mrf.mxu0 }
 0x222   : > { %v8382_v47 = vadd.f32 %v6172_v43, %v3864_v18 }
 0x223   : > { %v4179_v16 = vpop.f32.mrf.mxu0 }
 0x224   : > { %v5417_v50 = vpack.c.bf16 %v8382_v47, %v8380_v27  ;;  %v8391_v63 = vadd.f32 %v4179_v16, %v3862_v25  ;;  %v4496_v25 = vmul.f32 %v8382_v47, %v8382_v47 }
 0x225   : > { %v6175_v41 = vpop.f32.mrf.mxu0 }
 0x226   : > { %5456 = vst [vmem:[%s8228_s16 + $0x68] sm:$0xff] %v5417_v50   ;;  %v5412_v31 = vpack.c.bf16 %v8391_v63, %v8387_v57  ;;  %v4237_v11 = vadd.f32 %v6175_v41, %v3867_v37 }
 0x227   : > { %v4192_v7 = vpop.f32.mrf.mxu0 }
 0x228   : > { %5455 = vst [vmem:[%s8228_s16 + $0x60] sm:$0xff] %v5412_v31   ;;  %v4235_v55 = vadd.f32 %v4192_v7, %v3865_v42  ;;  %v4499_v52 = vmul.f32 %v4237_v11, %v4237_v11 }
 0x229   : > { %v6176_v23 = vpop.f32.mrf.mxu0 }
 0x22a   : > { %v4238_v56 = vadd.f32 %v6176_v23, %v3868_v35 }
 0x22b   : > { %v4195_v30 = vpop.f32.mrf.mxu0 }
 0x22c   : > { %v5427_v29 = vpack.c.bf16 %v4238_v56, %v4237_v11  ;;  %v4236_v26 = vadd.f32 %v4195_v30, %v3866_v53  ;;  %5675 = vmatprep.subr.mxu1 %v4238_v56  ;;  %v4500_v22 = vmul.f32 %v4238_v56, %v4238_v56 }
 0x22d   : > { %5676 = vmatpush3.msra.mxu1 %v8310_v1  ;;  %v4497_v1 = vmul.f32 %v4235_v55, %v4235_v55 }
 0x22e   : > { %5458 = vst [vmem:[%s8228_s16 + $0x78] sm:$0xff] %v5427_v29   ;;  %v5422_v18 = vpack.c.bf16 %v4236_v26, %v4235_v55  ;;  %5677 = vmatprep.subr.mxu1 %v4237_v11  ;;  %v4498_v43 = vmul.f32 %v4236_v26, %v4236_v26 }
 0x22f   : > { %5678 = vmatpush3.msra.mxu1 %v8308_v51  ;;  %v4480_v51 = vmul.f32 %v8284_v15, %v8284_v15 }
 0x230   : > { %5457 = vst [vmem:[%s8228_s16 + $0x70] sm:$0xff] %v5422_v18   ;;  %5679 = vmatprep.subr.mxu1 %v4236_v26 }
 0x231   : > { %5680 = vmatpush3.msra.mxu1 %v8319_v12  ;;  %v4479_v12 = vmul.f32 %v8282_v62, %v8282_v62 }
 0x232   : > { %5681 = vmatprep.subr.mxu1 %v4235_v55 }
 0x233   : > { %5682 = vmatpush3.msra.mxu1 %v8315_v9  ;;  %v4494_v9 = vmul.f32 %v8391_v63, %v8391_v63 }
 0x234   : > { %5683 = vmatprep.subr.mxu1 %v8382_v47  ;;  %v4477_v47 = vmul.f32 %v8289_v59, %v8289_v59 }
 0x235   : > { %5684 = vmatpush3.msra.mxu1 %v8284_v15  ;;  %v4493_v15 = vmul.f32 %v8387_v57, %v8387_v57 }
 0x236   : > { %5685 = vmatprep.subr.mxu1 %v8380_v27  ;;  %v4476_v27 = vmul.f32 %v8254_v61, %v8254_v61 }
 0x237   : > { %5686 = vmatpush3.msra.mxu1 %v8282_v62  ;;  %v4492_v62 = vmul.f32 %v8360_v33, %v8360_v33 }
 0x238   : > { %5687 = vmatprep.subr.mxu1 %v8391_v63 }
 0x239   : > { %5688 = vmatpush3.msra.mxu1 %v8293_v49  ;;  %v4491_v49 = vmul.f32 %v8358_v21, %v8358_v21 }
 0x23a   : > { %5689 = vmatprep.subr.mxu1 %v8387_v57 }
 0x23b   : > { %5690 = vmatpush3.msra.mxu1 %v8289_v59  ;;  %v4490_v59 = vmul.f32 %v8369_v54, %v8369_v54 }
 0x23c   : > { %5691 = vmatprep.subr.mxu1 %v8360_v33  ;;  %v4473_v33 = vmul.f32 %v8261_v34, %v8261_v34 }
 0x23d   : > { %5692 = vmatpush3.msra.mxu1 %v8254_v61  ;;  %v4489_v61 = vmul.f32 %v8365_v0, %v8365_v0 }
 0x23e   : > { %5693 = vmatprep.subr.mxu1 %v8358_v21  ;;  %v4472_v21 = vmul.f32 %v8217_v17, %v8217_v17 }
 0x23f   : > { %5694 = vmatpush3.msra.mxu1 %v8252_v60  ;;  %v4488_v60 = vmul.f32 %v8336_v10, %v8336_v10 }
 0x240   : > { %5695 = vmatprep.subr.mxu1 %v8369_v54  ;;  %v4469_v54 = vmul.f32 %v8231_v28, %v8231_v28 }
 0x241   : > { %5696 = vmatpush3.msra.mxu1 %v8265_v24  ;;  %v4487_v24 = vmul.f32 %v8334_v13, %v8334_v13 }
 0x242   : > { %5697 = vmatprep.subr.mxu1 %v8365_v0  ;;  %v4471_v0 = vmul.f32 %v8215_v4, %v8215_v4 }
 0x243   : > { %5698 = vmatpush3.msra.mxu1 %v8261_v34  ;;  %v4486_v34 = vmul.f32 %v8345_v6, %v8345_v6 }
 0x244   : > { %5699 = vmatprep.subr.mxu1 %v8336_v10  ;;  %v4470_v10 = vmul.f32 %v8235_v40, %v8235_v40 }
 0x245   : > { %5700 = vmatpush3.msra.mxu1 %v8217_v17  ;;  %v4485_v17 = vmul.f32 %v8341_v46, %v8341_v46 }
 0x246   : > { %5701 = vmatprep.subr.mxu1 %v8334_v13 }
 0x247   : > { %5702 = vmatpush3.msra.mxu1 %v8215_v4 }
 0x248   : > { %5703 = vmatprep.subr.mxu1 %v8345_v6 }
 0x249   : > { %5704 = vmatpush3.msra.mxu1 %v8235_v40 }
 0x24a   : > { %5705 = vmatprep.subr.mxu1 %v8341_v46 }
 0x24b   : > { %5706 = vmatpush3.msra.mxu1 %v8231_v28 }
 0x24c   : > { %5710 = vmatprep.subr.mxu1 %v4500_v22  ;;  %4464 = vmatmul.mubr.f32.vlgmr.msra.gmra.mxu1 %v8981_v39 }
 0x24d   : > { %5711 = vmatpush3.msra.mxu1 %v4484_v20  ;;  %4565 = vmatprep.mubr.f32.mxu1 %v8981_v39 }
 0x24e   : > { %5712 = vmatprep.subr.mxu1 %v4499_v52 }
 0x24f   : > { %5713 = vmatpush3.msra.mxu1 %v4483_v58 }
 0x250   : > { %5714 = vmatprep.subr.mxu1 %v4498_v43 }
 0x251   : > { %5715 = vmatpush3.msra.mxu1 %v4482_v8 }
 0x252   : > { %5716 = vmatprep.subr.mxu1 %v4497_v1 }
 0x253   : > { %5717 = vmatpush3.msra.mxu1 %v4481_v2 }
 0x254   : > { %5718 = vmatprep.subr.mxu1 %v4496_v25 }
 0x255   : > { %5719 = vmatpush3.msra.mxu1 %v4480_v51 }
 0x256   : > { %5720 = vmatprep.subr.mxu1 %v4495_v44 }
 0x257   : > { %5721 = vmatpush3.msra.mxu1 %v4479_v12 }
 0x258   : > { %5722 = vmatprep.subr.mxu1 %v4494_v9 }
 0x259   : > { %5723 = vmatpush3.msra.mxu1 %v4478_v38 }
 0x25a   : > { %5724 = vmatprep.subr.mxu1 %v4493_v15 }
 0x25b   : > { %5725 = vmatpush3.msra.mxu1 %v4477_v47 }
 0x25c   : > { %5726 = vmatprep.subr.mxu1 %v4492_v62 }
 0x25d   : > { %5727 = vmatpush3.msra.mxu1 %v4476_v27 }
 0x25e   : > { %5728 = vmatprep.subr.mxu1 %v4491_v49 }
 0x25f   : > { %5729 = vmatpush3.msra.mxu1 %v4475_v19 }
 0x260   : > { %5730 = vmatprep.subr.mxu1 %v4490_v59 }
 0x261   : > { %5731 = vmatpush3.msra.mxu1 %v4474_v14 }
 0x262   : > { %5732 = vmatprep.subr.mxu1 %v4489_v61 }
 0x263   : > { %5733 = vmatpush3.msra.mxu1 %v4473_v33 }
 0x264   : > { %5734 = vmatprep.subr.mxu1 %v4488_v60 }
 0x265   : > { %5735 = vmatpush3.msra.mxu1 %v4472_v21 }
 0x266   : > { %5736 = vmatprep.subr.mxu1 %v4487_v24 }
 0x267   : > { %5737 = vmatpush3.msra.mxu1 %v4471_v0 }
 0x268   : > { %5738 = vmatprep.subr.mxu1 %v4486_v34 }
 0x269   : > { %5739 = vmatpush3.msra.mxu1 %v4470_v10 }
 0x26a   : > { %5740 = vmatprep.subr.mxu1 %v4485_v17 }
 0x26b   : > { %5741 = vmatpush3.msra.mxu1 %v4469_v54 }
 0x26c   : > { %4566 = vmatmul.mubr.f32.vlgmr.msra.gmra.mxu1 %v8981_v39 }
 0x30c   : > { %v5707_v4 = vpop.f32.mrf.mxu1 }
 0x30e   : > { %v5708_v40 = vpop.f32.mrf.mxu1 }
 0x30f   : > { %v5709_v13 = vadd.f32 %v5708_v40, %v5707_v4 }
 0x311   : > { %4571 = vst [vmem:[%s268_s23] sm:$0x1] %v5709_v13 }
 0x32c   : > { %v5742_v6 = vpop.f32.mrf.mxu1 }
 0x32e   : > { %v5743_v16 = vpop.f32.mrf.mxu1 }
 0x32f   : > { %v5744_v46 = vadd.f32 %v5743_v16, %v5742_v6 }
 0x331   : > { %4572 = vst [vmem:[%s268_s23 + $0x1] sm:$0x1] %v5744_v46 }
 0x332 PF: > { %s16_s20 = sadd.s32 1, %s6301_s20   ;;  %s8982_s18 = smov %s6297_s19 }
 0x333   : > { %p13_p5 = scmp.ge.s32.totalorder %s16_s20, 4   ;;  %s8983_s19 = smov %s8985_s21 }
 0x335   :  { %15 = sbr.rel (!%p13_p5) target bundleno = 2 (0x2), region = 100 }

</bundles_post_ra>
